<compile_context>
chip_gen: v7x
topology: tpu7x:2x2x1
jax: 0.10.0
libtpu: 0.0.40
codegen_flags: <defaults>
</compile_context>

<pallas_src>
import functools

import jax
import jax.numpy as jnp
from jax.experimental import pallas as pl
from jax.experimental.pallas import tpu as pltpu


def _round_up(x, m):
    return (x + m - 1) // m * m


# ---------------------------------------------------------------------------
# In-kernel 3x3 / stride-2 max pool on a VMEM-resident value (H, W, C).
# Contiguous static slices + reshape/concat only -> no strided ref indexing.
# ---------------------------------------------------------------------------
def _pool3x3s2(y):
    H, W, C = y.shape
    OH = (H - 3) // 2 + 1
    OW = (W - 3) // 2 + 1
    # window-3 running max along H, then along W
    r = jnp.maximum(jnp.maximum(y[0:H - 2], y[1:H - 1]), y[2:H])            # (H-2, W, C)
    r = jnp.maximum(jnp.maximum(r[:, 0:W - 2], r[:, 1:W - 1]), r[:, 2:W])   # (H-2, W-2, C)
    W2 = W - 2
    # stride-2 subsample (indices 0,2,...,2*(O-1)) via even/odd reshape + concat
    if OH > 1:
        head = r[0:2 * (OH - 1)].reshape(OH - 1, 2, W2, C)[:, 0]
        r = jnp.concatenate([head, r[2 * (OH - 1):2 * OH - 1]], axis=0)     # (OH, W-2, C)
    else:
        r = r[0:1]
    if OW > 1:
        head = r[:, 0:2 * (OW - 1)].reshape(OH, OW - 1, 2, C)[:, :, 0]
        r = jnp.concatenate([head, r[:, 2 * (OW - 1):2 * OW - 1]], axis=1)  # (OH, OW, C)
    else:
        r = r[:, 0:1]
    return r


# ---------------------------------------------------------------------------
# Kernel A: im2col-matmul + (folded BN) shift + ReLU [+ 3x3/s2 maxpool], bf16 out
#   x_ref (Mp,Kp) bf16 | w_ref (Kp,Np) bf16 | b_ref (1,Np) f32 | o_ref NHWC bf16
# ---------------------------------------------------------------------------
def _conv_kernel(x_ref, w_ref, b_ref, o_ref, *, oh, ow, pool):
    y = jnp.dot(x_ref[...], w_ref[...], preferred_element_type=jnp.float32)
    y = jnp.maximum(y + b_ref[...], 0.0)
    y = y[:oh * ow].reshape(oh, ow, y.shape[-1])
    if pool:
        y = _pool3x3s2(y)
    o_ref[...] = y.astype(o_ref.dtype)


# ---------------------------------------------------------------------------
# Kernel B (network head): conv5 + BN + ReLU + maxpool + adaptive-avgpool +
#                          fc1 + ReLU + fc2 + ReLU + fc3   (Dropout = identity)
# ---------------------------------------------------------------------------
def _head_kernel(x_ref, w_ref, b_ref, w1_ref, b1_ref, w2_ref, b2_ref,
                 w3_ref, b3_ref, o_ref, *, oh, ow):
    y = jnp.dot(x_ref[...], w_ref[...], preferred_element_type=jnp.float32)
    y = jnp.maximum(y + b_ref[...], 0.0)
    y = y[:oh * ow].reshape(oh, ow, y.shape[-1])
    y = _pool3x3s2(y)                                   # (OHo, OWo, 256)
    c = y.shape[-1]
    # AdaptiveAvgPool2d((1,1)) == global spatial mean (identity at 1x1 here)
    h = jnp.mean(y.reshape(-1, c), axis=0, keepdims=True).astype(jnp.bfloat16)
    h = jnp.dot(h, w1_ref[...], preferred_element_type=jnp.float32) + b1_ref[...]
    h = jnp.maximum(h, 0.0).astype(jnp.bfloat16)
    h = jnp.dot(h, w2_ref[...], preferred_element_type=jnp.float32) + b2_ref[...]
    h = jnp.maximum(h, 0.0).astype(jnp.bfloat16)
    o_ref[...] = jnp.dot(h, w3_ref[...], preferred_element_type=jnp.float32) + b3_ref[...]


# ---------------------------------------------------------------------------
# XLA-side im2col (pad + shifted strided views + cast fuse in XLA).
# Feature order: (kh*KW + kw)*C + c, matching _pack_conv_weight.
# ---------------------------------------------------------------------------
def _im2col(x, ksize, stride, padding):
    N, H, W, C = x.shape
    KH = KW = ksize
    OH = (H + 2 * padding - KH) // stride + 1
    OW = (W + 2 * padding - KW) // stride + 1
    xp = jnp.pad(x.astype(jnp.bfloat16),
                 ((0, 0), (padding, padding), (padding, padding), (0, 0)))
    taps = []
    for kh in range(KH):
        for kw in range(KW):
            taps.append(xp[:, kh:kh + stride * (OH - 1) + 1:stride,
                           kw:kw + stride * (OW - 1) + 1:stride, :])
    p = jnp.stack(taps, axis=3).reshape(N, OH * OW, KH * KW * C)
    M, K = OH * OW, KH * KW * C
    Mp, Kp = _round_up(M, 8), _round_up(K, 128)
    if (Mp, Kp) != (M, K):
        p = jnp.pad(p, ((0, 0), (0, Mp - M), (0, Kp - K)))
    return p, OH, OW


# ---------------------------------------------------------------------------
# pallas_call wrappers
# ---------------------------------------------------------------------------
def conv_layer(x, wp, bp, *, ksize, stride, padding, pool):
    """x: (N,H,W,C) -> (N, OH', OW', Np) bf16 (pooled if pool); lane-padded C."""
    N = x.shape[0]
    patches, OH, OW = _im2col(x, ksize, stride, padding)
    _, Mp, Kp = patches.shape
    Kw, Np = wp.shape
    assert Kw == Kp
    OHo, OWo = ((OH - 3) // 2 + 1, (OW - 3) // 2 + 1) if pool else (OH, OW)
    kernel = functools.partial(_conv_kernel, oh=OH, ow=OW, pool=pool)
    return pl.pallas_call(
        kernel,
        out_shape=jax.ShapeDtypeStruct((N, OHo, OWo, Np), jnp.bfloat16),
        grid_spec=pltpu.PrefetchScalarGridSpec(
            num_scalar_prefetch=0,
            grid=(N,),
            in_specs=[
                pl.BlockSpec((None, Mp, Kp), lambda n: (n, 0, 0)),
                pl.BlockSpec((Kp, Np), lambda n: (0, 0)),
                pl.BlockSpec((1, Np), lambda n: (0, 0)),
            ],
            out_specs=pl.BlockSpec((None, OHo, OWo, Np), lambda n: (n, 0, 0, 0)),
        ),
        compiler_params=pltpu.CompilerParams(dimension_semantics=("parallel",)),
    )(patches, wp, bp)


def conv_pool_classifier(x, wp, bp, w1, b1, w2, b2, w3, b3, *, num_classes):
    """conv5(+BN+ReLU)+pool+avgpool+classifier in one kernel; returns f32 logits."""
    N = x.shape[0]
    patches, OH, OW = _im2col(x, 3, 1, 1)
    _, Mp, Kp = patches.shape
    Np = wp.shape[1]
    Ncp = w3.shape[1]
    kernel = functools.partial(_head_kernel, oh=OH, ow=OW)
    out = pl.pallas_call(
        kernel,
        out_shape=jax.ShapeDtypeStruct((N, 1, Ncp), jnp.float32),
        grid_spec=pltpu.PrefetchScalarGridSpec(
            num_scalar_prefetch=0,
            grid=(N,),
            in_specs=[
                pl.BlockSpec((None, Mp, Kp), lambda n: (n, 0, 0)),
                pl.BlockSpec((Kp, Np), lambda n: (0, 0)),
                pl.BlockSpec((1, Np), lambda n: (0, 0)),
                pl.BlockSpec(w1.shape, lambda n: (0, 0)),
                pl.BlockSpec(b1.shape, lambda n: (0, 0)),
                pl.BlockSpec(w2.shape, lambda n: (0, 0)),
                pl.BlockSpec(b2.shape, lambda n: (0, 0)),
                pl.BlockSpec(w3.shape, lambda n: (0, 0)),
                pl.BlockSpec(b3.shape, lambda n: (0, 0)),
            ],
            out_specs=pl.BlockSpec((None, 1, Ncp), lambda n: (n, 0, 0)),
        ),
        compiler_params=pltpu.CompilerParams(dimension_semantics=("parallel",)),
    )(patches, wp, bp, w1, b1, w2, b2, w3, b3)
    return out.reshape(N, Ncp)[:, :num_classes]


# ---------------------------------------------------------------------------
# One-time parameter packing: BN folded into weights, matmul-ready bf16.
# ---------------------------------------------------------------------------
def _bn_fold(conv_bias, gamma, beta, mean, var, eps=1e-5):
    scale = gamma / jnp.sqrt(var + eps)
    shift = beta + (conv_bias - mean) * scale
    return scale, shift


def _pack_conv_weight(w, scale=None, pad_cin=False):
    """torch (Cout,Cin,KH,KW) -> (KH*KW*Cin_p rounded to 128, Cout_p) bf16."""
    Cout, Cin, KH, KW = w.shape
    if scale is not None:
        w = w * scale[:, None, None, None]           # fold BN scale into columns
    wm = jnp.transpose(w, (2, 3, 1, 0))              # (KH, KW, Cin, Cout)
    Cin_p = _round_up(Cin, 128) if pad_cin else Cin
    Np = _round_up(Cout, 128)
    wm = jnp.pad(wm, ((0, 0), (0, 0), (0, Cin_p - Cin), (0, Np - Cout)))
    K = KH * KW * Cin_p
    Kp = _round_up(K, 128)
    wm = wm.reshape(K, Np)
    if Kp != K:
        wm = jnp.pad(wm, ((0, Kp - K), (0, 0)))
    return wm.astype(jnp.bfloat16)


def _pack_vec(v, n_pad):
    return jnp.pad(v.astype(jnp.float32), (0, n_pad - v.shape[0])).reshape(1, n_pad)


def _pack_fc_weight(w):  # torch Linear weight (out, in) -> (in, out_padded) bf16
    out_d, _ = w.shape
    Np = _round_up(out_d, 128)
    return jnp.pad(jnp.transpose(w), ((0, 0), (0, Np - out_d))).astype(jnp.bfloat16)


def prepare_params(p):
    q = {}
    q["c1_w"] = _pack_conv_weight(p["conv1_w"])                 # raw 3-ch input
    q["c1_b"] = _pack_vec(p["conv1_b"], 128)
    for name, cout in (("2", 192), ("3", 384), ("4", 256), ("5", 256)):
        s, b = _bn_fold(p[f"conv{name}_b"], *p[f"bn{name}"])
        # input channels arrive 128-padded (zeros) from the previous kernel
        q[f"c{name}_w"] = _pack_conv_weight(p[f"conv{name}_w"], scale=s, pad_cin=True)
        q[f"c{name}_b"] = _pack_vec(b, _round_up(cout, 128))
    q["fc1_w"] = _pack_fc_weight(p["fc1_w"]); q["fc1_b"] = _pack_vec(p["fc1_b"], 512)
    q["fc2_w"] = _pack_fc_weight(p["fc2_w"]); q["fc2_b"] = _pack_vec(p["fc2_b"], 512)
    nc = p["fc3_w"].shape[0]
    q["fc3_w"] = _pack_fc_weight(p["fc3_w"]); q["fc3_b"] = _pack_vec(p["fc3_b"], _round_up(nc, 128))
    return q


# ---------------------------------------------------------------------------
# Deterministic parameter initialization (shapes from the PyTorch module)
# ---------------------------------------------------------------------------
def init_params(key, num_classes=2, in_channels=3):
    ks = jax.random.split(key, 32)
    it = iter(range(32))

    def nrm(shape, fan_in):
        return jax.random.normal(ks[next(it)], shape, jnp.float32) / jnp.sqrt(fan_in)

    def bn(c):
        g = 1.0 + 0.1 * jax.random.normal(ks[next(it)], (c,), jnp.float32)
        b = 0.1 * jax.random.normal(ks[next(it)], (c,), jnp.float32)
        m = 0.1 * jax.random.normal(ks[next(it)], (c,), jnp.float32)
        v = 0.5 + 0.5 * jax.random.uniform(ks[next(it)], (c,), jnp.float32)
        return g, b, m, v

    p = {}
    p["conv1_w"] = nrm((64, in_channels, 11, 11), in_channels * 121)
    p["conv1_b"] = 0.01 * jax.random.normal(ks[next(it)], (64,), jnp.float32)
    p["conv2_w"] = nrm((192, 64, 5, 5), 64 * 25)
    p["conv2_b"] = 0.01 * jax.random.normal(ks[next(it)], (192,), jnp.float32)
    p["bn2"] = bn(192)
    p["conv3_w"] = nrm((384, 192, 3, 3), 192 * 9)
    p["conv3_b"] = 0.01 * jax.random.normal(ks[next(it)], (384,), jnp.float32)
    p["bn3"] = bn(384)
    p["conv4_w"] = nrm((256, 384, 3, 3), 384 * 9)
    p["conv4_b"] = 0.01 * jax.random.normal(ks[next(it)], (256,), jnp.float32)
    p["bn4"] = bn(256)
    p["conv5_w"] = nrm((256, 256, 3, 3), 256 * 9)
    p["conv5_b"] = 0.01 * jax.random.normal(ks[next(it)], (256,), jnp.float32)
    p["bn5"] = bn(256)
    p["fc1_w"] = nrm((512, 256), 256)          # torch Linear: (out, in)
    p["fc1_b"] = 0.01 * jax.random.normal(ks[next(it)], (512,), jnp.float32)
    p["fc2_w"] = nrm((512, 512), 512)
    p["fc2_b"] = 0.01 * jax.random.normal(ks[next(it)], (512,), jnp.float32)
    p["fc3_w"] = nrm((num_classes, 512), 512)
    p["fc3_b"] = 0.01 * jax.random.normal(ks[next(it)], (num_classes,), jnp.float32)
    return p


# ---------------------------------------------------------------------------
# Full forward pass (AlexNet.forward in eval mode) — 5 pallas_calls total.
# ---------------------------------------------------------------------------
def alexnet_forward(x_nchw, q, num_classes):
    x = jnp.transpose(x_nchw, (0, 2, 3, 1)).astype(jnp.float32)   # NCHW -> NHWC
    # conv1 + ReLU + maxpool (channels carried 128-padded, pads are exact zeros)
    x = conv_layer(x, q["c1_w"], q["c1_b"], ksize=11, stride=4, padding=2, pool=True)
    # conv2 + BN + ReLU + maxpool
    x = conv_layer(x, q["c2_w"], q["c2_b"], ksize=5, stride=1, padding=2, pool=True)
    # conv3 / conv4 (+ BN + ReLU)
    x = conv_layer(x, q["c3_w"], q["c3_b"], ksize=3, stride=1, padding=1, pool=False)
    x = conv_layer(x, q["c4_w"], q["c4_b"], ksize=3, stride=1, padding=1, pool=False)
    # conv5 + BN + ReLU + maxpool + AdaptiveAvgPool(1,1) + fc1/fc2/fc3
    # TODO(synk): training-mode Dropout RNG / batch-statistics BN not reproduced.
    return conv_pool_classifier(x, q["c5_w"], q["c5_b"],
                                q["fc1_w"], q["fc1_b"], q["fc2_w"], q["fc2_b"],
                                q["fc3_w"], q["fc3_b"], num_classes=num_classes)


if __name__ == "__main__":
    key = jax.random.PRNGKey(0)
    k_x, k_p = jax.random.split(key)

    # Input: NCHW like PyTorch; 64x64 is a small size AlexNet's stack accepts.
    x = jax.random.normal(k_x, (2, 3, 64, 64), jnp.float32)
    params = init_params(k_p, num_classes=2, in_channels=3)
    packed = prepare_params(params)

    fwd = jax.jit(alexnet_forward, static_argnums=(2,))
    logits = fwd(x, packed, 2)
    jax.block_until_ready(logits)
    assert logits.shape == (2, 2) and logits.dtype == jnp.float32
    print("KERNEL_OK")
</pallas_src>

<mosaic_0001>
module attributes {stable_mosaic.version = 11 : i64} {
  func.func @_conv_kernel(%arg0: i32, %arg1: memref<1x232x384xbf16, #tpu.memory_space<vmem>>, %arg2: memref<384x128xbf16, #tpu.memory_space<vmem>>, %arg3: memref<1x128xf32, #tpu.memory_space<vmem>>, %arg4: memref<1x7x7x128xbf16, #tpu.memory_space<vmem>>) attributes {dimension_semantics = [#tpu.dimension_semantics<parallel>], iteration_bounds = array<i64: 2>, scalar_prefetch = 0 : i64, scratch_operands = 0 : i64, tpu.core_type = #tpu.core_type<tc>, window_params = [{transform_indices = @transform_0, window_bounds = array<i64: 1, 232, 384>}, {pipeline_mode = #tpu.pipeline_mode<synchronous>, transform_indices = @transform_1, window_bounds = array<i64: 384, 128>}, {pipeline_mode = #tpu.pipeline_mode<synchronous>, transform_indices = @transform_2, window_bounds = array<i64: 1, 128>}, {transform_indices = @transform_3, window_bounds = array<i64: 1, 7, 7, 128>}]} {
    %c0 = arith.constant 0 : index
    %c0_0 = arith.constant 0 : index
    %c0_1 = arith.constant 0 : index
    %0 = vector.load %arg1[%c0, %c0_0, %c0_1] : memref<1x232x384xbf16, #tpu.memory_space<vmem>>, vector<1x232x384xbf16>
    %1 = vector.shape_cast %0 : vector<1x232x384xbf16> to vector<232x384xbf16>
    %c0_2 = arith.constant 0 : index
    %c0_3 = arith.constant 0 : index
    %2 = vector.load %arg2[%c0_2, %c0_3] : memref<384x128xbf16, #tpu.memory_space<vmem>>, vector<384x128xbf16>
    %cst = arith.constant dense<0.000000e+00> : vector<232x128xf32>
    %3 = tpu.matmul %1, %2, %cst {dimension_numbers = #tpu.dot_dimension_numbers<[1], [0], [0], [1], [0, 0, 1, 1], [], []>} : vector<232x384xbf16>, vector<384x128xbf16>, vector<232x128xf32> -> vector<232x128xf32>
    %c0_4 = arith.constant 0 : index
    %c0_5 = arith.constant 0 : index
    %4 = vector.load %arg3[%c0_4, %c0_5] : memref<1x128xf32, #tpu.memory_space<vmem>>, vector<1x128xf32>
    %5 = vector.broadcast %4 : vector<1x128xf32> to vector<232x128xf32>
    %6 = arith.addf %3, %5 : vector<232x128xf32>
    %cst_6 = arith.constant 0.000000e+00 : f32
    %7 = vector.broadcast %cst_6 : f32 to vector<232x128xf32>
    %8 = arith.maximumf %6, %7 : vector<232x128xf32>
    %9 = vector.extract_strided_slice %8 {offsets = [0, 0], sizes = [225, 128], strides = [1, 1]} : vector<232x128xf32> to vector<225x128xf32>
    %10 = vector.shape_cast %9 : vector<225x128xf32> to vector<15x15x128xf32>
    %11 = vector.extract_strided_slice %10 {offsets = [0, 0, 0], sizes = [13, 15, 128], strides = [1, 1, 1]} : vector<15x15x128xf32> to vector<13x15x128xf32>
    %12 = vector.extract_strided_slice %10 {offsets = [1, 0, 0], sizes = [13, 15, 128], strides = [1, 1, 1]} : vector<15x15x128xf32> to vector<13x15x128xf32>
    %13 = arith.maximumf %11, %12 : vector<13x15x128xf32>
    %14 = vector.extract_strided_slice %10 {offsets = [2, 0, 0], sizes = [13, 15, 128], strides = [1, 1, 1]} : vector<15x15x128xf32> to vector<13x15x128xf32>
    %15 = arith.maximumf %13, %14 : vector<13x15x128xf32>
    %16 = vector.extract_strided_slice %15 {offsets = [0, 0, 0], sizes = [13, 13, 128], strides = [1, 1, 1]} : vector<13x15x128xf32> to vector<13x13x128xf32>
    %17 = vector.extract_strided_slice %15 {offsets = [0, 1, 0], sizes = [13, 13, 128], strides = [1, 1, 1]} : vector<13x15x128xf32> to vector<13x13x128xf32>
    %18 = arith.maximumf %16, %17 : vector<13x13x128xf32>
    %19 = vector.extract_strided_slice %15 {offsets = [0, 2, 0], sizes = [13, 13, 128], strides = [1, 1, 1]} : vector<13x15x128xf32> to vector<13x13x128xf32>
    %20 = arith.maximumf %18, %19 : vector<13x13x128xf32>
    %21 = vector.extract_strided_slice %20 {offsets = [0, 0, 0], sizes = [12, 13, 128], strides = [1, 1, 1]} : vector<13x13x128xf32> to vector<12x13x128xf32>
    %22 = vector.shape_cast %21 : vector<12x13x128xf32> to vector<6x2x13x128xf32>
    %23 = vector.extract_strided_slice %22 {offsets = [0, 0, 0, 0], sizes = [6, 1, 13, 128], strides = [1, 1, 1, 1]} : vector<6x2x13x128xf32> to vector<6x1x13x128xf32>
    %24 = vector.shape_cast %23 : vector<6x1x13x128xf32> to vector<6x13x128xf32>
    %25 = vector.extract_strided_slice %20 {offsets = [12, 0, 0], sizes = [1, 13, 128], strides = [1, 1, 1]} : vector<13x13x128xf32> to vector<1x13x128xf32>
    %26 = tpu.concatenate %24, %25 in 0 : vector<6x13x128xf32>, vector<1x13x128xf32> -> vector<7x13x128xf32>
    %27 = vector.extract_strided_slice %26 {offsets = [0, 0, 0], sizes = [7, 12, 128], strides = [1, 1, 1]} : vector<7x13x128xf32> to vector<7x12x128xf32>
    %28 = vector.shape_cast %27 : vector<7x12x128xf32> to vector<7x6x2x128xf32>
    %29 = vector.extract_strided_slice %28 {offsets = [0, 0, 0, 0], sizes = [7, 6, 1, 128], strides = [1, 1, 1, 1]} : vector<7x6x2x128xf32> to vector<7x6x1x128xf32>
    %30 = vector.shape_cast %29 : vector<7x6x1x128xf32> to vector<7x6x128xf32>
    %31 = vector.extract_strided_slice %26 {offsets = [0, 12, 0], sizes = [7, 1, 128], strides = [1, 1, 1]} : vector<7x13x128xf32> to vector<7x1x128xf32>
    %32 = tpu.concatenate %30, %31 in 1 : vector<7x6x128xf32>, vector<7x1x128xf32> -> vector<7x7x128xf32>
    %33 = arith.truncf %32 : vector<7x7x128xf32> to vector<7x7x128xbf16>
    %c0_7 = arith.constant 0 : index
    %c0_8 = arith.constant 0 : index
    %c0_9 = arith.constant 0 : index
    %c0_10 = arith.constant 0 : index
    %34 = vector.load %arg4[%c0_7, %c0_8, %c0_9, %c0_10] : memref<1x7x7x128xbf16, #tpu.memory_space<vmem>>, vector<1x7x7x128xbf16>
    %35 = vector.shape_cast %34 : vector<1x7x7x128xbf16> to vector<7x7x128xbf16>
    %36 = vector.shape_cast %33 : vector<7x7x128xbf16> to vector<1x7x7x128xbf16>
    tpu.vector_store %arg4[%c0_7, %c0_8, %c0_9, %c0_10], %36 {strides = array<i32>} : memref<1x7x7x128xbf16, #tpu.memory_space<vmem>>, vector<1x7x7x128xbf16>,
    return
  }
  func.func @transform_0(%arg0: i32) -> (i32, i32, i32) {
    %c0_i32 = arith.constant 0 : i32
    %c0_i32_0 = arith.constant 0 : i32
    %c0_i32_1 = arith.constant 0 : i32
    return %arg0, %c0_i32, %c0_i32_0 : i32, i32, i32
  }
  func.func @transform_1(%arg0: i32) -> (i32, i32) {
    %c0_i32 = arith.constant 0 : i32
    %c0_i32_0 = arith.constant 0 : i32
    %c0_i32_1 = arith.constant 0 : i32
    return %c0_i32, %c0_i32_0 : i32, i32
  }
  func.func @transform_2(%arg0: i32) -> (i32, i32) {
    %c0_i32 = arith.constant 0 : i32
    %c0_i32_0 = arith.constant 0 : i32
    %c0_i32_1 = arith.constant 0 : i32
    return %c0_i32, %c0_i32_0 : i32, i32
  }
  func.func @transform_3(%arg0: i32) -> (i32, i32, i32, i32) {
    %c0_i32 = arith.constant 0 : i32
    %c0_i32_0 = arith.constant 0 : i32
    %c0_i32_1 = arith.constant 0 : i32
    %c0_i32_2 = arith.constant 0 : i32
    return %arg0, %c0_i32, %c0_i32_0, %c0_i32_1 : i32, i32, i32, i32
  }
}

module attributes {stable_mosaic.version = 11 : i64} {
  func.func @_conv_kernel(%arg0: i32, %arg1: memref<1x56x3200xbf16, #tpu.memory_space<vmem>>, %arg2: memref<3200x256xbf16, #tpu.memory_space<vmem>>, %arg3: memref<1x256xf32, #tpu.memory_space<vmem>>, %arg4: memref<1x3x3x256xbf16, #tpu.memory_space<vmem>>) attributes {dimension_semantics = [#tpu.dimension_semantics<parallel>], iteration_bounds = array<i64: 2>, scalar_prefetch = 0 : i64, scratch_operands = 0 : i64, tpu.core_type = #tpu.core_type<tc>, window_params = [{transform_indices = @transform_0, window_bounds = array<i64: 1, 56, 3200>}, {pipeline_mode = #tpu.pipeline_mode<synchronous>, transform_indices = @transform_1, window_bounds = array<i64: 3200, 256>}, {pipeline_mode = #tpu.pipeline_mode<synchronous>, transform_indices = @transform_2, window_bounds = array<i64: 1, 256>}, {transform_indices = @transform_3, window_bounds = array<i64: 1, 3, 3, 256>}]} {
    %c0 = arith.constant 0 : index
    %c0_0 = arith.constant 0 : index
    %c0_1 = arith.constant 0 : index
    %0 = vector.load %arg1[%c0, %c0_0, %c0_1] : memref<1x56x3200xbf16, #tpu.memory_space<vmem>>, vector<1x56x3200xbf16>
    %1 = vector.shape_cast %0 : vector<1x56x3200xbf16> to vector<56x3200xbf16>
    %c0_2 = arith.constant 0 : index
    %c0_3 = arith.constant 0 : index
    %2 = vector.load %arg2[%c0_2, %c0_3] : memref<3200x256xbf16, #tpu.memory_space<vmem>>, vector<3200x256xbf16>
    %cst = arith.constant dense<0.000000e+00> : vector<56x256xf32>
    %3 = tpu.matmul %1, %2, %cst {dimension_numbers = #tpu.dot_dimension_numbers<[1], [0], [0], [1], [0, 0, 1, 1], [], []>} : vector<56x3200xbf16>, vector<3200x256xbf16>, vector<56x256xf32> -> vector<56x256xf32>
    %c0_4 = arith.constant 0 : index
    %c0_5 = arith.constant 0 : index
    %4 = vector.load %arg3[%c0_4, %c0_5] : memref<1x256xf32, #tpu.memory_space<vmem>>, vector<1x256xf32>
    %5 = vector.broadcast %4 : vector<1x256xf32> to vector<56x256xf32>
    %6 = arith.addf %3, %5 : vector<56x256xf32>
    %cst_6 = arith.constant 0.000000e+00 : f32
    %7 = vector.broadcast %cst_6 : f32 to vector<56x256xf32>
    %8 = arith.maximumf %6, %7 : vector<56x256xf32>
    %9 = vector.extract_strided_slice %8 {offsets = [0, 0], sizes = [49, 256], strides = [1, 1]} : vector<56x256xf32> to vector<49x256xf32>
    %10 = vector.shape_cast %9 : vector<49x256xf32> to vector<7x7x256xf32>
    %11 = vector.extract_strided_slice %10 {offsets = [0, 0, 0], sizes = [5, 7, 256], strides = [1, 1, 1]} : vector<7x7x256xf32> to vector<5x7x256xf32>
    %12 = vector.extract_strided_slice %10 {offsets = [1, 0, 0], sizes = [5, 7, 256], strides = [1, 1, 1]} : vector<7x7x256xf32> to vector<5x7x256xf32>
    %13 = arith.maximumf %11, %12 : vector<5x7x256xf32>
    %14 = vector.extract_strided_slice %10 {offsets = [2, 0, 0], sizes = [5, 7, 256], strides = [1, 1, 1]} : vector<7x7x256xf32> to vector<5x7x256xf32>
    %15 = arith.maximumf %13, %14 : vector<5x7x256xf32>
    %16 = vector.extract_strided_slice %15 {offsets = [0, 0, 0], sizes = [5, 5, 256], strides = [1, 1, 1]} : vector<5x7x256xf32> to vector<5x5x256xf32>
    %17 = vector.extract_strided_slice %15 {offsets = [0, 1, 0], sizes = [5, 5, 256], strides = [1, 1, 1]} : vector<5x7x256xf32> to vector<5x5x256xf32>
    %18 = arith.maximumf %16, %17 : vector<5x5x256xf32>
    %19 = vector.extract_strided_slice %15 {offsets = [0, 2, 0], sizes = [5, 5, 256], strides = [1, 1, 1]} : vector<5x7x256xf32> to vector<5x5x256xf32>
    %20 = arith.maximumf %18, %19 : vector<5x5x256xf32>
    %21 = vector.extract_strided_slice %20 {offsets = [0, 0, 0], sizes = [4, 5, 256], strides = [1, 1, 1]} : vector<5x5x256xf32> to vector<4x5x256xf32>
    %22 = vector.shape_cast %21 : vector<4x5x256xf32> to vector<2x2x5x256xf32>
    %23 = vector.extract_strided_slice %22 {offsets = [0, 0, 0, 0], sizes = [2, 1, 5, 256], strides = [1, 1, 1, 1]} : vector<2x2x5x256xf32> to vector<2x1x5x256xf32>
    %24 = vector.shape_cast %23 : vector<2x1x5x256xf32> to vector<2x5x256xf32>
    %25 = vector.extract_strided_slice %20 {offsets = [4, 0, 0], sizes = [1, 5, 256], strides = [1, 1, 1]} : vector<5x5x256xf32> to vector<1x5x256xf32>
    %26 = tpu.concatenate %24, %25 in 0 : vector<2x5x256xf32>, vector<1x5x256xf32> -> vector<3x5x256xf32>
    %27 = vector.extract_strided_slice %26 {offsets = [0, 0, 0], sizes = [3, 4, 256], strides = [1, 1, 1]} : vector<3x5x256xf32> to vector<3x4x256xf32>
    %28 = vector.shape_cast %27 : vector<3x4x256xf32> to vector<3x2x2x256xf32>
    %29 = vector.extract_strided_slice %28 {offsets = [0, 0, 0, 0], sizes = [3, 2, 1, 256], strides = [1, 1, 1, 1]} : vector<3x2x2x256xf32> to vector<3x2x1x256xf32>
    %30 = vector.shape_cast %29 : vector<3x2x1x256xf32> to vector<3x2x256xf32>
    %31 = vector.extract_strided_slice %26 {offsets = [0, 4, 0], sizes = [3, 1, 256], strides = [1, 1, 1]} : vector<3x5x256xf32> to vector<3x1x256xf32>
    %32 = tpu.concatenate %30, %31 in 1 : vector<3x2x256xf32>, vector<3x1x256xf32> -> vector<3x3x256xf32>
    %33 = arith.truncf %32 : vector<3x3x256xf32> to vector<3x3x256xbf16>
    %c0_7 = arith.constant 0 : index
    %c0_8 = arith.constant 0 : index
    %c0_9 = arith.constant 0 : index
    %c0_10 = arith.constant 0 : index
    %34 = vector.load %arg4[%c0_7, %c0_8, %c0_9, %c0_10] : memref<1x3x3x256xbf16, #tpu.memory_space<vmem>>, vector<1x3x3x256xbf16>
    %35 = vector.shape_cast %34 : vector<1x3x3x256xbf16> to vector<3x3x256xbf16>
    %36 = vector.shape_cast %33 : vector<3x3x256xbf16> to vector<1x3x3x256xbf16>
    tpu.vector_store %arg4[%c0_7, %c0_8, %c0_9, %c0_10], %36 {strides = array<i32>} : memref<1x3x3x256xbf16, #tpu.memory_space<vmem>>, vector<1x3x3x256xbf16>,
    return
  }
  func.func @transform_0(%arg0: i32) -> (i32, i32, i32) {
    %c0_i32 = arith.constant 0 : i32
    %c0_i32_0 = arith.constant 0 : i32
    %c0_i32_1 = arith.constant 0 : i32
    return %arg0, %c0_i32, %c0_i32_0 : i32, i32, i32
  }
  func.func @transform_1(%arg0: i32) -> (i32, i32) {
    %c0_i32 = arith.constant 0 : i32
    %c0_i32_0 = arith.constant 0 : i32
    %c0_i32_1 = arith.constant 0 : i32
    return %c0_i32, %c0_i32_0 : i32, i32
  }
  func.func @transform_2(%arg0: i32) -> (i32, i32) {
    %c0_i32 = arith.constant 0 : i32
    %c0_i32_0 = arith.constant 0 : i32
    %c0_i32_1 = arith.constant 0 : i32
    return %c0_i32, %c0_i32_0 : i32, i32
  }
  func.func @transform_3(%arg0: i32) -> (i32, i32, i32, i32) {
    %c0_i32 = arith.constant 0 : i32
    %c0_i32_0 = arith.constant 0 : i32
    %c0_i32_1 = arith.constant 0 : i32
    %c0_i32_2 = arith.constant 0 : i32
    return %arg0, %c0_i32, %c0_i32_0, %c0_i32_1 : i32, i32, i32, i32
  }
}

module attributes {stable_mosaic.version = 11 : i64} {
  func.func @_conv_kernel(%arg0: i32, %arg1: memref<1x16x2304xbf16, #tpu.memory_space<vmem>>, %arg2: memref<2304x384xbf16, #tpu.memory_space<vmem>>, %arg3: memref<1x384xf32, #tpu.memory_space<vmem>>, %arg4: memref<1x3x3x384xbf16, #tpu.memory_space<vmem>>) attributes {dimension_semantics = [#tpu.dimension_semantics<parallel>], iteration_bounds = array<i64: 2>, scalar_prefetch = 0 : i64, scratch_operands = 0 : i64, tpu.core_type = #tpu.core_type<tc>, window_params = [{transform_indices = @transform_0, window_bounds = array<i64: 1, 16, 2304>}, {pipeline_mode = #tpu.pipeline_mode<synchronous>, transform_indices = @transform_1, window_bounds = array<i64: 2304, 384>}, {pipeline_mode = #tpu.pipeline_mode<synchronous>, transform_indices = @transform_2, window_bounds = array<i64: 1, 384>}, {transform_indices = @transform_3, window_bounds = array<i64: 1, 3, 3, 384>}]} {
    %c0 = arith.constant 0 : index
    %c0_0 = arith.constant 0 : index
    %c0_1 = arith.constant 0 : index
    %0 = vector.load %arg1[%c0, %c0_0, %c0_1] : memref<1x16x2304xbf16, #tpu.memory_space<vmem>>, vector<1x16x2304xbf16>
    %1 = vector.shape_cast %0 : vector<1x16x2304xbf16> to vector<16x2304xbf16>
    %c0_2 = arith.constant 0 : index
    %c0_3 = arith.constant 0 : index
    %2 = vector.load %arg2[%c0_2, %c0_3] : memref<2304x384xbf16, #tpu.memory_space<vmem>>, vector<2304x384xbf16>
    %cst = arith.constant dense<0.000000e+00> : vector<16x384xf32>
    %3 = tpu.matmul %1, %2, %cst {dimension_numbers = #tpu.dot_dimension_numbers<[1], [0], [0], [1], [0, 0, 1, 1], [], []>} : vector<16x2304xbf16>, vector<2304x384xbf16>, vector<16x384xf32> -> vector<16x384xf32>
    %c0_4 = arith.constant 0 : index
    %c0_5 = arith.constant 0 : index
    %4 = vector.load %arg3[%c0_4, %c0_5] : memref<1x384xf32, #tpu.memory_space<vmem>>, vector<1x384xf32>
    %5 = vector.broadcast %4 : vector<1x384xf32> to vector<16x384xf32>
    %6 = arith.addf %3, %5 : vector<16x384xf32>
    %cst_6 = arith.constant 0.000000e+00 : f32
    %7 = vector.broadcast %cst_6 : f32 to vector<16x384xf32>
    %8 = arith.maximumf %6, %7 : vector<16x384xf32>
    %9 = vector.extract_strided_slice %8 {offsets = [0, 0], sizes = [9, 384], strides = [1, 1]} : vector<16x384xf32> to vector<9x384xf32>
    %10 = vector.shape_cast %9 : vector<9x384xf32> to vector<3x3x384xf32>
    %11 = arith.truncf %10 : vector<3x3x384xf32> to vector<3x3x384xbf16>
    %c0_7 = arith.constant 0 : index
    %c0_8 = arith.constant 0 : index
    %c0_9 = arith.constant 0 : index
    %c0_10 = arith.constant 0 : index
    %12 = vector.load %arg4[%c0_7, %c0_8, %c0_9, %c0_10] : memref<1x3x3x384xbf16, #tpu.memory_space<vmem>>, vector<1x3x3x384xbf16>
    %13 = vector.shape_cast %12 : vector<1x3x3x384xbf16> to vector<3x3x384xbf16>
    %14 = vector.shape_cast %11 : vector<3x3x384xbf16> to vector<1x3x3x384xbf16>
    tpu.vector_store %arg4[%c0_7, %c0_8, %c0_9, %c0_10], %14 {strides = array<i32>} : memref<1x3x3x384xbf16, #tpu.memory_space<vmem>>, vector<1x3x3x384xbf16>,
    return
  }
  func.func @transform_0(%arg0: i32) -> (i32, i32, i32) {
    %c0_i32 = arith.constant 0 : i32
    %c0_i32_0 = arith.constant 0 : i32
    %c0_i32_1 = arith.constant 0 : i32
    return %arg0, %c0_i32, %c0_i32_0 : i32, i32, i32
  }
  func.func @transform_1(%arg0: i32) -> (i32, i32) {
    %c0_i32 = arith.constant 0 : i32
    %c0_i32_0 = arith.constant 0 : i32
    %c0_i32_1 = arith.constant 0 : i32
    return %c0_i32, %c0_i32_0 : i32, i32
  }
  func.func @transform_2(%arg0: i32) -> (i32, i32) {
    %c0_i32 = arith.constant 0 : i32
    %c0_i32_0 = arith.constant 0 : i32
    %c0_i32_1 = arith.constant 0 : i32
    return %c0_i32, %c0_i32_0 : i32, i32
  }
  func.func @transform_3(%arg0: i32) -> (i32, i32, i32, i32) {
    %c0_i32 = arith.constant 0 : i32
    %c0_i32_0 = arith.constant 0 : i32
    %c0_i32_1 = arith.constant 0 : i32
    %c0_i32_2 = arith.constant 0 : i32
    return %arg0, %c0_i32, %c0_i32_0, %c0_i32_1 : i32, i32, i32, i32
  }
}

module attributes {stable_mosaic.version = 11 : i64} {
  func.func @_conv_kernel(%arg0: i32, %arg1: memref<1x16x3456xbf16, #tpu.memory_space<vmem>>, %arg2: memref<3456x256xbf16, #tpu.memory_space<vmem>>, %arg3: memref<1x256xf32, #tpu.memory_space<vmem>>, %arg4: memref<1x3x3x256xbf16, #tpu.memory_space<vmem>>) attributes {dimension_semantics = [#tpu.dimension_semantics<parallel>], iteration_bounds = array<i64: 2>, scalar_prefetch = 0 : i64, scratch_operands = 0 : i64, tpu.core_type = #tpu.core_type<tc>, window_params = [{transform_indices = @transform_0, window_bounds = array<i64: 1, 16, 3456>}, {pipeline_mode = #tpu.pipeline_mode<synchronous>, transform_indices = @transform_1, window_bounds = array<i64: 3456, 256>}, {pipeline_mode = #tpu.pipeline_mode<synchronous>, transform_indices = @transform_2, window_bounds = array<i64: 1, 256>}, {transform_indices = @transform_3, window_bounds = array<i64: 1, 3, 3, 256>}]} {
    %c0 = arith.constant 0 : index
    %c0_0 = arith.constant 0 : index
    %c0_1 = arith.constant 0 : index
    %0 = vector.load %arg1[%c0, %c0_0, %c0_1] : memref<1x16x3456xbf16, #tpu.memory_space<vmem>>, vector<1x16x3456xbf16>
    %1 = vector.shape_cast %0 : vector<1x16x3456xbf16> to vector<16x3456xbf16>
    %c0_2 = arith.constant 0 : index
    %c0_3 = arith.constant 0 : index
    %2 = vector.load %arg2[%c0_2, %c0_3] : memref<3456x256xbf16, #tpu.memory_space<vmem>>, vector<3456x256xbf16>
    %cst = arith.constant dense<0.000000e+00> : vector<16x256xf32>
    %3 = tpu.matmul %1, %2, %cst {dimension_numbers = #tpu.dot_dimension_numbers<[1], [0], [0], [1], [0, 0, 1, 1], [], []>} : vector<16x3456xbf16>, vector<3456x256xbf16>, vector<16x256xf32> -> vector<16x256xf32>
    %c0_4 = arith.constant 0 : index
    %c0_5 = arith.constant 0 : index
    %4 = vector.load %arg3[%c0_4, %c0_5] : memref<1x256xf32, #tpu.memory_space<vmem>>, vector<1x256xf32>
    %5 = vector.broadcast %4 : vector<1x256xf32> to vector<16x256xf32>
    %6 = arith.addf %3, %5 : vector<16x256xf32>
    %cst_6 = arith.constant 0.000000e+00 : f32
    %7 = vector.broadcast %cst_6 : f32 to vector<16x256xf32>
    %8 = arith.maximumf %6, %7 : vector<16x256xf32>
    %9 = vector.extract_strided_slice %8 {offsets = [0, 0], sizes = [9, 256], strides = [1, 1]} : vector<16x256xf32> to vector<9x256xf32>
    %10 = vector.shape_cast %9 : vector<9x256xf32> to vector<3x3x256xf32>
    %11 = arith.truncf %10 : vector<3x3x256xf32> to vector<3x3x256xbf16>
    %c0_7 = arith.constant 0 : index
    %c0_8 = arith.constant 0 : index
    %c0_9 = arith.constant 0 : index
    %c0_10 = arith.constant 0 : index
    %12 = vector.load %arg4[%c0_7, %c0_8, %c0_9, %c0_10] : memref<1x3x3x256xbf16, #tpu.memory_space<vmem>>, vector<1x3x3x256xbf16>
    %13 = vector.shape_cast %12 : vector<1x3x3x256xbf16> to vector<3x3x256xbf16>
    %14 = vector.shape_cast %11 : vector<3x3x256xbf16> to vector<1x3x3x256xbf16>
    tpu.vector_store %arg4[%c0_7, %c0_8, %c0_9, %c0_10], %14 {strides = array<i32>} : memref<1x3x3x256xbf16, #tpu.memory_space<vmem>>, vector<1x3x3x256xbf16>,
    return
  }
  func.func @transform_0(%arg0: i32) -> (i32, i32, i32) {
    %c0_i32 = arith.constant 0 : i32
    %c0_i32_0 = arith.constant 0 : i32
    %c0_i32_1 = arith.constant 0 : i32
    return %arg0, %c0_i32, %c0_i32_0 : i32, i32, i32
  }
  func.func @transform_1(%arg0: i32) -> (i32, i32) {
    %c0_i32 = arith.constant 0 : i32
    %c0_i32_0 = arith.constant 0 : i32
    %c0_i32_1 = arith.constant 0 : i32
    return %c0_i32, %c0_i32_0 : i32, i32
  }
  func.func @transform_2(%arg0: i32) -> (i32, i32) {
    %c0_i32 = arith.constant 0 : i32
    %c0_i32_0 = arith.constant 0 : i32
    %c0_i32_1 = arith.constant 0 : i32
    return %c0_i32, %c0_i32_0 : i32, i32
  }
  func.func @transform_3(%arg0: i32) -> (i32, i32, i32, i32) {
    %c0_i32 = arith.constant 0 : i32
    %c0_i32_0 = arith.constant 0 : i32
    %c0_i32_1 = arith.constant 0 : i32
    %c0_i32_2 = arith.constant 0 : i32
    return %arg0, %c0_i32, %c0_i32_0, %c0_i32_1 : i32, i32, i32, i32
  }
}

module attributes {stable_mosaic.version = 11 : i64} {
  func.func @_head_kernel(%arg0: i32, %arg1: memref<1x16x2304xbf16, #tpu.memory_space<vmem>>, %arg2: memref<2304x256xbf16, #tpu.memory_space<vmem>>, %arg3: memref<1x256xf32, #tpu.memory_space<vmem>>, %arg4: memref<256x512xbf16, #tpu.memory_space<vmem>>, %arg5: memref<1x512xf32, #tpu.memory_space<vmem>>, %arg6: memref<512x512xbf16, #tpu.memory_space<vmem>>, %arg7: memref<1x512xf32, #tpu.memory_space<vmem>>, %arg8: memref<512x128xbf16, #tpu.memory_space<vmem>>, %arg9: memref<1x128xf32, #tpu.memory_space<vmem>>, %arg10: memref<1x1x128xf32, #tpu.memory_space<vmem>>) attributes {dimension_semantics = [#tpu.dimension_semantics<parallel>], iteration_bounds = array<i64: 2>, scalar_prefetch = 0 : i64, scratch_operands = 0 : i64, tpu.core_type = #tpu.core_type<tc>, window_params = [{transform_indices = @transform_0, window_bounds = array<i64: 1, 16, 2304>}, {pipeline_mode = #tpu.pipeline_mode<synchronous>, transform_indices = @transform_1, window_bounds = array<i64: 2304, 256>}, {pipeline_mode = #tpu.pipeline_mode<synchronous>, transform_indices = @transform_2, window_bounds = array<i64: 1, 256>}, {pipeline_mode = #tpu.pipeline_mode<synchronous>, transform_indices = @transform_3, window_bounds = array<i64: 256, 512>}, {pipeline_mode = #tpu.pipeline_mode<synchronous>, transform_indices = @transform_4, window_bounds = array<i64: 1, 512>}, {pipeline_mode = #tpu.pipeline_mode<synchronous>, transform_indices = @transform_5, window_bounds = array<i64: 512, 512>}, {pipeline_mode = #tpu.pipeline_mode<synchronous>, transform_indices = @transform_6, window_bounds = array<i64: 1, 512>}, {pipeline_mode = #tpu.pipeline_mode<synchronous>, transform_indices = @transform_7, window_bounds = array<i64: 512, 128>}, {pipeline_mode = #tpu.pipeline_mode<synchronous>, transform_indices = @transform_8, window_bounds = array<i64: 1, 128>}, {transform_indices = @transform_9, window_bounds = array<i64: 1, 1, 128>}]} {
    %c0 = arith.constant 0 : index
    %c0_0 = arith.constant 0 : index
    %c0_1 = arith.constant 0 : index
    %0 = vector.load %arg1[%c0, %c0_0, %c0_1] : memref<1x16x2304xbf16, #tpu.memory_space<vmem>>, vector<1x16x2304xbf16>
    %1 = vector.shape_cast %0 : vector<1x16x2304xbf16> to vector<16x2304xbf16>
    %c0_2 = arith.constant 0 : index
    %c0_3 = arith.constant 0 : index
    %2 = vector.load %arg2[%c0_2, %c0_3] : memref<2304x256xbf16, #tpu.memory_space<vmem>>, vector<2304x256xbf16>
    %cst = arith.constant dense<0.000000e+00> : vector<16x256xf32>
    %3 = tpu.matmul %1, %2, %cst {dimension_numbers = #tpu.dot_dimension_numbers<[1], [0], [0], [1], [0, 0, 1, 1], [], []>} : vector<16x2304xbf16>, vector<2304x256xbf16>, vector<16x256xf32> -> vector<16x256xf32>
    %c0_4 = arith.constant 0 : index
    %c0_5 = arith.constant 0 : index
    %4 = vector.load %arg3[%c0_4, %c0_5] : memref<1x256xf32, #tpu.memory_space<vmem>>, vector<1x256xf32>
    %5 = vector.broadcast %4 : vector<1x256xf32> to vector<16x256xf32>
    %6 = arith.addf %3, %5 : vector<16x256xf32>
    %cst_6 = arith.constant 0.000000e+00 : f32
    %7 = vector.broadcast %cst_6 : f32 to vector<16x256xf32>
    %8 = arith.maximumf %6, %7 : vector<16x256xf32>
    %9 = vector.extract_strided_slice %8 {offsets = [0, 0], sizes = [9, 256], strides = [1, 1]} : vector<16x256xf32> to vector<9x256xf32>
    %10 = vector.shape_cast %9 : vector<9x256xf32> to vector<3x3x256xf32>
    %11 = vector.extract_strided_slice %10 {offsets = [0, 0, 0], sizes = [1, 3, 256], strides = [1, 1, 1]} : vector<3x3x256xf32> to vector<1x3x256xf32>
    %12 = vector.extract_strided_slice %10 {offsets = [1, 0, 0], sizes = [1, 3, 256], strides = [1, 1, 1]} : vector<3x3x256xf32> to vector<1x3x256xf32>
    %13 = arith.maximumf %11, %12 : vector<1x3x256xf32>
    %14 = vector.extract_strided_slice %10 {offsets = [2, 0, 0], sizes = [1, 3, 256], strides = [1, 1, 1]} : vector<3x3x256xf32> to vector<1x3x256xf32>
    %15 = arith.maximumf %13, %14 : vector<1x3x256xf32>
    %16 = vector.extract_strided_slice %15 {offsets = [0, 0, 0], sizes = [1, 1, 256], strides = [1, 1, 1]} : vector<1x3x256xf32> to vector<1x1x256xf32>
    %17 = vector.extract_strided_slice %15 {offsets = [0, 1, 0], sizes = [1, 1, 256], strides = [1, 1, 1]} : vector<1x3x256xf32> to vector<1x1x256xf32>
    %18 = arith.maximumf %16, %17 : vector<1x1x256xf32>
    %19 = vector.extract_strided_slice %15 {offsets = [0, 2, 0], sizes = [1, 1, 256], strides = [1, 1, 1]} : vector<1x3x256xf32> to vector<1x1x256xf32>
    %20 = arith.maximumf %18, %19 : vector<1x1x256xf32>
    %21 = vector.shape_cast %20 : vector<1x1x256xf32> to vector<1x256xf32>
    %cst_7 = arith.constant dense<0.000000e+00> : vector<256xf32>
    %22 = vector.multi_reduction <add>, %21, %cst_7 [0] : vector<1x256xf32> to vector<256xf32>
    %23 = vector.shape_cast %22 : vector<256xf32> to vector<1x256xf32>
    %cst_8 = arith.constant 1.000000e+00 : f32
    %24 = vector.broadcast %cst_8 : f32 to vector<1x256xf32>
    %25 = arith.divf %23, %24 : vector<1x256xf32>
    %26 = arith.truncf %25 : vector<1x256xf32> to vector<1x256xbf16>
    %c0_9 = arith.constant 0 : index
    %c0_10 = arith.constant 0 : index
    %27 = vector.load %arg4[%c0_9, %c0_10] : memref<256x512xbf16, #tpu.memory_space<vmem>>, vector<256x512xbf16>
    %cst_11 = arith.constant dense<0.000000e+00> : vector<1x512xf32>
    %28 = tpu.matmul %26, %27, %cst_11 {dimension_numbers = #tpu.dot_dimension_numbers<[1], [0], [0], [1], [0, 0, 1, 1], [], []>} : vector<1x256xbf16>, vector<256x512xbf16>, vector<1x512xf32> -> vector<1x512xf32>
    %c0_12 = arith.constant 0 : index
    %c0_13 = arith.constant 0 : index
    %29 = vector.load %arg5[%c0_12, %c0_13] : memref<1x512xf32, #tpu.memory_space<vmem>>, vector<1x512xf32>
    %30 = arith.addf %28, %29 : vector<1x512xf32>
    %cst_14 = arith.constant 0.000000e+00 : f32
    %31 = vector.broadcast %cst_14 : f32 to vector<1x512xf32>
    %32 = arith.maximumf %30, %31 : vector<1x512xf32>
    %33 = arith.truncf %32 : vector<1x512xf32> to vector<1x512xbf16>
    %c0_15 = arith.constant 0 : index
    %c0_16 = arith.constant 0 : index
    %34 = vector.load %arg6[%c0_15, %c0_16] : memref<512x512xbf16, #tpu.memory_space<vmem>>, vector<512x512xbf16>
    %cst_17 = arith.constant dense<0.000000e+00> : vector<1x512xf32>
    %35 = tpu.matmul %33, %34, %cst_17 {dimension_numbers = #tpu.dot_dimension_numbers<[1], [0], [0], [1], [0, 0, 1, 1], [], []>} : vector<1x512xbf16>, vector<512x512xbf16>, vector<1x512xf32> -> vector<1x512xf32>
    %c0_18 = arith.constant 0 : index
    %c0_19 = arith.constant 0 : index
    %36 = vector.load %arg7[%c0_18, %c0_19] : memref<1x512xf32, #tpu.memory_space<vmem>>, vector<1x512xf32>
    %37 = arith.addf %35, %36 : vector<1x512xf32>
    %cst_20 = arith.constant 0.000000e+00 : f32
    %38 = vector.broadcast %cst_20 : f32 to vector<1x512xf32>
    %39 = arith.maximumf %37, %38 : vector<1x512xf32>
    %40 = arith.truncf %39 : vector<1x512xf32> to vector<1x512xbf16>
    %c0_21 = arith.constant 0 : index
    %c0_22 = arith.constant 0 : index
    %41 = vector.load %arg8[%c0_21, %c0_22] : memref<512x128xbf16, #tpu.memory_space<vmem>>, vector<512x128xbf16>
    %cst_23 = arith.constant dense<0.000000e+00> : vector<1x128xf32>
    %42 = tpu.matmul %40, %41, %cst_23 {dimension_numbers = #tpu.dot_dimension_numbers<[1], [0], [0], [1], [0, 0, 1, 1], [], []>} : vector<1x512xbf16>, vector<512x128xbf16>, vector<1x128xf32> -> vector<1x128xf32>
    %c0_24 = arith.constant 0 : index
    %c0_25 = arith.constant 0 : index
    %43 = vector.load %arg9[%c0_24, %c0_25] : memref<1x128xf32, #tpu.memory_space<vmem>>, vector<1x128xf32>
    %44 = arith.addf %42, %43 : vector<1x128xf32>
    %c0_26 = arith.constant 0 : index
    %c0_27 = arith.constant 0 : index
    %c0_28 = arith.constant 0 : index
    %45 = vector.load %arg10[%c0_26, %c0_27, %c0_28] : memref<1x1x128xf32, #tpu.memory_space<vmem>>, vector<1x1x128xf32>
    %46 = vector.shape_cast %45 : vector<1x1x128xf32> to vector<1x128xf32>
    %47 = vector.shape_cast %44 : vector<1x128xf32> to vector<1x1x128xf32>
    tpu.vector_store %arg10[%c0_26, %c0_27, %c0_28], %47 {strides = array<i32>} : memref<1x1x128xf32, #tpu.memory_space<vmem>>, vector<1x1x128xf32>,
    return
  }
  func.func @transform_0(%arg0: i32) -> (i32, i32, i32) {
    %c0_i32 = arith.constant 0 : i32
    %c0_i32_0 = arith.constant 0 : i32
    %c0_i32_1 = arith.constant 0 : i32
    return %arg0, %c0_i32, %c0_i32_0 : i32, i32, i32
  }
  func.func @transform_1(%arg0: i32) -> (i32, i32) {
    %c0_i32 = arith.constant 0 : i32
    %c0_i32_0 = arith.constant 0 : i32
    %c0_i32_1 = arith.constant 0 : i32
    return %c0_i32, %c0_i32_0 : i32, i32
  }
  func.func @transform_2(%arg0: i32) -> (i32, i32) {
    %c0_i32 = arith.constant 0 : i32
    %c0_i32_0 = arith.constant 0 : i32
    %c0_i32_1 = arith.constant 0 : i32
    return %c0_i32, %c0_i32_0 : i32, i32
  }
  func.func @transform_3(%arg0: i32) -> (i32, i32) {
    %c0_i32 = arith.constant 0 : i32
    %c0_i32_0 = arith.constant 0 : i32
    %c0_i32_1 = arith.constant 0 : i32
    return %c0_i32, %c0_i32_0 : i32, i32
  }
  func.func @transform_4(%arg0: i32) -> (i32, i32) {
    %c0_i32 = arith.constant 0 : i32
    %c0_i32_0 = arith.constant 0 : i32
    %c0_i32_1 = arith.constant 0 : i32
    return %c0_i32, %c0_i32_0 : i32, i32
  }
  func.func @transform_5(%arg0: i32) -> (i32, i32) {
    %c0_i32 = arith.constant 0 : i32
    %c0_i32_0 = arith.constant 0 : i32
    %c0_i32_1 = arith.constant 0 : i32
    return %c0_i32, %c0_i32_0 : i32, i32
  }
  func.func @transform_6(%arg0: i32) -> (i32, i32) {
    %c0_i32 = arith.constant 0 : i32
    %c0_i32_0 = arith.constant 0 : i32
    %c0_i32_1 = arith.constant 0 : i32
    return %c0_i32, %c0_i32_0 : i32, i32
  }
  func.func @transform_7(%arg0: i32) -> (i32, i32) {
    %c0_i32 = arith.constant 0 : i32
    %c0_i32_0 = arith.constant 0 : i32
    %c0_i32_1 = arith.constant 0 : i32
    return %c0_i32, %c0_i32_0 : i32, i32
  }
  func.func @transform_8(%arg0: i32) -> (i32, i32) {
    %c0_i32 = arith.constant 0 : i32
    %c0_i32_0 = arith.constant 0 : i32
    %c0_i32_1 = arith.constant 0 : i32
    return %c0_i32, %c0_i32_0 : i32, i32
  }
  func.func @transform_9(%arg0: i32) -> (i32, i32, i32) {
    %c0_i32 = arith.constant 0 : i32
    %c0_i32_0 = arith.constant 0 : i32
    %c0_i32_1 = arith.constant 0 : i32
    return %arg0, %c0_i32, %c0_i32_0 : i32, i32, i32
  }
}

</mosaic_0001>

<bundles_post_ra>
// kernel: alexnet_forward.5
= control target key start
LH: loop header
LB: loop body
LE: loop exit
PB: predicated region body
PF: predicated region fallthrough
CT: control target
= control target key end

     0   :  { %s3822_s12 = smov 0   ;;  %s5439_s0 = inlined_call_operand.vmem [shape: bf16[2,232,384], index: 0, kind: input, shape index: {}]   ;;  %s5440_s1 = inlined_call_operand.vmem [shape: bf16[384,128], index: 1, kind: input, shape index: {}]   ;;  %s5441_s2 = inlined_call_operand.vmem [shape: f32[1,128], index: 2, kind: input, shape index: {}]   ;;  %s5442_s3 = inlined_call_operand.vmem [shape: bf16[2,7,7,128], index: 3, kind: output, shape index: {}]  }
   0x1 LB: > { %s3410_s13 = sadd.s32 4294967295, %s3797_s12   ;;  %p3414_p0 = scmp.ge.s32.totalorder %s3797_s12, 1  ;;  %s3797_s12 = sphi %s3822_s12, %s13_s12  }
   0x2   : > { %p137_p1 = scmp.lt.s32.totalorder %s3797_s12, 3 }
   0x4   : > { %p138_p2 = pnand %p3414_p0, %p137_p1 }
   0x6   : > { %141 = sbr.rel (%p138_p2) target bundleno = 505 (0x1f9), region = 32 }
   0xd   : > { %v3707_v0 = vld [vmem:[%s5440_s1 + $0x40] sm:$0xff]   ;;  %v3799_v2 = vmov 0.0   ;;  %v3710_v4 = vld [vmem:[%s5440_s1 + $0x48] sm:$0xff]   ;;  %vm3800_vm0 = vmmov 0   ;;  %v3713_v7 = vld [vmem:[%s5440_s1 + $0x50] sm:$0xff]   ;;  %p161_p3 = scmp.lt.s32.totalorder %s3410_s13, 1 }
   0xe   : > { %v3708_v1 = vld [vmem:[%s5440_s1] sm:$0xff]   ;;  %3618 = vmatprep.subr.bf16.mxu1 %v3799_v2  ;;  %3489 = vmatprep.subr.bf16.mxu0 %v3707_v0  ;;  %v3711_v5 = vld [vmem:[%s5440_s1 + $0x8] sm:$0xff]   ;;  %v3714_v8 = vld [vmem:[%s5440_s1 + $0x10] sm:$0xff]   ;;  %vm3316_vm1 = vcmask 1045504   ;;  %vm3331_vm2 = vcmask 1043456  }
   0xf   : > { %v3709_v3 = vld [vmem:[%s5440_s1 + $0x80] sm:$0xff]   ;;  %3490 = vmatpush3.bf16.msra.mxu0 %v3708_v1  ;;  %3634 = vmatprep.mubr.msk.bf16.mxu1 %vm3800_vm0, %v3799_v2  ;;  %v3712_v6 = vld [vmem:[%s5440_s1 + $0x88] sm:$0xff]   ;;  %v3715_v9 = vld [vmem:[%s5440_s1 + $0x90] sm:$0xff]   ;;  %s5518_s13 = smov (!%p161_p3, %s3410_s13), 1  ;;  %vm3332_vm3 = vsmask.f32 3328 }
  0x10   : > { %3619 = vmatpush3.bf16.msra.mxu1 %v3709_v3  ;;  %3491 = vmatprep.subr.bf16.mxu0 %v3710_v4  ;;  %v3716_v10 = vld [vmem:[%s5440_s1 + $0x58] sm:$0xff]   ;;  %v3719_v13 = vld [vmem:[%s5440_s1 + $0x60] sm:$0xff]   ;;  %v3722_v16 = vld [vmem:[%s5440_s1 + $0x68] sm:$0xff]   ;;  %s3694_s21 = smul.u32 348, %s5518_s13 }
  0x11   : > { %3620 = vmatprep.subr.bf16.mxu1 %v3799_v2  ;;  %v3717_v11 = vld [vmem:[%s5440_s1 + $0x18] sm:$0xff]   ;;  %v3720_v14 = vld [vmem:[%s5440_s1 + $0x20] sm:$0xff]   ;;  %v3723_v17 = vld [vmem:[%s5440_s1 + $0x28] sm:$0xff]   ;;  %s3695_s18 = smul.u32 28, %s5518_s13 }
  0x12   : > { %v3718_v12 = vld [vmem:[%s5440_s1 + $0x98] sm:$0xff]   ;;  %v3721_v15 = vld [vmem:[%s5440_s1 + $0xa0] sm:$0xff]   ;;  %v3724_v18 = vld [vmem:[%s5440_s1 + $0xa8] sm:$0xff]   ;;  %s3908_s5 = scalar_lea.vmem %s5439_s0, %s3694_s21 }
  0x13   : > { %3492 = vmatpush3.bf16.msra.mxu0 %v3711_v5  ;;  %v3725_v19 = vld [vmem:[%s5440_s1 + $0x70] sm:$0xff]   ;;  %v3728_v22 = vld [vmem:[%s5440_s1 + $0x78] sm:$0xff]   ;;  %v3730_v26 = vld [vmem:[%s3908_s5] ss:$12 sps:$4 sm:$0xff]   ;;  %s4348_s20 = scalar_lea.vmem %s5442_s3, %s3695_s18 }
  0x14   : > { %3621 = vmatpush3.bf16.msra.mxu1 %v3712_v6  ;;  %3493 = vmatprep.subr.bf16.mxu0 %v3713_v7  ;;  %v3726_v20 = vld [vmem:[%s5440_s1 + $0x30] sm:$0xff]   ;;  %v3729_v24 = vld [vmem:[%s5440_s1 + $0x38] sm:$0xff]   ;;  %v3738_v30 = vld [vmem:[%s3908_s5 + $0x20] ss:$12 sps:$4 sm:$0xff]  }
  0x15   : > { %3622 = vmatprep.subr.bf16.mxu1 %v3799_v2  ;;  %v3727_v21 = vld [vmem:[%s5440_s1 + $0xb0] sm:$0xff]   ;;  %v3733_v25 = vld [vmem:[%s5440_s1 + $0xb8] sm:$0xff]   ;;  %v3749_v38 = vld [vmem:[%s3908_s5 + $0x60] ss:$12 sps:$4 sm:$0xff]  }
  0x16   : > { %v3732_v23 = vld [vmem:[%s3908_s5 + $0x4] ss:$12 sps:$4 sm:$0xff]   ;;  %v3734_v27 = vld [vmem:[%s3908_s5 + $0x8] ss:$12 sps:$4 sm:$0xff]   ;;  %v3743_v34 = vld [vmem:[%s3908_s5 + $0x4c] ss:$12 sps:$4 sm:$0xff]  }
  0x17   : > { %3494 = vmatpush3.bf16.msra.mxu0 %v3714_v8  ;;  %696 = vmatprep.mubr.bf16.mxu0 %v3732_v23  ;;  %v3735_v28 = vld [vmem:[%s3908_s5 + $0x1c] ss:$12 sps:$4 sm:$0xff]   ;;  %v3737_v29 = vld [vmem:[%s3908_s5 + $0x18] ss:$12 sps:$4 sm:$0xff]   ;;  %v3739_v31 = vld [vmem:[%s3908_s5 + $0x34] ss:$12 sps:$4 sm:$0xff]  }
  0x18   : > { %3623 = vmatpush3.bf16.msra.mxu1 %v3715_v9  ;;  %3495 = vmatprep.subr.bf16.mxu0 %v3716_v10  ;;  %v3741_v32 = vld [vmem:[%s3908_s5 + $0x30] ss:$12 sps:$4 sm:$0xff]   ;;  %v3742_v33 = vld [vmem:[%s3908_s5 + $0x38] ss:$12 sps:$4 sm:$0xff]   ;;  %v3745_v35 = vld [vmem:[%s3908_s5 + $0x48] ss:$12 sps:$4 sm:$0xff]   ;;  %v1030_v10 = vlaneseq }
  0x19   : > { %3624 = vmatprep.subr.bf16.mxu1 %v3799_v2  ;;  %v3746_v36 = vld [vmem:[%s3908_s5 + $0x50] ss:$12 sps:$4 sm:$0xff]   ;;  %v3750_v39 = vld [vmem:[%s3908_s5 + $0x68] ss:$12 sps:$4 sm:$0xff]   ;;  %v3753_v41 = vld [vmem:[%s3908_s5 + $0x78] ss:$12 sps:$4 sm:$0xff]  }
  0x1a   : > { %v3747_v37 = vld [vmem:[%s3908_s5 + $0x64] ss:$12 sps:$4 sm:$0xff]   ;;  %v3751_v40 = vld [vmem:[%s3908_s5 + $0x7c] ss:$12 sps:$4 sm:$0xff]   ;;  %v3754_v42 = vld [vmem:[%s3908_s5 + $0x80] ss:$12 sps:$4 sm:$0xff]  }
  0x1b   : > { %3496 = vmatpush3.bf16.msra.mxu0 %v3717_v11  ;;  %v3755_v43 = vld [vmem:[%s3908_s5 + $0x94] ss:$12 sps:$4 sm:$0xff]   ;;  %v3757_v44 = vld [vmem:[%s3908_s5 + $0x90] ss:$12 sps:$4 sm:$0xff]   ;;  %v3758_v45 = vld [vmem:[%s3908_s5 + $0x98] ss:$12 sps:$4 sm:$0xff]  }
  0x1c   : > { %3625 = vmatpush3.bf16.msra.mxu1 %v3718_v12  ;;  %3497 = vmatprep.subr.bf16.mxu0 %v3719_v13  ;;  %v3759_v46 = vld [vmem:[%s3908_s5 + $0xac] ss:$12 sps:$4 sm:$0xff]   ;;  %v3761_v47 = vld [vmem:[%s3908_s5 + $0xa8] ss:$12 sps:$4 sm:$0xff]   ;;  %v3762_v48 = vld [vmem:[%s3908_s5 + $0xb0] ss:$12 sps:$4 sm:$0xff]  }
  0x1d   : > { %3626 = vmatprep.subr.bf16.mxu1 %v3799_v2  ;;  %v3763_v49 = vld [vmem:[%s3908_s5 + $0xc4] ss:$12 sps:$4 sm:$0xff]   ;;  %v3765_v50 = vld [vmem:[%s3908_s5 + $0xc0] ss:$12 sps:$4 sm:$0xff]   ;;  %v3766_v51 = vld [vmem:[%s3908_s5 + $0xc8] ss:$12 sps:$4 sm:$0xff]  }
  0x1e   : > { %v3767_v52 = vld [vmem:[%s3908_s5 + $0xdc] ss:$12 sps:$4 sm:$0xff]   ;;  %v3769_v53 = vld [vmem:[%s3908_s5 + $0xd8] ss:$12 sps:$4 sm:$0xff]   ;;  %v3770_v54 = vld [vmem:[%s3908_s5 + $0xe0] ss:$12 sps:$4 sm:$0xff]  }
  0x1f   : > { %3498 = vmatpush3.bf16.msra.mxu0 %v3720_v14  ;;  %v3771_v55 = vld [vmem:[%s3908_s5 + $0xf4] ss:$12 sps:$4 sm:$0xff]   ;;  %v3773_v56 = vld [vmem:[%s3908_s5 + $0xf0] ss:$12 sps:$4 sm:$0xff]   ;;  %v3774_v57 = vld [vmem:[%s3908_s5 + $0xf8] ss:$12 sps:$4 sm:$0xff]  }
  0x20   : > { %3627 = vmatpush3.bf16.msra.mxu1 %v3721_v15  ;;  %3499 = vmatprep.subr.bf16.mxu0 %v3722_v16  ;;  %v3775_v58 = vld [vmem:[%s3908_s5 + $0x10c] ss:$12 sps:$4 sm:$0xff]   ;;  %v3777_v59 = vld [vmem:[%s3908_s5 + $0x108] ss:$12 sps:$4 sm:$0xff]   ;;  %v3778_v60 = vld [vmem:[%s3908_s5 + $0x110] ss:$12 sps:$4 sm:$0xff]  }
  0x21   : > { %3628 = vmatprep.subr.bf16.mxu1 %v3799_v2  ;;  %v3779_v61 = vld [vmem:[%s3908_s5 + $0x124] ss:$12 sps:$4 sm:$0xff]   ;;  %v3781_v62 = vld [vmem:[%s3908_s5 + $0x120] ss:$12 sps:$4 sm:$0xff]   ;;  %v3782_v63 = vld [vmem:[%s3908_s5 + $0x128] ss:$12 sps:$4 sm:$0xff]  }
  0x22   : > { %v3783_v0 = vld [vmem:[%s3908_s5 + $0x13c] ss:$12 sps:$4 sm:$0xff]   ;;  %v228_v1 = vld [vmem:[%s3908_s5 + $0x150] sm:$0xff]  ;;  %v3785_v3 = vld [vmem:[%s3908_s5 + $0x138] ss:$12 sps:$4 sm:$0xff]  }
  0x23   : > { %3500 = vmatpush3.bf16.msra.mxu0 %v3723_v17  ;;  %v3786_v4 = vld [vmem:[%s3908_s5 + $0x140] ss:$12 sps:$4 sm:$0xff]   ;;  %v3461_v5 = vcombine.high %v228_v1, %v228_v1  ;;  %v3460_v6 = vcombine.low %v228_v1, %v228_v1  ;;  %v3789_v7 = vld [vmem:[%s3908_s5 + $0x158] ss:$0 sps:$4 sm:$0xff]   ;;  %v3801_v8 = vmov 1966171168   ;;  %vm4385_vm4 = vmand %vm3331_vm2, %vm3332_vm3 }
  0x24   : > { %3629 = vmatpush3.bf16.msra.mxu1 %v3724_v18  ;;  %3501 = vmatprep.subr.bf16.mxu0 %v3725_v19  ;;  %v1028_v9 = vunpack.c.l.s4 %v3801_v8  ;;  %v3999_v13 = vld [vmem:[%s5441_s2] ss:$0 sm:$0xff]  ;;  %v1031_v18 = vshrl.u32 %v1030_v10, 7 }
  0x25   : > { %3630 = vmatprep.subr.bf16.mxu1 %v3799_v2 }
  0x26   : > { %v1029_v17 = vunpack.c.0.s8 %v1028_v9 }
  0x27   : > { %3502 = vmatpush3.bf16.msra.mxu0 %v3726_v20 }
  0x28   : > { %3631 = vmatpush3.bf16.msra.mxu1 %v3727_v21  ;;  %3503 = vmatprep.subr.bf16.mxu0 %v3728_v22 }
  0x29   : > { %3632 = vmatprep.subr.bf16.mxu1 %v3799_v2 }
  0x2b   : > { %3504 = vmatpush3.bf16.msra.mxu0 %v3729_v24 }
  0x2c   : > { %3633 = vmatpush3.bf16.msra.mxu1 %v3733_v25  ;;  %v4002_v25 = vsub.s32 %v1029_v17, %v1031_v18 }
  0x2e   : > { %697 = vmatmul.mubr.bf16.vlgmr.msra.gmra.mrb[0].mxu0 %v3730_v26 }
  0x2f   : > { %3635 = vmatmul.mubr.bf16.vlgmr.msra.gmra.mrb[0].mxu1 %v3734_v27  ;;  %704 = vmatprep.mubr.bf16.mxu0 %v3735_v28 }
  0x30   : > { %3638 = vmatprep.mubr.msk.bf16.mxu1 %vm3800_vm0, %v3799_v2 }
  0x36   : > { %705 = vmatmul.mubr.bf16.gmra.mrb[4].mxu0 %v3737_v29 }
  0x37   : > { %3639 = vmatmul.mubr.bf16.gmra.mrb[4].mxu1 %v3738_v30  ;;  %712 = vmatprep.mubr.bf16.mxu0 %v3739_v31 }
  0x38   : > { %3642 = vmatprep.mubr.msk.bf16.mxu1 %vm3800_vm0, %v3799_v2 }
  0x3e   : > { %713 = vmatmul.mubr.bf16.gmra.mrb[8].mxu0 %v3741_v32 }
  0x3f   : > { %3643 = vmatmul.mubr.bf16.gmra.mrb[8].mxu1 %v3742_v33  ;;  %720 = vmatprep.mubr.bf16.mxu0 %v3743_v34 }
  0x40   : > { %3646 = vmatprep.mubr.msk.bf16.mxu1 %vm3800_vm0, %v3799_v2 }
  0x46   : > { %721 = vmatmul.mubr.bf16.gmra.mrb[12].mxu0 %v3745_v35 }
  0x47   : > { %3647 = vmatmul.mubr.bf16.gmra.mrb[12].mxu1 %v3746_v36  ;;  %728 = vmatprep.mubr.bf16.mxu0 %v3747_v37 }
  0x48   : > { %3650 = vmatprep.mubr.msk.bf16.mxu1 %vm3800_vm0, %v3799_v2 }
  0x4e   : > { %729 = vmatmul.mubr.bf16.gmra.mrb[16].mxu0 %v3749_v38 }
  0x4f   : > { %3651 = vmatmul.mubr.bf16.gmra.mrb[16].mxu1 %v3750_v39  ;;  %736 = vmatprep.mubr.bf16.mxu0 %v3751_v40 }
  0x50   : > { %3654 = vmatprep.mubr.msk.bf16.mxu1 %vm3800_vm0, %v3799_v2 }
  0x56   : > { %737 = vmatmul.mubr.bf16.gmra.mrb[20].mxu0 %v3753_v41 }
  0x57   : > { %3655 = vmatmul.mubr.bf16.gmra.mrb[20].mxu1 %v3754_v42  ;;  %744 = vmatprep.mubr.bf16.mxu0 %v3755_v43 }
  0x58   : > { %3658 = vmatprep.mubr.msk.bf16.mxu1 %vm3800_vm0, %v3799_v2 }
  0x5e   : > { %745 = vmatmul.mubr.bf16.gmra.mrb[24].mxu0 %v3757_v44 }
  0x5f   : > { %3659 = vmatmul.mubr.bf16.gmra.mrb[24].mxu1 %v3758_v45  ;;  %752 = vmatprep.mubr.bf16.mxu0 %v3759_v46 }
  0x60   : > { %3662 = vmatprep.mubr.msk.bf16.mxu1 %vm3800_vm0, %v3799_v2 }
  0x66   : > { %753 = vmatmul.mubr.bf16.gmra.mrb[28].mxu0 %v3761_v47 }
  0x67   : > { %3663 = vmatmul.mubr.bf16.gmra.mrb[28].mxu1 %v3762_v48  ;;  %760 = vmatprep.mubr.bf16.mxu0 %v3763_v49 }
  0x68   : > { %3666 = vmatprep.mubr.msk.bf16.mxu1 %vm3800_vm0, %v3799_v2 }
  0x6e   : > { %761 = vmatmul.mubr.bf16.gmra.mrb[32].mxu0 %v3765_v50 }
  0x6f   : > { %3667 = vmatmul.mubr.bf16.gmra.mrb[32].mxu1 %v3766_v51  ;;  %768 = vmatprep.mubr.bf16.mxu0 %v3767_v52 }
  0x70   : > { %3670 = vmatprep.mubr.msk.bf16.mxu1 %vm3800_vm0, %v3799_v2 }
  0x76   : > { %769 = vmatmul.mubr.bf16.gmra.mrb[36].mxu0 %v3769_v53 }
  0x77   : > { %3671 = vmatmul.mubr.bf16.gmra.mrb[36].mxu1 %v3770_v54  ;;  %776 = vmatprep.mubr.bf16.mxu0 %v3771_v55 }
  0x78   : > { %3674 = vmatprep.mubr.msk.bf16.mxu1 %vm3800_vm0, %v3799_v2 }
  0x7e   : > { %777 = vmatmul.mubr.bf16.gmra.mrb[40].mxu0 %v3773_v56 }
  0x7f   : > { %3675 = vmatmul.mubr.bf16.gmra.mrb[40].mxu1 %v3774_v57  ;;  %784 = vmatprep.mubr.bf16.mxu0 %v3775_v58  ;;  %v4026_v58 = vsub.s32 0, %v1031_v18 }
  0x80   : > { %3678 = vmatprep.mubr.msk.bf16.mxu1 %vm3800_vm0, %v3799_v2 }
  0x86   : > { %785 = vmatmul.mubr.bf16.gmra.mrb[44].mxu0 %v3777_v59 }
  0x87   : > { %3679 = vmatmul.mubr.bf16.gmra.mrb[44].mxu1 %v3778_v60  ;;  %792 = vmatprep.mubr.bf16.mxu0 %v3779_v61 }
  0x88   : > { %3682 = vmatprep.mubr.msk.bf16.mxu1 %vm3800_vm0, %v3799_v2 }
  0x8e   : > { %793 = vmatmul.mubr.bf16.gmra.mrb[48].mxu0 %v3781_v62 }
  0x8f   : > { %3683 = vmatmul.mubr.bf16.gmra.mrb[48].mxu1 %v3782_v63  ;;  %800 = vmatprep.mubr.bf16.mxu0 %v3783_v0 }
  0x90   : > { %3686 = vmatprep.mubr.msk.bf16.mxu1 %vm3800_vm0, %v3799_v2 }
  0x96   : > { %801 = vmatmul.mubr.bf16.gmra.mrb[52].mxu0 %v3785_v3 }
  0x97   : > { %3687 = vmatmul.mubr.bf16.gmra.mrb[52].mxu1 %v3786_v4  ;;  %808 = vmatprep.mubr.bf16.mxu0 %v3461_v5 }
  0x98   : > { %3690 = vmatprep.mubr.msk.bf16.mxu1 %vm3800_vm0, %v3799_v2 }
  0x9e   : > { %809 = vmatmul.mubr.bf16.gmra.mrb[56].mxu0 %v3460_v6 }
  0x9f   : > { %3691 = vmatmul.mubr.bf16.gmra.mrb[56].mxu1 %v3789_v7 }
 0x101   : > { %v3505_v11 = vpop.f32.mrb[0].mxu0 }
 0x102   : > { %v3506_v12 = vpop.f32.mrb[1].mxu0  ;;  %v850_v14 = vpop.f32.mrb[0].mxu1 }
 0x103   : > { %v3507_v15 = vadd.f32 %v3506_v12, %v3505_v11  ;;  %v3508_v16 = vpop.f32.mrb[2].mxu0  ;;  %v3636_v2 = vpop.f32.mrb[1].mxu1 }
 0x104   : > { %v3509_v19 = vpop.f32.mrb[3].mxu0  ;;  %v853_v20 = vpop.f32.mrb[2].mxu1 }
 0x105   : > { %v699_v21 = vadd.f32 %v3507_v15, %v3999_v13  ;;  %v3510_v22 = vadd.f32 %v3509_v19, %v3508_v16  ;;  %v3637_v23 = vpop.f32.mrb[3].mxu1 }
 0x107   : > { %v851_v24 = vadd.f32 %v850_v14, %v699_v21  ;;  %v702_v26 = vadd.f32 %v3510_v22, %v3999_v13 }
 0x109   : > { %v968_v27 = vmax.f32 %v851_v24, 0.0  ;;  %v854_v28 = vadd.f32 %v853_v20, %v702_v26  ;;  %v3511_v29 = vpop.f32.mrb[4].mxu0 }
 0x10a   : > { %v3512_v30 = vpop.f32.mrb[5].mxu0  ;;  %v858_v31 = vpop.f32.mrb[4].mxu1 }
 0x10b   : > { %v1026_v32 = vcombine.high %v968_v27, %v968_v27  ;;  %v1033_v33 = vrot.slane %v968_v27, %v4002_v25  ;;  %v969_v34 = vmax.f32 %v854_v28, 0.0  ;;  %v3513_v35 = vadd.f32 %v3512_v30, %v3511_v29  ;;  %v3514_v36 = vpop.f32.mrb[6].mxu0  ;;  %v3640_v37 = vpop.f32.mrb[5].mxu1 }
 0x10c   : > { %v3515_v38 = vpop.f32.mrb[7].mxu0  ;;  %v861_v39 = vpop.f32.mrb[6].mxu1 }
 0x10d   : > { %v1040_v40 = vrot.slane %v1026_v32, %v4002_v25  ;;  %v1041_v41 = vcombine.high %v1033_v33, %v1033_v33  ;;  %v1075_v42 = vcombine.high %v969_v34, %v969_v34  ;;  %v3641_v43 = vpop.f32.mrb[7].mxu1  ;;  %v4008_v44 = vrot.slane %v1033_v33, %v4002_v25 }
 0x10e   : > { %v1082_v45 = vrot.slane %v969_v34, %v4002_v25  ;;  %v707_v46 = vadd.f32 %v3513_v35, %v3999_v13  ;;  %v3516_v47 = vadd.f32 %v3515_v38, %v3514_v36 }
 0x10f   : > { %v1042_v48 = vcombine.high %v1040_v40, %v1040_v40  ;;  %v4013_v49 = vrot.slane %v1040_v40, %v4002_v25  ;;  %v4016_v50 = vrot.slane %v1041_v41, %v4002_v25  ;;  %v1089_v51 = vrot.slane %v1075_v42, %v4002_v25 }
 0x110   : > { %v1090_v52 = vcombine.high %v1082_v45, %v1082_v45  ;;  %v4020_v53 = vrot.slane %v1082_v45, %v4002_v25  ;;  %v859_v54 = vadd.f32 %v858_v31, %v707_v46  ;;  %v710_v56 = vadd.f32 %v3516_v47, %v3999_v13 }
 0x111   : > { %v4023_v55 = vrot.slane %v1042_v48, %v4002_v25  ;;  %v3517_v57 = vpop.f32.mrb[8].mxu0  ;;  %v1071_v59 = vcombine.high %v4008_v44, %v4008_v44  ;;  %v1091_v60 = vcombine.high %v1089_v51, %v1089_v51  ;;  %v4031_v61 = vrot.slane %v1089_v51, %v4002_v25 }
 0x112   : > { %v4034_v62 = vrot.slane %v1090_v52, %v4002_v25  ;;  %v3518_v63 = vpop.f32.mrb[9].mxu0  ;;  %v866_v0 = vpop.f32.mrb[8].mxu1  ;;  %v1072_v1 = vcombine.high %v4013_v49, %v4013_v49  ;;  %v970_v3 = vmax.f32 %v859_v54, 0.0  ;;  %v862_v4 = vadd.f32 %v861_v39, %v710_v56 }
 0x113   : > { %v3519_v5 = vadd.f32 %v3518_v63, %v3517_v57  ;;  %v3520_v6 = vpop.f32.mrb[10].mxu0  ;;  %v3644_v7 = vpop.f32.mrb[9].mxu1  ;;  %v1073_v8 = vcombine.high %v4016_v50, %v4016_v50  ;;  %v1074_v9 = vcombine.high %v4023_v55, %v4023_v55  ;;  %v4043_v10 = vrot.slane %v1091_v60, %v4002_v25 }
 0x114   : > { %v1120_v11 = vcombine.high %v4020_v53, %v4020_v53  ;;  %v3521_v12 = vpop.f32.mrb[11].mxu0  ;;  %v4047_v14 = vpop.f32.mrb[10].mxu1  ;;  %v1124_v15 = vcombine.high %v970_v3, %v970_v3  ;;  %v1131_v16 = vrot.slane %v970_v3, %v4002_v25  ;;  %v971_v17 = vmax.f32 %v862_v4, 0.0 }
 0x115   : > { %v715_v18 = vadd.f32 %v3519_v5, %v3999_v13  ;;  %v3645_v2 = vpop.f32.mrb[11].mxu1  ;;  %v1121_v19 = vcombine.high %v4031_v61, %v4031_v61  ;;  %v1122_v20 = vcombine.high %v4034_v62, %v4034_v62  ;;  %v1123_v21 = vcombine.high %v4043_v10, %v4043_v10 }
 0x116   : > { %v3522_v22 = vadd.f32 %v3521_v12, %v3520_v6  ;;  %v1138_v23 = vrot.slane %v1124_v15, %v4002_v25  ;;  %v1139_v24 = vcombine.high %v1131_v16, %v1131_v16  ;;  %v1147_v26 = vrot.slane %v1131_v16, %v4002_v25 }
 0x117   : > { %v1173_v27 = vcombine.high %v971_v17, %v971_v17  ;;  %v1180_v28 = vrot.slane %v971_v17, %v4002_v25  ;;  %v2637_v29 = vmax.f32 %v4008_v44, %v1123_v21  ;;  %v867_v30 = vadd.f32 %v866_v0, %v715_v18 }
 0x118   : > { %v718_v31 = vadd.f32 %v3522_v22, %v3999_v13  ;;  %v1140_v32 = vcombine.high %v1138_v23, %v1138_v23  ;;  %v4063_v33 = vrot.slane %v1138_v23, %v4002_v25  ;;  %v1161_v34 = vrot.slane %v1139_v24, %v4002_v25 }
 0x119   : > { %v1169_v35 = vcombine.high %v1147_v26, %v1147_v26  ;;  %v3523_v36 = vpop.f32.mrb[12].mxu0  ;;  %v2638_v37 = vmax.f32 %v4016_v50, %v1147_v26  ;;  %v1187_v38 = vrot.slane %v1173_v27, %v4002_v25  ;;  %v1188_v39 = vcombine.high %v1180_v28, %v1180_v28 }
 0x11a   : > { %v4069_v40 = vrot.slane %v1180_v28, %v4002_v25  ;;  %v3524_v41 = vpop.f32.mrb[13].mxu0  ;;  %v874_v42 = vpop.f32.mrb[12].mxu1  ;;  %v1168_v43 = vrot.slane %v1140_v32, %v4002_v25  ;;  %v1170_v44 = vcombine.high %v4063_v33, %v4063_v33  ;;  %v1171_v45 = vcombine.high %v1161_v34, %v1161_v34 }
 0x11b   : > { %v2639_v46 = vmax.f32 %v1071_v59, %v1161_v34  ;;  %v3526_v47 = vpop.f32.mrb[14].mxu0  ;;  %v3648_v48 = vpop.f32.mrb[13].mxu1  ;;  %v4074_v51 = vmax.f32 %v1073_v8, %v1169_v35  ;;  %v2642_v50 = vmax.f32 %v4023_v55, %v4063_v33  ;;  %v1189_v52 = vcombine.high %v1187_v38, %v1187_v38 }
 0x11c   : > { %v4079_v54 = vrot.slane %v1187_v38, %v4002_v25  ;;  %v3527_v56 = vpop.f32.mrb[15].mxu0  ;;  %v4081_v57 = vpop.f32.mrb[14].mxu1  ;;  %v1172_v60 = vcombine.high %v1168_v43, %v1168_v43  ;;  %v2641_v63 = vmax.f32 %v4013_v49, %v1171_v45  ;;  %v2643_v0 = vmax.f32 %v1072_v1, %v1168_v43 }
 0x11d   : > { %v4084_v3 = vmax.f32 %v1074_v9, %v1170_v44  ;;  %v3649_v59 = vpop.f32.mrb[15].mxu1  ;;  %v1210_v4 = vrot.slane %v1188_v39, %v4002_v25  ;;  %v1217_v5 = vrot.slane %v1189_v52, %v4002_v25  ;;  %v1218_v6 = vcombine.high %v4069_v40, %v4069_v40 }
 0x11e   : > { %v4092_v7 = vcombine.high %v4079_v54, %v4079_v54  ;;  %v2645_v8 = vmax.f32 %v4020_v53, %v1172_v60  ;;  %v2646_v49 = vmax.f32 %v4034_v62, %v4069_v40  ;;  %v2650_v1 = vmax.f32 %v4043_v10, %v4079_v54 }
 0x11f   : > { %v972_v9 = vmax.f32 %v867_v30, 0.0  ;;  %v1220_v12 = vcombine.high %v1210_v4, %v1210_v4  ;;  %v4099_v15 = vcombine.high %v1217_v5, %v1217_v5  ;;  %v2647_v16 = vmax.f32 %v1120_v11, %v1210_v4 }
 0x120   : > { %v4101_v17 = vmax.f32 %v1122_v20, %v1218_v6  ;;  %v4103_v18 = vmax.f32 %v1121_v19, %v1217_v5  ;;  %v2742_v2 = vmax.f32 %v2637_v29, %v4092_v7  ;;  %v870_v24 = vadd.f32 %v4047_v14, %v718_v31 }
 0x121   : > { %v1222_v21 = vcombine.high %v972_v9, %v972_v9  ;;  %v1229_v53 = vrot.slane %v972_v9, %v4002_v25  ;;  %v3529_v22 = vpop.f32.mrb[16].mxu0  ;;  %v4108_v62 = vmax.f32 %v4031_v61, %v1220_v12  ;;  %v2743_v23 = vmax.f32 %v2638_v37, %v4099_v15 }
 0x122   : > { %v3525_v26 = vadd.f32 %v3524_v41, %v3523_v36  ;;  %v3530_v27 = vpop.f32.mrb[17].mxu0  ;;  %v4112_v11 = vpop.f32.mrb[16].mxu1  ;;  %v4118_v29 = vadd.f32 %v3527_v56, %v3526_v47  ;;  %v973_v34 = vmax.f32 %v870_v24, 0.0 }
 0x123   : > { %v1236_v19 = vrot.slane %v1222_v21, %v4002_v25  ;;  %v1237_v20 = vcombine.high %v1229_v53, %v1229_v53  ;;  %v4116_v28 = vrot.slane %v1229_v53, %v4002_v25  ;;  %v4120_v30 = vpop.f32.mrb[18].mxu0  ;;  %v3652_v61 = vpop.f32.mrb[17].mxu1  ;;  %v2847_v32 = vmax.f32 %v2742_v2, %v2743_v23 }
 0x124   : > { %v723_v35 = vadd.f32 %v3525_v26, %v3999_v13  ;;  %v4123_v14 = vadd.f32 %v3530_v27, %v3529_v22  ;;  %v4125_v31 = vpop.f32.mrb[19].mxu0  ;;  %v4127_v36 = vpop.f32.mrb[18].mxu1  ;;  %v1271_v44 = vcombine.high %v973_v34, %v973_v34  ;;  %v1278_v45 = vrot.slane %v973_v34, %v4002_v25 }
 0x125   : > { %v1238_v37 = vcombine.high %v1236_v19, %v1236_v19  ;;  %v4130_v38 = vrot.slane %v1236_v19, %v4002_v25  ;;  %v4133_v39 = vrot.slane %v1237_v20, %v4002_v25  ;;  %v4137_v40 = vcombine.high %v4116_v28, %v4116_v28  ;;  %v3653_v41 = vpop.f32.mrb[19].mxu1 }
 0x126   : > { %v2744_v43 = vmax.f32 %v2639_v46, %v4116_v28  ;;  %v875_v47 = vadd.f32 %v874_v42, %v723_v35  ;;  %v1285_v4 = vrot.slane %v1271_v44, %v4002_v25  ;;  %v1286_v42 = vcombine.high %v1278_v45, %v1278_v45 }
 0x127   : > { %v4142_v48 = vrot.slane %v1238_v37, %v4002_v25  ;;  %v4146_v52 = vcombine.high %v4130_v38, %v4130_v38  ;;  %v2745_v56 = vmax.f32 %v4074_v51, %v4133_v39  ;;  %v4151_v60 = vmax.f32 %v2641_v63, %v4137_v40 }
 0x128   : > { %v4154_v59 = vmax.f32 %v2643_v0, %v4130_v38  ;;  %v2896_v46 = vmax.f32 %v2847_v32, %v2744_v43  ;;  %v1287_v12 = vcombine.high %v1285_v4, %v1285_v4  ;;  %v4169_v0 = vrot.slane %v1278_v45, %v4002_v25 }
 0x129   : > { %v4159_v5 = vcombine.high %v4142_v48, %v4142_v48  ;;  %v2749_v6 = vmax.f32 %v4084_v3, %v4142_v48  ;;  %v4164_v9 = vmax.f32 %v2645_v8, %v4146_v52  ;;  %v2848_v51 = vmax.f32 %v2744_v43, %v2745_v56  ;;  %v4166_v63 = vpop.f32.mrb[20].mxu0 }
 0x12a   : > { %v4172_v2 = vrot.slane %v1285_v4, %v4002_v25  ;;  %v4175_v21 = vrot.slane %v1286_v42, %v4002_v25  ;;  %v4177_v53 = vpop.f32.mrb[21].mxu0  ;;  %v4179_v22 = vpop.f32.mrb[20].mxu1  ;;  %v974_v24 = vmax.f32 %v875_v47, 0.0  ;;  %v4189_v19 = vrot.slane %v1287_v12, %v4002_v25 }
 0x12b   : > { %v4182_v3 = vmax.f32 %v4154_v59, %v2749_v6  ;;  %v2897_v8 = vmax.f32 %v2848_v51, %v4151_v60  ;;  %v2751_v23 = vmax.f32 %v2646_v49, %v4159_v5  ;;  %v4186_v26 = vpop.f32.mrb[22].mxu0  ;;  %v3656_v27 = vpop.f32.mrb[21].mxu1  ;;  %v4193_v20 = vcombine.high %v4169_v0, %v4169_v0 }
 0x12c   : > { %v1317_v61 = vcombine.high %v4172_v2, %v4172_v2  ;;  %v2752_v32 = vmax.f32 %v2647_v16, %v4169_v0  ;;  %v4198_v34 = vpop.f32.mrb[23].mxu0  ;;  %v4200_v35 = vpop.f32.mrb[22].mxu1  ;;  %v2753_v41 = vmax.f32 %v4101_v17, %v4175_v21  ;;  %v2756_v43 = vmax.f32 %v4103_v18, %v4172_v2 }
 0x12d   : > { %v2899_v49 = vmax.f32 %v4182_v3, %v4164_v9  ;;  %v4204_v37 = vcombine.low %v2896_v46, %v2897_v8  ;;  %v3657_v44 = vpop.f32.mrb[23].mxu1  ;;  %v1319_v45 = vcombine.high %v4189_v19, %v4189_v19  ;;  %v2652_v16 = vmax.f32 %v4092_v7, %v4189_v19 }
 0x12e   : > { %v4215_v47 = vmax.f32 %v4099_v15, %v1317_v61  ;;  %v4219_v56 = vmax.f32 %v4108_v62, %v4193_v20  ;;  %v2851_v46 = vmax.f32 %v4164_v9, %v2751_v23  ;;  %v2852_v4 = vmax.f32 %v2752_v32, %v2753_v41 }
 0x12f   : > { %v2996_v17 = vrot.slane %v4204_v37, %v4002_v25  ;;  %v1269_v42 = vcombine.high %v4133_v39, %v4133_v39  ;;  %v4227_v6 = vmax.f32 %v4116_v28, %v1319_v45  ;;  %v1320_v51 = vcombine.high %v974_v24, %v974_v24 }
 0x130   : > { %v1327_v15 = vrot.slane %v974_v24, %v4002_v25  ;;  %v726_v12 = vadd.f32 %v4118_v29, %v3999_v13  ;;  %v2900_v62 = vmax.f32 %v2851_v46, %v2752_v32  ;;  %v2901_v3 = vmax.f32 %v2852_v4, %v4219_v56 }
 0x131   : > { %v2747_v9 = vmax.f32 %v2642_v50, %v1269_v42  ;;  %v4238_v8 = vcombine.high %v4175_v21, %v4175_v21  ;;  %v4240_v23 = vpop.f32.mrb[24].mxu0  ;;  %v1334_v28 = vrot.slane %v1320_v51, %v4002_v25  ;;  %v731_v37 = vadd.f32 %v4123_v14, %v3999_v13 }
 0x132   : > { %v1335_v27 = vcombine.high %v1327_v15, %v1327_v15  ;;  %v4244_v24 = vrot.slane %v1327_v15, %v4002_v25  ;;  %v878_v29 = vadd.f32 %v4081_v57, %v726_v12  ;;  %v4247_v61 = vpop.f32.mrb[25].mxu0  ;;  %v4249_v32 = vpop.f32.mrb[24].mxu1  ;;  %v2989_v55 = vcombine.low %v2900_v62, %v2901_v3 }
 0x133   : > { %v2849_v33 = vmax.f32 %v4151_v60, %v2747_v9  ;;  %v2755_v50 = vmax.f32 %v2650_v1, %v4238_v8  ;;  %v4258_v41 = vpop.f32.mrb[26].mxu0  ;;  %v3660_v44 = vpop.f32.mrb[25].mxu1  ;;  %v1336_v45 = vcombine.high %v1334_v28, %v1334_v28  ;;  %v4261_v57 = vrot.slane %v1334_v28, %v4002_v25 }
 0x134   : > { %v4264_v46 = vrot.slane %v1335_v27, %v4002_v25  ;;  %v1365_v60 = vcombine.high %v4244_v24, %v4244_v24  ;;  %v4268_v4 = vpop.f32.mrb[27].mxu0  ;;  %v4270_v10 = vpop.f32.mrb[26].mxu1  ;;  %v3010_v54 = vrot.slane %v2989_v55, %v4002_v25  ;;  %v2655_v1 = vmax.f32 %v4133_v39, %v4244_v24 }
 0x135   : > { %v2898_v14 = vmax.f32 %v2849_v33, %v4154_v59  ;;  %v975_v51 = vmax.f32 %v878_v29, 0.0  ;;  %v3661_v15 = vpop.f32.mrb[27].mxu1  ;;  %v4277_v12 = vrot.slane %v1336_v45, %v4002_v25  ;;  %v1366_v62 = vcombine.high %v4261_v57, %v4261_v57 }
 0x136   : > { %v1367_v3 = vcombine.high %v4264_v46, %v4264_v46  ;;  %v3025_v28 = vrot.slane %v3010_v54, %v4002_v25  ;;  %v4286_v27 = vmax.f32 %v1269_v42, %v1365_v60  ;;  %v2853_v54 = vmax.f32 %v4219_v56, %v2755_v50 }
 0x137   : > { %v2988_v29 = vcombine.low %v2898_v14, %v2899_v49  ;;  %v1368_v55 = vcombine.high %v4277_v12, %v4277_v12  ;;  %v4298_v42 = vmax.f32 %v4159_v5, %v1366_v62  ;;  %v1369_v60 = vcombine.high %v975_v51, %v975_v51 }
 0x138   : > { %v4293_v33 = vmax.f32 %v4130_v38, %v1367_v3  ;;  %v1376_v49 = vrot.slane %v975_v51, %v4002_v25  ;;  %v883_v38 = vadd.f32 %v4112_v11, %v731_v37  ;;  %v3534_v3 = vadd.f32 %v4125_v31, %v4120_v30 }
 0x139   : > { %v3003_v45 = vrot.slane %v2988_v29, %v4002_v25  ;;  %v4303_v14 = vpop.f32.mrb[28].mxu0  ;;  %v4306_v15 = vmax.f32 %v4169_v0, %v1368_v55  ;;  %v3537_v5 = vadd.f32 %v4177_v53, %v4166_v63  ;;  %v1383_v56 = vrot.slane %v1369_v60, %v4002_v25 }
 0x13a   : > { %v4313_v62 = vpop.f32.mrb[29].mxu0  ;;  %v4315_v29 = vpop.f32.mrb[28].mxu1  ;;  %v1384_v50 = vcombine.high %v1376_v49, %v1376_v49  ;;  %v4320_v0 = vrot.slane %v1376_v49, %v4002_v25  ;;  %v2902_v30 = vmax.f32 %v2853_v54, %v2756_v43  ;;  %v976_v31 = vmax.f32 %v883_v38, 0.0 }
 0x13b   : > { %v3011_v51 = vcombine.low %v2996_v17, %v3003_v45  ;;  %v4322_v55 = vpop.f32.mrb[30].mxu0  ;;  %v3664_v11 = vpop.f32.mrb[29].mxu1  ;;  %v734_v63 = vadd.f32 %v3534_v3, %v3999_v13  ;;  %v739_v53 = vadd.f32 %v3537_v5, %v3999_v13  ;;  %v1385_v60 = vcombine.high %v1383_v56, %v1383_v56 }
 0x13c   : > { %v4329_v17 = vpop.f32.mrb[31].mxu0  ;;  %v4331_v37 = vpop.f32.mrb[30].mxu1  ;;  %v4335_v49 = vrot.slane %v1383_v56, %v4002_v25  ;;  %v4338_v11 = vrot.slane %v1384_v50, %v4002_v25  ;;  %v1414_v43 = vcombine.high %v4320_v0, %v4320_v0  ;;  %v2663_v54 = vmax.f32 %v4175_v21, %v4320_v0 }
 0x13d   : > { %5450 = vst [vmem:[#allocation2_spill] sm:$0xff] %v4331_v37  ;;  %v3018_v45 = vrot.slane %v3011_v51, %v4002_v25  ;;  %v3665_v18 = vpop.f32.mrb[31].mxu1  ;;  %v3284_v38 = vrot.slane %v2902_v30, %v4026_v58  ;;  %v1418_v3 = vcombine.high %v976_v31, %v976_v31  ;;  %v4351_v51 = vrot.slane %v1385_v60, %v4002_v25 }
 0x13e   : > { %v4355_v56 = vcombine.high %v4335_v49, %v4335_v49  ;;  %v1416_v21 = vcombine.high %v4338_v11, %v4338_v11  ;;  %v2757_v0 = vmax.f32 %v2652_v16, %v4335_v49  ;;  %v1425_v30 = vrot.slane %v976_v31, %v4002_v25  ;;  %v3334_v16 = vld [vmem:[%s4348_s20] sm:$0xf] }
 0x13f   : > { %v3026_v5 = vcombine.low %v3018_v45, %v3025_v28  ;;  %5451 = vst [vmem:[#allocation3_spill] sm:$0xff] %v4351_v51  ;;  %v4362_v28 = vmax.f32 %v4238_v8, %v1414_v43  ;;  %v4371_v45 = vcombine.high %v4351_v51, %v4351_v51  ;;  %v2758_v18 = vmax.f32 %v4215_v47, %v4351_v51 }
 0x140   : > { %v4374_v60 = vmax.f32 %v4172_v2, %v1416_v21  ;;  %v2759_v8 = vmax.f32 %v4227_v6, %v4355_v56  ;;  %v5452_v19 = vmov 0  ;;  %v1432_v2 = vrot.slane %v1418_v3, %v4002_v25 }
 0x141   : > { %v4380_v43 = vpop.f32.mrb[32].mxu0  ;;  %v3317_v7 = vsel %vm3316_vm1, %v3026_v5, %v3284_v38  ;;  %v5453_v19 = vsel %vm4385_vm4, 4294967295, %v5452_v19  ;;  %v1433_v31 = vcombine.high %v1425_v30, %v1425_v30  ;;  %v4392_v21 = vrot.slane %v1425_v30, %v4002_v25 }
 0x142   : > { %5454 = vst [vmem:[#allocation4_spill] sm:$0xff] %v5453_v19  ;;  %v4394_v47 = vpop.f32.mrb[33].mxu0  ;;  %v4396_v6 = vpop.f32.mrb[32].mxu1  ;;  %v2854_v59 = vmax.f32 %v2757_v0, %v2758_v18  ;;  %v3324_v50 = vpack.c.bf16 %v3317_v7, %v3317_v7  ;;  %v2760_v38 = vmax.f32 %v2655_v1, %v4371_v45  ;;  %v886_v5 = vadd.f32 %v4127_v36, %v734_v63 }
 0x143   : > { %v4403_v44 = vpop.f32.mrb[34].mxu0  ;;  %v3668_v3 = vpop.f32.mrb[33].mxu1  ;;  %v1434_v9 = vcombine.high %v1432_v2, %v1432_v2  ;;  %v4406_v30 = vrot.slane %v1432_v2, %v4002_v25  ;;  %v4409_v37 = vrot.slane %v1433_v31, %v4002_v25  ;;  %v4413_v0 = vcombine.high %v4392_v21, %v4392_v21 }
 0x144   : > { %v4415_v18 = vpop.f32.mrb[35].mxu0  ;;  %v4417_v39 = vpop.f32.mrb[34].mxu1  ;;  %v3335_v36 = vsel %vm4385_vm4, %v3324_v50, %v3334_v16  ;;  %v5455_v24 = vmax.f32 %v4137_v40, %v4264_v46  ;;  %v2855_v63 = vmax.f32 %v2759_v8, %v2760_v38  ;;  %v2903_v7 = vmax.f32 %v2854_v59, %v2759_v8 }
 0x145   : > { %v3669_v2 = vpop.f32.mrb[35].mxu1  ;;  %3336 = vst [vmem:[%s4348_s20] sm:$0xf] %v3335_v36  ;;  %v4427_v31 = vrot.slane %v1434_v9, %v4002_v25  ;;  %v4431_v3 = vcombine.high %v4406_v30, %v4406_v30  ;;  %v2762_v19 = vmax.f32 %v4286_v27, %v4409_v37  ;;  %v4437_v50 = vmax.f32 %v4293_v33, %v4413_v0 }
 0x146   : > { %v2761_v1 = vmax.f32 %v5455_v24, %v4392_v21  ;;  %v5456_v40 = vmax.f32 %v4146_v52, %v4277_v12  ;;  %v977_v9 = vmax.f32 %v886_v5, 0.0  ;;  %v891_v8 = vadd.f32 %v4179_v22, %v739_v53 }
 0x147   : > { %v4448_v16 = vcombine.high %v4427_v31, %v4427_v31  ;;  %v2766_v27 = vmax.f32 %v4298_v42, %v4427_v31  ;;  %v2767_v33 = vmax.f32 %v4306_v15, %v4431_v3  ;;  %v4467_v15 = vcombine.high %v4409_v37, %v4409_v37 }
 0x148   : > { %v4443_v46 = vmax.f32 %v5456_v40, %v4406_v30  ;;  %v2904_v59 = vmax.f32 %v2855_v63, %v2761_v1  ;;  %v4454_v38 = vmax.f32 %v2761_v1, %v2762_v19  ;;  %v1467_v52 = vcombine.high %v977_v9, %v977_v9 }
 0x149   : > { %v1474_v12 = vrot.slane %v977_v9, %v4002_v25  ;;  %v978_v5 = vmax.f32 %v891_v8, 0.0  ;;  %v4459_v24 = vpop.f32.mrb[36].mxu0  ;;  %v2768_v42 = vmax.f32 %v2663_v54, %v4448_v16 }
 0x14a   : > { %v4456_v36 = vcombine.low %v2903_v7, %v2904_v59  ;;  %5458 = vst [vmem:[#allocation6_spill] sm:$0xff] %v4459_v24  ;;  %v2858_v22 = vmax.f32 %v4443_v46, %v2766_v27  ;;  %v4469_v19 = vpop.f32.mrb[37].mxu0  ;;  %v4471_v1 = vpop.f32.mrb[36].mxu1  ;;  %v1481_v7 = vrot.slane %v1467_v52, %v4002_v25 }
 0x14b   : > { %5459 = vst [vmem:[#allocation7_spill] sm:$0xff] %v4469_v19  ;;  %5460 = vst [vmem:[#allocation8_spill] sm:$0xff] %v4471_v1  ;;  %v1482_v2 = vcombine.high %v1474_v12, %v1474_v12  ;;  %v1490_v40 = vrot.slane %v1474_v12, %v4002_v25  ;;  %v4477_v59 = vpop.f32.mrb[38].mxu0  ;;  %v3672_v9 = vpop.f32.mrb[37].mxu1  ;;  %v2859_v54 = vmax.f32 %v2767_v33, %v2768_v42 }
 0x14c   : > { %5457 = vst [vmem:[#allocation5_spill] sm:$0xff] %v4456_v36  ;;  %5461 = vst [vmem:[#allocation9_spill] sm:$0xff] %v4477_v59  ;;  %v2907_v8 = vmax.f32 %v2858_v22, %v2767_v33  ;;  %v1516_v27 = vcombine.high %v978_v5, %v978_v5  ;;  %v1523_v53 = vrot.slane %v978_v5, %v4002_v25  ;;  %v4480_v24 = vpop.f32.mrb[39].mxu0  ;;  %v4482_v19 = vpop.f32.mrb[38].mxu1 }
 0x14d   : > { %5462 = vst [vmem:[#allocation10_spill] sm:$0xff] %v4480_v24  ;;  %5463 = vst [vmem:[#allocation11_spill] sm:$0xff] %v4482_v19  ;;  %v1483_v1 = vcombine.high %v1481_v7, %v1481_v7  ;;  %v4485_v63 = vrot.slane %v1481_v7, %v4002_v25  ;;  %v4488_v52 = vrot.slane %v1482_v2, %v4002_v25  ;;  %v3673_v59 = vpop.f32.mrb[39].mxu1 }
 0x14e   : > { %v4490_v12 = vcombine.high %v1490_v40, %v1490_v40  ;;  %v5466_v33 = vmax.f32 %v4193_v20, %v4338_v11  ;;  %v1530_v5 = vrot.slane %v1516_v27, %v4002_v25  ;;  %v1531_v42 = vcombine.high %v1523_v53, %v1523_v53 }
 0x14f   : > { %5464 = vst [vmem:[#allocation12_spill] sm:$0xff] %v4485_v63  ;;  %v4497_v9 = vrot.slane %v1523_v53, %v4002_v25  ;;  %v4500_v19 = vrot.slane %v1483_v1, %v4002_v25  ;;  %v1513_v7 = vcombine.high %v4485_v63, %v4485_v63  ;;  %v1514_v2 = vcombine.high %v4488_v52, %v4488_v52 }
 0x150   : > { %5465 = vst [vmem:[#allocation13_spill] sm:$0xff] %v4490_v12  ;;  %v2769_v22 = vmax.f32 %v5466_v33, %v1490_v40  ;;  %v2770_v20 = vmax.f32 %v4362_v28, %v4488_v52  ;;  %v2771_v11 = vmax.f32 %v4374_v60, %v4490_v12  ;;  %v1532_v27 = vcombine.high %v1530_v5, %v1530_v5 }
 0x151   : > { %v1515_v1 = vcombine.high %v4500_v19, %v4500_v19  ;;  %v4517_v24 = vmax.f32 %v4371_v45, %v1513_v7  ;;  %v4520_v36 = vrot.slane %v1530_v5, %v4002_v25  ;;  %v4522_v59 = vpop.f32.mrb[40].mxu0  ;;  %v4525_v60 = vrot.slane %v1531_v42, %v4002_v25 }
 0x152   : > { %v2908_v53 = vmax.f32 %v2859_v54, %v2769_v22  ;;  %v2860_v28 = vmax.f32 %v2769_v22, %v2770_v20  ;;  %v4528_v54 = vrot.slane %v1532_v27, %v4002_v25  ;;  %v4530_v51 = vpop.f32.mrb[41].mxu0  ;;  %v4532_v12 = vpop.f32.mrb[40].mxu1  ;;  %v1561_v5 = vcombine.high %v4497_v9, %v4497_v9 }
 0x153   : > { %5467 = vst [vmem:[#allocation14_spill] sm:$0xff] %v4532_v12  ;;  %v4535_v45 = vmax.f32 %v4392_v21, %v1515_v1  ;;  %v1562_v22 = vcombine.high %v4520_v36, %v4520_v36  ;;  %v4543_v42 = vpop.f32.mrb[42].mxu0  ;;  %v3676_v7 = vpop.f32.mrb[41].mxu1  ;;  %v1563_v21 = vcombine.high %v4525_v60, %v4525_v60 }
 0x154   : > { %v3029_v63 = vcombine.low %v2907_v8, %v2908_v53  ;;  %v4545_v20 = vmax.f32 %v2860_v28, %v2771_v11  ;;  %v1564_v27 = vcombine.high %v4528_v54, %v4528_v54  ;;  %v4552_v1 = vpop.f32.mrb[43].mxu0  ;;  %v4554_v33 = vpop.f32.mrb[42].mxu1  ;;  %v4559_v12 = vmax.f32 %v4467_v15, %v1561_v5 }
 0x155   : > { %5468 = vst [vmem:[#allocation15_spill] sm:$0xff] %v4552_v1  ;;  %5469 = vst [vmem:[#allocation16_spill] sm:$0xff] %v4554_v33  ;;  %v3677_v28 = vpop.f32.mrb[43].mxu1  ;;  %v4571_v33 = vmax.f32 %v4406_v30, %v1563_v21  ;;  %v4574_v8 = vmax.f32 %v4448_v16, %v1562_v22  ;;  %v5470_v11 = vmax.f32 %v4142_v48, %v4261_v57 }
 0x156   : > { %v3050_v53 = vrot.slane %v3029_v63, %v4002_v25  ;;  %v3288_v1 = vrot.slane %v4545_v20, %v4026_v58  ;;  %v4576_v5 = vmax.f32 %v1490_v40, %v1564_v27  ;;  %v4585_v28 = vmax.f32 %v4335_v49, %v1514_v2  ;;  %v5471_v27 = vld [vmem:[#allocation2_spill] sm:$0xff] }
 0x157   : > { %v2764_v63 = vmax.f32 %v5470_v11, %v4467_v15  ;;  %v3543_v30 = vadd.f32 %v4247_v61, %v4240_v23  ;;  %v3546_v16 = vadd.f32 %v4268_v4, %v4258_v41  ;;  %v3549_v40 = vadd.f32 %v4313_v62, %v4303_v14 }
 0x158   : > { %v4566_v7 = vrot.slane %v3050_v53, %v4002_v25  ;;  %v3540_v53 = vadd.f32 %v4198_v34, %v4186_v26  ;;  %v3552_v22 = vadd.f32 %v4329_v17, %v4322_v55  ;;  %v3555_v26 = vadd.f32 %v4394_v47, %v4380_v43 }
 0x159   : > { %v2857_v48 = vmax.f32 %v4437_v50, %v2764_v63  ;;  %v3558_v34 = vadd.f32 %v4415_v18, %v4403_v44  ;;  %v4601_v23 = vpop.f32.mrb[44].mxu0  ;;  %v747_v61 = vadd.f32 %v3543_v30, %v3999_v13  ;;  %v750_v41 = vadd.f32 %v3546_v16, %v3999_v13 }
 0x15a   : > { %v742_v57 = vadd.f32 %v3540_v53, %v3999_v13  ;;  %v755_v4 = vadd.f32 %v3549_v40, %v3999_v13  ;;  %v758_v14 = vadd.f32 %v3552_v22, %v3999_v13  ;;  %v4607_v62 = vpop.f32.mrb[45].mxu0  ;;  %v4609_v55 = vpop.f32.mrb[44].mxu1  ;;  %v763_v44 = vadd.f32 %v3555_v26, %v3999_v13 }
 0x15b   : > { %v2906_v17 = vmax.f32 %v2857_v48, %v4443_v46  ;;  %v766_v43 = vadd.f32 %v3558_v34, %v3999_v13  ;;  %v4615_v47 = vpop.f32.mrb[46].mxu0  ;;  %v3680_v18 = vpop.f32.mrb[45].mxu1  ;;  %v899_v15 = vadd.f32 %v4249_v32, %v747_v61  ;;  %v902_v2 = vadd.f32 %v4270_v10, %v750_v41  ;;  %v5474_v61 = vld [vmem:[#allocation5_spill] sm:$0xff] }
 0x15c   : > { %v894_v49 = vadd.f32 %v4200_v35, %v742_v57  ;;  %v907_v21 = vadd.f32 %v4315_v29, %v755_v4  ;;  %v910_v11 = vadd.f32 %v5471_v27, %v758_v14  ;;  %v4621_v63 = vpop.f32.mrb[47].mxu0  ;;  %v4623_v46 = vpop.f32.mrb[46].mxu1  ;;  %v5473_v35 = vmax.f32 %v4454_v38, %v4437_v50 }
 0x15d   : > { %5472 = vst [vmem:[#allocation2_spill] sm:$0xff] %v4623_v46  ;;  %v915_v30 = vadd.f32 %v4396_v6, %v763_v44  ;;  %v4630_v16 = vadd.f32 %v4417_v39, %v766_v43  ;;  %v3681_v32 = vpop.f32.mrb[47].mxu1  ;;  %v980_v10 = vmax.f32 %v899_v15, 0.0  ;;  %v981_v40 = vmax.f32 %v902_v2, 0.0 }
 0x15e   : > { %v3028_v53 = vcombine.low %v5473_v35, %v2906_v17  ;;  %v979_v13 = vmax.f32 %v894_v49, 0.0  ;;  %v4632_v29 = vmax.f32 %v907_v21, 0.0  ;;  %v4634_v22 = vmax.f32 %v910_v11, 0.0 }
 0x15f   : > { %v4638_v50 = vmax.f32 %v915_v30, 0.0  ;;  %v1614_v38 = vcombine.high %v980_v10, %v980_v10  ;;  %v1621_v6 = vrot.slane %v980_v10, %v4002_v25  ;;  %v1663_v34 = vcombine.high %v981_v40, %v981_v40 }
 0x160   : > { %v3043_v48 = vrot.slane %v3028_v53, %v4002_v25  ;;  %v1565_v57 = vcombine.high %v979_v13, %v979_v13  ;;  %v1572_v26 = vrot.slane %v979_v13, %v4002_v25  ;;  %v4642_v39 = vrot.slane %v981_v40, %v4002_v25  ;;  %v5480_v40 = vld [vmem:[#allocation3_spill] sm:$0xff] }
 0x161   : > { %v5475_v41 = vrot.slane %v5474_v61, %v4002_v25  ;;  %v4651_v44 = vpop.f32.mrb[48].mxu0  ;;  %v1628_v43 = vrot.slane %v1614_v38, %v4002_v25  ;;  %v1629_v18 = vcombine.high %v1621_v6, %v1621_v6  ;;  %v4655_v15 = vrot.slane %v1621_v6, %v4002_v25 }
 0x162   : > { %v1579_v14 = vrot.slane %v1565_v57, %v4002_v25  ;;  %v1580_v17 = vcombine.high %v1572_v26, %v1572_v26  ;;  %v4649_v49 = vrot.slane %v1572_v26, %v4002_v25  ;;  %v4658_v2 = vrot.slane %v1663_v34, %v4002_v25  ;;  %v4660_v21 = vpop.f32.mrb[49].mxu0  ;;  %v4662_v27 = vpop.f32.mrb[48].mxu1 }
 0x163   : > { %v3051_v4 = vcombine.low %v5475_v41, %v3043_v48  ;;  %5476 = vst [vmem:[#allocation5_spill] sm:$0xff] %v4662_v27  ;;  %v4671_v30 = vpop.f32.mrb[50].mxu0  ;;  %v3684_v32 = vpop.f32.mrb[49].mxu1  ;;  %v1630_v48 = vcombine.high %v1628_v43, %v1628_v43  ;;  %v4680_v57 = vrot.slane %v1628_v43, %v4002_v25 }
 0x164   : > { %v1581_v35 = vcombine.high %v1579_v14, %v1579_v14  ;;  %v4666_v53 = vrot.slane %v1579_v14, %v4002_v25  ;;  %v4669_v13 = vrot.slane %v1580_v17, %v4002_v25  ;;  %v4675_v10 = vcombine.high %v4649_v49, %v4649_v49  ;;  %v4682_v26 = vpop.f32.mrb[51].mxu0  ;;  %v4684_v38 = vpop.f32.mrb[50].mxu1  ;;  %v5478_v14 = vld [vmem:[#allocation13_spill] sm:$0xff] }
 0x165   : > { %v3058_v11 = vrot.slane %v3051_v4, %v4002_v25  ;;  %5477 = vst [vmem:[#allocation17_spill] sm:$0xff] %v4684_v38  ;;  %v3685_v4 = vpop.f32.mrb[51].mxu1  ;;  %v5481_v38 = vld [vmem:[#allocation12_spill] sm:$0xff]  ;;  %v4722_v20 = vrot.slane %v1630_v48, %v4002_v25 }
 0x166   : > { %v4688_v34 = vrot.slane %v1581_v35, %v4002_v25  ;;  %v4692_v61 = vcombine.high %v4666_v53, %v4666_v53  ;;  %v1612_v41 = vcombine.high %v4669_v13, %v4669_v13  ;;  %v2772_v43 = vmax.f32 %v4585_v28, %v4675_v10  ;;  %v3337_v4 = vld [vmem:[%s4348_s20 + $0x4] sm:$0xf] }
 0x167   : > { %v3066_v6 = vcombine.low %v3058_v11, %v4566_v7  ;;  %v5479_v7 = vmax.f32 %v4355_v56, %v4500_v19  ;;  %v4705_v35 = vrot.slane %v1629_v18, %v4002_v25  ;;  %v5482_v28 = vmax.f32 %v5480_v40, %v5481_v38 }
 0x168   : > { %v1613_v17 = vcombine.high %v4688_v34, %v4688_v34  ;;  %v2775_v56 = vmax.f32 %v4517_v24, %v4688_v34  ;;  %v2776_v18 = vmax.f32 %v4535_v45, %v4692_v61  ;;  %v4730_v40 = vcombine.high %v4680_v57, %v4680_v57 }
 0x169   : > { %v2774_v11 = vmax.f32 %v5479_v7, %v4666_v53  ;;  %v3318_v32 = vsel %vm3316_vm1, %v3066_v6, %v3288_v1  ;;  %v2773_v27 = vmax.f32 %v5482_v28, %v1612_v41  ;;  %v4726_v1 = vcombine.high %v4655_v15, %v4655_v15 }
 0x16a   : > { %v3325_v19 = vpack.c.bf16 %v3318_v32, %v3318_v32  ;;  %v5483_v24 = vmax.f32 %v4409_v37, %v4497_v9  ;;  %v4735_v32 = vpop.f32.mrb[52].mxu0  ;;  %v4741_v28 = vcombine.high %v4722_v20, %v4722_v20  ;;  %v4751_v37 = vpop.f32.mrb[52].mxu1 }
 0x16b   : > { %v2861_v6 = vmax.f32 %v2772_v43, %v2773_v27  ;;  %v2862_v7 = vmax.f32 %v2774_v11, %v2775_v56  ;;  %v5485_v27 = vmax.f32 %v4413_v0, %v4525_v60  ;;  %v2779_v56 = vmax.f32 %v4559_v12, %v4705_v35  ;;  %v4749_v46 = vpop.f32.mrb[53].mxu0  ;;  %5486 = vst [vmem:[#allocation13_spill] sm:$0xff] %v4751_v37  ;;  %v3688_v12 = vpop.f32.mrb[53].mxu1 }
 0x16c   : > { %v2777_v38 = vmax.f32 %v5483_v24, %v1613_v17  ;;  %v3338_v48 = vsel %vm4385_vm4, %v3325_v19, %v3337_v4  ;;  %v4756_v4 = vmax.f32 %v4571_v33, %v4726_v1  ;;  %v5487_v19 = vmax.f32 %v4431_v3, %v4528_v54  ;;  %v4764_v60 = vpop.f32.mrb[54].mxu0 }
 0x16d   : > { %v2778_v43 = vmax.f32 %v5485_v27, %v4655_v15  ;;  %3339 = vst [vmem:[%s4348_s20 + $0x4] sm:$0xf] %v3338_v48  ;;  %v2910_v9 = vmax.f32 %v2861_v6, %v2774_v11  ;;  %v2911_v24 = vmax.f32 %v2862_v7, %v2776_v18  ;;  %5488 = vst [vmem:[#allocation3_spill] sm:$0xff] %v4764_v60  ;;  %v4772_v33 = vpop.f32.mrb[55].mxu0  ;;  %v4774_v48 = vpop.f32.mrb[54].mxu1 }
 0x16e   : > { %v4762_v0 = vmax.f32 %v5487_v19, %v4680_v57  ;;  %v2783_v27 = vmax.f32 %v4574_v8, %v4722_v20  ;;  %v4770_v11 = vmax.f32 %v4576_v5, %v4730_v40  ;;  %v2863_v6 = vmax.f32 %v2776_v18, %v2777_v38  ;;  %5489 = vst [vmem:[#allocation12_spill] sm:$0xff] %v4772_v33  ;;  %v3689_v19 = vpop.f32.mrb[55].mxu1 }
 0x16f   : > { %v2864_v7 = vmax.f32 %v2778_v43, %v2779_v56  ;;  %5490 = vst [vmem:[#allocation4_spill] sm:$0xff] %v4774_v48  ;;  %v3067_v37 = vcombine.low %v2910_v9, %v2911_v24  ;;  %v1678_v3 = vcombine.high %v4642_v39, %v4642_v39  ;;  %v1679_v54 = vcombine.high %v4658_v2, %v4658_v2 }
 0x170   : > { %v4782_v8 = vrot.slane %v4642_v39, %v4002_v25  ;;  %v4785_v5 = vmax.f32 %v4762_v0, %v2783_v27  ;;  %v2912_v18 = vmax.f32 %v2863_v6, %v2778_v43  ;;  %v4790_v56 = vrot.slane %v4658_v2, %v4002_v25 }
 0x171   : > { %v2913_v38 = vmax.f32 %v2864_v7, %v4756_v4  ;;  %v3076_v9 = vrot.slane %v3067_v37, %v4002_v25  ;;  %v4794_v24 = vrot.slane %v1678_v3, %v4002_v25  ;;  %v4797_v12 = vrot.slane %v1679_v54, %v4002_v25  ;;  %v4815_v19 = vpop.f32.mrb[56].mxu0 }
 0x172   : > { %v1708_v39 = vcombine.high %v4782_v8, %v4782_v8  ;;  %v2915_v43 = vmax.f32 %v4785_v5, %v4770_v11  ;;  %v1709_v6 = vcombine.high %v4790_v56, %v4790_v56  ;;  %v5491_v2 = vmax.f32 %v4488_v52, %v4649_v49  ;;  %v4826_v33 = vpop.f32.mrb[57].mxu0  ;;  %v4828_v60 = vpop.f32.mrb[56].mxu1 }
 0x173   : > { %v3068_v27 = vcombine.low %v2912_v18, %v2913_v38  ;;  %v1710_v37 = vcombine.high %v4794_v24, %v4794_v24  ;;  %v1711_v7 = vcombine.high %v4797_v12, %v4797_v12  ;;  %v2682_v3 = vmax.f32 %v4675_v10, %v4794_v24  ;;  %5492 = vst [vmem:[#allocation18_spill] sm:$0xff] %v4826_v33 }
 0x174   : > { %v4813_v54 = vmax.f32 %v1612_v41, %v1708_v39  ;;  %v4820_v38 = vmax.f32 %v1613_v17, %v1709_v6  ;;  %v2785_v48 = vmax.f32 %v5491_v2, %v4741_v28  ;;  %5493 = vst [vmem:[#allocation19_spill] sm:$0xff] %v4828_v60  ;;  %v5494_v24 = vmax.f32 %v5478_v14, %v4669_v13  ;;  %v3692_v6 = vpop.f32.mrb[57].mxu1 }
 0x175   : > { %v3083_v5 = vrot.slane %v3068_v27, %v4002_v25  ;;  %v2684_v10 = vmax.f32 %v4666_v53, %v1710_v37  ;;  %v2688_v41 = vmax.f32 %v4655_v15, %v1711_v7  ;;  %v1661_v17 = vcombine.high %v4705_v35, %v4705_v35  ;;  %v3592_v27 = vpop.f32.mrb[58].mxu0  ;;  %v965_v37 = vpop.f32.mrb[58].mxu1 }
 0x176   : > { %v2786_v39 = vmax.f32 %v5494_v24, %v4782_v8  ;;  %v2867_v49 = vmax.f32 %v4770_v11, %v2785_v48  ;;  %v1712_v2 = vcombine.high %v4632_v29, %v4632_v29  ;;  %v1719_v53 = vrot.slane %v4632_v29, %v4002_v25  ;;  %v3593_v15 = vpop.f32.mrb[59].mxu0  ;;  %v3693_v48 = vpop.f32.mrb[59].mxu1 }
 0x177   : > { %v3091_v52 = vcombine.low %v3076_v9, %v3083_v5  ;;  %v5495_v13 = vmax.f32 %v4427_v31, %v4520_v36  ;;  %v1761_v7 = vcombine.high %v4634_v22, %v4634_v22  ;;  %v1768_v9 = vrot.slane %v4634_v22, %v4002_v25 }
 0x178   : > { %v1810_v11 = vcombine.high %v4638_v50, %v4638_v50  ;;  %v2916_v24 = vmax.f32 %v2867_v49, %v2786_v39  ;;  %v1726_v29 = vrot.slane %v1712_v2, %v4002_v25  ;;  %v1727_v27 = vcombine.high %v1719_v53, %v1719_v53 }
 0x179   : > { %v2781_v14 = vmax.f32 %v5495_v13, %v1661_v17  ;;  %v3098_v5 = vrot.slane %v3091_v52, %v4002_v25  ;;  %v1735_v6 = vrot.slane %v1719_v53, %v4002_v25  ;;  %v1775_v36 = vrot.slane %v1761_v7, %v4002_v25 }
 0x17a   : > { %v1776_v15 = vcombine.high %v1768_v9, %v1768_v9  ;;  %v3292_v37 = vrot.slane %v2916_v24, %v4026_v58  ;;  %v1728_v22 = vcombine.high %v1726_v29, %v1726_v29  ;;  %v4859_v13 = vrot.slane %v1726_v29, %v4002_v25 }
 0x17b   : > { %v2865_v31 = vmax.f32 %v4756_v4, %v2781_v14  ;;  %v1749_v48 = vrot.slane %v1727_v27, %v4002_v25  ;;  %v1757_v52 = vcombine.high %v1735_v6, %v1735_v6  ;;  %v2689_v39 = vmax.f32 %v4705_v35, %v1735_v6 }
 0x17c   : > { %v1777_v2 = vcombine.high %v1775_v36, %v1775_v36  ;;  %v1756_v53 = vrot.slane %v1728_v22, %v4002_v25  ;;  %v1758_v4 = vcombine.high %v4859_v13, %v4859_v13  ;;  %v1784_v27 = vrot.slane %v1768_v9, %v4002_v25 }
 0x17d   : > { %v2914_v49 = vmax.f32 %v2865_v31, %v4762_v0  ;;  %v1759_v14 = vcombine.high %v1749_v48, %v1749_v48  ;;  %v2690_v7 = vmax.f32 %v4726_v1, %v1749_v48  ;;  %v2691_v24 = vmax.f32 %v1661_v17, %v1757_v52 }
 0x17e   : > { %v1760_v60 = vcombine.high %v1756_v53, %v1756_v53  ;;  %v2694_v0 = vmax.f32 %v4730_v40, %v1756_v53  ;;  %v2695_v6 = vmax.f32 %v4741_v28, %v1758_v4  ;;  %v4876_v22 = vrot.slane %v1775_v36, %v4002_v25 }
 0x17f   : > { %v3069_v18 = vcombine.low %v2914_v49, %v2915_v43  ;;  %v2692_v35 = vmax.f32 %v4680_v57, %v1759_v14  ;;  %v4879_v1 = vrot.slane %v1776_v15, %v4002_v25  ;;  %v4882_v17 = vrot.slane %v1777_v2, %v4002_v25 }
 0x180   : > { %v2696_v43 = vmax.f32 %v4782_v8, %v1760_v60  ;;  %v4885_v9 = vcombine.high %v1784_v27, %v1784_v27  ;;  %v2787_v57 = vmax.f32 %v2682_v3, %v1784_v27  ;;  %v1817_v40 = vrot.slane %v4638_v50, %v4002_v25 }
 0x181   : > { %v3090_v31 = vrot.slane %v3069_v18, %v4002_v25  ;;  %v4892_v18 = vcombine.high %v4876_v22, %v4876_v22  ;;  %v4896_v36 = vcombine.high %v4882_v17, %v4882_v17  ;;  %v2788_v60 = vmax.f32 %v4813_v54, %v4879_v1 }
 0x182   : > { %v4901_v8 = vmax.f32 %v2684_v10, %v4885_v9  ;;  %v5496_v50 = vmax.f32 %v4692_v61, %v4797_v12  ;;  %v2792_v15 = vmax.f32 %v4820_v38, %v4882_v17  ;;  %v1824_v48 = vrot.slane %v1810_v11, %v4002_v25  ;;  %v3340_v38 = vld [vmem:[%s4348_s20 + $0x8] sm:$0xf] }
 0x183   : > { %v3105_v28 = vrot.slane %v3090_v31, %v4002_v25  ;;  %v2793_v49 = vmax.f32 %v2688_v41, %v4892_v18  ;;  %v4913_v2 = vmax.f32 %v2787_v57, %v2788_v60  ;;  %v1825_v54 = vcombine.high %v1817_v40, %v1817_v40 }
 0x184   : > { %v4907_v3 = vmax.f32 %v5496_v50, %v4876_v22  ;;  %v1826_v53 = vcombine.high %v1824_v48, %v1824_v48  ;;  %v4917_v4 = vrot.slane %v1817_v40, %v4002_v25  ;;  %v4920_v61 = vrot.slane %v1824_v48, %v4002_v25 }
 0x185   : > { %v3106_v52 = vcombine.low %v3098_v5, %v3105_v28  ;;  %v2917_v11 = vmax.f32 %v4913_v2, %v4901_v8  ;;  %v4927_v41 = vrot.slane %v1825_v54, %v4002_v25  ;;  %v2794_v5 = vmax.f32 %v2689_v39, %v4896_v36 }
 0x186   : > { %v2870_v10 = vmax.f32 %v4907_v3, %v2792_v15  ;;  %v4931_v31 = vrot.slane %v1826_v53, %v4002_v25  ;;  %v4935_v57 = vcombine.high %v4917_v4, %v4917_v4  ;;  %v2795_v40 = vmax.f32 %v2690_v7, %v4917_v4 }
 0x187   : > { %v3319_v12 = vsel %vm3316_vm1, %v3106_v52, %v3292_v37  ;;  %v4939_v37 = vcombine.high %v4920_v61, %v4920_v61  ;;  %v2796_v28 = vmax.f32 %v2691_v24, %v4927_v41  ;;  %v2799_v60 = vmax.f32 %v2694_v0, %v4920_v61 }
 0x188   : > { %v3326_v14 = vpack.c.bf16 %v3319_v12, %v3319_v12  ;;  %v2871_v50 = vmax.f32 %v2793_v49, %v2794_v5  ;;  %v1858_v15 = vcombine.high %v4931_v31, %v4931_v31  ;;  %v2797_v48 = vmax.f32 %v2692_v35, %v4935_v57  ;;  %v5498_v5 = vld [vmem:[#allocation7_spill] sm:$0xff] }
 0x189   : > { %v2800_v52 = vmax.f32 %v2695_v6, %v4931_v31  ;;  %v2801_v2 = vmax.f32 %v2696_v43, %v4939_v37  ;;  %v2872_v54 = vmax.f32 %v2795_v40, %v2796_v28  ;;  %v2919_v7 = vmax.f32 %v2870_v10, %v2793_v49 }
 0x18a   : > { %v3341_v39 = vsel %vm4385_vm4, %v3326_v14, %v3340_v38  ;;  %v2920_v53 = vmax.f32 %v2871_v50, %v2795_v40  ;;  %v985_v0 = vmax.f32 %v4630_v16, 0.0  ;;  %v1808_v12 = vcombine.high %v4879_v1, %v4879_v1  ;;  %v5497_v38 = vld [vmem:[#allocation6_spill] sm:$0xff] }
 0x18b   : > { %3342 = vst [vmem:[%s4348_s20 + $0x8] sm:$0xf] %v3341_v39  ;;  %v2874_v24 = vmax.f32 %v2799_v60, %v2800_v52  ;;  %v3561_v14 = vadd.f32 %v5498_v5, %v5497_v38  ;;  %v2921_v29 = vmax.f32 %v2872_v54, %v2797_v48  ;;  %v4959_v35 = vcombine.high %v4927_v41, %v4927_v41  ;;  %v4973_v50 = vld [vmem:[%s5441_s2] ss:$0 sm:$0xff]  ;;  %v5501_v52 = vld [vmem:[#allocation9_spill] sm:$0xff] }
 0x18c   : > { %v3108_v33 = vcombine.low %v2919_v7, %v2920_v53  ;;  %v4961_v6 = vmax.f32 %v1784_v27, %v1858_v15  ;;  %v1859_v49 = vcombine.high %v985_v0, %v985_v0  ;;  %v1866_v10 = vrot.slane %v985_v0, %v4002_v25 }
 0x18d   : > { %v4963_v43 = vmax.f32 %v2874_v24, %v2801_v2  ;;  %v5499_v16 = vmax.f32 %v4688_v34, %v4790_v56  ;;  %v771_v39 = vadd.f32 %v4973_v50, %v3561_v14  ;;  %v5500_v27 = vmax.f32 %v4722_v20, %v4859_v13  ;;  %v5502_v2 = vld [vmem:[#allocation10_spill] sm:$0xff]  ;;  %v5503_v24 = vld [vmem:[#allocation8_spill] sm:$0xff] }
 0x18e   : > { %v3123_v28 = vrot.slane %v3108_v33, %v4002_v25  ;;  %v3564_v54 = vadd.f32 %v5502_v2, %v5501_v52  ;;  %v1873_v33 = vrot.slane %v1859_v49, %v4002_v25  ;;  %v1874_v56 = vcombine.high %v1866_v10, %v1866_v10 }
 0x18f   : > { %v2790_v40 = vmax.f32 %v5499_v16, %v1808_v12  ;;  %v2798_v15 = vmax.f32 %v5500_v27, %v4959_v35  ;;  %v3296_v34 = vrot.slane %v4963_v43, %v4026_v58  ;;  %v1882_v7 = vrot.slane %v1866_v10, %v4002_v25 }
 0x190   : > { %v923_v0 = vadd.f32 %v5503_v24, %v771_v39  ;;  %v774_v5 = vadd.f32 %v4973_v50, %v3564_v54  ;;  %v1875_v20 = vcombine.high %v1873_v33, %v1873_v33  ;;  %v4990_v13 = vrot.slane %v1873_v33, %v4002_v25  ;;  %v5504_v24 = vld [vmem:[#allocation11_spill] sm:$0xff] }
 0x191   : > { %v2869_v53 = vmax.f32 %v4901_v8, %v2790_v40  ;;  %v2873_v38 = vmax.f32 %v2797_v48, %v2798_v15  ;;  %v4993_v14 = vrot.slane %v1874_v56, %v4002_v25  ;;  %v1904_v16 = vcombine.high %v1882_v7, %v1882_v7 }
 0x192   : > { %v2698_v49 = vmax.f32 %v4879_v1, %v1882_v7  ;;  %v986_v10 = vmax.f32 %v923_v0, 0.0  ;;  %v4998_v8 = vrot.slane %v1875_v20, %v4002_v25  ;;  %v1905_v48 = vcombine.high %v4990_v13, %v4990_v13 }
 0x193   : > { %v2918_v27 = vmax.f32 %v2869_v53, %v4907_v3  ;;  %v2922_v52 = vmax.f32 %v2873_v38, %v2799_v60  ;;  %v1906_v40 = vcombine.high %v4993_v14, %v4993_v14  ;;  %v2699_v39 = vmax.f32 %v4885_v9, %v4993_v14  ;;  %v5505_v38 = vld [vmem:[#allocation15_spill] sm:$0xff] }
 0x194   : > { %v5006_v15 = vmax.f32 %v1808_v12, %v1904_v16  ;;  %v2702_v1 = vmax.f32 %v4882_v17, %v4990_v13  ;;  %v1908_v2 = vcombine.high %v986_v10, %v986_v10  ;;  %v1907_v60 = vcombine.high %v4998_v8, %v4998_v8 }
 0x195   : > { %v3107_v3 = vcombine.low %v2917_v11, %v2918_v27  ;;  %v2701_v54 = vmax.f32 %v4876_v22, %v1906_v40  ;;  %v2703_v33 = vmax.f32 %v4892_v18, %v4998_v8  ;;  %v5016_v56 = vmax.f32 %v4896_v36, %v1905_v48 }
 0x196   : > { %v1915_v12 = vrot.slane %v986_v10, %v4002_v25  ;;  %v1922_v7 = vrot.slane %v1908_v2, %v4002_v25  ;;  %v3109_v53 = vcombine.low %v2921_v29, %v2922_v52  ;;  %v2705_v11 = vmax.f32 %v4917_v4, %v1907_v60 }
 0x197   : > { %v3116_v9 = vrot.slane %v3107_v3, %v4002_v25  ;;  %v926_v0 = vadd.f32 %v5504_v24, %v774_v5  ;;  %v3567_v22 = vadd.f32 %v4530_v51, %v4522_v59  ;;  %v3570_v18 = vadd.f32 %v5505_v38, %v4543_v42 }
 0x198   : > { %v1923_v36 = vcombine.high %v1915_v12, %v1915_v12  ;;  %v1924_v14 = vcombine.high %v1922_v7, %v1922_v7  ;;  %v5028_v16 = vrot.slane %v1915_v12, %v4002_v25  ;;  %v5031_v27 = vrot.slane %v1922_v7, %v4002_v25 }
 0x199   : > { %v3131_v20 = vcombine.low %v3116_v9, %v3123_v28  ;;  %v3130_v29 = vrot.slane %v3109_v53, %v4002_v25  ;;  %v987_v4 = vmax.f32 %v926_v0, 0.0  ;;  %v779_v5 = vadd.f32 %v4973_v50, %v3567_v22  ;;  %v5506_v22 = vld [vmem:[#allocation14_spill] sm:$0xff] }
 0x19a   : > { %v1945_v51 = vrot.slane %v1923_v36, %v4002_v25  ;;  %v5038_v59 = vrot.slane %v1924_v14, %v4002_v25  ;;  %v1953_v42 = vcombine.high %v5028_v16, %v5028_v16  ;;  %v5044_v28 = vcombine.high %v5031_v27, %v5031_v27 }
 0x19b   : > { %v3138_v10 = vrot.slane %v3131_v20, %v4002_v25  ;;  %v2706_v52 = vmax.f32 %v4927_v41, %v5028_v16  ;;  %v2710_v8 = vmax.f32 %v4931_v31, %v5031_v27  ;;  %v3145_v48 = vrot.slane %v3130_v29, %v4002_v25 }
 0x19c   : > { %v1955_v40 = vcombine.high %v1945_v51, %v1945_v51  ;;  %v5053_v3 = vcombine.high %v5038_v59, %v5038_v59  ;;  %v2707_v2 = vmax.f32 %v4935_v57, %v1945_v51  ;;  %v5057_v60 = vmax.f32 %v4959_v35, %v1953_v42  ;;  %v3343_v35 = vld [vmem:[%s4348_s20 + $0xc] sm:$0xf] }
 0x19d   : > { %v2711_v9 = vmax.f32 %v4939_v37, %v5038_v59  ;;  %v2802_v41 = vmax.f32 %v4961_v6, %v5044_v28  ;;  %v3146_v12 = vcombine.low %v3138_v10, %v3145_v48  ;;  %v1957_v7 = vcombine.high %v987_v4, %v987_v4 }
 0x19e   : > { %v2709_v53 = vmax.f32 %v4920_v61, %v1955_v40  ;;  %v2803_v24 = vmax.f32 %v2698_v49, %v5053_v3  ;;  %v1964_v0 = vrot.slane %v987_v4, %v4002_v25  ;;  %v931_v38 = vadd.f32 %v5506_v22, %v779_v5 }
 0x19f   : > { %v3320_v57 = vsel %vm3316_vm1, %v3146_v12, %v3296_v34  ;;  %v1971_v37 = vrot.slane %v1957_v7, %v4002_v25  ;;  %v782_v6 = vadd.f32 %v4973_v50, %v3570_v18  ;;  %v3573_v61 = vadd.f32 %v4607_v62, %v4601_v23  ;;  %v5507_v34 = vld [vmem:[#allocation16_spill] sm:$0xff] }
 0x1a0   : > { %v2875_v20 = vmax.f32 %v2802_v41, %v2803_v24  ;;  %v3327_v49 = vpack.c.bf16 %v3320_v57, %v3320_v57  ;;  %v1972_v36 = vcombine.high %v1964_v0, %v1964_v0  ;;  %v1980_v14 = vrot.slane %v1964_v0, %v4002_v25 }
 0x1a1   : > { %v1973_v16 = vcombine.high %v1971_v37, %v1971_v37  ;;  %v5078_v29 = vrot.slane %v1971_v37, %v4002_v25  ;;  %v988_v43 = vmax.f32 %v931_v38, 0.0  ;;  %v934_v4 = vadd.f32 %v5507_v34, %v782_v6 }
 0x1a2   : > { %v3344_v5 = vsel %vm4385_vm4, %v3327_v49, %v3343_v35  ;;  %v5084_v18 = vrot.slane %v1972_v36, %v4002_v25  ;;  %v5086_v10 = vcombine.high %v1980_v14, %v1980_v14  ;;  %v2804_v23 = vmax.f32 %v2699_v39, %v1980_v14 }
 0x1a3   : > { %3345 = vst [vmem:[%s4348_s20 + $0xc] sm:$0xf] %v3344_v5  ;;  %v5090_v62 = vrot.slane %v1973_v16, %v4002_v25  ;;  %v5094_v51 = vcombine.high %v5078_v29, %v5078_v29  ;;  %v2808_v59 = vmax.f32 %v2703_v33, %v5078_v29  ;;  %v2006_v42 = vcombine.high %v988_v43, %v988_v43 }
 0x1a4   : > { %v2805_v48 = vmax.f32 %v5006_v15, %v5084_v18  ;;  %v2806_v40 = vmax.f32 %v2701_v54, %v5086_v10  ;;  %v2924_v41 = vmax.f32 %v2875_v20, %v2804_v23  ;;  %v2013_v12 = vrot.slane %v988_v43, %v4002_v25 }
 0x1a5   : > { %v5103_v39 = vcombine.high %v5090_v62, %v5090_v62  ;;  %v2809_v7 = vmax.f32 %v5016_v56, %v5090_v62  ;;  %v2810_v24 = vmax.f32 %v2705_v11, %v5094_v51  ;;  %v2020_v33 = vrot.slane %v2006_v42, %v4002_v25 }
 0x1a6   : > { %v2876_v0 = vmax.f32 %v2804_v23, %v2805_v48  ;;  %v2021_v22 = vcombine.high %v2013_v12, %v2013_v12  ;;  %v2029_v15 = vrot.slane %v2013_v12, %v4002_v25  ;;  %v989_v38 = vmax.f32 %v934_v4, 0.0 }
 0x1a7   : > { %v2878_v54 = vmax.f32 %v2808_v59, %v2809_v7  ;;  %v2022_v57 = vcombine.high %v2020_v33, %v2020_v33  ;;  %v5111_v35 = vrot.slane %v2020_v33, %v4002_v25  ;;  %v2811_v37 = vmax.f32 %v2706_v52, %v5103_v39 }
 0x1a8   : > { %v2925_v6 = vmax.f32 %v2876_v0, %v2806_v40  ;;  %v5115_v20 = vrot.slane %v2021_v22, %v4002_v25  ;;  %v5117_v56 = vcombine.high %v2029_v15, %v2029_v15  ;;  %v2812_v11 = vmax.f32 %v2707_v2, %v2029_v15 }
 0x1a9   : > { %v2927_v49 = vmax.f32 %v2878_v54, %v2810_v24  ;;  %v5120_v36 = vrot.slane %v2022_v57, %v4002_v25  ;;  %v2052_v16 = vcombine.high %v5111_v35, %v5111_v35  ;;  %v2816_v43 = vmax.f32 %v2711_v9, %v5111_v35 }
 0x1aa   : > { %v3147_v34 = vcombine.low %v2924_v41, %v2925_v6  ;;  %v2813_v52 = vmax.f32 %v5057_v60, %v5115_v20  ;;  %v2814_v4 = vmax.f32 %v2709_v53, %v5117_v56  ;;  %v2879_v5 = vmax.f32 %v2810_v24, %v2811_v37 }
 0x1ab   : > { %v2054_v23 = vcombine.high %v5120_v36, %v5120_v36  ;;  %v2712_v2 = vmax.f32 %v5044_v28, %v5120_v36  ;;  %v5133_v42 = vmax.f32 %v5053_v3, %v2052_v16  ;;  %v2004_v48 = vcombine.high %v5084_v18, %v5084_v18 }
 0x1ac   : > { %v3156_v9 = vrot.slane %v3147_v34, %v4002_v25  ;;  %v2880_v41 = vmax.f32 %v2812_v11, %v2813_v52  ;;  %v2928_v12 = vmax.f32 %v2879_v5, %v2812_v11  ;;  %v2055_v60 = vcombine.high %v989_v38, %v989_v38 }
 0x1ad   : > { %v5138_v7 = vmax.f32 %v1980_v14, %v2054_v23  ;;  %v2062_v53 = vrot.slane %v989_v38, %v4002_v25  ;;  %v2807_v24 = vmax.f32 %v2702_v1, %v2004_v48  ;;  %v787_v33 = vadd.f32 %v4973_v50, %v3573_v61 }
 0x1ae   : > { %v2929_v3 = vmax.f32 %v2880_v41, %v2814_v4  ;;  %v2069_v0 = vrot.slane %v2055_v60, %v4002_v25  ;;  %v2053_v22 = vcombine.high %v5115_v20, %v5115_v20  ;;  %v3576_v54 = vadd.f32 %v4621_v63, %v4615_v47 }
 0x1af   : > { %v2070_v57 = vcombine.high %v2062_v53, %v2062_v53  ;;  %v5151_v14 = vrot.slane %v2062_v53, %v4002_v25  ;;  %v2877_v38 = vmax.f32 %v2806_v40, %v2807_v24  ;;  %v939_v37 = vadd.f32 %v4609_v55, %v787_v33 }
 0x1b0   : > { %v3149_v17 = vcombine.low %v2928_v12, %v2929_v3  ;;  %v2071_v13 = vcombine.high %v2069_v0, %v2069_v0  ;;  %v5155_v1 = vrot.slane %v2069_v0, %v4002_v25  ;;  %v2815_v61 = vmax.f32 %v2710_v8, %v2053_v22 }
 0x1b1   : > { %v5161_v6 = vrot.slane %v2070_v57, %v4002_v25  ;;  %v2100_v47 = vcombine.high %v5151_v14, %v5151_v14  ;;  %v2715_v63 = vmax.f32 %v5084_v18, %v5151_v14  ;;  %v2926_v40 = vmax.f32 %v2877_v38, %v2808_v59 }
 0x1b2   : > { %v3170_v55 = vrot.slane %v3149_v17, %v4002_v25  ;;  %v5169_v11 = vrot.slane %v2071_v13, %v4002_v25  ;;  %v2101_v16 = vcombine.high %v5155_v1, %v5155_v1  ;;  %v2719_v31 = vmax.f32 %v5090_v62, %v5155_v1  ;;  %v5510_v13 = vld [vmem:[#allocation17_spill] sm:$0xff] }
 0x1b3   : > { %v2102_v27 = vcombine.high %v5161_v6, %v5161_v6  ;;  %v2716_v8 = vmax.f32 %v5086_v10, %v5161_v6  ;;  %v5179_v34 = vmax.f32 %v2004_v48, %v2100_v47  ;;  %v3148_v59 = vcombine.low %v2926_v40, %v2927_v49 }
 0x1b4   : > { %v3185_v52 = vrot.slane %v3170_v55, %v4002_v25  ;;  %v2103_v5 = vcombine.high %v5169_v11, %v5169_v11  ;;  %v2720_v23 = vmax.f32 %v5094_v51, %v5169_v11  ;;  %v5187_v41 = vmax.f32 %v5103_v39, %v2101_v16 }
 0x1b5   : > { %v5190_v12 = vmax.f32 %v5078_v29, %v2102_v27  ;;  %v3163_v60 = vrot.slane %v3148_v59, %v4002_v25  ;;  %v990_v53 = vmax.f32 %v939_v37, 0.0  ;;  %v2881_v48 = vmax.f32 %v2814_v4, %v2815_v61  ;;  %v5508_v29 = vld [vmem:[#allocation2_spill] sm:$0xff] }
 0x1b6   : > { %v2722_v24 = vmax.f32 %v2029_v15, %v2103_v5  ;;  %v790_v49 = vadd.f32 %v4973_v50, %v3576_v54  ;;  %v3579_v33 = vadd.f32 %v4660_v21, %v4651_v44  ;;  %v3582_v3 = vadd.f32 %v4682_v26, %v4671_v30  ;;  %v5509_v54 = vld [vmem:[#allocation5_spill] sm:$0xff] }
 0x1b7   : > { %v3171_v51 = vcombine.low %v3156_v9, %v3163_v60  ;;  %v2104_v0 = vcombine.high %v990_v53, %v990_v53  ;;  %v2111_v39 = vrot.slane %v990_v53, %v4002_v25  ;;  %v2930_v57 = vmax.f32 %v2881_v48, %v2816_v43 }
 0x1b8   : > { %v942_v38 = vadd.f32 %v5508_v29, %v790_v49  ;;  %v795_v17 = vadd.f32 %v4973_v50, %v3579_v33  ;;  %v798_v4 = vadd.f32 %v4973_v50, %v3582_v3  ;;  %v5204_v15 = vadd.f32 %v4749_v46, %v4735_v32 }
 0x1b9   : > { %v3178_v44 = vrot.slane %v3171_v51, %v4002_v25  ;;  %v2118_v21 = vrot.slane %v2104_v0, %v4002_v25  ;;  %v2119_v30 = vcombine.high %v2111_v39, %v2111_v39  ;;  %v2127_v26 = vrot.slane %v2111_v39, %v4002_v25  ;;  %v3346_v51 = vld [vmem:[%s4348_s20 + $0x10] sm:$0xf] }
 0x1ba   : > { %v3300_v9 = vrot.slane %v2930_v57, %v4026_v58  ;;  %v991_v43 = vmax.f32 %v942_v38, 0.0  ;;  %v947_v37 = vadd.f32 %v5509_v54, %v795_v17  ;;  %v950_v61 = vadd.f32 %v5510_v13, %v798_v4 }
 0x1bb   : > { %v3186_v47 = vcombine.low %v3178_v44, %v3185_v52  ;;  %v2120_v40 = vcombine.high %v2118_v21, %v2118_v21  ;;  %v5213_v55 = vrot.slane %v2118_v21, %v4002_v25  ;;  %v2141_v46 = vrot.slane %v2119_v30, %v4002_v25 }
 0x1bc   : > { %v2149_v32 = vcombine.high %v2127_v26, %v2127_v26  ;;  %v2723_v11 = vmax.f32 %v5115_v20, %v2127_v26  ;;  %v2153_v16 = vcombine.high %v991_v43, %v991_v43  ;;  %v2160_v27 = vrot.slane %v991_v43, %v4002_v25 }
 0x1bd   : > { %v5219_v59 = vrot.slane %v2120_v40, %v4002_v25  ;;  %v5223_v5 = vcombine.high %v5213_v55, %v5213_v55  ;;  %v2151_v52 = vcombine.high %v2141_v46, %v2141_v46  ;;  %v2724_v60 = vmax.f32 %v5117_v56, %v2141_v46 }
 0x1be   : > { %v5226_v53 = vmax.f32 %v2053_v22, %v2149_v32  ;;  %v2817_v20 = vmax.f32 %v2712_v2, %v5213_v55  ;;  %v3321_v48 = vsel %vm3316_vm1, %v3186_v47, %v3300_v9  ;;  %v2167_v49 = vrot.slane %v2153_v16, %v4002_v25 }
 0x1bf   : > { %v2152_v33 = vcombine.high %v5219_v59, %v5219_v59  ;;  %v5237_v3 = vmax.f32 %v5111_v35, %v2151_v52  ;;  %v2818_v56 = vmax.f32 %v5133_v42, %v5219_v59  ;;  %v2819_v22 = vmax.f32 %v5138_v7, %v5223_v5 }
 0x1c0   : > { %v3328_v28 = vpack.c.bf16 %v3321_v48, %v3321_v48  ;;  %v2168_v36 = vcombine.high %v2160_v27, %v2160_v27  ;;  %v2169_v2 = vcombine.high %v2167_v49, %v2167_v49  ;;  %v5245_v0 = vrot.slane %v2160_v27, %v4002_v25 }
 0x1c1   : > { %v2882_v39 = vmax.f32 %v2817_v20, %v2818_v56  ;;  %v5248_v57 = vrot.slane %v2167_v49, %v4002_v25  ;;  %v2820_v35 = vmax.f32 %v2715_v63, %v2152_v33  ;;  %v992_v29 = vmax.f32 %v947_v37, 0.0 }
 0x1c2   : > { %v3347_v42 = vsel %vm4385_vm4, %v3328_v28, %v3346_v51  ;;  %v5256_v7 = vrot.slane %v2168_v36, %v4002_v25  ;;  %v5259_v38 = vrot.slane %v2169_v2, %v4002_v25  ;;  %v5263_v17 = vcombine.high %v5245_v0, %v5245_v0 }
 0x1c3   : > { %3348 = vst [vmem:[%s4348_s20 + $0x10] sm:$0xf] %v3347_v42  ;;  %v5268_v4 = vcombine.high %v5248_v57, %v5248_v57  ;;  %v2821_v18 = vmax.f32 %v2716_v8, %v5245_v0  ;;  %v5275_v14 = vmax.f32 %v2720_v23, %v5248_v57  ;;  %v2883_v63 = vmax.f32 %v2819_v22, %v2820_v35 }
 0x1c4   : > { %v2201_v44 = vcombine.high %v5259_v38, %v5259_v38  ;;  %v2822_v21 = vmax.f32 %v5179_v34, %v5256_v7  ;;  %v5283_v30 = vmax.f32 %v5190_v12, %v5263_v17  ;;  %v2826_v26 = vmax.f32 %v5187_v41, %v5259_v38 }
 0x1c5   : > { %v2827_v10 = vmax.f32 %v2722_v24, %v5268_v4  ;;  %v2931_v6 = vmax.f32 %v2882_v39, %v2819_v22  ;;  %v2932_v8 = vmax.f32 %v2883_v63, %v2821_v18  ;;  %v2202_v23 = vcombine.high %v992_v29, %v992_v29 }
 0x1c6   : > { %v5288_v9 = vmax.f32 %v2821_v18, %v2822_v21  ;;  %v2886_v43 = vmax.f32 %v5275_v14, %v2826_v26  ;;  %v2209_v54 = vrot.slane %v992_v29, %v4002_v25  ;;  %v2828_v37 = vmax.f32 %v2723_v11, %v2201_v44 }
 0x1c7   : > { %v5292_v34 = vcombine.low %v2931_v6, %v2932_v8  ;;  %v2216_v12 = vrot.slane %v2202_v23, %v4002_v25  ;;  %v993_v13 = vmax.f32 %v950_v61, 0.0  ;;  %v2200_v11 = vcombine.high %v5256_v7, %v5256_v7 }
 0x1c8   : > { %v2933_v41 = vmax.f32 %v5288_v9, %v5283_v30  ;;  %v2217_v47 = vcombine.high %v2209_v54, %v2209_v54  ;;  %v2225_v24 = vrot.slane %v2209_v54, %v4002_v25  ;;  %v2887_v40 = vmax.f32 %v2827_v10, %v2828_v37 }
 0x1c9   : > { %v2218_v46 = vcombine.high %v2216_v12, %v2216_v12  ;;  %v5299_v32 = vrot.slane %v2216_v12, %v4002_v25  ;;  %v2935_v16 = vmax.f32 %v2886_v43, %v2827_v10  ;;  %v2251_v20 = vcombine.high %v993_v13, %v993_v13 }
 0x1ca   : > { %v5304_v27 = vrot.slane %v2217_v47, %v4002_v25  ;;  %v5306_v52 = vcombine.high %v2225_v24, %v2225_v24  ;;  %v2829_v61 = vmax.f32 %v2724_v60, %v2225_v24  ;;  %v2258_v56 = vrot.slane %v993_v13, %v4002_v25  ;;  %v5511_v13 = vld [vmem:[#allocation13_spill] sm:$0xff] }
 0x1cb   : > { %v2248_v48 = vcombine.high %v5299_v32, %v5299_v32  ;;  %v2728_v49 = vmax.f32 %v5219_v59, %v5299_v32  ;;  %v5314_v22 = vrot.slane %v2218_v46, %v4002_v25  ;;  %v2265_v39 = vrot.slane %v2251_v20, %v4002_v25 }
 0x1cc   : > { %v2830_v51 = vmax.f32 %v5226_v53, %v5304_v27  ;;  %v2831_v28 = vmax.f32 %v5237_v3, %v5306_v52  ;;  %v2936_v36 = vmax.f32 %v2887_v40, %v2829_v61  ;;  %v2249_v60 = vcombine.high %v5304_v27, %v5304_v27 }
 0x1cd   : > { %v5322_v2 = vmax.f32 %v2152_v33, %v2248_v48  ;;  %v2266_v35 = vcombine.high %v2258_v56, %v2258_v56  ;;  %v5326_v18 = vrot.slane %v2258_v56, %v4002_v25  ;;  %v2824_v53 = vmax.f32 %v2719_v31, %v2200_v11 }
 0x1ce   : > { %v2888_v29 = vmax.f32 %v2829_v61, %v2830_v51  ;;  %v3189_v42 = vcombine.low %v2935_v16, %v2936_v36  ;;  %v2267_v63 = vcombine.high %v2265_v39, %v2265_v39  ;;  %v5332_v3 = vrot.slane %v2265_v39, %v4002_v25  ;;  %v5513_v61 = vld [vmem:[#allocation12_spill] sm:$0xff] }
 0x1cf   : > { %v5335_v21 = vrot.slane %v2266_v35, %v4002_v25  ;;  %v803_v33 = vadd.f32 %v4973_v50, %v5204_v15  ;;  %v2250_v26 = vcombine.high %v5314_v22, %v5314_v22  ;;  %v2296_v6 = vcombine.high %v5326_v18, %v5326_v18 }
 0x1d0   : > { %v2937_v10 = vmax.f32 %v2888_v29, %v2831_v28  ;;  %v2732_v62 = vmax.f32 %v5256_v7, %v5326_v18  ;;  %v5346_v1 = vrot.slane %v2267_v63, %v4002_v25  ;;  %v2297_v31 = vcombine.high %v5332_v3, %v5332_v3 }
 0x1d1   : > { %v2298_v8 = vcombine.high %v5335_v21, %v5335_v21  ;;  %v2736_v15 = vmax.f32 %v5259_v38, %v5332_v3  ;;  %v3196_v23 = vrot.slane %v5292_v34, %v4002_v25  ;;  %v3210_v9 = vrot.slane %v3189_v42, %v4002_v25  ;;  %v5516_v42 = vld [vmem:[#allocation19_spill] sm:$0xff] }
 0x1d2   : > { %v5357_v43 = vmax.f32 %v2200_v11, %v2296_v6  ;;  %v2885_v54 = vmax.f32 %v5283_v30, %v2824_v53  ;;  %v2299_v37 = vcombine.high %v5346_v1, %v5346_v1  ;;  %v5362_v12 = vmax.f32 %v2201_v44, %v2297_v31  ;;  %v5512_v11 = vld [vmem:[#allocation3_spill] sm:$0xff] }
 0x1d3   : > { %v955_v47 = vadd.f32 %v5511_v13, %v803_v33  ;;  %v2727_v40 = vmax.f32 %v5213_v55, %v2249_v60  ;;  %v2729_v34 = vmax.f32 %v5223_v5, %v5314_v22  ;;  %v2731_v16 = vmax.f32 %v5245_v0, %v2250_v26  ;;  %v5514_v5 = vld [vmem:[#allocation18_spill] sm:$0xff]  ;;  %v5515_v60 = vld [vmem:[#allocation4_spill] sm:$0xff] }
 0x1d4   : > { %v2934_v46 = vmax.f32 %v2885_v54, %v5275_v14  ;;  %v3588_v20 = vadd.f32 %v5513_v61, %v5512_v11  ;;  %v2733_v48 = vmax.f32 %v5263_v17, %v5335_v21  ;;  %v2735_v44 = vmax.f32 %v5248_v57, %v2298_v8 }
 0x1d5   : > { %v994_v30 = vmax.f32 %v955_v47, 0.0  ;;  %v2737_v56 = vmax.f32 %v5268_v4, %v5346_v1  ;;  %v2739_v51 = vmax.f32 %v2225_v24, %v2299_v37  ;;  %v3591_v22 = vadd.f32 %v5514_v5, %v4815_v19 }
 0x1d6   : > { %v3188_v55 = vcombine.low %v2933_v41, %v2934_v46  ;;  %v806_v14 = vadd.f32 %v4973_v50, %v3588_v20  ;;  %v3225_v57 = vrot.slane %v3210_v9, %v4002_v25  ;;  %v3304_v24 = vrot.slane %v2937_v10, %v4026_v58 }
 0x1d7   : > { %v2300_v0 = vcombine.high %v994_v30, %v994_v30  ;;  %v2307_v28 = vrot.slane %v994_v30, %v4002_v25  ;;  %v811_v17 = vadd.f32 %v4973_v50, %v3591_v22  ;;  %v3349_v30 = vld [vmem:[%s4348_s20 + $0x14] sm:$0xf] }
 0x1d8   : > { %v3203_v36 = vrot.slane %v3188_v55, %v4002_v25  ;;  %v958_v39 = vadd.f32 %v5515_v60, %v806_v14 }
 0x1d9   : > { %v2314_v4 = vrot.slane %v2300_v0, %v4002_v25  ;;  %v2315_v41 = vcombine.high %v2307_v28, %v2307_v28  ;;  %v2323_v35 = vrot.slane %v2307_v28, %v4002_v25  ;;  %v963_v53 = vadd.f32 %v5516_v42, %v811_v17 }
 0x1da   : > { %v3211_v29 = vcombine.low %v3196_v23, %v3203_v36  ;;  %v995_v19 = vmax.f32 %v958_v39, 0.0 }
 0x1db   : > { %v2316_v63 = vcombine.high %v2314_v4, %v2314_v4  ;;  %v2330_v21 = vrot.slane %v2314_v4, %v4002_v25  ;;  %v5391_v33 = vrot.slane %v2315_v41, %v4002_v25  ;;  %v2345_v50 = vcombine.high %v2323_v35, %v2323_v35 }
 0x1dc   : > { %v3218_v26 = vrot.slane %v3211_v29, %v4002_v25  ;;  %v2740_v6 = vmax.f32 %v5304_v27, %v2323_v35  ;;  %v2349_v1 = vcombine.high %v995_v19, %v995_v19  ;;  %v2356_v31 = vrot.slane %v995_v19, %v4002_v25 }
 0x1dd   : > { %v2344_v10 = vrot.slane %v2316_v63, %v4002_v25  ;;  %v2346_v8 = vcombine.high %v2330_v21, %v2330_v21  ;;  %v2347_v23 = vcombine.high %v5391_v33, %v5391_v33  ;;  %v2832_v9 = vmax.f32 %v2727_v40, %v2345_v50 }
 0x1de   : > { %v3226_v54 = vcombine.low %v3218_v26, %v3225_v57  ;;  %v2834_v37 = vmax.f32 %v2729_v34, %v2330_v21  ;;  %v2363_v13 = vrot.slane %v2349_v1, %v4002_v25  ;;  %v2364_v47 = vcombine.high %v2356_v31, %v2356_v31 }
 0x1df   : > { %v2348_v46 = vcombine.high %v2344_v10, %v2344_v10  ;;  %v2833_v27 = vmax.f32 %v2728_v49, %v2347_v23  ;;  %v2835_v11 = vmax.f32 %v5322_v2, %v2344_v10  ;;  %v2836_v61 = vmax.f32 %v2731_v16, %v2346_v8 }
 0x1e0   : > { %v3322_v20 = vsel %vm3316_vm1, %v3226_v54, %v3304_v24  ;;  %v2365_v55 = vcombine.high %v2363_v13, %v2363_v13  ;;  %v2372_v40 = vrot.slane %v2356_v31, %v4002_v25  ;;  %v2379_v34 = vrot.slane %v2363_v13, %v4002_v25  ;;  %v3352_v54 = vld [vmem:[%s4348_s20 + $0x18] sm:$0xf] }
 0x1e1   : > { %v3329_v14 = vpack.c.bf16 %v3322_v20, %v3322_v20  ;;  %v2889_v5 = vmax.f32 %v2832_v9, %v2833_v27  ;;  %v2890_v22 = vmax.f32 %v2834_v37, %v2835_v11  ;;  %v2386_v0 = vrot.slane %v2364_v47, %v4002_v25 }
 0x1e2   : > { %v2393_v59 = vrot.slane %v2365_v55, %v4002_v25  ;;  %v2394_v32 = vcombine.high %v2372_v40, %v2372_v40  ;;  %v2395_v49 = vcombine.high %v2379_v34, %v2379_v34  ;;  %v2837_v2 = vmax.f32 %v2732_v62, %v2348_v46 }
 0x1e3   : > { %v3350_v16 = vsel %vm4385_vm4, %v3329_v14, %v3349_v30  ;;  %v2938_v28 = vmax.f32 %v2889_v5, %v2834_v37  ;;  %v2939_v36 = vmax.f32 %v2890_v22, %v2836_v61  ;;  %v2396_v60 = vcombine.high %v2386_v0, %v2386_v0 }
 0x1e4   : > { %3351 = vst [vmem:[%s4348_s20 + $0x14] sm:$0xf] %v3350_v16  ;;  %v2397_v39 = vcombine.high %v2393_v59, %v2393_v59  ;;  %v2838_v17 = vmax.f32 %v2733_v48, %v2372_v40  ;;  %v2839_v57 = vmax.f32 %v5357_v43, %v2386_v0  ;;  %v2840_v4 = vmax.f32 %v2735_v44, %v2394_v32 }
 0x1e5   : > { %v3227_v41 = vcombine.low %v2938_v28, %v2939_v36  ;;  %v2841_v35 = vmax.f32 %v2736_v15, %v2396_v60  ;;  %v2842_v24 = vmax.f32 %v2737_v56, %v2379_v34  ;;  %v2843_v7 = vmax.f32 %v5362_v12, %v2393_v59 }
 0x1e6   : > { %v2844_v18 = vmax.f32 %v2739_v51, %v2395_v49  ;;  %v2891_v62 = vmax.f32 %v2836_v61, %v2837_v2  ;;  %v2892_v29 = vmax.f32 %v2838_v17, %v2839_v57  ;;  %v996_v19 = vmax.f32 %v963_v53, 0.0 }
 0x1e7   : > { %v2893_v42 = vmax.f32 %v2840_v4, %v2841_v35  ;;  %v2894_v63 = vmax.f32 %v2842_v24, %v2843_v7  ;;  %v2741_v48 = vmax.f32 %v5306_v52, %v5391_v33  ;;  %v2845_v50 = vmax.f32 %v2740_v6, %v2397_v39 }
 0x1e8   : > { %v2940_v21 = vmax.f32 %v2891_v62, %v2838_v17  ;;  %v2941_v43 = vmax.f32 %v2892_v29, %v2840_v4  ;;  %v2404_v44 = vrot.slane %v996_v19, %v4002_v25  ;;  %v3236_v51 = vrot.slane %v3227_v41, %v4002_v25 }
 0x1e9   : > { %v2942_v26 = vmax.f32 %v2893_v42, %v2842_v24  ;;  %v2943_v38 = vmax.f32 %v2894_v63, %v2844_v18  ;;  %v2895_v12 = vmax.f32 %v2844_v18, %v2845_v50 }
 0x1ea   : > { %v3228_v3 = vcombine.low %v2940_v21, %v2941_v43  ;;  %v2411_v15 = vrot.slane %v2404_v44, %v4002_v25 }
 0x1eb   : > { %v3229_v56 = vcombine.low %v2942_v26, %v2943_v38 }
 0x1ec   : > { %v3243_v53 = vrot.slane %v3228_v3, %v4002_v25  ;;  %v2846_v1 = vmax.f32 %v2741_v48, %v2411_v15 }
 0x1ed   : > { %v3250_v52 = vrot.slane %v3229_v56, %v4002_v25 }
 0x1ee   : > { %v3251_v33 = vcombine.low %v3236_v51, %v3243_v53  ;;  %v2944_v31 = vmax.f32 %v2895_v12, %v2846_v1 }
 0x1ef   : > { %v3265_v10 = vrot.slane %v3250_v52, %v4002_v25 }
 0x1f0   : > { %v3258_v6 = vrot.slane %v3251_v33, %v4002_v25  ;;  %v3308_v23 = vrot.slane %v2944_v31, %v4026_v58 }
 0x1f2   : > { %v3266_v8 = vcombine.low %v3258_v6, %v3265_v10 }
 0x1f4   : > { %v3323_v9 = vsel %vm3316_vm1, %v3266_v8, %v3308_v23 }
 0x1f5   : > { %v3330_v37 = vpack.c.bf16 %v3323_v9, %v3323_v9 }
 0x1f7   : > { %v3353_v13 = vsel %vm4385_vm4, %v3330_v37, %v3352_v54 }
 0x1f8   : > { %3354 = vst [vmem:[%s4348_s20 + $0x18] sm:$0xf] %v3353_v13 }
 0x1f9 PF: > { %s13_s12 = sadd.s32 1, %s3797_s12  }
 0x1fa   : > { %p10_p4 = scmp.ge.s32.totalorder %s13_s12, 4  }
 0x1fc   :  { %12 = sbr.rel (!%p10_p4) target bundleno = 1 (0x1), region = 62 }

// kernel: alexnet_forward.6
= control target key start
LH: loop header
LB: loop body
LE: loop exit
PB: predicated region body
PF: predicated region fallthrough
CT: control target
= control target key end

     0   :  { %s6257_s12 = smov 0   ;;  %s7814_s0 = inlined_call_operand.vmem [shape: bf16[2,56,3200], index: 0, kind: input, shape index: {}]   ;;  %s7815_s1 = inlined_call_operand.vmem [shape: bf16[3200,256], index: 1, kind: input, shape index: {}]   ;;  %s7816_s2 = inlined_call_operand.vmem [shape: f32[1,256], index: 2, kind: input, shape index: {}]   ;;  %s7817_s3 = inlined_call_operand.vmem [shape: bf16[2,3,3,256], index: 3, kind: output, shape index: {}]  }
   0x1 LB: > { %s4747_s13 = sadd.s32 4294967295, %s6232_s12   ;;  %p4751_p0 = scmp.ge.s32.totalorder %s6232_s12, 1  ;;  %s6232_s12 = sphi %s6257_s12, %s13_s12  }
   0x2   : > { %p137_p1 = scmp.lt.s32.totalorder %s6232_s12, 3 }
   0x4   : > { %p138_p2 = pnand %p4751_p0, %p137_p1 }
   0x5   : > { %v5490_v0 = vld [vmem:[%s7815_s1 + $0x4] ss:$8 sps:$4 sm:$0xff] (!%p138_p2)   ;;  %v5494_v2 = vld [vmem:[%s7815_s1] ss:$8 sps:$4 sm:$0xff] (!%p138_p2)   ;;  %v5496_v4 = vld [vmem:[%s7815_s1 + $0x14] ss:$8 sps:$4 sm:$0xff] (!%p138_p2)  }
   0x6   : > { %141 = sbr.rel (%p138_p2) target bundleno = 700 (0x2bc), region = 32  ;;  %v5492_v1 = vld [vmem:[%s7815_s1 + $0x604] ss:$8 sps:$4 sm:$0xff] (!%p138_p2)   ;;  %3141 = vmatprep.subr.bf16.mxu1 (!%p138_p2), %v5490_v0  ;;  %v5495_v3 = vld [vmem:[%s7815_s1 + $0x600] ss:$8 sps:$4 sm:$0xff] (!%p138_p2)   ;;  %p161_p3 = scmp.lt.s32.totalorder (!%p138_p2), %s4747_s13, 1 }
   0x7   : > { %3567 = vmatprep.subr.bf16.mxu0 (!%p138_p2), %v5492_v1  ;;  %3142 = vmatpush1.bf16.msra.mxu1 (!%p138_p2), %v5494_v2  ;;  %v5498_v5 = vld [vmem:[%s7815_s1 + $0x614] ss:$8 sps:$4 sm:$0xff] (!%p138_p2)   ;;  %v5500_v6 = vld [vmem:[%s7815_s1 + $0x10] ss:$8 sps:$4 sm:$0xff] (!%p138_p2)   ;;  %v5502_v8 = vld [vmem:[%s7815_s1 + $0x24] ss:$8 sps:$4 sm:$0xff] (!%p138_p2)  }
   0x8   : > { %3568 = vmatpush1.bf16.msra.mxu0 (!%p138_p2), %v5495_v3  ;;  %3143 = vmatprep.subr.bf16.mxu1 (!%p138_p2), %v5496_v4  ;;  %v5501_v7 = vld [vmem:[%s7815_s1 + $0x610] ss:$8 sps:$4 sm:$0xff] (!%p138_p2)   ;;  %v5504_v9 = vld [vmem:[%s7815_s1 + $0x624] ss:$8 sps:$4 sm:$0xff] (!%p138_p2)   ;;  %v5506_v10 = vld [vmem:[%s7815_s1 + $0x20] ss:$8 sps:$4 sm:$0xff] (!%p138_p2)  }
   0x9   : > { %3569 = vmatprep.subr.bf16.mxu0 (!%p138_p2), %v5498_v5  ;;  %v5507_v11 = vld [vmem:[%s7815_s1 + $0x620] ss:$8 sps:$4 sm:$0xff] (!%p138_p2)   ;;  %v5508_v12 = vld [vmem:[%s7815_s1 + $0x34] ss:$8 sps:$4 sm:$0xff] (!%p138_p2)   ;;  %v5512_v14 = vld [vmem:[%s7815_s1 + $0x30] ss:$8 sps:$4 sm:$0xff] (!%p138_p2)  }
   0xa   : > { %v5510_v13 = vld [vmem:[%s7815_s1 + $0x634] ss:$8 sps:$4 sm:$0xff] (!%p138_p2)   ;;  %v5513_v15 = vld [vmem:[%s7815_s1 + $0x630] ss:$8 sps:$4 sm:$0xff] (!%p138_p2)   ;;  %v5514_v16 = vld [vmem:[%s7815_s1 + $0x44] ss:$8 sps:$4 sm:$0xff] (!%p138_p2)  }
   0xb   : > { %3144 = vmatpush1.bf16.msra.mxu1 (!%p138_p2), %v5500_v6  ;;  %v5516_v17 = vld [vmem:[%s7815_s1 + $0x644] ss:$8 sps:$4 sm:$0xff] (!%p138_p2)   ;;  %v5518_v18 = vld [vmem:[%s7815_s1 + $0x40] ss:$8 sps:$4 sm:$0xff] (!%p138_p2)   ;;  %v5520_v20 = vld [vmem:[%s7815_s1 + $0x54] ss:$8 sps:$4 sm:$0xff] (!%p138_p2)  }
   0xc   : > { %3570 = vmatpush1.bf16.msra.mxu0 (!%p138_p2), %v5501_v7  ;;  %3145 = vmatprep.subr.bf16.mxu1 (!%p138_p2), %v5502_v8  ;;  %v5519_v19 = vld [vmem:[%s7815_s1 + $0x640] ss:$8 sps:$4 sm:$0xff] (!%p138_p2)   ;;  %v5522_v21 = vld [vmem:[%s7815_s1 + $0x654] ss:$8 sps:$4 sm:$0xff] (!%p138_p2)   ;;  %v5524_v22 = vld [vmem:[%s7815_s1 + $0x50] ss:$8 sps:$4 sm:$0xff] (!%p138_p2)  }
   0xd   : > { %3571 = vmatprep.subr.bf16.mxu0 %v5504_v9  ;;  %v5525_v23 = vld [vmem:[%s7815_s1 + $0x650] ss:$8 sps:$4 sm:$0xff]   ;;  %v5526_v24 = vld [vmem:[%s7815_s1 + $0x64] ss:$8 sps:$4 sm:$0xff]   ;;  %v5530_v26 = vld [vmem:[%s7815_s1 + $0x60] ss:$8 sps:$4 sm:$0xff]  }
   0xe   : > { %v5528_v25 = vld [vmem:[%s7815_s1 + $0x664] ss:$8 sps:$4 sm:$0xff]   ;;  %v5531_v27 = vld [vmem:[%s7815_s1 + $0x660] ss:$8 sps:$4 sm:$0xff]   ;;  %v5532_v28 = vld [vmem:[%s7815_s1 + $0x74] ss:$8 sps:$4 sm:$0xff]  }
   0xf   : > { %3146 = vmatpush1.bf16.msra.mxu1 %v5506_v10  ;;  %v5534_v29 = vld [vmem:[%s7815_s1 + $0x674] ss:$8 sps:$4 sm:$0xff]   ;;  %v5536_v30 = vld [vmem:[%s7815_s1 + $0x70] ss:$8 sps:$4 sm:$0xff]   ;;  %v5538_v32 = vld [vmem:[%s7815_s1 + $0x84] ss:$8 sps:$4 sm:$0xff]  }
  0x10   : > { %3572 = vmatpush1.bf16.msra.mxu0 %v5507_v11  ;;  %3147 = vmatprep.subr.bf16.mxu1 %v5508_v12  ;;  %v5537_v31 = vld [vmem:[%s7815_s1 + $0x670] ss:$8 sps:$4 sm:$0xff]   ;;  %v5540_v33 = vld [vmem:[%s7815_s1 + $0x684] ss:$8 sps:$4 sm:$0xff]   ;;  %v5542_v34 = vld [vmem:[%s7815_s1 + $0x80] ss:$8 sps:$4 sm:$0xff]  }
  0x11   : > { %3573 = vmatprep.subr.bf16.mxu0 %v5510_v13  ;;  %v5543_v35 = vld [vmem:[%s7815_s1 + $0x680] ss:$8 sps:$4 sm:$0xff]   ;;  %v5544_v36 = vld [vmem:[%s7815_s1 + $0x94] ss:$8 sps:$4 sm:$0xff]   ;;  %s7821_s13 = smov (!%p161_p3, %s4747_s13), 1  ;;  %vm4679_vm1 = vcmask 1043458  }
  0x12   : > { %v5546_v37 = vld [vmem:[%s7815_s1 + $0x694] ss:$8 sps:$4 sm:$0xff]   ;;  %v5548_v38 = vld [vmem:[%s7815_s1 + $0x90] ss:$8 sps:$4 sm:$0xff]   ;;  %v5550_v40 = vld [vmem:[%s7815_s1 + $0xa4] ss:$8 sps:$4 sm:$0xff]  }
  0x13   : > { %3148 = vmatpush1.bf16.msra.mxu1 %v5512_v14  ;;  %v5549_v39 = vld [vmem:[%s7815_s1 + $0x690] ss:$8 sps:$4 sm:$0xff]   ;;  %s5477_s21 = smul.u32 700, %s7821_s13  ;;  %v5552_v41 = vld [vmem:[%s7815_s1 + $0x6a4] ss:$8 sps:$4 sm:$0xff]   ;;  %vm4630_vm3 = vcmask 1041408  }
  0x14   : > { %3574 = vmatpush1.bf16.msra.mxu0 %v5513_v15  ;;  %3149 = vmatprep.subr.bf16.mxu1 %v5514_v16  ;;  %v5554_v42 = vld [vmem:[%s7815_s1 + $0xa0] ss:$8 sps:$4 sm:$0xff]   ;;  %v5556_v44 = vld [vmem:[%s7815_s1 + $0xb4] ss:$8 sps:$4 sm:$0xff]   ;;  %v5560_v46 = vld [vmem:[%s7815_s1 + $0xb0] ss:$8 sps:$4 sm:$0xff]  }
  0x15   : > { %3575 = vmatprep.subr.bf16.mxu0 %v5516_v17  ;;  %v5555_v43 = vld [vmem:[%s7815_s1 + $0x6a0] ss:$8 sps:$4 sm:$0xff]   ;;  %s6410_s5 = scalar_lea.vmem %s7814_s0, %s5477_s21  ;;  %v5558_v45 = vld [vmem:[%s7815_s1 + $0x6b4] ss:$8 sps:$4 sm:$0xff]   ;;  %v5561_v47 = vld [vmem:[%s7815_s1 + $0x6b0] ss:$8 sps:$4 sm:$0xff]  }
  0x16   : > { %v5588_v48 = vld [vmem:[%s6410_s5 + $0x4] ss:$100 sps:$4 sm:$0xff]   ;;  %v5594_v51 = vld [vmem:[%s6410_s5 + $0x34] ss:$100 sps:$4 sm:$0xff]   ;;  %v5652_v17 = vld [vmem:[%s6410_s5 + $0xcc] ss:$100 sps:$4 sm:$0xff]  }
  0x17   : > { %3150 = vmatpush1.bf16.msra.mxu1 %v5518_v18  ;;  %v5562_v49 = vld [vmem:[%s7815_s1 + $0xc4] ss:$8 sps:$4 sm:$0xff]   ;;  %3173 = vmatprep.mubr.bf16.mxu1 %v5588_v48  ;;  %v5566_v52 = vld [vmem:[%s7815_s1 + $0xc0] ss:$8 sps:$4 sm:$0xff]   ;;  %v5568_v54 = vld [vmem:[%s7815_s1 + $0xd4] ss:$8 sps:$4 sm:$0xff]  }
  0x18   : > { %3576 = vmatpush1.bf16.msra.mxu0 %v5519_v19  ;;  %3151 = vmatprep.subr.bf16.mxu1 %v5520_v20  ;;  %v5564_v50 = vld [vmem:[%s7815_s1 + $0x6c4] ss:$8 sps:$4 sm:$0xff]   ;;  %v5567_v53 = vld [vmem:[%s7815_s1 + $0x6c0] ss:$8 sps:$4 sm:$0xff]   ;;  %v5570_v55 = vld [vmem:[%s7815_s1 + $0x6d4] ss:$8 sps:$4 sm:$0xff]  }
  0x19   : > { %3577 = vmatprep.subr.bf16.mxu0 %v5522_v21  ;;  %3599 = vmatprep.mubr.bf16.mxu0 %v5594_v51  ;;  %v5572_v56 = vld [vmem:[%s7815_s1 + $0xd0] ss:$8 sps:$4 sm:$0xff]   ;;  %v5574_v58 = vld [vmem:[%s7815_s1 + $0xe4] ss:$8 sps:$4 sm:$0xff]   ;;  %v5578_v60 = vld [vmem:[%s7815_s1 + $0xe0] ss:$8 sps:$4 sm:$0xff]  }
  0x1a   : > { %v5573_v57 = vld [vmem:[%s7815_s1 + $0x6d0] ss:$8 sps:$4 sm:$0xff]   ;;  %v5576_v59 = vld [vmem:[%s7815_s1 + $0x6e4] ss:$8 sps:$4 sm:$0xff]   ;;  %v5579_v61 = vld [vmem:[%s7815_s1 + $0x6e0] ss:$8 sps:$4 sm:$0xff]  }
  0x1b   : > { %3152 = vmatpush1.bf16.msra.mxu1 %v5524_v22  ;;  %v5580_v62 = vld [vmem:[%s7815_s1 + $0xf4] ss:$8 sps:$4 sm:$0xff]   ;;  %v5584_v0 = vld [vmem:[%s7815_s1 + $0xf0] ss:$8 sps:$4 sm:$0xff]   ;;  %v5591_v2 = vld [vmem:[%s7815_s1 + $0x104] ss:$8 sps:$4 sm:$0xff]  }
  0x1c   : > { %3578 = vmatpush1.bf16.msra.mxu0 %v5525_v23  ;;  %3153 = vmatprep.subr.bf16.mxu1 %v5526_v24  ;;  %v5582_v63 = vld [vmem:[%s7815_s1 + $0x6f4] ss:$8 sps:$4 sm:$0xff]   ;;  %v5585_v1 = vld [vmem:[%s7815_s1 + $0x6f0] ss:$8 sps:$4 sm:$0xff]   ;;  %v5597_v3 = vld [vmem:[%s7815_s1 + $0x704] ss:$8 sps:$4 sm:$0xff]  }
  0x1d   : > { %3579 = vmatprep.subr.bf16.mxu0 %v5528_v25  ;;  %v5586_v4 = vld [vmem:[%s6410_s5] ss:$100 sps:$4 sm:$0xff]   ;;  %v5592_v6 = vld [vmem:[%s6410_s5 + $0x30] ss:$100 sps:$4 sm:$0xff]   ;;  %v5662_v24 = vld [vmem:[%s6410_s5 + $0xc8] ss:$100 sps:$4 sm:$0xff]  }
  0x1e   : > { %v5589_v5 = vld [vmem:[%s7815_s1 + $0x100] ss:$8 sps:$4 sm:$0xff]   ;;  %v5600_v8 = vld [vmem:[%s7815_s1 + $0x114] ss:$8 sps:$4 sm:$0xff]   ;;  %v5598_v10 = vld [vmem:[%s7815_s1 + $0x110] ss:$8 sps:$4 sm:$0xff]  }
  0x1f   : > { %3154 = vmatpush1.bf16.msra.mxu1 %v5530_v26  ;;  %v5595_v7 = vld [vmem:[%s7815_s1 + $0x700] ss:$8 sps:$4 sm:$0xff]   ;;  %v5603_v9 = vld [vmem:[%s7815_s1 + $0x714] ss:$8 sps:$4 sm:$0xff]   ;;  %v5601_v11 = vld [vmem:[%s7815_s1 + $0x710] ss:$8 sps:$4 sm:$0xff]  }
  0x20   : > { %3580 = vmatpush1.bf16.msra.mxu0 %v5531_v27  ;;  %3155 = vmatprep.subr.bf16.mxu1 %v5532_v28  ;;  %v5606_v12 = vld [vmem:[%s7815_s1 + $0x124] ss:$8 sps:$4 sm:$0xff]   ;;  %v5604_v14 = vld [vmem:[%s7815_s1 + $0x120] ss:$8 sps:$4 sm:$0xff]   ;;  %v5612_v16 = vld [vmem:[%s7815_s1 + $0x134] ss:$8 sps:$4 sm:$0xff]  }
  0x21   : > { %3581 = vmatprep.subr.bf16.mxu0 %v5534_v29  ;;  %v5609_v13 = vld [vmem:[%s7815_s1 + $0x724] ss:$8 sps:$4 sm:$0xff]   ;;  %v5607_v15 = vld [vmem:[%s7815_s1 + $0x720] ss:$8 sps:$4 sm:$0xff]   ;;  %v5615_v18 = vld [vmem:[%s7815_s1 + $0x734] ss:$8 sps:$4 sm:$0xff]  }
  0x22   : > { %v5610_v19 = vld [vmem:[%s7815_s1 + $0x130] ss:$8 sps:$4 sm:$0xff]   ;;  %v5657_v21 = vld [vmem:[%s6410_s5 + $0xfc] ss:$100 sps:$4 sm:$0xff]   ;;  %v5618_v22 = vld [vmem:[%s7815_s1 + $0x144] ss:$8 sps:$4 sm:$0xff]  }
  0x23   : > { %3156 = vmatpush1.bf16.msra.mxu1 %v5536_v30  ;;  %v5613_v20 = vld [vmem:[%s7815_s1 + $0x730] ss:$8 sps:$4 sm:$0xff]   ;;  %v5621_v23 = vld [vmem:[%s7815_s1 + $0x744] ss:$8 sps:$4 sm:$0xff]   ;;  %v5616_v26 = vld [vmem:[%s7815_s1 + $0x140] ss:$8 sps:$4 sm:$0xff]  }
  0x24   : > { %3582 = vmatpush1.bf16.msra.mxu0 %v5537_v31  ;;  %3157 = vmatprep.subr.bf16.mxu1 %v5538_v32  ;;  %v5663_v25 = vld [vmem:[%s6410_s5 + $0xf8] ss:$100 sps:$4 sm:$0xff]   ;;  %v5619_v27 = vld [vmem:[%s7815_s1 + $0x740] ss:$8 sps:$4 sm:$0xff]   ;;  %v5645_v51 = vld [vmem:[%s7815_s1 + $0x784] ss:$8 sps:$4 sm:$0xff]  }
  0x25   : > { %3583 = vmatprep.subr.bf16.mxu0 %v5540_v33  ;;  %v5624_v28 = vld [vmem:[%s7815_s1 + $0x154] ss:$8 sps:$4 sm:$0xff]   ;;  %v5622_v31 = vld [vmem:[%s7815_s1 + $0x150] ss:$8 sps:$4 sm:$0xff]   ;;  %v5675_v33 = vld [vmem:[%s6410_s5 + $0x1c4] ss:$100 sps:$4 sm:$0xff]  }
  0x26   : > { %v5670_v29 = vld [vmem:[%s6410_s5 + $0x194] ss:$100 sps:$4 sm:$0xff]   ;;  %vm4677_vm0 = vsmask.f32 1280  ;;  %vm4680_vm2 = vsmask.f32 3328 }
  0x27   : > { %3158 = vmatpush1.bf16.msra.mxu1 %v5542_v34  ;;  %v5627_v30 = vld [vmem:[%s7815_s1 + $0x754] ss:$8 sps:$4 sm:$0xff]   ;;  %v5625_v32 = vld [vmem:[%s7815_s1 + $0x750] ss:$8 sps:$4 sm:$0xff]   ;;  %v5630_v34 = vld [vmem:[%s7815_s1 + $0x164] ss:$8 sps:$4 sm:$0xff]  }
  0x28   : > { %3584 = vmatpush1.bf16.msra.mxu0 %v5543_v35  ;;  %3159 = vmatprep.subr.bf16.mxu1 %v5544_v36  ;;  %v5633_v35 = vld [vmem:[%s7815_s1 + $0x764] ss:$8 sps:$4 sm:$0xff]   ;;  %v5680_v36 = vld [vmem:[%s6410_s5 + $0x190] ss:$100 sps:$4 sm:$0xff]   ;;  %s5478_s23 = smul.u32 12, %s7821_s13  ;;  %vm4678_vm4 = vmand %vm4630_vm3, %vm4677_vm0 }
  0x29   : > { %3585 = vmatprep.subr.bf16.mxu0 %v5546_v37  ;;  %v5681_v37 = vld [vmem:[%s6410_s5 + $0x1c0] ss:$100 sps:$4 sm:$0xff]   ;;  %v5634_v48 = vld [vmem:[%s7815_s1 + $0x170] ss:$8 sps:$4 sm:$0xff]   ;;  %vm4681_vm5 = vmand %vm4679_vm1, %vm4680_vm2 }
  0x2a   : > { %s7770_s25 = scalar_lea.vmem %s7817_s3, %s5478_s23  ;;  %vm7781_vm6 = vmor %vm4681_vm5, %vm4678_vm4 }
  0x2b   : > { %3160 = vmatpush1.bf16.msra.mxu1 %v5548_v38  ;;  %v5628_v38 = vld [vmem:[%s7815_s1 + $0x160] ss:$8 sps:$4 sm:$0xff]  }
  0x2c   : > { %3586 = vmatpush1.bf16.msra.mxu0 %v5549_v39  ;;  %3161 = vmatprep.subr.bf16.mxu1 %v5550_v40  ;;  %v5631_v39 = vld [vmem:[%s7815_s1 + $0x760] ss:$8 sps:$4 sm:$0xff]   ;;  %v250_v40 = vld [vmem:[%s6410_s5 + $0x258] sm:$0xff] }
  0x2d   : > { %3587 = vmatprep.subr.bf16.mxu0 %v5552_v41  ;;  %v5636_v41 = vld [vmem:[%s7815_s1 + $0x174] ss:$8 sps:$4 sm:$0xff]  }
  0x2f   : > { %3162 = vmatpush1.bf16.msra.mxu1 %v5554_v42  ;;  %v5639_v42 = vld [vmem:[%s7815_s1 + $0x774] ss:$8 sps:$4 sm:$0xff]  }
  0x30   : > { %3588 = vmatpush1.bf16.msra.mxu0 %v5555_v43  ;;  %3163 = vmatprep.subr.bf16.mxu1 %v5556_v44  ;;  %v4830_v43 = vcombine.high %v250_v40, %v250_v40  ;;  %v256_v44 = vld [vmem:[%s6410_s5 + $0x288] sm:$0xff] }
  0x31   : > { %3589 = vmatprep.subr.bf16.mxu0 %v5558_v45  ;;  %v4842_v45 = vcombine.high %v256_v44, %v256_v44 }
  0x33   : > { %3164 = vmatpush1.bf16.msra.mxu1 %v5560_v46  ;;  %v4829_v46 = vcombine.low %v250_v40, %v250_v40  ;;  %v5788_v40 = vld [vmem:[%s6410_s5 + $0x19c] ss:$100 sps:$4 sm:$0xff]  }
  0x34   : > { %3590 = vmatpush1.bf16.msra.mxu0 %v5561_v47  ;;  %3165 = vmatprep.subr.bf16.mxu1 %v5562_v49  ;;  %v4841_v47 = vcombine.low %v256_v44, %v256_v44  ;;  %v5637_v49 = vld [vmem:[%s7815_s1 + $0x770] ss:$8 sps:$4 sm:$0xff]   ;;  %v5736_v44 = vld [vmem:[%s7815_s1 + $0x244] ss:$8 sps:$4 sm:$0xff]  }
  0x35   : > { %3591 = vmatprep.subr.bf16.mxu0 %v5564_v50  ;;  %v5642_v50 = vld [vmem:[%s7815_s1 + $0x184] ss:$8 sps:$4 sm:$0xff]  }
  0x37   : > { %3166 = vmatpush1.bf16.msra.mxu1 %v5566_v52  ;;  %v5640_v52 = vld [vmem:[%s7815_s1 + $0x180] ss:$8 sps:$4 sm:$0xff]  }
  0x38   : > { %3592 = vmatpush1.bf16.msra.mxu0 %v5567_v53  ;;  %3167 = vmatprep.subr.bf16.mxu1 %v5568_v54  ;;  %v5706_v53 = vld [vmem:[%s6410_s5 + $0xc] ss:$100 sps:$4 sm:$0xff]   ;;  %v5643_v54 = vld [vmem:[%s7815_s1 + $0x780] ss:$8 sps:$4 sm:$0xff]  }
  0x39   : > { %3593 = vmatprep.subr.bf16.mxu0 %v5570_v55  ;;  %v5648_v55 = vld [vmem:[%s7815_s1 + $0x194] ss:$8 sps:$4 sm:$0xff]  }
  0x3b   : > { %3168 = vmatpush1.bf16.msra.mxu1 %v5572_v56  ;;  %v5651_v56 = vld [vmem:[%s7815_s1 + $0x794] ss:$8 sps:$4 sm:$0xff]  }
  0x3c   : > { %3594 = vmatpush1.bf16.msra.mxu0 %v5573_v57  ;;  %3169 = vmatprep.subr.bf16.mxu1 %v5574_v58  ;;  %v5712_v57 = vld [vmem:[%s6410_s5 + $0x3c] ss:$100 sps:$4 sm:$0xff]   ;;  %v5646_v58 = vld [vmem:[%s7815_s1 + $0x190] ss:$8 sps:$4 sm:$0xff]  }
  0x3d   : > { %3595 = vmatprep.subr.bf16.mxu0 %v5576_v59  ;;  %v5649_v59 = vld [vmem:[%s7815_s1 + $0x790] ss:$8 sps:$4 sm:$0xff]  }
  0x3f   : > { %3170 = vmatpush1.bf16.msra.mxu1 %v5578_v60  ;;  %v5656_v60 = vld [vmem:[%s7815_s1 + $0x1a4] ss:$8 sps:$4 sm:$0xff]  }
  0x40   : > { %3596 = vmatpush1.bf16.msra.mxu0 %v5579_v61  ;;  %3171 = vmatprep.subr.bf16.mxu1 %v5580_v62  ;;  %v5661_v61 = vld [vmem:[%s7815_s1 + $0x7a4] ss:$8 sps:$4 sm:$0xff]   ;;  %v5654_v62 = vld [vmem:[%s7815_s1 + $0x1a0] ss:$8 sps:$4 sm:$0xff]  }
  0x41   : > { %3597 = vmatprep.subr.bf16.mxu0 %v5582_v63  ;;  %v5659_v63 = vld [vmem:[%s7815_s1 + $0x7a0] ss:$8 sps:$4 sm:$0xff]  }
  0x43   : > { %3172 = vmatpush1.bf16.msra.mxu1 %v5584_v0  ;;  %v5666_v0 = vld [vmem:[%s7815_s1 + $0x1b4] ss:$8 sps:$4 sm:$0xff]  }
  0x44   : > { %3598 = vmatpush1.bf16.msra.mxu0 %v5585_v1  ;;  %3212 = vmatprep.subr.bf16.mxu1 %v5591_v2  ;;  %v5669_v1 = vld [vmem:[%s7815_s1 + $0x7b4] ss:$8 sps:$4 sm:$0xff]   ;;  %v5664_v2 = vld [vmem:[%s7815_s1 + $0x1b0] ss:$8 sps:$4 sm:$0xff]  }
  0x45   : > { %3638 = vmatprep.subr.bf16.mxu0 %v5597_v3  ;;  %v5667_v3 = vld [vmem:[%s7815_s1 + $0x7b0] ss:$8 sps:$4 sm:$0xff]  }
  0x46   : > { %3174 = vmatmul.mubr.bf16.vlgmr.msra.gmra.mrb[0].mxu1 %v5586_v4  ;;  %v5674_v4 = vld [vmem:[%s7815_s1 + $0x1c4] ss:$8 sps:$4 sm:$0xff]  }
  0x47   : > { %3600 = vmatmul.mubr.bf16.vlgmr.msra.gmra.mrb[0].mxu0 %v5592_v6  ;;  %3213 = vmatpush1.bf16.msra.mxu1 %v5589_v5  ;;  %v5679_v5 = vld [vmem:[%s7815_s1 + $0x7c4] ss:$8 sps:$4 sm:$0xff]   ;;  %v5672_v6 = vld [vmem:[%s7815_s1 + $0x1c0] ss:$8 sps:$4 sm:$0xff]  }
  0x48   : > { %3639 = vmatpush1.bf16.msra.mxu0 %v5595_v7  ;;  %3214 = vmatprep.subr.bf16.mxu1 %v5600_v8  ;;  %v5677_v7 = vld [vmem:[%s7815_s1 + $0x7c0] ss:$8 sps:$4 sm:$0xff]   ;;  %v5684_v8 = vld [vmem:[%s7815_s1 + $0x1d4] ss:$8 sps:$4 sm:$0xff]  }
  0x49   : > { %3640 = vmatprep.subr.bf16.mxu0 %v5603_v9  ;;  %3183 = vmatprep.mubr.bf16.mxu1 %v5652_v17  ;;  %v5687_v9 = vld [vmem:[%s7815_s1 + $0x7d4] ss:$8 sps:$4 sm:$0xff]  }
  0x4a   : > { %3609 = vmatprep.mubr.bf16.mxu0 %v5657_v21  ;;  %v5703_v17 = vld [vmem:[%s7815_s1 + $0x7f4] ss:$8 sps:$4 sm:$0xff]   ;;  %v5715_v21 = vld [vmem:[%s7815_s1 + $0x804] ss:$8 sps:$4 sm:$0xff]  }
  0x4b   : > { %3215 = vmatpush1.bf16.msra.mxu1 %v5598_v10  ;;  %v5682_v10 = vld [vmem:[%s7815_s1 + $0x1d0] ss:$8 sps:$4 sm:$0xff]  }
  0x4c   : > { %3641 = vmatpush1.bf16.msra.mxu0 %v5601_v11  ;;  %3216 = vmatprep.subr.bf16.mxu1 %v5606_v12  ;;  %v5685_v11 = vld [vmem:[%s7815_s1 + $0x7d0] ss:$8 sps:$4 sm:$0xff]   ;;  %v5691_v12 = vld [vmem:[%s7815_s1 + $0x1e4] ss:$8 sps:$4 sm:$0xff]  }
  0x4d   : > { %3642 = vmatprep.subr.bf16.mxu0 %v5609_v13  ;;  %v5695_v13 = vld [vmem:[%s7815_s1 + $0x7e4] ss:$8 sps:$4 sm:$0xff]  }
  0x4e   : > { %3184 = vmatmul.mubr.bf16.gmra.mrb[4].mxu1 %v5662_v24  ;;  %v5710_v24 = vld [vmem:[%s6410_s5 + $0x38] ss:$100 sps:$4 sm:$0xff]  }
  0x4f   : > { %3217 = vmatpush1.bf16.msra.mxu1 %v5604_v14  ;;  %3610 = vmatmul.mubr.bf16.gmra.mrb[4].mxu0 %v5663_v25  ;;  %v5689_v14 = vld [vmem:[%s7815_s1 + $0x1e0] ss:$8 sps:$4 sm:$0xff]  }
  0x50   : > { %3643 = vmatpush1.bf16.msra.mxu0 %v5607_v15  ;;  %3218 = vmatprep.subr.bf16.mxu1 %v5612_v16  ;;  %v5693_v15 = vld [vmem:[%s7815_s1 + $0x7e0] ss:$8 sps:$4 sm:$0xff]   ;;  %v5700_v16 = vld [vmem:[%s7815_s1 + $0x1f4] ss:$8 sps:$4 sm:$0xff]  }
  0x51   : > { %3644 = vmatprep.subr.bf16.mxu0 %v5615_v18  ;;  %3193 = vmatprep.mubr.bf16.mxu1 %v5670_v29  ;;  %v5698_v18 = vld [vmem:[%s7815_s1 + $0x1f0] ss:$8 sps:$4 sm:$0xff]   ;;  %v5713_v25 = vld [vmem:[%s7815_s1 + $0x800] ss:$8 sps:$4 sm:$0xff]  }
  0x52   : > { %3619 = vmatprep.mubr.bf16.mxu0 %v5675_v33  ;;  %v5775_v29 = vld [vmem:[%s6410_s5 + $0x104] ss:$100 sps:$4 sm:$0xff]  }
  0x53   : > { %3219 = vmatpush1.bf16.msra.mxu1 %v5610_v19  ;;  %v5701_v19 = vld [vmem:[%s7815_s1 + $0x7f0] ss:$8 sps:$4 sm:$0xff]   ;;  %v5727_v33 = vld [vmem:[%s7815_s1 + $0x824] ss:$8 sps:$4 sm:$0xff]  }
  0x54   : > { %3645 = vmatpush1.bf16.msra.mxu0 %v5613_v20  ;;  %3220 = vmatprep.subr.bf16.mxu1 %v5618_v22  ;;  %v5709_v20 = vld [vmem:[%s7815_s1 + $0x204] ss:$8 sps:$4 sm:$0xff]  }
  0x55   : > { %3646 = vmatprep.subr.bf16.mxu0 %v5621_v23  ;;  %v5704_v22 = vld [vmem:[%s6410_s5 + $0x8] ss:$100 sps:$4 sm:$0xff]  }
  0x56   : > { %3194 = vmatmul.mubr.bf16.gmra.mrb[8].mxu1 %v5680_v36  ;;  %v5707_v23 = vld [vmem:[%s7815_s1 + $0x200] ss:$8 sps:$4 sm:$0xff]  }
  0x57   : > { %3221 = vmatpush1.bf16.msra.mxu1 %v5616_v26  ;;  %3620 = vmatmul.mubr.bf16.gmra.mrb[8].mxu0 %v5681_v37  ;;  %v5718_v26 = vld [vmem:[%s7815_s1 + $0x214] ss:$8 sps:$4 sm:$0xff]   ;;  %v5781_v36 = vld [vmem:[%s6410_s5 + $0x100] ss:$100 sps:$4 sm:$0xff]  }
  0x58   : > { %3647 = vmatpush1.bf16.msra.mxu0 %v5619_v27  ;;  %3222 = vmatprep.subr.bf16.mxu1 %v5624_v28  ;;  %v5721_v27 = vld [vmem:[%s7815_s1 + $0x814] ss:$8 sps:$4 sm:$0xff]   ;;  %v5725_v37 = vld [vmem:[%s7815_s1 + $0x820] ss:$8 sps:$4 sm:$0xff]  }
  0x59   : > { %3648 = vmatprep.subr.bf16.mxu0 %v5627_v30  ;;  %3203 = vmatprep.mubr.bf16.mxu1 %v4830_v43  ;;  %v5770_v28 = vld [vmem:[%s6410_s5 + $0xd4] ss:$100 sps:$4 sm:$0xff]  }
  0x5a   : > { %3629 = vmatprep.mubr.bf16.mxu0 %v4842_v45  ;;  %v5716_v30 = vld [vmem:[%s7815_s1 + $0x210] ss:$8 sps:$4 sm:$0xff]   ;;  %v5739_v45 = vld [vmem:[%s7815_s1 + $0x844] ss:$8 sps:$4 sm:$0xff]  }
  0x5b   : > { %3223 = vmatpush1.bf16.msra.mxu1 %v5622_v31  ;;  %v5719_v31 = vld [vmem:[%s7815_s1 + $0x810] ss:$8 sps:$4 sm:$0xff]  }
  0x5c   : > { %3649 = vmatpush1.bf16.msra.mxu0 %v5625_v32  ;;  %3224 = vmatprep.subr.bf16.mxu1 %v5630_v34  ;;  %v5724_v32 = vld [vmem:[%s7815_s1 + $0x224] ss:$8 sps:$4 sm:$0xff]   ;;  %v5722_v34 = vld [vmem:[%s7815_s1 + $0x220] ss:$8 sps:$4 sm:$0xff]   ;;  %v5731_v43 = vld [vmem:[%s7815_s1 + $0x830] ss:$8 sps:$4 sm:$0xff]  }
  0x5d   : > { %3650 = vmatprep.subr.bf16.mxu0 %v5633_v35  ;;  %v5780_v35 = vld [vmem:[%s6410_s5 + $0xd0] ss:$100 sps:$4 sm:$0xff]  }
  0x5e   : > { %3204 = vmatmul.mubr.bf16.gmra.mrb[12].mxu1 %v4829_v46  ;;  %v5734_v46 = vld [vmem:[%s7815_s1 + $0x240] ss:$8 sps:$4 sm:$0xff]  }
  0x5f   : > { %3225 = vmatpush1.bf16.msra.mxu1 %v5628_v38  ;;  %3630 = vmatmul.mubr.bf16.gmra.mrb[12].mxu0 %v4841_v47  ;;  %v5730_v38 = vld [vmem:[%s7815_s1 + $0x234] ss:$8 sps:$4 sm:$0xff]   ;;  %v5737_v47 = vld [vmem:[%s7815_s1 + $0x840] ss:$8 sps:$4 sm:$0xff]  }
  0x60   : > { %3651 = vmatpush1.bf16.msra.mxu0 %v5631_v39  ;;  %3226 = vmatprep.subr.bf16.mxu1 %v5636_v41  ;;  %v5733_v39 = vld [vmem:[%s7815_s1 + $0x834] ss:$8 sps:$4 sm:$0xff]   ;;  %v5793_v41 = vld [vmem:[%s6410_s5 + $0x1cc] ss:$100 sps:$4 sm:$0xff]  }
  0x61   : > { %3652 = vmatprep.subr.bf16.mxu0 %v5639_v42  ;;  %3244 = vmatprep.mubr.bf16.mxu1 %v5706_v53  ;;  %v5728_v42 = vld [vmem:[%s7815_s1 + $0x230] ss:$8 sps:$4 sm:$0xff]   ;;  %v5745_v53 = vld [vmem:[%s7815_s1 + $0x854] ss:$8 sps:$4 sm:$0xff]  }
  0x62   : > { %3670 = vmatprep.mubr.bf16.mxu0 %v5712_v57  ;;  %v5743_v57 = vld [vmem:[%s7815_s1 + $0x850] ss:$8 sps:$4 sm:$0xff]  }
  0x63   : > { %3227 = vmatpush1.bf16.msra.mxu1 %v5634_v48  ;;  %v5798_v48 = vld [vmem:[%s6410_s5 + $0x198] ss:$100 sps:$4 sm:$0xff]  }
  0x64   : > { %3653 = vmatpush1.bf16.msra.mxu0 %v5637_v49  ;;  %3228 = vmatprep.subr.bf16.mxu1 %v5642_v50  ;;  %v5799_v49 = vld [vmem:[%s6410_s5 + $0x1c8] ss:$100 sps:$4 sm:$0xff]   ;;  %v251_v50 = vld [vmem:[%s6410_s5 + $0x260] sm:$0xff] }
  0x65   : > { %3654 = vmatprep.subr.bf16.mxu0 %v5645_v51  ;;  %v257_v51 = vld [vmem:[%s6410_s5 + $0x290] sm:$0xff] }
  0x67   : > { %3229 = vmatpush1.bf16.msra.mxu1 %v5640_v52  ;;  %v5742_v52 = vld [vmem:[%s7815_s1 + $0x254] ss:$8 sps:$4 sm:$0xff]  }
  0x68   : > { %3655 = vmatpush1.bf16.msra.mxu0 %v5643_v54  ;;  %3230 = vmatprep.subr.bf16.mxu1 %v5648_v55  ;;  %v4832_v54 = vcombine.high %v251_v50, %v251_v50  ;;  %v4844_v55 = vcombine.high %v257_v51, %v257_v51 }
  0x69   : > { %3656 = vmatprep.subr.bf16.mxu0 %v5651_v56  ;;  %v5740_v56 = vld [vmem:[%s7815_s1 + $0x250] ss:$8 sps:$4 sm:$0xff]  }
  0x6b   : > { %3231 = vmatpush1.bf16.msra.mxu1 %v5646_v58  ;;  %v5748_v58 = vld [vmem:[%s7815_s1 + $0x264] ss:$8 sps:$4 sm:$0xff]  }
  0x6c   : > { %3657 = vmatpush1.bf16.msra.mxu0 %v5649_v59  ;;  %3232 = vmatprep.subr.bf16.mxu1 %v5656_v60  ;;  %v5751_v59 = vld [vmem:[%s7815_s1 + $0x864] ss:$8 sps:$4 sm:$0xff]   ;;  %v5746_v60 = vld [vmem:[%s7815_s1 + $0x260] ss:$8 sps:$4 sm:$0xff]  }
  0x6d   : > { %3658 = vmatprep.subr.bf16.mxu0 %v5661_v61  ;;  %v5749_v61 = vld [vmem:[%s7815_s1 + $0x860] ss:$8 sps:$4 sm:$0xff]  }
  0x6f   : > { %3233 = vmatpush1.bf16.msra.mxu1 %v5654_v62  ;;  %v4831_v62 = vcombine.low %v251_v50, %v251_v50  ;;  %v5842_v50 = vld [vmem:[%s7815_s1 + $0x324] ss:$8 sps:$4 sm:$0xff]  }
  0x70   : > { %3659 = vmatpush1.bf16.msra.mxu0 %v5659_v63  ;;  %3234 = vmatprep.subr.bf16.mxu1 %v5666_v0  ;;  %v4843_v63 = vcombine.low %v257_v51, %v257_v51  ;;  %v5754_v0 = vld [vmem:[%s7815_s1 + $0x274] ss:$8 sps:$4 sm:$0xff]   ;;  %v5845_v51 = vld [vmem:[%s7815_s1 + $0x924] ss:$8 sps:$4 sm:$0xff]  }
  0x71   : > { %3660 = vmatprep.subr.bf16.mxu0 %v5669_v1  ;;  %v5757_v1 = vld [vmem:[%s7815_s1 + $0x874] ss:$8 sps:$4 sm:$0xff]  }
  0x73   : > { %3235 = vmatpush1.bf16.msra.mxu1 %v5664_v2  ;;  %v5824_v2 = vld [vmem:[%s6410_s5 + $0x14] ss:$100 sps:$4 sm:$0xff]  }
  0x74   : > { %3661 = vmatpush1.bf16.msra.mxu0 %v5667_v3  ;;  %3236 = vmatprep.subr.bf16.mxu1 %v5674_v4  ;;  %v5830_v3 = vld [vmem:[%s6410_s5 + $0x44] ss:$100 sps:$4 sm:$0xff]   ;;  %v5752_v4 = vld [vmem:[%s7815_s1 + $0x270] ss:$8 sps:$4 sm:$0xff]  }
  0x75   : > { %3662 = vmatprep.subr.bf16.mxu0 %v5679_v5  ;;  %v5755_v5 = vld [vmem:[%s7815_s1 + $0x870] ss:$8 sps:$4 sm:$0xff]  }
  0x77   : > { %3237 = vmatpush1.bf16.msra.mxu1 %v5672_v6  ;;  %v5760_v6 = vld [vmem:[%s7815_s1 + $0x284] ss:$8 sps:$4 sm:$0xff]  }
  0x78   : > { %3663 = vmatpush1.bf16.msra.mxu0 %v5677_v7  ;;  %3238 = vmatprep.subr.bf16.mxu1 %v5684_v8  ;;  %v5763_v7 = vld [vmem:[%s7815_s1 + $0x884] ss:$8 sps:$4 sm:$0xff]   ;;  %v5758_v8 = vld [vmem:[%s7815_s1 + $0x280] ss:$8 sps:$4 sm:$0xff]  }
  0x79   : > { %3664 = vmatprep.subr.bf16.mxu0 %v5687_v9  ;;  %v5761_v9 = vld [vmem:[%s7815_s1 + $0x880] ss:$8 sps:$4 sm:$0xff]  }
  0x7b   : > { %3239 = vmatpush1.bf16.msra.mxu1 %v5682_v10  ;;  %v5766_v10 = vld [vmem:[%s7815_s1 + $0x294] ss:$8 sps:$4 sm:$0xff]  }
  0x7c   : > { %3665 = vmatpush1.bf16.msra.mxu0 %v5685_v11  ;;  %3240 = vmatprep.subr.bf16.mxu1 %v5691_v12  ;;  %v5769_v11 = vld [vmem:[%s7815_s1 + $0x894] ss:$8 sps:$4 sm:$0xff]   ;;  %v5764_v12 = vld [vmem:[%s7815_s1 + $0x290] ss:$8 sps:$4 sm:$0xff]  }
  0x7d   : > { %3666 = vmatprep.subr.bf16.mxu0 %v5695_v13  ;;  %v5767_v13 = vld [vmem:[%s7815_s1 + $0x890] ss:$8 sps:$4 sm:$0xff]  }
  0x7f   : > { %3241 = vmatpush1.bf16.msra.mxu1 %v5689_v14  ;;  %v5774_v14 = vld [vmem:[%s7815_s1 + $0x2a4] ss:$8 sps:$4 sm:$0xff]  }
  0x80   : > { %3667 = vmatpush1.bf16.msra.mxu0 %v5693_v15  ;;  %3242 = vmatprep.subr.bf16.mxu1 %v5700_v16  ;;  %v5779_v15 = vld [vmem:[%s7815_s1 + $0x8a4] ss:$8 sps:$4 sm:$0xff]   ;;  %v5772_v16 = vld [vmem:[%s7815_s1 + $0x2a0] ss:$8 sps:$4 sm:$0xff]  }
  0x81   : > { %3668 = vmatprep.subr.bf16.mxu0 %v5703_v17  ;;  %v5777_v17 = vld [vmem:[%s7815_s1 + $0x8a0] ss:$8 sps:$4 sm:$0xff]  }
  0x83   : > { %3243 = vmatpush1.bf16.msra.mxu1 %v5698_v18  ;;  %v5784_v18 = vld [vmem:[%s7815_s1 + $0x2b4] ss:$8 sps:$4 sm:$0xff]  }
  0x84   : > { %3669 = vmatpush1.bf16.msra.mxu0 %v5701_v19  ;;  %3283 = vmatprep.subr.bf16.mxu1 %v5709_v20  ;;  %v5787_v19 = vld [vmem:[%s7815_s1 + $0x8b4] ss:$8 sps:$4 sm:$0xff]   ;;  %v5782_v20 = vld [vmem:[%s7815_s1 + $0x2b0] ss:$8 sps:$4 sm:$0xff]  }
  0x85   : > { %3709 = vmatprep.subr.bf16.mxu0 %v5715_v21  ;;  %v5785_v21 = vld [vmem:[%s7815_s1 + $0x8b0] ss:$8 sps:$4 sm:$0xff]  }
  0x86   : > { %3245 = vmatmul.mubr.bf16.vlgmr.msra.gmra.mrb[0].mxu1 %v5704_v22  ;;  %v5792_v22 = vld [vmem:[%s7815_s1 + $0x2c4] ss:$8 sps:$4 sm:$0xff]  }
  0x87   : > { %3671 = vmatmul.mubr.bf16.vlgmr.msra.gmra.mrb[0].mxu0 %v5710_v24  ;;  %3284 = vmatpush1.bf16.msra.mxu1 %v5707_v23  ;;  %v5797_v23 = vld [vmem:[%s7815_s1 + $0x8c4] ss:$8 sps:$4 sm:$0xff]   ;;  %v5790_v24 = vld [vmem:[%s7815_s1 + $0x2c0] ss:$8 sps:$4 sm:$0xff]  }
  0x88   : > { %3710 = vmatpush1.bf16.msra.mxu0 %v5713_v25  ;;  %3285 = vmatprep.subr.bf16.mxu1 %v5718_v26  ;;  %v5795_v25 = vld [vmem:[%s7815_s1 + $0x8c0] ss:$8 sps:$4 sm:$0xff]   ;;  %v5802_v26 = vld [vmem:[%s7815_s1 + $0x2d4] ss:$8 sps:$4 sm:$0xff]  }
  0x89   : > { %3711 = vmatprep.subr.bf16.mxu0 %v5721_v27  ;;  %3254 = vmatprep.mubr.bf16.mxu1 %v5770_v28  ;;  %v5805_v27 = vld [vmem:[%s7815_s1 + $0x8d4] ss:$8 sps:$4 sm:$0xff]   ;;  %v5800_v28 = vld [vmem:[%s7815_s1 + $0x2d0] ss:$8 sps:$4 sm:$0xff]  }
  0x8a   : > { %3680 = vmatprep.mubr.bf16.mxu0 %v5775_v29  ;;  %v5803_v29 = vld [vmem:[%s7815_s1 + $0x8d0] ss:$8 sps:$4 sm:$0xff]  }
  0x8b   : > { %3286 = vmatpush1.bf16.msra.mxu1 %v5716_v30  ;;  %v5809_v30 = vld [vmem:[%s7815_s1 + $0x2e4] ss:$8 sps:$4 sm:$0xff]  }
  0x8c   : > { %3712 = vmatpush1.bf16.msra.mxu0 %v5719_v31  ;;  %3287 = vmatprep.subr.bf16.mxu1 %v5724_v32  ;;  %v5813_v31 = vld [vmem:[%s7815_s1 + $0x8e4] ss:$8 sps:$4 sm:$0xff]   ;;  %v5807_v32 = vld [vmem:[%s7815_s1 + $0x2e0] ss:$8 sps:$4 sm:$0xff]  }
  0x8d   : > { %3713 = vmatprep.subr.bf16.mxu0 %v5727_v33  ;;  %v5811_v33 = vld [vmem:[%s7815_s1 + $0x8e0] ss:$8 sps:$4 sm:$0xff]  }
  0x8e   : > { %3255 = vmatmul.mubr.bf16.gmra.mrb[4].mxu1 %v5780_v35  ;;  %v5821_v35 = vld [vmem:[%s7815_s1 + $0x8f4] ss:$8 sps:$4 sm:$0xff]  }
  0x8f   : > { %3681 = vmatmul.mubr.bf16.gmra.mrb[4].mxu0 %v5781_v36  ;;  %3288 = vmatpush1.bf16.msra.mxu1 %v5722_v34  ;;  %v5818_v34 = vld [vmem:[%s7815_s1 + $0x2f4] ss:$8 sps:$4 sm:$0xff]   ;;  %v5816_v36 = vld [vmem:[%s7815_s1 + $0x2f0] ss:$8 sps:$4 sm:$0xff]  }
  0x90   : > { %3714 = vmatpush1.bf16.msra.mxu0 %v5725_v37  ;;  %3289 = vmatprep.subr.bf16.mxu1 %v5730_v38  ;;  %v5819_v37 = vld [vmem:[%s7815_s1 + $0x8f0] ss:$8 sps:$4 sm:$0xff]   ;;  %v5827_v38 = vld [vmem:[%s7815_s1 + $0x304] ss:$8 sps:$4 sm:$0xff]  }
  0x91   : > { %3715 = vmatprep.subr.bf16.mxu0 %v5733_v39  ;;  %3264 = vmatprep.mubr.bf16.mxu1 %v5788_v40  ;;  %v5833_v39 = vld [vmem:[%s7815_s1 + $0x904] ss:$8 sps:$4 sm:$0xff]   ;;  %v5822_v40 = vld [vmem:[%s6410_s5 + $0x10] ss:$100 sps:$4 sm:$0xff]  }
  0x92   : > { %3690 = vmatprep.mubr.bf16.mxu0 %v5793_v41  ;;  %v5825_v41 = vld [vmem:[%s7815_s1 + $0x300] ss:$8 sps:$4 sm:$0xff]  }
  0x93   : > { %3290 = vmatpush1.bf16.msra.mxu1 %v5728_v42  ;;  %v5828_v42 = vld [vmem:[%s6410_s5 + $0x40] ss:$100 sps:$4 sm:$0xff]  }
  0x94   : > { %3716 = vmatpush1.bf16.msra.mxu0 %v5731_v43  ;;  %3291 = vmatprep.subr.bf16.mxu1 %v5736_v44  ;;  %v5831_v43 = vld [vmem:[%s7815_s1 + $0x900] ss:$8 sps:$4 sm:$0xff]   ;;  %v5836_v44 = vld [vmem:[%s7815_s1 + $0x314] ss:$8 sps:$4 sm:$0xff]  }
  0x95   : > { %3717 = vmatprep.subr.bf16.mxu0 %v5739_v45  ;;  %v5839_v45 = vld [vmem:[%s7815_s1 + $0x914] ss:$8 sps:$4 sm:$0xff]  }
  0x96   : > { %3265 = vmatmul.mubr.bf16.gmra.mrb[8].mxu1 %v5798_v48  ;;  %v5834_v48 = vld [vmem:[%s7815_s1 + $0x310] ss:$8 sps:$4 sm:$0xff]  }
  0x97   : > { %3691 = vmatmul.mubr.bf16.gmra.mrb[8].mxu0 %v5799_v49  ;;  %3292 = vmatpush1.bf16.msra.mxu1 %v5734_v46  ;;  %v5888_v46 = vld [vmem:[%s6410_s5 + $0xdc] ss:$100 sps:$4 sm:$0xff]   ;;  %v5837_v49 = vld [vmem:[%s7815_s1 + $0x910] ss:$8 sps:$4 sm:$0xff]  }
  0x98   : > { %3718 = vmatpush1.bf16.msra.mxu0 %v5737_v47  ;;  %3293 = vmatprep.subr.bf16.mxu1 %v5742_v52  ;;  %v5893_v47 = vld [vmem:[%s6410_s5 + $0x10c] ss:$100 sps:$4 sm:$0xff]   ;;  %v5840_v52 = vld [vmem:[%s7815_s1 + $0x320] ss:$8 sps:$4 sm:$0xff]  }
  0x99   : > { %3719 = vmatprep.subr.bf16.mxu0 %v5745_v53  ;;  %3274 = vmatprep.mubr.bf16.mxu1 %v4832_v54  ;;  %v5898_v53 = vld [vmem:[%s6410_s5 + $0xd8] ss:$100 sps:$4 sm:$0xff]   ;;  %v5899_v54 = vld [vmem:[%s6410_s5 + $0x108] ss:$100 sps:$4 sm:$0xff]  }
  0x9a   : > { %3700 = vmatprep.mubr.bf16.mxu0 %v4844_v55  ;;  %v5843_v55 = vld [vmem:[%s7815_s1 + $0x920] ss:$8 sps:$4 sm:$0xff]  }
  0x9b   : > { %3294 = vmatpush1.bf16.msra.mxu1 %v5740_v56  ;;  %v5848_v56 = vld [vmem:[%s7815_s1 + $0x334] ss:$8 sps:$4 sm:$0xff]  }
  0x9c   : > { %3720 = vmatpush1.bf16.msra.mxu0 %v5743_v57  ;;  %3295 = vmatprep.subr.bf16.mxu1 %v5748_v58  ;;  %v5851_v57 = vld [vmem:[%s7815_s1 + $0x934] ss:$8 sps:$4 sm:$0xff]   ;;  %v5906_v58 = vld [vmem:[%s6410_s5 + $0x1a4] ss:$100 sps:$4 sm:$0xff]  }
  0x9d   : > { %3721 = vmatprep.subr.bf16.mxu0 %v5751_v59  ;;  %v5846_v59 = vld [vmem:[%s7815_s1 + $0x330] ss:$8 sps:$4 sm:$0xff]  }
  0x9e   : > { %3275 = vmatmul.mubr.bf16.gmra.mrb[12].mxu1 %v4831_v62  ;;  %v5854_v62 = vld [vmem:[%s7815_s1 + $0x344] ss:$8 sps:$4 sm:$0xff]  }
  0x9f   : > { %3701 = vmatmul.mubr.bf16.gmra.mrb[12].mxu0 %v4843_v63  ;;  %3296 = vmatpush1.bf16.msra.mxu1 %v5746_v60  ;;  %v5911_v60 = vld [vmem:[%s6410_s5 + $0x1d4] ss:$100 sps:$4 sm:$0xff]   ;;  %v5857_v63 = vld [vmem:[%s7815_s1 + $0x944] ss:$8 sps:$4 sm:$0xff]  }
  0xa0   : > { %3722 = vmatpush1.bf16.msra.mxu0 %v5749_v61  ;;  %3297 = vmatprep.subr.bf16.mxu1 %v5754_v0  ;;  %v5849_v61 = vld [vmem:[%s7815_s1 + $0x930] ss:$8 sps:$4 sm:$0xff]   ;;  %v5916_v0 = vld [vmem:[%s6410_s5 + $0x1a0] ss:$100 sps:$4 sm:$0xff]  }
  0xa1   : > { %3723 = vmatprep.subr.bf16.mxu0 %v5757_v1  ;;  %3315 = vmatprep.mubr.bf16.mxu1 %v5824_v2  ;;  %v5917_v1 = vld [vmem:[%s6410_s5 + $0x1d0] ss:$100 sps:$4 sm:$0xff]   ;;  %v252_v2 = vld [vmem:[%s6410_s5 + $0x268] sm:$0xff] }
  0xa2   : > { %3741 = vmatprep.mubr.bf16.mxu0 %v5830_v3  ;;  %v258_v3 = vld [vmem:[%s6410_s5 + $0x298] sm:$0xff] }
  0xa3   : > { %3298 = vmatpush1.bf16.msra.mxu1 %v5752_v4  ;;  %v5852_v4 = vld [vmem:[%s7815_s1 + $0x340] ss:$8 sps:$4 sm:$0xff]  }
  0xa4   : > { %3724 = vmatpush1.bf16.msra.mxu0 %v5755_v5  ;;  %3299 = vmatprep.subr.bf16.mxu1 %v5760_v6  ;;  %v5855_v5 = vld [vmem:[%s7815_s1 + $0x940] ss:$8 sps:$4 sm:$0xff]   ;;  %v5860_v6 = vld [vmem:[%s7815_s1 + $0x354] ss:$8 sps:$4 sm:$0xff]  }
  0xa5   : > { %3725 = vmatprep.subr.bf16.mxu0 %v5763_v7  ;;  %v5863_v7 = vld [vmem:[%s7815_s1 + $0x954] ss:$8 sps:$4 sm:$0xff]  }
  0xa7   : > { %3300 = vmatpush1.bf16.msra.mxu1 %v5758_v8  ;;  %v4834_v8 = vcombine.high %v252_v2, %v252_v2 }
  0xa8   : > { %3726 = vmatpush1.bf16.msra.mxu0 %v5761_v9  ;;  %3301 = vmatprep.subr.bf16.mxu1 %v5766_v10  ;;  %v4846_v9 = vcombine.high %v258_v3, %v258_v3  ;;  %v5858_v10 = vld [vmem:[%s7815_s1 + $0x350] ss:$8 sps:$4 sm:$0xff]  }
  0xa9   : > { %3727 = vmatprep.subr.bf16.mxu0 %v5769_v11  ;;  %v5861_v11 = vld [vmem:[%s7815_s1 + $0x950] ss:$8 sps:$4 sm:$0xff]  }
  0xab   : > { %3302 = vmatpush1.bf16.msra.mxu1 %v5764_v12  ;;  %v5866_v12 = vld [vmem:[%s7815_s1 + $0x364] ss:$8 sps:$4 sm:$0xff]  }
  0xac   : > { %3728 = vmatpush1.bf16.msra.mxu0 %v5767_v13  ;;  %3303 = vmatprep.subr.bf16.mxu1 %v5774_v14  ;;  %v5869_v13 = vld [vmem:[%s7815_s1 + $0x964] ss:$8 sps:$4 sm:$0xff]   ;;  %v5864_v14 = vld [vmem:[%s7815_s1 + $0x360] ss:$8 sps:$4 sm:$0xff]  }
  0xad   : > { %3729 = vmatprep.subr.bf16.mxu0 %v5779_v15  ;;  %v4833_v15 = vcombine.low %v252_v2, %v252_v2  ;;  %v5952_v2 = vld [vmem:[%s7815_s1 + $0x410] ss:$8 sps:$4 sm:$0xff]  }
  0xaf   : > { %3304 = vmatpush1.bf16.msra.mxu1 %v5772_v16  ;;  %v4845_v16 = vcombine.low %v258_v3, %v258_v3  ;;  %v5955_v3 = vld [vmem:[%s7815_s1 + $0xa10] ss:$8 sps:$4 sm:$0xff]  }
  0xb0   : > { %3730 = vmatpush1.bf16.msra.mxu0 %v5777_v17  ;;  %3305 = vmatprep.subr.bf16.mxu1 %v5784_v18  ;;  %v5867_v17 = vld [vmem:[%s7815_s1 + $0x960] ss:$8 sps:$4 sm:$0xff]   ;;  %v5872_v18 = vld [vmem:[%s7815_s1 + $0x374] ss:$8 sps:$4 sm:$0xff]  }
  0xb1   : > { %3731 = vmatprep.subr.bf16.mxu0 %v5787_v19  ;;  %v5875_v19 = vld [vmem:[%s7815_s1 + $0x974] ss:$8 sps:$4 sm:$0xff]  }
  0xb3   : > { %3306 = vmatpush1.bf16.msra.mxu1 %v5782_v20  ;;  %v5942_v20 = vld [vmem:[%s6410_s5 + $0x1c] ss:$100 sps:$4 sm:$0xff]  }
  0xb4   : > { %3732 = vmatpush1.bf16.msra.mxu0 %v5785_v21  ;;  %3307 = vmatprep.subr.bf16.mxu1 %v5792_v22  ;;  %v5948_v21 = vld [vmem:[%s6410_s5 + $0x4c] ss:$100 sps:$4 sm:$0xff]  }
  0xb5   : > { %3733 = vmatprep.subr.bf16.mxu0 %v5797_v23  ;;  %v5870_v22 = vld [vmem:[%s7815_s1 + $0x370] ss:$8 sps:$4 sm:$0xff]  }
  0xb6   : > { %v5873_v23 = vld [vmem:[%s7815_s1 + $0x970] ss:$8 sps:$4 sm:$0xff]  }
  0xb7   : > { %3308 = vmatpush1.bf16.msra.mxu1 %v5790_v24  ;;  %v5878_v24 = vld [vmem:[%s7815_s1 + $0x384] ss:$8 sps:$4 sm:$0xff]  }
  0xb8   : > { %3734 = vmatpush1.bf16.msra.mxu0 %v5795_v25  ;;  %3309 = vmatprep.subr.bf16.mxu1 %v5802_v26  ;;  %v5881_v25 = vld [vmem:[%s7815_s1 + $0x984] ss:$8 sps:$4 sm:$0xff]   ;;  %v5876_v26 = vld [vmem:[%s7815_s1 + $0x380] ss:$8 sps:$4 sm:$0xff]  }
  0xb9   : > { %3735 = vmatprep.subr.bf16.mxu0 %v5805_v27  ;;  %v5879_v27 = vld [vmem:[%s7815_s1 + $0x980] ss:$8 sps:$4 sm:$0xff]  }
  0xbb   : > { %3310 = vmatpush1.bf16.msra.mxu1 %v5800_v28  ;;  %v5884_v28 = vld [vmem:[%s7815_s1 + $0x394] ss:$8 sps:$4 sm:$0xff]  }
  0xbc   : > { %3736 = vmatpush1.bf16.msra.mxu0 %v5803_v29  ;;  %3311 = vmatprep.subr.bf16.mxu1 %v5809_v30  ;;  %v5887_v29 = vld [vmem:[%s7815_s1 + $0x994] ss:$8 sps:$4 sm:$0xff]   ;;  %v5882_v30 = vld [vmem:[%s7815_s1 + $0x390] ss:$8 sps:$4 sm:$0xff]  }
  0xbd   : > { %3737 = vmatprep.subr.bf16.mxu0 %v5813_v31  ;;  %v5885_v31 = vld [vmem:[%s7815_s1 + $0x990] ss:$8 sps:$4 sm:$0xff]  }
  0xbf   : > { %3312 = vmatpush1.bf16.msra.mxu1 %v5807_v32  ;;  %v5892_v32 = vld [vmem:[%s7815_s1 + $0x3a4] ss:$8 sps:$4 sm:$0xff]  }
  0xc0   : > { %3738 = vmatpush1.bf16.msra.mxu0 %v5811_v33  ;;  %3313 = vmatprep.subr.bf16.mxu1 %v5818_v34  ;;  %v5897_v33 = vld [vmem:[%s7815_s1 + $0x9a4] ss:$8 sps:$4 sm:$0xff]   ;;  %v5890_v34 = vld [vmem:[%s7815_s1 + $0x3a0] ss:$8 sps:$4 sm:$0xff]  }
  0xc1   : > { %3739 = vmatprep.subr.bf16.mxu0 %v5821_v35  ;;  %v5895_v35 = vld [vmem:[%s7815_s1 + $0x9a0] ss:$8 sps:$4 sm:$0xff]  }
  0xc3   : > { %3314 = vmatpush1.bf16.msra.mxu1 %v5816_v36  ;;  %v5902_v36 = vld [vmem:[%s7815_s1 + $0x3b4] ss:$8 sps:$4 sm:$0xff]  }
  0xc4   : > { %3740 = vmatpush1.bf16.msra.mxu0 %v5819_v37  ;;  %3354 = vmatprep.subr.bf16.mxu1 %v5827_v38  ;;  %v5905_v37 = vld [vmem:[%s7815_s1 + $0x9b4] ss:$8 sps:$4 sm:$0xff]   ;;  %v5900_v38 = vld [vmem:[%s7815_s1 + $0x3b0] ss:$8 sps:$4 sm:$0xff]  }
  0xc5   : > { %3780 = vmatprep.subr.bf16.mxu0 %v5833_v39  ;;  %v5903_v39 = vld [vmem:[%s7815_s1 + $0x9b0] ss:$8 sps:$4 sm:$0xff]  }
  0xc6   : > { %3316 = vmatmul.mubr.bf16.vlgmr.msra.gmra.mrb[0].mxu1 %v5822_v40  ;;  %v5910_v40 = vld [vmem:[%s7815_s1 + $0x3c4] ss:$8 sps:$4 sm:$0xff]  }
  0xc7   : > { %3742 = vmatmul.mubr.bf16.vlgmr.msra.gmra.mrb[0].mxu0 %v5828_v42  ;;  %3355 = vmatpush1.bf16.msra.mxu1 %v5825_v41  ;;  %v5915_v41 = vld [vmem:[%s7815_s1 + $0x9c4] ss:$8 sps:$4 sm:$0xff]   ;;  %v5908_v42 = vld [vmem:[%s7815_s1 + $0x3c0] ss:$8 sps:$4 sm:$0xff]  }
  0xc8   : > { %3781 = vmatpush1.bf16.msra.mxu0 %v5831_v43  ;;  %3356 = vmatprep.subr.bf16.mxu1 %v5836_v44  ;;  %v5913_v43 = vld [vmem:[%s7815_s1 + $0x9c0] ss:$8 sps:$4 sm:$0xff]   ;;  %v5920_v44 = vld [vmem:[%s7815_s1 + $0x3d4] ss:$8 sps:$4 sm:$0xff]  }
  0xc9   : > { %3782 = vmatprep.subr.bf16.mxu0 %v5839_v45  ;;  %3325 = vmatprep.mubr.bf16.mxu1 %v5888_v46  ;;  %v5923_v45 = vld [vmem:[%s7815_s1 + $0x9d4] ss:$8 sps:$4 sm:$0xff]   ;;  %v5918_v46 = vld [vmem:[%s7815_s1 + $0x3d0] ss:$8 sps:$4 sm:$0xff]  }
  0xca   : > { %3751 = vmatprep.mubr.bf16.mxu0 %v5893_v47  ;;  %v5921_v47 = vld [vmem:[%s7815_s1 + $0x9d0] ss:$8 sps:$4 sm:$0xff]  }
  0xcb   : > { %3357 = vmatpush1.bf16.msra.mxu1 %v5834_v48  ;;  %v5927_v48 = vld [vmem:[%s7815_s1 + $0x3e4] ss:$8 sps:$4 sm:$0xff]  }
  0xcc   : > { %3783 = vmatpush1.bf16.msra.mxu0 %v5837_v49  ;;  %3358 = vmatprep.subr.bf16.mxu1 %v5842_v50  ;;  %v5931_v49 = vld [vmem:[%s7815_s1 + $0x9e4] ss:$8 sps:$4 sm:$0xff]   ;;  %v5925_v50 = vld [vmem:[%s7815_s1 + $0x3e0] ss:$8 sps:$4 sm:$0xff]  }
  0xcd   : > { %3784 = vmatprep.subr.bf16.mxu0 %v5845_v51  ;;  %v5929_v51 = vld [vmem:[%s7815_s1 + $0x9e0] ss:$8 sps:$4 sm:$0xff]  }
  0xce   : > { %3326 = vmatmul.mubr.bf16.gmra.mrb[4].mxu1 %v5898_v53  ;;  %v5939_v53 = vld [vmem:[%s7815_s1 + $0x9f4] ss:$8 sps:$4 sm:$0xff]  }
  0xcf   : > { %3752 = vmatmul.mubr.bf16.gmra.mrb[4].mxu0 %v5899_v54  ;;  %3359 = vmatpush1.bf16.msra.mxu1 %v5840_v52  ;;  %v5936_v52 = vld [vmem:[%s7815_s1 + $0x3f4] ss:$8 sps:$4 sm:$0xff]   ;;  %v5934_v54 = vld [vmem:[%s7815_s1 + $0x3f0] ss:$8 sps:$4 sm:$0xff]  }
  0xd0   : > { %3785 = vmatpush1.bf16.msra.mxu0 %v5843_v55  ;;  %3360 = vmatprep.subr.bf16.mxu1 %v5848_v56  ;;  %v5937_v55 = vld [vmem:[%s7815_s1 + $0x9f0] ss:$8 sps:$4 sm:$0xff]   ;;  %v5945_v56 = vld [vmem:[%s7815_s1 + $0x404] ss:$8 sps:$4 sm:$0xff]  }
  0xd1   : > { %3786 = vmatprep.subr.bf16.mxu0 %v5851_v57  ;;  %3335 = vmatprep.mubr.bf16.mxu1 %v5906_v58  ;;  %v5951_v57 = vld [vmem:[%s7815_s1 + $0xa04] ss:$8 sps:$4 sm:$0xff]   ;;  %v5940_v58 = vld [vmem:[%s6410_s5 + $0x18] ss:$100 sps:$4 sm:$0xff]  }
  0xd2   : > { %3761 = vmatprep.mubr.bf16.mxu0 %v5911_v60  ;;  %v5946_v60 = vld [vmem:[%s6410_s5 + $0x48] ss:$100 sps:$4 sm:$0xff]  }
  0xd3   : > { %3361 = vmatpush1.bf16.msra.mxu1 %v5846_v59  ;;  %v5943_v59 = vld [vmem:[%s7815_s1 + $0x400] ss:$8 sps:$4 sm:$0xff]  }
  0xd4   : > { %3787 = vmatpush1.bf16.msra.mxu0 %v5849_v61  ;;  %3362 = vmatprep.subr.bf16.mxu1 %v5854_v62  ;;  %v5949_v61 = vld [vmem:[%s7815_s1 + $0xa00] ss:$8 sps:$4 sm:$0xff]   ;;  %v5954_v62 = vld [vmem:[%s7815_s1 + $0x414] ss:$8 sps:$4 sm:$0xff]  }
  0xd5   : > { %3788 = vmatprep.subr.bf16.mxu0 %v5857_v63  ;;  %v5957_v63 = vld [vmem:[%s7815_s1 + $0xa14] ss:$8 sps:$4 sm:$0xff]  }
  0xd6   : > { %3336 = vmatmul.mubr.bf16.gmra.mrb[8].mxu1 %v5916_v0  ;;  %v6006_v0 = vld [vmem:[%s6410_s5 + $0xe4] ss:$100 sps:$4 sm:$0xff]  }
  0xd7   : > { %3762 = vmatmul.mubr.bf16.gmra.mrb[8].mxu0 %v5917_v1  ;;  %3363 = vmatpush1.bf16.msra.mxu1 %v5852_v4  ;;  %v6011_v1 = vld [vmem:[%s6410_s5 + $0x114] ss:$100 sps:$4 sm:$0xff]   ;;  %v5960_v4 = vld [vmem:[%s7815_s1 + $0x424] ss:$8 sps:$4 sm:$0xff]  }
  0xd8   : > { %3789 = vmatpush1.bf16.msra.mxu0 %v5855_v5  ;;  %3364 = vmatprep.subr.bf16.mxu1 %v5860_v6  ;;  %v5963_v5 = vld [vmem:[%s7815_s1 + $0xa24] ss:$8 sps:$4 sm:$0xff]   ;;  %v5958_v6 = vld [vmem:[%s7815_s1 + $0x420] ss:$8 sps:$4 sm:$0xff]  }
  0xd9   : > { %3790 = vmatprep.subr.bf16.mxu0 %v5863_v7  ;;  %3345 = vmatprep.mubr.bf16.mxu1 %v4834_v8  ;;  %v5961_v7 = vld [vmem:[%s7815_s1 + $0xa20] ss:$8 sps:$4 sm:$0xff]  }
  0xda   : > { %3771 = vmatprep.mubr.bf16.mxu0 %v4846_v9  ;;  %v6016_v8 = vld [vmem:[%s6410_s5 + $0xe0] ss:$100 sps:$4 sm:$0xff]   ;;  %v6017_v9 = vld [vmem:[%s6410_s5 + $0x110] ss:$100 sps:$4 sm:$0xff]  }
  0xdb   : > { %3365 = vmatpush1.bf16.msra.mxu1 %v5858_v10  ;;  %v5966_v10 = vld [vmem:[%s7815_s1 + $0x434] ss:$8 sps:$4 sm:$0xff]  }
  0xdc   : > { %3791 = vmatpush1.bf16.msra.mxu0 %v5861_v11  ;;  %3366 = vmatprep.subr.bf16.mxu1 %v5866_v12  ;;  %v5969_v11 = vld [vmem:[%s7815_s1 + $0xa34] ss:$8 sps:$4 sm:$0xff]   ;;  %v6024_v12 = vld [vmem:[%s6410_s5 + $0x1ac] ss:$100 sps:$4 sm:$0xff]  }
  0xdd   : > { %3792 = vmatprep.subr.bf16.mxu0 %v5869_v13  ;;  %v6029_v13 = vld [vmem:[%s6410_s5 + $0x1dc] ss:$100 sps:$4 sm:$0xff]  }
  0xde   : > { %3346 = vmatmul.mubr.bf16.gmra.mrb[12].mxu1 %v4833_v15  ;;  %v5967_v15 = vld [vmem:[%s7815_s1 + $0xa30] ss:$8 sps:$4 sm:$0xff]  }
  0xdf   : > { %3772 = vmatmul.mubr.bf16.gmra.mrb[12].mxu0 %v4845_v16  ;;  %3367 = vmatpush1.bf16.msra.mxu1 %v5864_v14  ;;  %v5964_v14 = vld [vmem:[%s7815_s1 + $0x430] ss:$8 sps:$4 sm:$0xff]   ;;  %v5972_v16 = vld [vmem:[%s7815_s1 + $0x444] ss:$8 sps:$4 sm:$0xff]  }
  0xe0   : > { %3793 = vmatpush1.bf16.msra.mxu0 %v5867_v17  ;;  %3368 = vmatprep.subr.bf16.mxu1 %v5872_v18  ;;  %v5975_v17 = vld [vmem:[%s7815_s1 + $0xa44] ss:$8 sps:$4 sm:$0xff]   ;;  %v5970_v18 = vld [vmem:[%s7815_s1 + $0x440] ss:$8 sps:$4 sm:$0xff]  }
  0xe1   : > { %3794 = vmatprep.subr.bf16.mxu0 %v5875_v19  ;;  %3386 = vmatprep.mubr.bf16.mxu1 %v5942_v20  ;;  %v5973_v19 = vld [vmem:[%s7815_s1 + $0xa40] ss:$8 sps:$4 sm:$0xff]  }
  0xe2   : > { %3812 = vmatprep.mubr.bf16.mxu0 %v5948_v21  ;;  %v6034_v20 = vld [vmem:[%s6410_s5 + $0x1a8] ss:$100 sps:$4 sm:$0xff]   ;;  %v6035_v21 = vld [vmem:[%s6410_s5 + $0x1d8] ss:$100 sps:$4 sm:$0xff]  }
  0xe3   : > { %3369 = vmatpush1.bf16.msra.mxu1 %v5870_v22  ;;  %v253_v22 = vld [vmem:[%s6410_s5 + $0x270] sm:$0xff] }
  0xe4   : > { %3795 = vmatpush1.bf16.msra.mxu0 %v5873_v23  ;;  %3370 = vmatprep.subr.bf16.mxu1 %v5878_v24  ;;  %v259_v23 = vld [vmem:[%s6410_s5 + $0x2a0] sm:$0xff]  ;;  %v5978_v24 = vld [vmem:[%s7815_s1 + $0x454] ss:$8 sps:$4 sm:$0xff]  }
  0xe5   : > { %3796 = vmatprep.subr.bf16.mxu0 %v5881_v25  ;;  %v5981_v25 = vld [vmem:[%s7815_s1 + $0xa54] ss:$8 sps:$4 sm:$0xff]  }
  0xe7   : > { %3371 = vmatpush1.bf16.msra.mxu1 %v5876_v26  ;;  %v4836_v26 = vcombine.high %v253_v22, %v253_v22 }
  0xe8   : > { %3797 = vmatpush1.bf16.msra.mxu0 %v5879_v27  ;;  %3372 = vmatprep.subr.bf16.mxu1 %v5884_v28  ;;  %v4848_v27 = vcombine.high %v259_v23, %v259_v23  ;;  %v5976_v28 = vld [vmem:[%s7815_s1 + $0x450] ss:$8 sps:$4 sm:$0xff]  }
  0xe9   : > { %3798 = vmatprep.subr.bf16.mxu0 %v5887_v29  ;;  %v5979_v29 = vld [vmem:[%s7815_s1 + $0xa50] ss:$8 sps:$4 sm:$0xff]  }
  0xeb   : > { %3373 = vmatpush1.bf16.msra.mxu1 %v5882_v30  ;;  %v5984_v30 = vld [vmem:[%s7815_s1 + $0x464] ss:$8 sps:$4 sm:$0xff]  }
  0xec   : > { %3799 = vmatpush1.bf16.msra.mxu0 %v5885_v31  ;;  %3374 = vmatprep.subr.bf16.mxu1 %v5892_v32  ;;  %v5987_v31 = vld [vmem:[%s7815_s1 + $0xa64] ss:$8 sps:$4 sm:$0xff]   ;;  %v5982_v32 = vld [vmem:[%s7815_s1 + $0x460] ss:$8 sps:$4 sm:$0xff]  }
  0xed   : > { %3800 = vmatprep.subr.bf16.mxu0 %v5897_v33  ;;  %v4835_v33 = vcombine.low %v253_v22, %v253_v22  ;;  %v6078_v22 = vld [vmem:[%s7815_s1 + $0x524] ss:$8 sps:$4 sm:$0xff]  }
  0xef   : > { %3375 = vmatpush1.bf16.msra.mxu1 %v5890_v34  ;;  %v4847_v34 = vcombine.low %v259_v23, %v259_v23  ;;  %v6081_v23 = vld [vmem:[%s7815_s1 + $0xb24] ss:$8 sps:$4 sm:$0xff]  }
  0xf0   : > { %3801 = vmatpush1.bf16.msra.mxu0 %v5895_v35  ;;  %3376 = vmatprep.subr.bf16.mxu1 %v5902_v36  ;;  %v5985_v35 = vld [vmem:[%s7815_s1 + $0xa60] ss:$8 sps:$4 sm:$0xff]   ;;  %v5990_v36 = vld [vmem:[%s7815_s1 + $0x474] ss:$8 sps:$4 sm:$0xff]  }
  0xf1   : > { %3802 = vmatprep.subr.bf16.mxu0 %v5905_v37  ;;  %v5993_v37 = vld [vmem:[%s7815_s1 + $0xa74] ss:$8 sps:$4 sm:$0xff]  }
  0xf3   : > { %3377 = vmatpush1.bf16.msra.mxu1 %v5900_v38  ;;  %v6060_v38 = vld [vmem:[%s6410_s5 + $0x24] ss:$100 sps:$4 sm:$0xff]  }
  0xf4   : > { %3803 = vmatpush1.bf16.msra.mxu0 %v5903_v39  ;;  %3378 = vmatprep.subr.bf16.mxu1 %v5910_v40  ;;  %v6066_v39 = vld [vmem:[%s6410_s5 + $0x54] ss:$100 sps:$4 sm:$0xff]  }
  0xf5   : > { %3804 = vmatprep.subr.bf16.mxu0 %v5915_v41  ;;  %v5988_v40 = vld [vmem:[%s7815_s1 + $0x470] ss:$8 sps:$4 sm:$0xff]  }
  0xf6   : > { %v5991_v41 = vld [vmem:[%s7815_s1 + $0xa70] ss:$8 sps:$4 sm:$0xff]  }
  0xf7   : > { %3379 = vmatpush1.bf16.msra.mxu1 %v5908_v42  ;;  %v5996_v42 = vld [vmem:[%s7815_s1 + $0x484] ss:$8 sps:$4 sm:$0xff]  }
  0xf8   : > { %3805 = vmatpush1.bf16.msra.mxu0 %v5913_v43  ;;  %3380 = vmatprep.subr.bf16.mxu1 %v5920_v44  ;;  %v5999_v43 = vld [vmem:[%s7815_s1 + $0xa84] ss:$8 sps:$4 sm:$0xff]   ;;  %v5994_v44 = vld [vmem:[%s7815_s1 + $0x480] ss:$8 sps:$4 sm:$0xff]  }
  0xf9   : > { %3806 = vmatprep.subr.bf16.mxu0 %v5923_v45  ;;  %v5997_v45 = vld [vmem:[%s7815_s1 + $0xa80] ss:$8 sps:$4 sm:$0xff]  }
  0xfb   : > { %3381 = vmatpush1.bf16.msra.mxu1 %v5918_v46  ;;  %v6002_v46 = vld [vmem:[%s7815_s1 + $0x494] ss:$8 sps:$4 sm:$0xff]  }
  0xfc   : > { %3807 = vmatpush1.bf16.msra.mxu0 %v5921_v47  ;;  %3382 = vmatprep.subr.bf16.mxu1 %v5927_v48  ;;  %v6005_v47 = vld [vmem:[%s7815_s1 + $0xa94] ss:$8 sps:$4 sm:$0xff]   ;;  %v6000_v48 = vld [vmem:[%s7815_s1 + $0x490] ss:$8 sps:$4 sm:$0xff]  }
  0xfd   : > { %3808 = vmatprep.subr.bf16.mxu0 %v5931_v49  ;;  %v6003_v49 = vld [vmem:[%s7815_s1 + $0xa90] ss:$8 sps:$4 sm:$0xff]  }
  0xff   : > { %3383 = vmatpush1.bf16.msra.mxu1 %v5925_v50  ;;  %v6010_v50 = vld [vmem:[%s7815_s1 + $0x4a4] ss:$8 sps:$4 sm:$0xff]  }
 0x100   : > { %3809 = vmatpush1.bf16.msra.mxu0 %v5929_v51  ;;  %3384 = vmatprep.subr.bf16.mxu1 %v5936_v52  ;;  %v6015_v51 = vld [vmem:[%s7815_s1 + $0xaa4] ss:$8 sps:$4 sm:$0xff]   ;;  %v6008_v52 = vld [vmem:[%s7815_s1 + $0x4a0] ss:$8 sps:$4 sm:$0xff]  }
 0x101   : > { %3810 = vmatprep.subr.bf16.mxu0 %v5939_v53  ;;  %v6013_v53 = vld [vmem:[%s7815_s1 + $0xaa0] ss:$8 sps:$4 sm:$0xff]  }
 0x103   : > { %3385 = vmatpush1.bf16.msra.mxu1 %v5934_v54  ;;  %v6020_v54 = vld [vmem:[%s7815_s1 + $0x4b4] ss:$8 sps:$4 sm:$0xff]  }
 0x104   : > { %3811 = vmatpush1.bf16.msra.mxu0 %v5937_v55  ;;  %3425 = vmatprep.subr.bf16.mxu1 %v5945_v56  ;;  %v6023_v55 = vld [vmem:[%s7815_s1 + $0xab4] ss:$8 sps:$4 sm:$0xff]   ;;  %v6018_v56 = vld [vmem:[%s7815_s1 + $0x4b0] ss:$8 sps:$4 sm:$0xff]  }
 0x105   : > { %3851 = vmatprep.subr.bf16.mxu0 %v5951_v57  ;;  %v6021_v57 = vld [vmem:[%s7815_s1 + $0xab0] ss:$8 sps:$4 sm:$0xff]  }
 0x106   : > { %3387 = vmatmul.mubr.bf16.vlgmr.msra.gmra.mrb[0].mxu1 %v5940_v58  ;;  %v6028_v58 = vld [vmem:[%s7815_s1 + $0x4c4] ss:$8 sps:$4 sm:$0xff]  }
 0x107   : > { %3813 = vmatmul.mubr.bf16.vlgmr.msra.gmra.mrb[0].mxu0 %v5946_v60  ;;  %3426 = vmatpush1.bf16.msra.mxu1 %v5943_v59  ;;  %v6033_v59 = vld [vmem:[%s7815_s1 + $0xac4] ss:$8 sps:$4 sm:$0xff]   ;;  %v6026_v60 = vld [vmem:[%s7815_s1 + $0x4c0] ss:$8 sps:$4 sm:$0xff]  }
 0x108   : > { %3852 = vmatpush1.bf16.msra.mxu0 %v5949_v61  ;;  %3427 = vmatprep.subr.bf16.mxu1 %v5954_v62  ;;  %v6031_v61 = vld [vmem:[%s7815_s1 + $0xac0] ss:$8 sps:$4 sm:$0xff]   ;;  %v6038_v62 = vld [vmem:[%s7815_s1 + $0x4d4] ss:$8 sps:$4 sm:$0xff]  }
 0x109   : > { %3853 = vmatprep.subr.bf16.mxu0 %v5957_v63  ;;  %3396 = vmatprep.mubr.bf16.mxu1 %v6006_v0  ;;  %v6041_v63 = vld [vmem:[%s7815_s1 + $0xad4] ss:$8 sps:$4 sm:$0xff]   ;;  %v6036_v0 = vld [vmem:[%s7815_s1 + $0x4d0] ss:$8 sps:$4 sm:$0xff]  }
 0x10a   : > { %3822 = vmatprep.mubr.bf16.mxu0 %v6011_v1  ;;  %v6039_v1 = vld [vmem:[%s7815_s1 + $0xad0] ss:$8 sps:$4 sm:$0xff]  }
 0x10b   : > { %3428 = vmatpush1.bf16.msra.mxu1 %v5952_v2  ;;  %v6045_v2 = vld [vmem:[%s7815_s1 + $0x4e4] ss:$8 sps:$4 sm:$0xff]  }
 0x10c   : > { %3854 = vmatpush1.bf16.msra.mxu0 %v5955_v3  ;;  %3429 = vmatprep.subr.bf16.mxu1 %v5960_v4  ;;  %v6049_v3 = vld [vmem:[%s7815_s1 + $0xae4] ss:$8 sps:$4 sm:$0xff]   ;;  %v6043_v4 = vld [vmem:[%s7815_s1 + $0x4e0] ss:$8 sps:$4 sm:$0xff]  }
 0x10d   : > { %3855 = vmatprep.subr.bf16.mxu0 %v5963_v5  ;;  %v6047_v5 = vld [vmem:[%s7815_s1 + $0xae0] ss:$8 sps:$4 sm:$0xff]  }
 0x10e   : > { %3397 = vmatmul.mubr.bf16.gmra.mrb[4].mxu1 %v6016_v8  ;;  %v6052_v8 = vld [vmem:[%s7815_s1 + $0x4f0] ss:$8 sps:$4 sm:$0xff]  }
 0x10f   : > { %3823 = vmatmul.mubr.bf16.gmra.mrb[4].mxu0 %v6017_v9  ;;  %3430 = vmatpush1.bf16.msra.mxu1 %v5958_v6  ;;  %v6054_v6 = vld [vmem:[%s7815_s1 + $0x4f4] ss:$8 sps:$4 sm:$0xff]   ;;  %v6055_v9 = vld [vmem:[%s7815_s1 + $0xaf0] ss:$8 sps:$4 sm:$0xff]  }
 0x110   : > { %3856 = vmatpush1.bf16.msra.mxu0 %v5961_v7  ;;  %3431 = vmatprep.subr.bf16.mxu1 %v5966_v10  ;;  %v6057_v7 = vld [vmem:[%s7815_s1 + $0xaf4] ss:$8 sps:$4 sm:$0xff]   ;;  %v6063_v10 = vld [vmem:[%s7815_s1 + $0x504] ss:$8 sps:$4 sm:$0xff]  }
 0x111   : > { %3857 = vmatprep.subr.bf16.mxu0 %v5969_v11  ;;  %3406 = vmatprep.mubr.bf16.mxu1 %v6024_v12  ;;  %v6058_v11 = vld [vmem:[%s6410_s5 + $0x20] ss:$100 sps:$4 sm:$0xff]  }
 0x112   : > { %3832 = vmatprep.mubr.bf16.mxu0 %v6029_v13  ;;  %v6069_v12 = vld [vmem:[%s7815_s1 + $0xb04] ss:$8 sps:$4 sm:$0xff]   ;;  %v6061_v13 = vld [vmem:[%s7815_s1 + $0x500] ss:$8 sps:$4 sm:$0xff]  }
 0x113   : > { %3432 = vmatpush1.bf16.msra.mxu1 %v5964_v14  ;;  %v6064_v14 = vld [vmem:[%s6410_s5 + $0x50] ss:$100 sps:$4 sm:$0xff]  }
 0x114   : > { %3858 = vmatpush1.bf16.msra.mxu0 %v5967_v15  ;;  %3433 = vmatprep.subr.bf16.mxu1 %v5972_v16  ;;  %v6067_v15 = vld [vmem:[%s7815_s1 + $0xb00] ss:$8 sps:$4 sm:$0xff]   ;;  %v6072_v16 = vld [vmem:[%s7815_s1 + $0x514] ss:$8 sps:$4 sm:$0xff]  }
 0x115   : > { %3859 = vmatprep.subr.bf16.mxu0 %v5975_v17  ;;  %v6075_v17 = vld [vmem:[%s7815_s1 + $0xb14] ss:$8 sps:$4 sm:$0xff]  }
 0x116   : > { %3407 = vmatmul.mubr.bf16.gmra.mrb[8].mxu1 %v6034_v20  ;;  %v6070_v20 = vld [vmem:[%s7815_s1 + $0x510] ss:$8 sps:$4 sm:$0xff]  }
 0x117   : > { %3833 = vmatmul.mubr.bf16.gmra.mrb[8].mxu0 %v6035_v21  ;;  %3434 = vmatpush1.bf16.msra.mxu1 %v5970_v18  ;;  %v6124_v18 = vld [vmem:[%s6410_s5 + $0xec] ss:$100 sps:$4 sm:$0xff]  }
 0x118   : > { %3860 = vmatpush1.bf16.msra.mxu0 %v5973_v19  ;;  %3435 = vmatprep.subr.bf16.mxu1 %v5978_v24  ;;  %v6126_v19 = vld [vmem:[%s6410_s5 + $0x11c] ss:$100 sps:$4 sm:$0xff]   ;;  %v6073_v21 = vld [vmem:[%s7815_s1 + $0xb10] ss:$8 sps:$4 sm:$0xff]   ;;  %v6128_v24 = vld [vmem:[%s6410_s5 + $0xe8] ss:$100 sps:$4 sm:$0xff]  }
 0x119   : > { %3861 = vmatprep.subr.bf16.mxu0 %v5981_v25  ;;  %3416 = vmatprep.mubr.bf16.mxu1 %v4836_v26  ;;  %v6132_v25 = vld [vmem:[%s6410_s5 + $0x118] ss:$100 sps:$4 sm:$0xff]   ;;  %v6076_v26 = vld [vmem:[%s7815_s1 + $0x520] ss:$8 sps:$4 sm:$0xff]  }
 0x11a   : > { %3842 = vmatprep.mubr.bf16.mxu0 %v4848_v27  ;;  %v6079_v27 = vld [vmem:[%s7815_s1 + $0xb20] ss:$8 sps:$4 sm:$0xff]  }
 0x11b   : > { %3436 = vmatpush1.bf16.msra.mxu1 %v5976_v28  ;;  %v6084_v28 = vld [vmem:[%s7815_s1 + $0x534] ss:$8 sps:$4 sm:$0xff]  }
 0x11c   : > { %3862 = vmatpush1.bf16.msra.mxu0 %v5979_v29  ;;  %3437 = vmatprep.subr.bf16.mxu1 %v5984_v30  ;;  %v6087_v29 = vld [vmem:[%s7815_s1 + $0xb34] ss:$8 sps:$4 sm:$0xff]  }
 0x11d   : > { %3863 = vmatprep.subr.bf16.mxu0 %v5987_v31  ;;  %v6142_v30 = vld [vmem:[%s6410_s5 + $0x1b4] ss:$100 sps:$4 sm:$0xff]   ;;  %v6144_v31 = vld [vmem:[%s6410_s5 + $0x1e4] ss:$100 sps:$4 sm:$0xff]  }
 0x11e   : > { %3417 = vmatmul.mubr.bf16.gmra.mrb[12].mxu1 %v4835_v33  ;;  %v6085_v33 = vld [vmem:[%s7815_s1 + $0xb30] ss:$8 sps:$4 sm:$0xff]  }
 0x11f   : > { %3843 = vmatmul.mubr.bf16.gmra.mrb[12].mxu0 %v4847_v34  ;;  %3438 = vmatpush1.bf16.msra.mxu1 %v5982_v32  ;;  %v6082_v32 = vld [vmem:[%s7815_s1 + $0x530] ss:$8 sps:$4 sm:$0xff]   ;;  %v6090_v34 = vld [vmem:[%s7815_s1 + $0x544] ss:$8 sps:$4 sm:$0xff]  }
 0x120   : > { %3864 = vmatpush1.bf16.msra.mxu0 %v5985_v35  ;;  %3439 = vmatprep.subr.bf16.mxu1 %v5990_v36  ;;  %v6093_v35 = vld [vmem:[%s7815_s1 + $0xb44] ss:$8 sps:$4 sm:$0xff]   ;;  %v6146_v36 = vld [vmem:[%s6410_s5 + $0x1b0] ss:$100 sps:$4 sm:$0xff]  }
 0x121   : > { %3865 = vmatprep.subr.bf16.mxu0 %v5993_v37  ;;  %3457 = vmatprep.mubr.bf16.mxu1 %v6060_v38  ;;  %v6150_v37 = vld [vmem:[%s6410_s5 + $0x1e0] ss:$100 sps:$4 sm:$0xff]   ;;  %v254_v38 = vld [vmem:[%s6410_s5 + $0x278] sm:$0xff] }
 0x122   : > { %3883 = vmatprep.mubr.bf16.mxu0 %v6066_v39  ;;  %v260_v39 = vld [vmem:[%s6410_s5 + $0x2a8] sm:$0xff] }
 0x123   : > { %3440 = vmatpush1.bf16.msra.mxu1 %v5988_v40  ;;  %v6088_v40 = vld [vmem:[%s7815_s1 + $0x540] ss:$8 sps:$4 sm:$0xff]  }
 0x124   : > { %3866 = vmatpush1.bf16.msra.mxu0 %v5991_v41  ;;  %3441 = vmatprep.subr.bf16.mxu1 %v5996_v42  ;;  %v6091_v41 = vld [vmem:[%s7815_s1 + $0xb40] ss:$8 sps:$4 sm:$0xff]   ;;  %v6096_v42 = vld [vmem:[%s7815_s1 + $0x554] ss:$8 sps:$4 sm:$0xff]  }
 0x125   : > { %3867 = vmatprep.subr.bf16.mxu0 %v5999_v43  ;;  %v6099_v43 = vld [vmem:[%s7815_s1 + $0xb54] ss:$8 sps:$4 sm:$0xff]  }
 0x127   : > { %3442 = vmatpush1.bf16.msra.mxu1 %v5994_v44  ;;  %v4838_v44 = vcombine.high %v254_v38, %v254_v38 }
 0x128   : > { %3868 = vmatpush1.bf16.msra.mxu0 %v5997_v45  ;;  %3443 = vmatprep.subr.bf16.mxu1 %v6002_v46  ;;  %v4850_v45 = vcombine.high %v260_v39, %v260_v39  ;;  %v6094_v46 = vld [vmem:[%s7815_s1 + $0x550] ss:$8 sps:$4 sm:$0xff]  }
 0x129   : > { %3869 = vmatprep.subr.bf16.mxu0 %v6005_v47  ;;  %v6097_v47 = vld [vmem:[%s7815_s1 + $0xb50] ss:$8 sps:$4 sm:$0xff]  }
 0x12b   : > { %3444 = vmatpush1.bf16.msra.mxu1 %v6000_v48  ;;  %v6102_v48 = vld [vmem:[%s7815_s1 + $0x564] ss:$8 sps:$4 sm:$0xff]  }
 0x12c   : > { %3870 = vmatpush1.bf16.msra.mxu0 %v6003_v49  ;;  %3445 = vmatprep.subr.bf16.mxu1 %v6010_v50  ;;  %v6105_v49 = vld [vmem:[%s7815_s1 + $0xb64] ss:$8 sps:$4 sm:$0xff]   ;;  %v4837_v50 = vcombine.low %v254_v38, %v254_v38 }
 0x12d   : > { %3871 = vmatprep.subr.bf16.mxu0 %v6015_v51  ;;  %v4849_v51 = vcombine.low %v260_v39, %v260_v39  ;;  %v6193_v38 = vld [vmem:[%s6410_s5 + $0x120] ss:$100 sps:$4 sm:$0xff]  }
 0x12e   : > { %v6194_v39 = vld [vmem:[%s7815_s1 + $0xc20] ss:$8 sps:$4 sm:$0xff]  }
 0x12f   : > { %3446 = vmatpush1.bf16.msra.mxu1 %v6008_v52  ;;  %v6100_v52 = vld [vmem:[%s7815_s1 + $0x560] ss:$8 sps:$4 sm:$0xff]  }
 0x130   : > { %3872 = vmatpush1.bf16.msra.mxu0 %v6013_v53  ;;  %3447 = vmatprep.subr.bf16.mxu1 %v6020_v54  ;;  %v6103_v53 = vld [vmem:[%s7815_s1 + $0xb60] ss:$8 sps:$4 sm:$0xff]   ;;  %v6108_v54 = vld [vmem:[%s7815_s1 + $0x574] ss:$8 sps:$4 sm:$0xff]  }
 0x131   : > { %3873 = vmatprep.subr.bf16.mxu0 %v6023_v55  ;;  %v6111_v55 = vld [vmem:[%s7815_s1 + $0xb74] ss:$8 sps:$4 sm:$0xff]  }
 0x133   : > { %3448 = vmatpush1.bf16.msra.mxu1 %v6018_v56  ;;  %v6178_v56 = vld [vmem:[%s6410_s5 + $0x2c] ss:$100 sps:$4 sm:$0xff]  }
 0x134   : > { %3874 = vmatpush1.bf16.msra.mxu0 %v6021_v57  ;;  %3449 = vmatprep.subr.bf16.mxu1 %v6028_v58  ;;  %v6181_v57 = vld [vmem:[%s6410_s5 + $0x5c] ss:$100 sps:$4 sm:$0xff]   ;;  %v6106_v58 = vld [vmem:[%s7815_s1 + $0x570] ss:$8 sps:$4 sm:$0xff]  }
 0x135   : > { %3875 = vmatprep.subr.bf16.mxu0 %v6033_v59  ;;  %v6109_v59 = vld [vmem:[%s7815_s1 + $0xb70] ss:$8 sps:$4 sm:$0xff]  }
 0x137   : > { %3450 = vmatpush1.bf16.msra.mxu1 %v6026_v60  ;;  %v6114_v60 = vld [vmem:[%s7815_s1 + $0x584] ss:$8 sps:$4 sm:$0xff]  }
 0x138   : > { %3876 = vmatpush1.bf16.msra.mxu0 %v6031_v61  ;;  %3451 = vmatprep.subr.bf16.mxu1 %v6038_v62  ;;  %v6117_v61 = vld [vmem:[%s7815_s1 + $0xb84] ss:$8 sps:$4 sm:$0xff]   ;;  %v6112_v62 = vld [vmem:[%s7815_s1 + $0x580] ss:$8 sps:$4 sm:$0xff]  }
 0x139   : > { %3877 = vmatprep.subr.bf16.mxu0 %v6041_v63  ;;  %v6115_v63 = vld [vmem:[%s7815_s1 + $0xb80] ss:$8 sps:$4 sm:$0xff]  }
 0x13b   : > { %3452 = vmatpush1.bf16.msra.mxu1 %v6036_v0  ;;  %v6120_v0 = vld [vmem:[%s7815_s1 + $0x594] ss:$8 sps:$4 sm:$0xff]  }
 0x13c   : > { %3878 = vmatpush1.bf16.msra.mxu0 %v6039_v1  ;;  %3453 = vmatprep.subr.bf16.mxu1 %v6045_v2  ;;  %v6123_v1 = vld [vmem:[%s7815_s1 + $0xb94] ss:$8 sps:$4 sm:$0xff]   ;;  %v6118_v2 = vld [vmem:[%s7815_s1 + $0x590] ss:$8 sps:$4 sm:$0xff]  }
 0x13d   : > { %3879 = vmatprep.subr.bf16.mxu0 %v6049_v3  ;;  %v6121_v3 = vld [vmem:[%s7815_s1 + $0xb90] ss:$8 sps:$4 sm:$0xff]  }
 0x13f   : > { %3454 = vmatpush1.bf16.msra.mxu1 %v6043_v4  ;;  %v6131_v4 = vld [vmem:[%s7815_s1 + $0x5a4] ss:$8 sps:$4 sm:$0xff]  }
 0x140   : > { %3880 = vmatpush1.bf16.msra.mxu0 %v6047_v5  ;;  %3455 = vmatprep.subr.bf16.mxu1 %v6054_v6  ;;  %v6135_v5 = vld [vmem:[%s7815_s1 + $0xba4] ss:$8 sps:$4 sm:$0xff]   ;;  %v6129_v6 = vld [vmem:[%s7815_s1 + $0x5a0] ss:$8 sps:$4 sm:$0xff]  }
 0x141   : > { %3881 = vmatprep.subr.bf16.mxu0 %v6057_v7  ;;  %v6133_v7 = vld [vmem:[%s7815_s1 + $0xba0] ss:$8 sps:$4 sm:$0xff]  }
 0x143   : > { %3456 = vmatpush1.bf16.msra.mxu1 %v6052_v8  ;;  %v6138_v8 = vld [vmem:[%s7815_s1 + $0x5b4] ss:$8 sps:$4 sm:$0xff]  }
 0x144   : > { %3882 = vmatpush1.bf16.msra.mxu0 %v6055_v9  ;;  %3496 = vmatprep.subr.bf16.mxu1 %v6063_v10  ;;  %v6141_v9 = vld [vmem:[%s7815_s1 + $0xbb4] ss:$8 sps:$4 sm:$0xff]   ;;  %v6136_v10 = vld [vmem:[%s7815_s1 + $0x5b0] ss:$8 sps:$4 sm:$0xff]  }
 0x145   : > { %3922 = vmatprep.subr.bf16.mxu0 %v6069_v12  ;;  %v6149_v12 = vld [vmem:[%s7815_s1 + $0x5c4] ss:$8 sps:$4 sm:$0xff]  }
 0x146   : > { %3458 = vmatmul.mubr.bf16.vlgmr.msra.gmra.mrb[0].mxu1 %v6058_v11  ;;  %v6139_v11 = vld [vmem:[%s7815_s1 + $0xbb0] ss:$8 sps:$4 sm:$0xff]  }
 0x147   : > { %3884 = vmatmul.mubr.bf16.vlgmr.msra.gmra.mrb[0].mxu0 %v6064_v14  ;;  %3497 = vmatpush1.bf16.msra.mxu1 %v6061_v13  ;;  %v6153_v13 = vld [vmem:[%s7815_s1 + $0xbc4] ss:$8 sps:$4 sm:$0xff]   ;;  %v6147_v14 = vld [vmem:[%s7815_s1 + $0x5c0] ss:$8 sps:$4 sm:$0xff]  }
 0x148   : > { %3923 = vmatpush1.bf16.msra.mxu0 %v6067_v15  ;;  %3498 = vmatprep.subr.bf16.mxu1 %v6072_v16  ;;  %v6151_v15 = vld [vmem:[%s7815_s1 + $0xbc0] ss:$8 sps:$4 sm:$0xff]   ;;  %v6156_v16 = vld [vmem:[%s7815_s1 + $0x5d4] ss:$8 sps:$4 sm:$0xff]  }
 0x149   : > { %3924 = vmatprep.subr.bf16.mxu0 %v6075_v17  ;;  %3467 = vmatprep.mubr.bf16.mxu1 %v6124_v18  ;;  %v6159_v17 = vld [vmem:[%s7815_s1 + $0xbd4] ss:$8 sps:$4 sm:$0xff]   ;;  %v6154_v18 = vld [vmem:[%s7815_s1 + $0x5d0] ss:$8 sps:$4 sm:$0xff]  }
 0x14a   : > { %3893 = vmatprep.mubr.bf16.mxu0 %v6126_v19  ;;  %v6157_v19 = vld [vmem:[%s7815_s1 + $0xbd0] ss:$8 sps:$4 sm:$0xff]  }
 0x14b   : > { %3499 = vmatpush1.bf16.msra.mxu1 %v6070_v20  ;;  %v6165_v20 = vld [vmem:[%s7815_s1 + $0x5e4] ss:$8 sps:$4 sm:$0xff]  }
 0x14c   : > { %3925 = vmatpush1.bf16.msra.mxu0 %v6073_v21  ;;  %3500 = vmatprep.subr.bf16.mxu1 %v6078_v22  ;;  %v6169_v21 = vld [vmem:[%s7815_s1 + $0xbe4] ss:$8 sps:$4 sm:$0xff]   ;;  %v6163_v22 = vld [vmem:[%s7815_s1 + $0x5e0] ss:$8 sps:$4 sm:$0xff]  }
 0x14d   : > { %3926 = vmatprep.subr.bf16.mxu0 %v6081_v23  ;;  %v6167_v23 = vld [vmem:[%s7815_s1 + $0xbe0] ss:$8 sps:$4 sm:$0xff]  }
 0x14e   : > { %3468 = vmatmul.mubr.bf16.gmra.mrb[4].mxu1 %v6128_v24  ;;  %v6172_v24 = vld [vmem:[%s7815_s1 + $0x5f4] ss:$8 sps:$4 sm:$0xff]  }
 0x14f   : > { %3894 = vmatmul.mubr.bf16.gmra.mrb[4].mxu0 %v6132_v25  ;;  %3501 = vmatpush1.bf16.msra.mxu1 %v6076_v26  ;;  %v6175_v25 = vld [vmem:[%s7815_s1 + $0xbf4] ss:$8 sps:$4 sm:$0xff]   ;;  %v6170_v26 = vld [vmem:[%s7815_s1 + $0x5f0] ss:$8 sps:$4 sm:$0xff]  }
 0x150   : > { %3927 = vmatpush1.bf16.msra.mxu0 %v6079_v27  ;;  %3502 = vmatprep.subr.bf16.mxu1 %v6084_v28  ;;  %v6173_v27 = vld [vmem:[%s7815_s1 + $0xbf0] ss:$8 sps:$4 sm:$0xff]   ;;  %v6184_v28 = vld [vmem:[%s7815_s1 + $0xc04] ss:$8 sps:$4 sm:$0xff]  }
 0x151   : > { %3928 = vmatprep.subr.bf16.mxu0 %v6087_v29  ;;  %3477 = vmatprep.mubr.bf16.mxu1 %v6142_v30  ;;  %v6176_v29 = vld [vmem:[%s6410_s5 + $0x28] ss:$100 sps:$4 sm:$0xff]   ;;  %v6179_v30 = vld [vmem:[%s6410_s5 + $0x58] ss:$100 sps:$4 sm:$0xff]  }
 0x152   : > { %3903 = vmatprep.mubr.bf16.mxu0 %v6144_v31  ;;  %v6182_v31 = vld [vmem:[%s7815_s1 + $0xc00] ss:$8 sps:$4 sm:$0xff]  }
 0x153   : > { %3503 = vmatpush1.bf16.msra.mxu1 %v6082_v32  ;;  %v6187_v32 = vld [vmem:[%s7815_s1 + $0xc14] ss:$8 sps:$4 sm:$0xff]  }
 0x154   : > { %3929 = vmatpush1.bf16.msra.mxu0 %v6085_v33  ;;  %3504 = vmatprep.subr.bf16.mxu1 %v6090_v34  ;;  %v6188_v33 = vld [vmem:[%s6410_s5 + $0xf4] ss:$100 sps:$4 sm:$0xff]   ;;  %v6190_v34 = vld [vmem:[%s6410_s5 + $0x124] ss:$100 sps:$4 sm:$0xff]  }
 0x155   : > { %3930 = vmatprep.subr.bf16.mxu0 %v6093_v35  ;;  %v6185_v35 = vld [vmem:[%s7815_s1 + $0xc10] ss:$8 sps:$4 sm:$0xff]  }
 0x156   : > { %3478 = vmatmul.mubr.bf16.gmra.mrb[8].mxu1 %v6146_v36  ;;  %v6196_v36 = vld [vmem:[%s7815_s1 + $0xc24] ss:$8 sps:$4 sm:$0xff]  }
 0x157   : > { %3904 = vmatmul.mubr.bf16.gmra.mrb[8].mxu0 %v6150_v37  ;;  %3505 = vmatpush1.bf16.msra.mxu1 %v6088_v40  ;;  %v6192_v37 = vld [vmem:[%s6410_s5 + $0xf0] ss:$100 sps:$4 sm:$0xff]  }
 0x158   : > { %3931 = vmatpush1.bf16.msra.mxu0 %v6091_v41  ;;  %3506 = vmatprep.subr.bf16.mxu1 %v6096_v42  ;;  %v6199_v40 = vld [vmem:[%s7815_s1 + $0xc34] ss:$8 sps:$4 sm:$0xff]   ;;  %v6202_v42 = vld [vmem:[%s6410_s5 + $0x1ec] ss:$100 sps:$4 sm:$0xff]  }
 0x159   : > { %3932 = vmatprep.subr.bf16.mxu0 %v6099_v43  ;;  %3487 = vmatprep.mubr.bf16.mxu1 %v4838_v44  ;;  %v6200_v41 = vld [vmem:[%s6410_s5 + $0x1bc] ss:$100 sps:$4 sm:$0xff]   ;;  %v6197_v43 = vld [vmem:[%s7815_s1 + $0xc30] ss:$8 sps:$4 sm:$0xff]   ;;  %v6208_v44 = vld [vmem:[%s7815_s1 + $0xc44] ss:$8 sps:$4 sm:$0xff]  }
 0x15a   : > { %3913 = vmatprep.mubr.bf16.mxu0 %v4850_v45  ;;  %v6204_v45 = vld [vmem:[%s6410_s5 + $0x1b8] ss:$100 sps:$4 sm:$0xff]  }
 0x15b   : > { %3507 = vmatpush1.bf16.msra.mxu1 %v6094_v46  ;;  %v6205_v46 = vld [vmem:[%s6410_s5 + $0x1e8] ss:$100 sps:$4 sm:$0xff]  }
 0x15c   : > { %3933 = vmatpush1.bf16.msra.mxu0 %v6097_v47  ;;  %3508 = vmatprep.subr.bf16.mxu1 %v6102_v48  ;;  %v255_v47 = vld [vmem:[%s6410_s5 + $0x280] sm:$0xff]  ;;  %v261_v48 = vld [vmem:[%s6410_s5 + $0x2b0] sm:$0xff] }
 0x15d   : > { %3934 = vmatprep.subr.bf16.mxu0 %v6105_v49  ;;  %v6206_v49 = vld [vmem:[%s7815_s1 + $0xc40] ss:$8 sps:$4 sm:$0xff]  }
 0x15e   : > { %3488 = vmatmul.mubr.bf16.gmra.mrb[12].mxu1 %v4837_v50  ;;  %v6211_v50 = vld [vmem:[%s7815_s1 + $0xc54] ss:$8 sps:$4 sm:$0xff]  }
 0x15f   : > { %3914 = vmatmul.mubr.bf16.gmra.mrb[12].mxu0 %v4849_v51  ;;  %3509 = vmatpush1.bf16.msra.mxu1 %v6100_v52  ;;  %v4840_v51 = vcombine.high %v255_v47, %v255_v47  ;;  %v4852_v52 = vcombine.high %v261_v48, %v261_v48 }
 0x160   : > { %3935 = vmatpush1.bf16.msra.mxu0 %v6103_v53  ;;  %3510 = vmatprep.subr.bf16.mxu1 %v6108_v54  ;;  %v6209_v53 = vld [vmem:[%s7815_s1 + $0xc50] ss:$8 sps:$4 sm:$0xff]   ;;  %v6218_v54 = vld [vmem:[%s7815_s1 + $0xc64] ss:$8 sps:$4 sm:$0xff]  }
 0x161   : > { %3936 = vmatprep.subr.bf16.mxu0 %v6111_v55  ;;  %3528 = vmatprep.mubr.bf16.mxu1 %v6178_v56  ;;  %v4839_v55 = vcombine.low %v255_v47, %v255_v47  ;;  %v4851_v56 = vcombine.low %v261_v48, %v261_v48 }
 0x162   : > { %3954 = vmatprep.mubr.bf16.mxu0 %v6181_v57  ;;  %v6216_v57 = vld [vmem:[%s7815_s1 + $0xc60] ss:$8 sps:$4 sm:$0xff]  }
 0x163   : > { %3511 = vmatpush1.bf16.msra.mxu1 %v6106_v58  ;;  %v6221_v58 = vld [vmem:[%s7815_s1 + $0xc74] ss:$8 sps:$4 sm:$0xff]  }
 0x164   : > { %3937 = vmatpush1.bf16.msra.mxu0 %v6109_v59  ;;  %3512 = vmatprep.subr.bf16.mxu1 %v6114_v60  ;;  %v6219_v59 = vld [vmem:[%s7815_s1 + $0xc70] ss:$8 sps:$4 sm:$0xff]   ;;  %v6234_v60 = vmov 0  }
 0x165   : > { %3938 = vmatprep.subr.bf16.mxu0 %v6117_v61  ;;  %v6222_v61 = vld [vmem:[%s6410_s5 + $0x60] ss:$100 sps:$4 sm:$0xff]  }
 0x167   : > { %3513 = vmatpush1.bf16.msra.mxu1 %v6112_v62  ;;  %v6223_v62 = vld [vmem:[%s6410_s5 + $0x1f0] ss:$100 sps:$4 sm:$0xff]  }
 0x168   : > { %3939 = vmatpush1.bf16.msra.mxu0 %v6115_v63  ;;  %3514 = vmatprep.subr.bf16.mxu1 %v6120_v0  ;;  %v6224_v63 = vld [vmem:[%s6410_s5 + $0x128] ss:$100 sps:$4 sm:$0xff]   ;;  %v6225_v0 = vld [vmem:[%s6410_s5 + $0x2b8] ss:$0 sps:$4 sm:$0xff]  }
 0x169   : > { %3940 = vmatprep.subr.bf16.mxu0 %v6123_v1 }
 0x16b   : > { %3515 = vmatpush1.bf16.msra.mxu1 %v6118_v2 }
 0x16c   : > { %3941 = vmatpush1.bf16.msra.mxu0 %v6121_v3  ;;  %3516 = vmatprep.subr.bf16.mxu1 %v6131_v4  ;;  %v665_v4 = vlaneseq }
 0x16d   : > { %3942 = vmatprep.subr.bf16.mxu0 %v6135_v5 }
 0x16f   : > { %3517 = vmatpush1.bf16.msra.mxu1 %v6129_v6  ;;  %v7565_v6 = vshrl.u32 %v665_v4, 7 }
 0x170   : > { %3943 = vmatpush1.bf16.msra.mxu0 %v6133_v7  ;;  %3518 = vmatprep.subr.bf16.mxu1 %v6138_v8 }
 0x171   : > { %3944 = vmatprep.subr.bf16.mxu0 %v6141_v9 }
 0x173   : > { %3519 = vmatpush1.bf16.msra.mxu1 %v6136_v10  ;;  %v7574_v10 = vsub.s32 0, %v7565_v6 }
 0x174   : > { %3945 = vmatpush1.bf16.msra.mxu0 %v6139_v11  ;;  %3520 = vmatprep.subr.bf16.mxu1 %v6149_v12  ;;  %v663_v12 = vld [vmem:[%s7816_s2] sm:$0x3] }
 0x175   : > { %3946 = vmatprep.subr.bf16.mxu0 %v6153_v13  ;;  %v7582_v13 = vsub.s32 1, %v7565_v6 }
 0x177   : > { %3521 = vmatpush1.bf16.msra.mxu1 %v6147_v14  ;;  %v7585_v14 = vrot.slane %v663_v12, %v7574_v10 }
 0x178   : > { %3947 = vmatpush1.bf16.msra.mxu0 %v6151_v15  ;;  %3522 = vmatprep.subr.bf16.mxu1 %v6156_v16  ;;  %v7588_v15 = vrot.slane %v663_v12, %v7582_v13 }
 0x179   : > { %3948 = vmatprep.subr.bf16.mxu0 %v6159_v17 }
 0x17b   : > { %3523 = vmatpush1.bf16.msra.mxu1 %v6154_v18 }
 0x17c   : > { %3949 = vmatpush1.bf16.msra.mxu0 %v6157_v19  ;;  %3524 = vmatprep.subr.bf16.mxu1 %v6165_v20 }
 0x17d   : > { %3950 = vmatprep.subr.bf16.mxu0 %v6169_v21 }
 0x17f   : > { %3525 = vmatpush1.bf16.msra.mxu1 %v6163_v22 }
 0x180   : > { %3951 = vmatpush1.bf16.msra.mxu0 %v6167_v23  ;;  %3526 = vmatprep.subr.bf16.mxu1 %v6172_v24 }
 0x181   : > { %3952 = vmatprep.subr.bf16.mxu0 %v6175_v25 }
 0x183   : > { %3527 = vmatpush1.bf16.msra.mxu1 %v6170_v26 }
 0x184   : > { %3953 = vmatpush1.bf16.msra.mxu0 %v6173_v27  ;;  %5259 = vmatprep.subr.bf16.mxu1 %v6184_v28 }
 0x185   : > { %3993 = vmatprep.subr.bf16.mxu0 %v6184_v28 }
 0x186   : > { %3529 = vmatmul.mubr.bf16.vlgmr.msra.gmra.mrb[0].mxu1 %v6176_v29 }
 0x187   : > { %3955 = vmatmul.mubr.bf16.vlgmr.msra.gmra.mrb[0].mxu0 %v6179_v30  ;;  %5267 = vmatpush1.bf16.msra.mxu1 %v6182_v31 }
 0x188   : > { %3994 = vmatpush1.bf16.msra.mxu0 %v6182_v31  ;;  %5260 = vmatprep.subr.bf16.mxu1 %v6187_v32 }
 0x189   : > { %3995 = vmatprep.subr.bf16.mxu0 %v6187_v32  ;;  %3538 = vmatprep.mubr.bf16.mxu1 %v6188_v33 }
 0x18a   : > { %3964 = vmatprep.mubr.bf16.mxu0 %v6190_v34 }
 0x18b   : > { %5268 = vmatpush1.bf16.msra.mxu1 %v6185_v35 }
 0x18c   : > { %3996 = vmatpush1.bf16.msra.mxu0 %v6185_v35  ;;  %5261 = vmatprep.subr.bf16.mxu1 %v6196_v36 }
 0x18d   : > { %3997 = vmatprep.subr.bf16.mxu0 %v6196_v36 }
 0x18e   : > { %3539 = vmatmul.mubr.bf16.gmra.mrb[4].mxu1 %v6192_v37  ;;  %v6235_v37 = vmov 1966171168  }
 0x18f   : > { %3965 = vmatmul.mubr.bf16.gmra.mrb[4].mxu0 %v6193_v38  ;;  %5269 = vmatpush1.bf16.msra.mxu1 %v6194_v39  ;;  %v4095_v38 = vunpack.c.l.s4 %v6235_v37 }
 0x190   : > { %3998 = vmatpush1.bf16.msra.mxu0 %v6194_v39  ;;  %5262 = vmatprep.subr.bf16.mxu1 %v6199_v40 }
 0x191   : > { %3999 = vmatprep.subr.bf16.mxu0 %v6199_v40  ;;  %3548 = vmatprep.mubr.bf16.mxu1 %v6200_v41 }
 0x192   : > { %3974 = vmatprep.mubr.bf16.mxu0 %v6202_v42 }
 0x193   : > { %5270 = vmatpush1.bf16.msra.mxu1 %v6197_v43 }
 0x194   : > { %4000 = vmatpush1.bf16.msra.mxu0 %v6197_v43  ;;  %5263 = vmatprep.subr.bf16.mxu1 %v6208_v44 }
 0x195   : > { %4001 = vmatprep.subr.bf16.mxu0 %v6208_v44 }
 0x196   : > { %3549 = vmatmul.mubr.bf16.gmra.mrb[8].mxu1 %v6204_v45 }
 0x197   : > { %3975 = vmatmul.mubr.bf16.gmra.mrb[8].mxu0 %v6205_v46  ;;  %5271 = vmatpush1.bf16.msra.mxu1 %v6206_v49  ;;  %v4096_v46 = vunpack.c.0.s8 %v4095_v38 }
 0x198   : > { %4002 = vmatpush1.bf16.msra.mxu0 %v6206_v49  ;;  %5264 = vmatprep.subr.bf16.mxu1 %v6211_v50 }
 0x199   : > { %4003 = vmatprep.subr.bf16.mxu0 %v6211_v50  ;;  %3558 = vmatprep.mubr.bf16.mxu1 %v4840_v51 }
 0x19a   : > { %3984 = vmatprep.mubr.bf16.mxu0 %v4852_v52 }
 0x19b   : > { %5272 = vmatpush1.bf16.msra.mxu1 %v6209_v53 }
 0x19c   : > { %4004 = vmatpush1.bf16.msra.mxu0 %v6209_v53  ;;  %5265 = vmatprep.subr.bf16.mxu1 %v6218_v54 }
 0x19d   : > { %4005 = vmatprep.subr.bf16.mxu0 %v6218_v54 }
 0x19e   : > { %3559 = vmatmul.mubr.bf16.gmra.mrb[12].mxu1 %v4839_v55 }
 0x19f   : > { %3985 = vmatmul.mubr.bf16.gmra.mrb[12].mxu0 %v4851_v56  ;;  %5273 = vmatpush1.bf16.msra.mxu1 %v6216_v57  ;;  %v7604_v56 = vsub.s32 %v4096_v46, %v7565_v6 }
 0x1a0   : > { %4006 = vmatpush1.bf16.msra.mxu0 %v6216_v57  ;;  %5266 = vmatprep.subr.bf16.mxu1 %v6221_v58 }
 0x1a1   : > { %4007 = vmatprep.subr.bf16.mxu0 %v6221_v58  ;;  %4025 = vmatprep.mubr.bf16.mxu0 %v6234_v60 }
 0x1a2   : > { %4045 = vmatprep.mubr.bf16.mxu1 %v6234_v60 }
 0x1a3   : > { %5274 = vmatpush1.bf16.msra.mxu1 %v6219_v59 }
 0x1a4   : > { %4008 = vmatpush1.bf16.msra.mxu0 %v6219_v59 }
 0x1a6   : > { %4046 = vmatmul.mubr.bf16.vlgmr.msra.gmra.mrb[16].mxu1 %v6223_v62 }
 0x1a7   : > { %4026 = vmatmul.mubr.bf16.vlgmr.msra.gmra.mrb[0].mxu0 %v6222_v61  ;;  %4055 = vmatprep.mubr.bf16.mxu1 %v6234_v60 }
 0x1a8   : > { %4035 = vmatprep.mubr.bf16.mxu0 %v6234_v60 }
 0x1ae   : > { %4056 = vmatmul.mubr.bf16.gmra.mrb[20].mxu1 %v6225_v0 }
 0x1af   : > { %4036 = vmatmul.mubr.bf16.gmra.mrb[4].mxu0 %v6224_v63 }
 0x259   : > { %v3530_v1 = vpop.f32.mrb[0].mxu1 }
 0x25a   : > { %v3532_v2 = vpop.f32.mrb[1].mxu1  ;;  %v5275_v47 = vadd.f32 %v3530_v1, %v7585_v14 }
 0x25b   : > { %v3534_v3 = vpop.f32.mrb[2].mxu1  ;;  %v5277_v48 = vadd.f32 %v3532_v2, %v7588_v15 }
 0x25c   : > { %v3536_v5 = vpop.f32.mrb[3].mxu1  ;;  %v5279_v51 = vadd.f32 %v3534_v3, %v7585_v14 }
 0x25d   : > { %v5281_v57 = vadd.f32 %v3536_v5, %v7588_v15 }
 0x261   : > { %v7567_v7 = vpop.f32.mrb[4].mxu1 }
 0x262   : > { %v7569_v8 = vpop.f32.mrb[5].mxu1 }
 0x263   : > { %v7571_v9 = vpop.f32.mrb[6].mxu1  ;;  %v5285_v46 = vadd.f32 %v7569_v8, %v7588_v15 }
 0x264   : > { %v7576_v11 = vpop.f32.mrb[7].mxu1 }
 0x269   : > { %v3550_v16 = vpop.f32.mrb[8].mxu1 }
 0x26a   : > { %v3976_v17 = vpop.f32.mrb[8].mxu0  ;;  %v5291_v18 = vadd.f32 %v3550_v16, %v7585_v14  ;;  %v3552_v19 = vpop.f32.mrb[9].mxu1 }
 0x26b   : > { %v3978_v20 = vpop.f32.mrb[9].mxu0  ;;  %v5294_v21 = vadd.f32 %v3552_v19, %v7588_v15  ;;  %v3554_v22 = vpop.f32.mrb[10].mxu1 }
 0x26c   : > { %v3980_v23 = vpop.f32.mrb[10].mxu0  ;;  %v5292_v24 = vadd.f32 %v5291_v18, %v3976_v17  ;;  %v5297_v25 = vadd.f32 %v3554_v22, %v7585_v14  ;;  %v3556_v26 = vpop.f32.mrb[11].mxu1 }
 0x26d   : > { %v3982_v27 = vpop.f32.mrb[11].mxu0  ;;  %v5295_v28 = vadd.f32 %v5294_v21, %v3978_v20  ;;  %v5300_v29 = vadd.f32 %v3556_v26, %v7588_v15 }
 0x26e   : > { %v5298_v30 = vadd.f32 %v5297_v25, %v3980_v23 }
 0x26f   : > { %v5301_v31 = vadd.f32 %v5300_v29, %v3982_v27 }
 0x271   : > { %v3560_v32 = vpop.f32.mrb[12].mxu1 }
 0x272   : > { %v3986_v33 = vpop.f32.mrb[12].mxu0  ;;  %v5303_v34 = vadd.f32 %v3560_v32, %v7585_v14  ;;  %v3562_v35 = vpop.f32.mrb[13].mxu1 }
 0x273   : > { %v3988_v36 = vpop.f32.mrb[13].mxu0  ;;  %v5306_v39 = vadd.f32 %v3562_v35, %v7588_v15  ;;  %v3564_v40 = vpop.f32.mrb[14].mxu1 }
 0x274   : > { %v3990_v41 = vpop.f32.mrb[14].mxu0  ;;  %v7596_v42 = vadd.f32 %v5303_v34, %v3986_v33  ;;  %v3565_v43 = vpop.f32.mrb[15].mxu1 }
 0x275   : > { %v3991_v44 = vpop.f32.mrb[15].mxu0  ;;  %v7598_v45 = vadd.f32 %v5306_v39, %v3988_v36 }
 0x276   : > { %v5283_v44 = vadd.f32 %v7567_v7, %v7585_v14 }
 0x279   : > { %v4047_v50 = vpop.f32.mrb[16].mxu1 }
 0x27a   : > { %v4027_v49 = vpop.f32.mrb[0].mxu0  ;;  %v5293_v53 = vadd.f32 %v5292_v24, %v4047_v50  ;;  %v4049_v55 = vpop.f32.mrb[17].mxu1 }
 0x27b   : > { %v5276_v52 = vadd.f32 %v5275_v47, %v4027_v49  ;;  %v4029_v54 = vpop.f32.mrb[1].mxu0  ;;  %v5296_v59 = vadd.f32 %v5295_v28, %v4049_v55  ;;  %v4051_v61 = vpop.f32.mrb[18].mxu1 }
 0x27c   : > { %v5278_v58 = vadd.f32 %v5277_v48, %v4029_v54  ;;  %v4031_v60 = vpop.f32.mrb[2].mxu0  ;;  %v4072_v63 = vmax.f32 %v5293_v53, 0.0  ;;  %v5299_v1 = vadd.f32 %v5298_v30, %v4051_v61  ;;  %v4053_v4 = vpop.f32.mrb[19].mxu1 }
 0x27d   : > { %v4064_v62 = vmax.f32 %v5276_v52, 0.0  ;;  %v5280_v0 = vadd.f32 %v5279_v51, %v4031_v60  ;;  %v4033_v2 = vpop.f32.mrb[3].mxu0  ;;  %v4073_v12 = vmax.f32 %v5296_v59, 0.0  ;;  %v5302_v17 = vadd.f32 %v5301_v31, %v4053_v4 }
 0x27e   : > { %v4065_v3 = vmax.f32 %v5278_v58, 0.0  ;;  %v5282_v16 = vadd.f32 %v5281_v57, %v4033_v2  ;;  %v4074_v19 = vmax.f32 %v5299_v1, 0.0  ;;  %v5287_v51 = vadd.f32 %v7571_v9, %v7585_v14 }
 0x27f   : > { %v4066_v18 = vmax.f32 %v5280_v0, 0.0  ;;  %v4292_v22 = vcombine.low %v4072_v63, %v4073_v12  ;;  %v4293_v5 = vcombine.high %v4072_v63, %v4073_v12  ;;  %v4075_v24 = vmax.f32 %v5302_v17, 0.0 }
 0x280   : > { %v4092_v20 = vcombine.low %v4064_v62, %v4065_v3  ;;  %v4093_v21 = vcombine.high %v4064_v62, %v4065_v3  ;;  %v4067_v23 = vmax.f32 %v5282_v16, 0.0 }
 0x281   : > { %v4300_v27 = vrot.slane %v4292_v22, %v7604_v56  ;;  %v7611_v28 = vrot.slane %v4293_v5, %v7604_v56  ;;  %v7613_v30 = vpop.f32.mrb[20].mxu1  ;;  %v4342_v33 = vcombine.low %v4074_v19, %v4075_v24  ;;  %v4343_v34 = vcombine.high %v4074_v19, %v4075_v24 }
 0x282   : > { %v4100_v25 = vrot.slane %v4092_v20, %v7604_v56  ;;  %v4107_v26 = vrot.slane %v4093_v21, %v7604_v56  ;;  %v4037_v29 = vpop.f32.mrb[4].mxu0  ;;  %v4142_v31 = vcombine.low %v4066_v18, %v4067_v23  ;;  %v4143_v32 = vcombine.high %v4066_v18, %v4067_v23  ;;  %v7617_v36 = vpop.f32.mrb[21].mxu1 }
 0x283   : > { %v7615_v35 = vpop.f32.mrb[5].mxu0  ;;  %v4061_v43 = vpop.f32.mrb[22].mxu1  ;;  %v4308_v47 = vcombine.high %v4300_v27, %v4300_v27  ;;  %v4309_v48 = vcombine.high %v7611_v28, %v7611_v28  ;;  %v7636_v54 = vrot.slane %v4300_v27, %v7604_v56  ;;  %v4350_v61 = vrot.slane %v4342_v33, %v7604_v56 }
 0x284   : > { %v4108_v37 = vcombine.high %v4100_v25, %v4100_v25  ;;  %v4109_v38 = vcombine.high %v4107_v26, %v4107_v26  ;;  %v4116_v39 = vrot.slane %v4100_v25, %v7604_v56  ;;  %v4123_v40 = vrot.slane %v4107_v26, %v7604_v56  ;;  %v7621_v41 = vpop.f32.mrb[6].mxu0  ;;  %v4062_v50 = vpop.f32.mrb[23].mxu1 }
 0x285   : > { %v4043_v49 = vpop.f32.mrb[7].mxu0  ;;  %v7639_v8 = vrot.slane %v4308_v47, %v7604_v56  ;;  %v7642_v57 = vrot.slane %v4309_v48, %v7604_v56  ;;  %v4150_v14 = vrot.slane %v4142_v31, %v7604_v56  ;;  %v4157_v59 = vrot.slane %v4143_v32, %v7604_v56 }
 0x286   : > { %v4130_v52 = vrot.slane %v4108_v37, %v7604_v56  ;;  %v7633_v53 = vrot.slane %v4109_v38, %v7604_v56  ;;  %v4138_v7 = vcombine.high %v4116_v39, %v4116_v39  ;;  %v4139_v55 = vcombine.high %v4123_v40, %v4123_v40 }
 0x287   : > { %v4341_v60 = vcombine.high %v7642_v57, %v7642_v57  ;;  %v4357_v62 = vrot.slane %v4343_v34, %v7604_v56  ;;  %v5284_v63 = vadd.f32 %v5283_v44, %v4037_v29  ;;  %v4158_v1 = vcombine.high %v4150_v14, %v4150_v14 }
 0x288   : > { %v4140_v58 = vcombine.high %v4130_v52, %v4130_v52  ;;  %v4141_v9 = vcombine.high %v7633_v53, %v7633_v53  ;;  %v4159_v2 = vcombine.high %v4157_v59, %v4157_v59  ;;  %v4166_v4 = vrot.slane %v4150_v14, %v7604_v56 }
 0x289   : > { %v4474_v3 = vmax.f32 %v7636_v54, %v4341_v60  ;;  %v7655_v12 = vrot.slane %v4157_v59, %v7604_v56  ;;  %v4358_v16 = vcombine.high %v4350_v61, %v4350_v61  ;;  %v4359_v17 = vcombine.high %v4357_v62, %v4357_v62 }
 0x28a   : > { %v4456_v0 = vmax.f32 %v4116_v39, %v4141_v9  ;;  %v4180_v18 = vrot.slane %v4158_v1, %v7604_v56  ;;  %v4187_v19 = vrot.slane %v4159_v2, %v7604_v56  ;;  %v4188_v20 = vcombine.high %v4166_v4, %v4166_v4 }
 0x28b   : > { %v4457_v21 = vmax.f32 %v4130_v52, %v4166_v4  ;;  %v7661_v22 = vcombine.high %v7655_v12, %v7655_v12  ;;  %v4461_v5 = vmax.f32 %v7633_v53, %v7655_v12  ;;  %v7666_v23 = vrot.slane %v4350_v61, %v7604_v56 }
 0x28c   : > { %v7669_v24 = vrot.slane %v4357_v62, %v7604_v56  ;;  %v4190_v25 = vcombine.high %v4180_v18, %v4180_v18  ;;  %v4191_v26 = vcombine.high %v4187_v19, %v4187_v19  ;;  %v4458_v27 = vmax.f32 %v4138_v7, %v4180_v18 }
 0x28d   : > { %v7671_v29 = vmax.f32 %v4140_v58, %v4188_v20  ;;  %v7673_v31 = vmax.f32 %v4139_v55, %v4187_v19  ;;  %v4477_v32 = vmax.f32 %v4456_v0, %v7661_v22  ;;  %v7677_v33 = vrot.slane %v4358_v16, %v7604_v56 }
 0x28e   : > { %v7680_v34 = vrot.slane %v4359_v17, %v7604_v56  ;;  %v5289_v37 = vadd.f32 %v7576_v11, %v7588_v15  ;;  %v4460_v38 = vmax.f32 %v4123_v40, %v4190_v25  ;;  %v4478_v39 = vmax.f32 %v4457_v21, %v4191_v26 }
 0x28f   : > { %v4389_v43 = vcombine.high %v7669_v24, %v7669_v24  ;;  %v7688_v44 = vcombine.high %v7636_v54, %v7636_v54  ;;  %v4475_v48 = vmax.f32 %v7639_v8, %v7666_v23  ;;  %v4068_v50 = vmax.f32 %v5284_v63, 0.0 }
 0x290   : > { %v4391_v47 = vcombine.high %v7680_v34, %v7680_v34  ;;  %v7694_v52 = vmax.f32 %v4477_v32, %v4478_v39  ;;  %v5305_v11 = vadd.f32 %v7596_v42, %v7613_v30  ;;  %v5286_v15 = vadd.f32 %v5285_v46, %v7615_v35 }
 0x291   : > { %v7696_v7 = vmax.f32 %v4474_v3, %v4389_v43  ;;  %v5308_v55 = vadd.f32 %v7598_v45, %v7617_v36  ;;  %v4476_v58 = vmax.f32 %v7688_v44, %v7677_v33  ;;  %v5288_v9 = vadd.f32 %v5287_v51, %v7621_v41 }
 0x292   : > { %v4496_v40 = vmax.f32 %v4475_v48, %v4391_v47  ;;  %v4076_v14 = vmax.f32 %v5305_v11, 0.0  ;;  %v4069_v59 = vmax.f32 %v5286_v15, 0.0  ;;  %v5290_v60 = vadd.f32 %v5289_v37, %v4043_v49 }
 0x293   : > { %v6236_v61 = vmov 1983009808   ;;  %v7710_v42 = vrot.slane %v7611_v28, %v7604_v56  ;;  %v4077_v30 = vmax.f32 %v5308_v55, 0.0  ;;  %v4070_v46 = vmax.f32 %v5288_v9, 0.0 }
 0x294   : > { %v7706_v62 = vunpack.c.l.s4 %v6236_v61  ;;  %v4506_v35 = vmax.f32 %v7696_v7, %v4496_v40  ;;  %v4192_v45 = vcombine.low %v4068_v50, %v4069_v59  ;;  %v4193_v36 = vcombine.high %v4068_v50, %v4069_v59 }
 0x295   : > { %v4071_v63 = vmax.f32 %v5290_v60, 0.0  ;;  %v4392_v0 = vcombine.low %v4076_v14, %v4077_v30  ;;  %v4339_v2 = vcombine.high %v7710_v42, %v7710_v42  ;;  %v4388_v19 = vcombine.high %v7666_v23, %v7666_v23 }
 0x296   : > { %v4200_v41 = vrot.slane %v4192_v45, %v7604_v56  ;;  %v4207_v51 = vrot.slane %v4193_v36, %v7604_v56  ;;  %v4652_v4 = vunpack.c.0.s8 %v7706_v62  ;;  %v4683_v62 = vld [vmem:[%s7770_s25] sm:$0xf] }
 0x297   : > { %v4242_v49 = vcombine.low %v4070_v46, %v4071_v63  ;;  %v4243_v1 = vcombine.high %v4070_v46, %v4071_v63  ;;  %v4399_v28 = vrot.slane %v4392_v0, %v7604_v56 }
 0x298   : > { %v4208_v3 = vcombine.high %v4200_v41, %v4200_v41  ;;  %v4209_v16 = vcombine.high %v4207_v51, %v4207_v51  ;;  %v4216_v17 = vrot.slane %v4200_v41, %v7604_v56  ;;  %v7721_v18 = vrot.slane %v4207_v51, %v7604_v56 }
 0x299   : > { %v4406_v20 = vrot.slane %v4399_v28, %v7604_v56  ;;  %v4250_v21 = vrot.slane %v4242_v49, %v7604_v56  ;;  %v4257_v25 = vrot.slane %v4243_v1, %v7604_v56 }
 0x29a   : > { %v4230_v32 = vrot.slane %v4208_v3, %v7604_v56  ;;  %v4237_v37 = vrot.slane %v4209_v16, %v7604_v56  ;;  %v4238_v39 = vcombine.high %v4216_v17, %v4216_v17  ;;  %v4239_v43 = vcombine.high %v7721_v18, %v7721_v18 }
 0x29b   : > { %v4479_v47 = vmax.f32 %v4458_v27, %v4216_v17  ;;  %v4483_v48 = vmax.f32 %v7673_v31, %v7721_v18  ;;  %v4497_v50 = vmax.f32 %v4476_v58, %v4406_v20  ;;  %v4258_v23 = vcombine.high %v4250_v21, %v4250_v21 }
 0x29c   : > { %v4241_v11 = vcombine.high %v4237_v37, %v4237_v37  ;;  %v4463_v15 = vmax.f32 %v7661_v22, %v4237_v37  ;;  %v4464_v40 = vmax.f32 %v4191_v26, %v4239_v43  ;;  %v4480_v55 = vmax.f32 %v7671_v29, %v4230_v32 }
 0x29d   : > { %v4481_v9 = vmax.f32 %v4460_v38, %v4238_v39  ;;  %v4507_v14 = vmax.f32 %v7694_v52, %v4479_v47  ;;  %v7737_v59 = vmax.f32 %v4506_v35, %v4497_v50  ;;  %v4240_v60 = vcombine.high %v4230_v32, %v4230_v32 }
 0x29e   : > { %v4465_v61 = vmax.f32 %v4216_v17, %v4241_v11  ;;  %v4499_v30 = vmax.f32 %v4479_v47, %v4480_v55  ;;  %v4259_v27 = vcombine.high %v4257_v25, %v4257_v25  ;;  %v4266_v46 = vrot.slane %v4250_v21, %v7604_v56 }
 0x29f   : > { %v4390_v31 = vcombine.high %v7677_v33, %v7677_v33  ;;  %v4273_v58 = vrot.slane %v4257_v25, %v7604_v56  ;;  %v4280_v22 = vrot.slane %v4258_v23, %v7604_v56  ;;  %v4340_v26 = vcombine.high %v7639_v8, %v7639_v8 }
 0x2a0   : > { %v4508_v29 = vmax.f32 %v4499_v30, %v4481_v9  ;;  %v4287_v38 = vrot.slane %v4259_v27, %v7604_v56  ;;  %v4288_v52 = vcombine.high %v4266_v46, %v4266_v46  ;;  %v4466_v35 = vmax.f32 %v4230_v32, %v4266_v46 }
 0x2a1   : > { %v4289_v45 = vcombine.high %v4273_v58, %v4273_v58  ;;  %v4290_v36 = vcombine.high %v4280_v22, %v4280_v22  ;;  %v4467_v63 = vmax.f32 %v4238_v39, %v4280_v22  ;;  %v4470_v0 = vmax.f32 %v4273_v58, %v4340_v26 }
 0x2a2   : > { %v4522_v41 = vcombine.low %v4507_v14, %v4508_v29  ;;  %v4291_v33 = vcombine.high %v4287_v38, %v4287_v38  ;;  %v4468_v51 = vmax.f32 %v4240_v60, %v4288_v52  ;;  %v4471_v49 = vmax.f32 %v4287_v38, %v7710_v42 }
 0x2a3   : > { %v4469_v1 = vmax.f32 %v7721_v18, %v4290_v36  ;;  %v4472_v28 = vmax.f32 %v4289_v45, %v7642_v57  ;;  %v4482_v3 = vmax.f32 %v4461_v5, %v4240_v60  ;;  %v4484_v16 = vmax.f32 %v4463_v15, %v4273_v58 }
 0x2a4   : > { %v4529_v17 = vrot.slane %v4522_v41, %v7604_v56  ;;  %v4473_v20 = vmax.f32 %v4291_v33, %v4339_v2  ;;  %v4485_v21 = vmax.f32 %v4464_v40, %v4287_v38  ;;  %v4486_v25 = vmax.f32 %v4465_v61, %v4289_v45 }
 0x2a5   : > { %v4487_v32 = vmax.f32 %v4466_v35, %v4291_v33  ;;  %v4488_v37 = vmax.f32 %v4467_v63, %v7636_v54  ;;  %v4489_v42 = vmax.f32 %v4468_v51, %v7639_v8  ;;  %v4490_v18 = vmax.f32 %v4469_v1, %v7688_v44  ;;  %v4686_v1 = vld [vmem:[%s7770_s25 + $0x4] sm:$0xf] }
 0x2a6   : > { %v4530_v39 = vcombine.high %v4529_v17, %v4529_v17  ;;  %v4491_v57 = vmax.f32 %v4470_v0, %v4388_v19  ;;  %v4492_v43 = vmax.f32 %v4471_v49, %v4390_v31  ;;  %v4493_v53 = vmax.f32 %v4472_v28, %v7669_v24 }
 0x2a7   : > { %v4494_v12 = vmax.f32 %v4473_v20, %v7680_v34  ;;  %v4500_v5 = vmax.f32 %v4481_v9, %v4482_v3  ;;  %v4501_v2 = vmax.f32 %v4484_v16, %v4485_v21  ;;  %v4537_v47 = vrot.slane %v4529_v17, %v7604_v56  ;;  %v4689_v3 = vld [vmem:[%s7770_s25 + $0x8] sm:$0xf] }
 0x2a8   : > { %v4502_v50 = vmax.f32 %v4486_v25, %v4487_v32  ;;  %v4503_v23 = vmax.f32 %v4488_v37, %v4489_v42  ;;  %v4504_v54 = vmax.f32 %v4491_v57, %v4492_v43  ;;  %v4544_v8 = vrot.slane %v4530_v39, %v7604_v56 }
 0x2a9   : > { %v4505_v11 = vmax.f32 %v4493_v53, %v4494_v12  ;;  %v4509_v44 = vmax.f32 %v4500_v5, %v4483_v48  ;;  %v4510_v15 = vmax.f32 %v4501_v2, %v4486_v25  ;;  %v4655_v14 = vsub.s32 %v4652_v4, %v7565_v6 }
 0x2aa   : > { %v4511_v19 = vmax.f32 %v4502_v50, %v4488_v37  ;;  %v4512_v40 = vmax.f32 %v4503_v23, %v4490_v18  ;;  %v4513_v55 = vmax.f32 %v4504_v54, %v4493_v53  ;;  %v4619_v26 = vrot.slane %v7737_v59, %v7574_v10 }
 0x2ab   : > { %v4514_v24 = vmax.f32 %v4505_v11, %v7696_v7  ;;  %v4603_v34 = vrot.slane %v4509_v44, %v7574_v10  ;;  %v4607_v9 = vrot.slane %v4509_v44, %v7582_v13  ;;  %v4623_v63 = vrot.slane %v7737_v59, %v7582_v13 }
 0x2ac   : > { %v4545_v48 = vcombine.low %v4510_v15, %v4511_v19  ;;  %v4611_v58 = vrot.slane %v4512_v40, %v7574_v10  ;;  %v4615_v35 = vrot.slane %v4512_v40, %v7582_v13 }
 0x2ad   : > { %v4568_v7 = vcombine.low %v4513_v55, %v4514_v24  ;;  %v4631_v60 = vsel %vm4630_vm3, %v4537_v47, %v4603_v34  ;;  %v4632_v61 = vsel %vm4630_vm3, %v4544_v8, %v4607_v9 }
 0x2ae   : > { %v4552_v30 = vrot.slane %v4545_v48, %v7604_v56  ;;  %v5254_v27 = vpack.c.bf16 %v4632_v61, %v4631_v60 }
 0x2af   : > { %v4575_v46 = vrot.slane %v4568_v7, %v7604_v56 }
 0x2b0   : > { %v4553_v6 = vcombine.high %v4552_v30, %v4552_v30  ;;  %v4560_v4 = vrot.slane %v4552_v30, %v7604_v56  ;;  %v4656_v22 = vrot.slane %v5254_v27, %v4655_v14 }
 0x2b1   : > { %v4576_v29 = vcombine.high %v4575_v46, %v4575_v46  ;;  %v4583_v38 = vrot.slane %v4575_v46, %v7604_v56 }
 0x2b2   : > { %v4567_v52 = vrot.slane %v4553_v6, %v7604_v56  ;;  %v4633_v45 = vsel %vm4630_vm3, %v4560_v4, %v4611_v58  ;;  %v4684_v36 = vsel %vm7781_vm6, %v4656_v22, %v4683_v62 }
 0x2b3   : > { %v4590_v10 = vrot.slane %v4576_v29, %v7604_v56  ;;  %v4635_v0 = vsel %vm4630_vm3, %v4583_v38, %v4619_v26  ;;  %4685 = vst [vmem:[%s7770_s25] sm:$0xf] %v4684_v36 }
 0x2b4   : > { %v4634_v41 = vsel %vm4630_vm3, %v4567_v52, %v4615_v35 }
 0x2b5   : > { %v4636_v33 = vsel %vm4630_vm3, %v4590_v10, %v4623_v63  ;;  %v5255_v51 = vpack.c.bf16 %v4634_v41, %v4633_v45 }
 0x2b6   : > { %v5256_v49 = vpack.c.bf16 %v4636_v33, %v4635_v0 }
 0x2b7   : > { %v4664_v28 = vrot.slane %v5255_v51, %v4655_v14 }
 0x2b8   : > { %v4672_v16 = vrot.slane %v5256_v49, %v4655_v14 }
 0x2b9   : > { %v4687_v17 = vsel %vm7781_vm6, %v4664_v28, %v4686_v1 }
 0x2ba   : > { %4688 = vst [vmem:[%s7770_s25 + $0x4] sm:$0xf] %v4687_v17  ;;  %v4690_v13 = vsel %vm7781_vm6, %v4672_v16, %v4689_v3 }
 0x2bb   : > { %4691 = vst [vmem:[%s7770_s25 + $0x8] sm:$0xf] %v4690_v13 }
 0x2bc PF: > { %s13_s12 = sadd.s32 1, %s6232_s12  }
 0x2bd   : > { %p10_p4 = scmp.ge.s32.totalorder %s13_s12, 4  }
 0x2bf   :  { %12 = sbr.rel (!%p10_p4) target bundleno = 1 (0x1), region = 62 }

// kernel: alexnet_forward.7
= control target key start
LH: loop header
LB: loop body
LE: loop exit
PB: predicated region body
PF: predicated region fallthrough
CT: control target
= control target key end

     0   :  { %s5630_s12 = smov 0   ;;  %s7093_s0 = inlined_call_operand.vmem [shape: bf16[2,16,2304], index: 0, kind: input, shape index: {}]   ;;  %s7094_s1 = inlined_call_operand.vmem [shape: bf16[2304,384], index: 1, kind: input, shape index: {}]   ;;  %s7095_s2 = inlined_call_operand.vmem [shape: f32[1,384], index: 2, kind: input, shape index: {}]   ;;  %s7096_s3 = inlined_call_operand.vmem [shape: bf16[2,3,3,384], index: 3, kind: output, shape index: {}]  }
   0x1 LB: > { %s4284_s13 = sadd.s32 4294967295, %s5606_s12   ;;  %p4288_p0 = scmp.ge.s32.totalorder %s5606_s12, 1  ;;  %s5606_s12 = sphi %s5630_s12, %s13_s12  }
   0x2   : > { %p137_p1 = scmp.lt.s32.totalorder %s5606_s12, 3 }
   0x4   : > { %p138_p2 = pnand %p4288_p0, %p137_p1 }
   0x5   : > { %v4993_v0 = vld [vmem:[%s7094_s1 + $0x4] ss:$12 sps:$4 sm:$0xff] (!%p138_p2)   ;;  %v4997_v2 = vld [vmem:[%s7094_s1] ss:$12 sps:$4 sm:$0xff] (!%p138_p2)   ;;  %v4999_v4 = vld [vmem:[%s7094_s1 + $0x1c] ss:$12 sps:$4 sm:$0xff] (!%p138_p2)  }
   0x6   : > { %141 = sbr.rel (%p138_p2) target bundleno = 700 (0x2bc), region = 32  ;;  %v4995_v1 = vld [vmem:[%s7094_s1 + $0x304] ss:$12 sps:$4 sm:$0xff] (!%p138_p2)   ;;  %3177 = vmatprep.subr.bf16.mxu1 (!%p138_p2), %v4993_v0  ;;  %v4998_v3 = vld [vmem:[%s7094_s1 + $0x300] ss:$12 sps:$4 sm:$0xff] (!%p138_p2)   ;;  %p161_p3 = scmp.lt.s32.totalorder (!%p138_p2), %s4284_s13, 1 }
   0x7   : > { %3263 = vmatprep.subr.bf16.mxu0 (!%p138_p2), %v4995_v1  ;;  %3178 = vmatpush1.bf16.msra.mxu1 (!%p138_p2), %v4997_v2  ;;  %v5001_v5 = vld [vmem:[%s7094_s1 + $0x31c] ss:$12 sps:$4 sm:$0xff] (!%p138_p2)   ;;  %v5003_v6 = vld [vmem:[%s7094_s1 + $0x18] ss:$12 sps:$4 sm:$0xff] (!%p138_p2)   ;;  %v5005_v8 = vld [vmem:[%s7094_s1 + $0x34] ss:$12 sps:$4 sm:$0xff] (!%p138_p2)  }
   0x8   : > { %3264 = vmatpush1.bf16.msra.mxu0 (!%p138_p2), %v4998_v3  ;;  %3179 = vmatprep.subr.bf16.mxu1 (!%p138_p2), %v4999_v4  ;;  %v5004_v7 = vld [vmem:[%s7094_s1 + $0x318] ss:$12 sps:$4 sm:$0xff] (!%p138_p2)   ;;  %v5007_v9 = vld [vmem:[%s7094_s1 + $0x334] ss:$12 sps:$4 sm:$0xff] (!%p138_p2)   ;;  %v5009_v10 = vld [vmem:[%s7094_s1 + $0x30] ss:$12 sps:$4 sm:$0xff] (!%p138_p2)  }
   0x9   : > { %3265 = vmatprep.subr.bf16.mxu0 (!%p138_p2), %v5001_v5  ;;  %v5010_v11 = vld [vmem:[%s7094_s1 + $0x330] ss:$12 sps:$4 sm:$0xff] (!%p138_p2)   ;;  %v5011_v12 = vld [vmem:[%s7094_s1 + $0x4c] ss:$12 sps:$4 sm:$0xff] (!%p138_p2)   ;;  %v5015_v14 = vld [vmem:[%s7094_s1 + $0x48] ss:$12 sps:$4 sm:$0xff] (!%p138_p2)  }
   0xa   : > { %v5013_v13 = vld [vmem:[%s7094_s1 + $0x34c] ss:$12 sps:$4 sm:$0xff] (!%p138_p2)   ;;  %v5016_v15 = vld [vmem:[%s7094_s1 + $0x348] ss:$12 sps:$4 sm:$0xff] (!%p138_p2)   ;;  %v5017_v16 = vld [vmem:[%s7094_s1 + $0x64] ss:$12 sps:$4 sm:$0xff] (!%p138_p2)  }
   0xb   : > { %3180 = vmatpush1.bf16.msra.mxu1 (!%p138_p2), %v5003_v6  ;;  %v5019_v17 = vld [vmem:[%s7094_s1 + $0x364] ss:$12 sps:$4 sm:$0xff] (!%p138_p2)   ;;  %v5021_v18 = vld [vmem:[%s7094_s1 + $0x60] ss:$12 sps:$4 sm:$0xff] (!%p138_p2)   ;;  %v5023_v20 = vld [vmem:[%s7094_s1 + $0x7c] ss:$12 sps:$4 sm:$0xff] (!%p138_p2)  }
   0xc   : > { %3266 = vmatpush1.bf16.msra.mxu0 (!%p138_p2), %v5004_v7  ;;  %3181 = vmatprep.subr.bf16.mxu1 (!%p138_p2), %v5005_v8  ;;  %v5022_v19 = vld [vmem:[%s7094_s1 + $0x360] ss:$12 sps:$4 sm:$0xff] (!%p138_p2)   ;;  %v5025_v21 = vld [vmem:[%s7094_s1 + $0x37c] ss:$12 sps:$4 sm:$0xff] (!%p138_p2)   ;;  %v5027_v22 = vld [vmem:[%s7094_s1 + $0x78] ss:$12 sps:$4 sm:$0xff] (!%p138_p2)  }
   0xd   : > { %3267 = vmatprep.subr.bf16.mxu0 %v5007_v9  ;;  %v5028_v23 = vld [vmem:[%s7094_s1 + $0x378] ss:$12 sps:$4 sm:$0xff]   ;;  %v5029_v24 = vld [vmem:[%s7094_s1 + $0x94] ss:$12 sps:$4 sm:$0xff]   ;;  %v5033_v26 = vld [vmem:[%s7094_s1 + $0x90] ss:$12 sps:$4 sm:$0xff]  }
   0xe   : > { %v5031_v25 = vld [vmem:[%s7094_s1 + $0x394] ss:$12 sps:$4 sm:$0xff]   ;;  %v5034_v27 = vld [vmem:[%s7094_s1 + $0x390] ss:$12 sps:$4 sm:$0xff]   ;;  %v5035_v28 = vld [vmem:[%s7094_s1 + $0xac] ss:$12 sps:$4 sm:$0xff]  }
   0xf   : > { %3182 = vmatpush1.bf16.msra.mxu1 %v5009_v10  ;;  %v5037_v29 = vld [vmem:[%s7094_s1 + $0x3ac] ss:$12 sps:$4 sm:$0xff]   ;;  %v5039_v30 = vld [vmem:[%s7094_s1 + $0xa8] ss:$12 sps:$4 sm:$0xff]   ;;  %v5041_v32 = vld [vmem:[%s7094_s1 + $0xc4] ss:$12 sps:$4 sm:$0xff]  }
  0x10   : > { %3268 = vmatpush1.bf16.msra.mxu0 %v5010_v11  ;;  %3183 = vmatprep.subr.bf16.mxu1 %v5011_v12  ;;  %v5040_v31 = vld [vmem:[%s7094_s1 + $0x3a8] ss:$12 sps:$4 sm:$0xff]   ;;  %v5043_v33 = vld [vmem:[%s7094_s1 + $0x3c4] ss:$12 sps:$4 sm:$0xff]   ;;  %v5045_v34 = vld [vmem:[%s7094_s1 + $0xc0] ss:$12 sps:$4 sm:$0xff]  }
  0x11   : > { %3269 = vmatprep.subr.bf16.mxu0 %v5013_v13  ;;  %v5046_v35 = vld [vmem:[%s7094_s1 + $0x3c0] ss:$12 sps:$4 sm:$0xff]   ;;  %v5047_v36 = vld [vmem:[%s7094_s1 + $0xdc] ss:$12 sps:$4 sm:$0xff]   ;;  %s7102_s13 = smov (!%p161_p3, %s4284_s13), 1  ;;  %vm4209_vm0 = vcmask 1041408  }
  0x12   : > { %v5049_v37 = vld [vmem:[%s7094_s1 + $0x3dc] ss:$12 sps:$4 sm:$0xff]   ;;  %v5051_v38 = vld [vmem:[%s7094_s1 + $0xd8] ss:$12 sps:$4 sm:$0xff]   ;;  %v5053_v40 = vld [vmem:[%s7094_s1 + $0xf4] ss:$12 sps:$4 sm:$0xff]  }
  0x13   : > { %3184 = vmatpush1.bf16.msra.mxu1 %v5015_v14  ;;  %v5052_v39 = vld [vmem:[%s7094_s1 + $0x3d8] ss:$12 sps:$4 sm:$0xff]   ;;  %s4981_s21 = smul.u32 144, %s7102_s13  ;;  %v5055_v41 = vld [vmem:[%s7094_s1 + $0x3f4] ss:$12 sps:$4 sm:$0xff]   ;;  %vm4212_vm2 = vcmask 1043458  }
  0x14   : > { %3270 = vmatpush1.bf16.msra.mxu0 %v5016_v15  ;;  %3185 = vmatprep.subr.bf16.mxu1 %v5017_v16  ;;  %v5057_v42 = vld [vmem:[%s7094_s1 + $0xf0] ss:$12 sps:$4 sm:$0xff]   ;;  %v5059_v44 = vld [vmem:[%s7094_s1 + $0x10c] ss:$12 sps:$4 sm:$0xff]   ;;  %v5063_v46 = vld [vmem:[%s7094_s1 + $0x108] ss:$12 sps:$4 sm:$0xff]  }
  0x15   : > { %3271 = vmatprep.subr.bf16.mxu0 %v5019_v17  ;;  %v5058_v43 = vld [vmem:[%s7094_s1 + $0x3f0] ss:$12 sps:$4 sm:$0xff]   ;;  %s5783_s5 = scalar_lea.vmem %s7093_s0, %s4981_s21  ;;  %v5061_v45 = vld [vmem:[%s7094_s1 + $0x40c] ss:$12 sps:$4 sm:$0xff]   ;;  %v5064_v47 = vld [vmem:[%s7094_s1 + $0x408] ss:$12 sps:$4 sm:$0xff]  }
  0x16   : > { %v5795_v48 = vld [vmem:[%s5783_s5 + $0x4] ss:$72 sps:$4 sm:$0xff]   ;;  %v5097_v51 = vld [vmem:[%s5783_s5 + $0x14] ss:$72 sps:$4 sm:$0xff]   ;;  %v5854_v4 = vld [vmem:[%s5783_s5] ss:$72 sps:$4 sm:$0xff]  }
  0x17   : > { %3186 = vmatpush1.bf16.msra.mxu1 %v5021_v18  ;;  %v5065_v49 = vld [vmem:[%s7094_s1 + $0x124] ss:$12 sps:$4 sm:$0xff]   ;;  %3209 = vmatprep.mubr.bf16.mxu1 %v5795_v48  ;;  %v5069_v52 = vld [vmem:[%s7094_s1 + $0x120] ss:$12 sps:$4 sm:$0xff]   ;;  %v5071_v54 = vld [vmem:[%s7094_s1 + $0x13c] ss:$12 sps:$4 sm:$0xff]  }
  0x18   : > { %3272 = vmatpush1.bf16.msra.mxu0 %v5022_v19  ;;  %3187 = vmatprep.subr.bf16.mxu1 %v5023_v20  ;;  %v5067_v50 = vld [vmem:[%s7094_s1 + $0x424] ss:$12 sps:$4 sm:$0xff]   ;;  %v5070_v53 = vld [vmem:[%s7094_s1 + $0x420] ss:$12 sps:$4 sm:$0xff]   ;;  %v5073_v55 = vld [vmem:[%s7094_s1 + $0x43c] ss:$12 sps:$4 sm:$0xff]  }
  0x19   : > { %3273 = vmatprep.subr.bf16.mxu0 %v5025_v21  ;;  %3295 = vmatprep.mubr.bf16.mxu0 %v5097_v51  ;;  %v5075_v56 = vld [vmem:[%s7094_s1 + $0x138] ss:$12 sps:$4 sm:$0xff]   ;;  %v5077_v58 = vld [vmem:[%s7094_s1 + $0x154] ss:$12 sps:$4 sm:$0xff]   ;;  %v5081_v60 = vld [vmem:[%s7094_s1 + $0x150] ss:$12 sps:$4 sm:$0xff]  }
  0x1a   : > { %v5076_v57 = vld [vmem:[%s7094_s1 + $0x438] ss:$12 sps:$4 sm:$0xff]   ;;  %v5079_v59 = vld [vmem:[%s7094_s1 + $0x454] ss:$12 sps:$4 sm:$0xff]   ;;  %v5082_v61 = vld [vmem:[%s7094_s1 + $0x450] ss:$12 sps:$4 sm:$0xff]  }
  0x1b   : > { %3188 = vmatpush1.bf16.msra.mxu1 %v5027_v22  ;;  %v5083_v62 = vld [vmem:[%s7094_s1 + $0x16c] ss:$12 sps:$4 sm:$0xff]   ;;  %v5087_v0 = vld [vmem:[%s7094_s1 + $0x168] ss:$12 sps:$4 sm:$0xff]   ;;  %v5094_v2 = vld [vmem:[%s7094_s1 + $0x184] ss:$12 sps:$4 sm:$0xff]  }
  0x1c   : > { %3274 = vmatpush1.bf16.msra.mxu0 %v5028_v23  ;;  %3189 = vmatprep.subr.bf16.mxu1 %v5029_v24  ;;  %v5085_v63 = vld [vmem:[%s7094_s1 + $0x46c] ss:$12 sps:$4 sm:$0xff]   ;;  %v5088_v1 = vld [vmem:[%s7094_s1 + $0x468] ss:$12 sps:$4 sm:$0xff]   ;;  %v5100_v3 = vld [vmem:[%s7094_s1 + $0x484] ss:$12 sps:$4 sm:$0xff]  }
  0x1d   : > { %3275 = vmatprep.subr.bf16.mxu0 %v5031_v25  ;;  %v5092_v5 = vld [vmem:[%s7094_s1 + $0x180] ss:$12 sps:$4 sm:$0xff]   ;;  %v5095_v6 = vld [vmem:[%s5783_s5 + $0x10] ss:$72 sps:$4 sm:$0xff]   ;;  %v5103_v8 = vld [vmem:[%s7094_s1 + $0x19c] ss:$12 sps:$4 sm:$0xff]  }
  0x1e   : > { %v5098_v7 = vld [vmem:[%s7094_s1 + $0x480] ss:$12 sps:$4 sm:$0xff]   ;;  %v5106_v9 = vld [vmem:[%s7094_s1 + $0x49c] ss:$12 sps:$4 sm:$0xff]   ;;  %v5101_v10 = vld [vmem:[%s7094_s1 + $0x198] ss:$12 sps:$4 sm:$0xff]  }
  0x1f   : > { %3190 = vmatpush1.bf16.msra.mxu1 %v5033_v26  ;;  %v5104_v11 = vld [vmem:[%s7094_s1 + $0x498] ss:$12 sps:$4 sm:$0xff]   ;;  %v5109_v12 = vld [vmem:[%s7094_s1 + $0x1b4] ss:$12 sps:$4 sm:$0xff]   ;;  %v5107_v14 = vld [vmem:[%s7094_s1 + $0x1b0] ss:$12 sps:$4 sm:$0xff]  }
  0x20   : > { %3276 = vmatpush1.bf16.msra.mxu0 %v5034_v27  ;;  %3191 = vmatprep.subr.bf16.mxu1 %v5035_v28  ;;  %v5112_v13 = vld [vmem:[%s7094_s1 + $0x4b4] ss:$12 sps:$4 sm:$0xff]   ;;  %v5110_v15 = vld [vmem:[%s7094_s1 + $0x4b0] ss:$12 sps:$4 sm:$0xff]   ;;  %v5115_v16 = vld [vmem:[%s7094_s1 + $0x1cc] ss:$12 sps:$4 sm:$0xff]  }
  0x21   : > { %3277 = vmatprep.subr.bf16.mxu0 %v5037_v29  ;;  %v5118_v17 = vld [vmem:[%s7094_s1 + $0x4cc] ss:$12 sps:$4 sm:$0xff]   ;;  %v5113_v18 = vld [vmem:[%s7094_s1 + $0x1c8] ss:$12 sps:$4 sm:$0xff]   ;;  %v5121_v20 = vld [vmem:[%s7094_s1 + $0x1e4] ss:$12 sps:$4 sm:$0xff]  }
  0x22   : > { %v5116_v19 = vld [vmem:[%s7094_s1 + $0x4c8] ss:$12 sps:$4 sm:$0xff]   ;;  %v5124_v21 = vld [vmem:[%s7094_s1 + $0x4e4] ss:$12 sps:$4 sm:$0xff]   ;;  %v5119_v22 = vld [vmem:[%s7094_s1 + $0x1e0] ss:$12 sps:$4 sm:$0xff]  }
  0x23   : > { %3192 = vmatpush1.bf16.msra.mxu1 %v5039_v30  ;;  %v5122_v23 = vld [vmem:[%s7094_s1 + $0x4e0] ss:$12 sps:$4 sm:$0xff]   ;;  %v5127_v24 = vld [vmem:[%s7094_s1 + $0x1fc] ss:$12 sps:$4 sm:$0xff]   ;;  %v5125_v26 = vld [vmem:[%s7094_s1 + $0x1f8] ss:$12 sps:$4 sm:$0xff]  }
  0x24   : > { %3278 = vmatpush1.bf16.msra.mxu0 %v5040_v31  ;;  %3193 = vmatprep.subr.bf16.mxu1 %v5041_v32  ;;  %v5130_v25 = vld [vmem:[%s7094_s1 + $0x4fc] ss:$12 sps:$4 sm:$0xff]   ;;  %v5128_v27 = vld [vmem:[%s7094_s1 + $0x4f8] ss:$12 sps:$4 sm:$0xff]   ;;  %v5133_v28 = vld [vmem:[%s7094_s1 + $0x214] ss:$12 sps:$4 sm:$0xff]  }
  0x25   : > { %3279 = vmatprep.subr.bf16.mxu0 %v5043_v33  ;;  %v5136_v29 = vld [vmem:[%s7094_s1 + $0x514] ss:$12 sps:$4 sm:$0xff]   ;;  %v5131_v30 = vld [vmem:[%s7094_s1 + $0x210] ss:$12 sps:$4 sm:$0xff]   ;;  %v5139_v32 = vld [vmem:[%s7094_s1 + $0x22c] ss:$12 sps:$4 sm:$0xff]  }
  0x26   : > { %v5134_v31 = vld [vmem:[%s7094_s1 + $0x510] ss:$12 sps:$4 sm:$0xff]   ;;  %v5142_v33 = vld [vmem:[%s7094_s1 + $0x52c] ss:$12 sps:$4 sm:$0xff]   ;;  %vm4210_vm1 = vsmask.f32 1280 }
  0x27   : > { %3194 = vmatpush1.bf16.msra.mxu1 %v5045_v34  ;;  %v5943_v34 = vld [vmem:[%s5783_s5 + $0xc] ss:$72 sps:$4 sm:$0xff]   ;;  %vm4213_vm3 = vsmask.f32 3328  ;;  %vm7065_vm4 = vmand %vm4209_vm0, %vm4210_vm1  ;;  %s4982_s15 = smul.u32 18, %s7102_s13  ;;  %vm4216_vm6 = vcmask 1045508  }
  0x28   : > { %3280 = vmatpush1.bf16.msra.mxu0 %v5046_v35  ;;  %3195 = vmatprep.subr.bf16.mxu1 %v5047_v36  ;;  %v5196_v35 = vld [vmem:[%s5783_s5 + $0x1c] ss:$72 sps:$4 sm:$0xff]   ;;  %v5137_v36 = vld [vmem:[%s7094_s1 + $0x228] ss:$12 sps:$4 sm:$0xff]   ;;  %v5163_v51 = vld [vmem:[%s7094_s1 + $0x28c] ss:$12 sps:$4 sm:$0xff]  }
  0x29   : > { %3281 = vmatprep.subr.bf16.mxu0 %v5049_v37  ;;  %v5140_v37 = vld [vmem:[%s7094_s1 + $0x528] ss:$12 sps:$4 sm:$0xff]   ;;  %vm7074_vm5 = vmand %vm4212_vm2, %vm4213_vm3  ;;  %vm4217_vm7 = vsmask.f32 5376 }
  0x2a   : > { %vm4215_vm8 = vmor %vm7074_vm5, %vm7065_vm4 }
  0x2b   : > { %3196 = vmatpush1.bf16.msra.mxu1 %v5051_v38  ;;  %v5145_v38 = vld [vmem:[%s7094_s1 + $0x244] ss:$12 sps:$4 sm:$0xff]   ;;  %vm4218_vm9 = vmand %vm4216_vm6, %vm4217_vm7 }
  0x2c   : > { %3282 = vmatpush1.bf16.msra.mxu0 %v5052_v39  ;;  %3197 = vmatprep.subr.bf16.mxu1 %v5053_v40  ;;  %v5148_v39 = vld [vmem:[%s7094_s1 + $0x544] ss:$12 sps:$4 sm:$0xff]   ;;  %v5143_v40 = vld [vmem:[%s7094_s1 + $0x240] ss:$12 sps:$4 sm:$0xff]   ;;  %vm4219_vm10 = vmor %vm4218_vm9, %vm4215_vm8 }
  0x2d   : > { %3283 = vmatprep.subr.bf16.mxu0 %v5055_v41  ;;  %v5146_v41 = vld [vmem:[%s7094_s1 + $0x540] ss:$12 sps:$4 sm:$0xff]  }
  0x2f   : > { %3198 = vmatpush1.bf16.msra.mxu1 %v5057_v42  ;;  %v5151_v42 = vld [vmem:[%s7094_s1 + $0x25c] ss:$12 sps:$4 sm:$0xff]  }
  0x30   : > { %3284 = vmatpush1.bf16.msra.mxu0 %v5058_v43  ;;  %3199 = vmatprep.subr.bf16.mxu1 %v5059_v44  ;;  %v5154_v43 = vld [vmem:[%s7094_s1 + $0x55c] ss:$12 sps:$4 sm:$0xff]   ;;  %v5149_v44 = vld [vmem:[%s7094_s1 + $0x258] ss:$12 sps:$4 sm:$0xff]  }
  0x31   : > { %3285 = vmatprep.subr.bf16.mxu0 %v5061_v45  ;;  %v5152_v45 = vld [vmem:[%s7094_s1 + $0x558] ss:$12 sps:$4 sm:$0xff]  }
  0x33   : > { %3200 = vmatpush1.bf16.msra.mxu1 %v5063_v46  ;;  %v5157_v46 = vld [vmem:[%s7094_s1 + $0x274] ss:$12 sps:$4 sm:$0xff]  }
  0x34   : > { %3286 = vmatpush1.bf16.msra.mxu0 %v5064_v47  ;;  %3201 = vmatprep.subr.bf16.mxu1 %v5065_v49  ;;  %v5160_v47 = vld [vmem:[%s7094_s1 + $0x574] ss:$12 sps:$4 sm:$0xff]   ;;  %v5155_v49 = vld [vmem:[%s7094_s1 + $0x270] ss:$12 sps:$4 sm:$0xff]  }
  0x35   : > { %3287 = vmatprep.subr.bf16.mxu0 %v5067_v50  ;;  %v5158_v50 = vld [vmem:[%s7094_s1 + $0x570] ss:$12 sps:$4 sm:$0xff]  }
  0x37   : > { %3202 = vmatpush1.bf16.msra.mxu1 %v5069_v52  ;;  %v5166_v52 = vld [vmem:[%s7094_s1 + $0x58c] ss:$12 sps:$4 sm:$0xff]  }
  0x38   : > { %3288 = vmatpush1.bf16.msra.mxu0 %v5070_v53  ;;  %3203 = vmatprep.subr.bf16.mxu1 %v5071_v54  ;;  %v5161_v53 = vld [vmem:[%s7094_s1 + $0x288] ss:$12 sps:$4 sm:$0xff]  }
  0x39   : > { %3289 = vmatprep.subr.bf16.mxu0 %v5073_v55  ;;  %v5164_v54 = vld [vmem:[%s7094_s1 + $0x588] ss:$12 sps:$4 sm:$0xff]   ;;  %v5169_v55 = vld [vmem:[%s7094_s1 + $0x2a4] ss:$12 sps:$4 sm:$0xff]  }
  0x3b   : > { %3204 = vmatpush1.bf16.msra.mxu1 %v5075_v56  ;;  %v5172_v56 = vld [vmem:[%s7094_s1 + $0x5a4] ss:$12 sps:$4 sm:$0xff]  }
  0x3c   : > { %3290 = vmatpush1.bf16.msra.mxu0 %v5076_v57  ;;  %3205 = vmatprep.subr.bf16.mxu1 %v5077_v58  ;;  %v5167_v57 = vld [vmem:[%s7094_s1 + $0x2a0] ss:$12 sps:$4 sm:$0xff]  }
  0x3d   : > { %3291 = vmatprep.subr.bf16.mxu0 %v5079_v59  ;;  %v5170_v58 = vld [vmem:[%s7094_s1 + $0x5a0] ss:$12 sps:$4 sm:$0xff]   ;;  %v5175_v59 = vld [vmem:[%s7094_s1 + $0x2bc] ss:$12 sps:$4 sm:$0xff]  }
  0x3f   : > { %3206 = vmatpush1.bf16.msra.mxu1 %v5081_v60  ;;  %v5178_v60 = vld [vmem:[%s7094_s1 + $0x5bc] ss:$12 sps:$4 sm:$0xff]  }
  0x40   : > { %3292 = vmatpush1.bf16.msra.mxu0 %v5082_v61  ;;  %3207 = vmatprep.subr.bf16.mxu1 %v5083_v62  ;;  %v5173_v61 = vld [vmem:[%s7094_s1 + $0x2b8] ss:$12 sps:$4 sm:$0xff]  }
  0x41   : > { %3293 = vmatprep.subr.bf16.mxu0 %v5085_v63  ;;  %v5176_v62 = vld [vmem:[%s7094_s1 + $0x5b8] ss:$12 sps:$4 sm:$0xff]   ;;  %v5181_v63 = vld [vmem:[%s7094_s1 + $0x2d4] ss:$12 sps:$4 sm:$0xff]  }
  0x43   : > { %3208 = vmatpush1.bf16.msra.mxu1 %v5087_v0  ;;  %v5184_v0 = vld [vmem:[%s7094_s1 + $0x5d4] ss:$12 sps:$4 sm:$0xff]  }
  0x44   : > { %3294 = vmatpush1.bf16.msra.mxu0 %v5088_v1  ;;  %3220 = vmatprep.subr.bf16.mxu1 %v5094_v2  ;;  %v5179_v1 = vld [vmem:[%s7094_s1 + $0x2d0] ss:$12 sps:$4 sm:$0xff]  }
  0x45   : > { %3306 = vmatprep.subr.bf16.mxu0 %v5100_v3  ;;  %v5182_v2 = vld [vmem:[%s7094_s1 + $0x5d0] ss:$12 sps:$4 sm:$0xff]   ;;  %v5187_v3 = vld [vmem:[%s7094_s1 + $0x2ec] ss:$12 sps:$4 sm:$0xff]  }
  0x46   : > { %3210 = vmatmul.mubr.bf16.vlgmr.msra.gmra.mrb[0].mxu1 %v5854_v4 }
  0x47   : > { %3296 = vmatmul.mubr.bf16.vlgmr.msra.gmra.mrb[0].mxu0 %v5095_v6  ;;  %3221 = vmatpush1.bf16.msra.mxu1 %v5092_v5  ;;  %v5190_v5 = vld [vmem:[%s7094_s1 + $0x5ec] ss:$12 sps:$4 sm:$0xff]   ;;  %v5185_v6 = vld [vmem:[%s7094_s1 + $0x2e8] ss:$12 sps:$4 sm:$0xff]  }
  0x48   : > { %3307 = vmatpush1.bf16.msra.mxu0 %v5098_v7  ;;  %3222 = vmatprep.subr.bf16.mxu1 %v5103_v8  ;;  %v5188_v7 = vld [vmem:[%s7094_s1 + $0x5e8] ss:$12 sps:$4 sm:$0xff]   ;;  %v5199_v8 = vld [vmem:[%s7094_s1 + $0x604] ss:$12 sps:$4 sm:$0xff]  }
  0x49   : > { %3308 = vmatprep.subr.bf16.mxu0 %v5106_v9  ;;  %3252 = vmatprep.mubr.bf16.mxu1 %v5943_v34  ;;  %v6053_v9 = vld [vmem:[%s5783_s5 + $0x8] ss:$72 sps:$4 sm:$0xff]  }
  0x4a   : > { %3338 = vmatprep.mubr.bf16.mxu0 %v5196_v35  ;;  %v5229_v35 = vld [vmem:[%s7094_s1 + $0x694] ss:$12 sps:$4 sm:$0xff]  }
  0x4b   : > { %3223 = vmatpush1.bf16.msra.mxu1 %v5101_v10  ;;  %v5200_v10 = vld [vmem:[%s7094_s1 + $0xc8] ss:$12 sps:$4 sm:$0xff]  }
  0x4c   : > { %3309 = vmatpush1.bf16.msra.mxu0 %v5104_v11  ;;  %3224 = vmatprep.subr.bf16.mxu1 %v5109_v12  ;;  %v5194_v11 = vld [vmem:[%s5783_s5 + $0x18] ss:$72 sps:$4 sm:$0xff]  }
  0x4d   : > { %3310 = vmatprep.subr.bf16.mxu0 %v5112_v13  ;;  %v5197_v12 = vld [vmem:[%s7094_s1 + $0x600] ss:$12 sps:$4 sm:$0xff]   ;;  %v5201_v13 = vld [vmem:[%s7094_s1 + $0x8] ss:$12 sps:$4 sm:$0xff]  }
  0x4f   : > { %3225 = vmatpush1.bf16.msra.mxu1 %v5107_v14  ;;  %v5204_v14 = vld [vmem:[%s7094_s1 + $0x61c] ss:$12 sps:$4 sm:$0xff]  }
  0x50   : > { %3311 = vmatpush1.bf16.msra.mxu0 %v5110_v15  ;;  %3226 = vmatprep.subr.bf16.mxu1 %v5115_v16  ;;  %v5205_v15 = vld [vmem:[%s7094_s1 + $0xe0] ss:$12 sps:$4 sm:$0xff]   ;;  %v5202_v16 = vld [vmem:[%s7094_s1 + $0x618] ss:$12 sps:$4 sm:$0xff]  }
  0x51   : > { %3312 = vmatprep.subr.bf16.mxu0 %v5118_v17  ;;  %v5206_v17 = vld [vmem:[%s7094_s1 + $0x20] ss:$12 sps:$4 sm:$0xff]  }
  0x53   : > { %3227 = vmatpush1.bf16.msra.mxu1 %v5113_v18  ;;  %v5209_v18 = vld [vmem:[%s7094_s1 + $0x634] ss:$12 sps:$4 sm:$0xff]  }
  0x54   : > { %3313 = vmatpush1.bf16.msra.mxu0 %v5116_v19  ;;  %3228 = vmatprep.subr.bf16.mxu1 %v5121_v20  ;;  %v5210_v19 = vld [vmem:[%s7094_s1 + $0xf8] ss:$12 sps:$4 sm:$0xff]   ;;  %v5207_v20 = vld [vmem:[%s7094_s1 + $0x630] ss:$12 sps:$4 sm:$0xff]  }
  0x55   : > { %3314 = vmatprep.subr.bf16.mxu0 %v5124_v21  ;;  %v5211_v21 = vld [vmem:[%s7094_s1 + $0x38] ss:$12 sps:$4 sm:$0xff]  }
  0x57   : > { %3229 = vmatpush1.bf16.msra.mxu1 %v5119_v22  ;;  %v5214_v22 = vld [vmem:[%s7094_s1 + $0x64c] ss:$12 sps:$4 sm:$0xff]  }
  0x58   : > { %3315 = vmatpush1.bf16.msra.mxu0 %v5122_v23  ;;  %3230 = vmatprep.subr.bf16.mxu1 %v5127_v24  ;;  %v5215_v23 = vld [vmem:[%s7094_s1 + $0x110] ss:$12 sps:$4 sm:$0xff]  }
  0x59   : > { %3316 = vmatprep.subr.bf16.mxu0 %v5130_v25  ;;  %v5216_v24 = vld [vmem:[%s7094_s1 + $0x50] ss:$12 sps:$4 sm:$0xff]  }
  0x5a   : > { %v5219_v25 = vld [vmem:[%s7094_s1 + $0x664] ss:$12 sps:$4 sm:$0xff]  }
  0x5b   : > { %3231 = vmatpush1.bf16.msra.mxu1 %v5125_v26  ;;  %v5220_v26 = vld [vmem:[%s7094_s1 + $0x128] ss:$12 sps:$4 sm:$0xff]  }
  0x5c   : > { %3317 = vmatpush1.bf16.msra.mxu0 %v5128_v27  ;;  %3232 = vmatprep.subr.bf16.mxu1 %v5133_v28  ;;  %v5217_v27 = vld [vmem:[%s7094_s1 + $0x660] ss:$12 sps:$4 sm:$0xff]   ;;  %v5221_v28 = vld [vmem:[%s7094_s1 + $0x68] ss:$12 sps:$4 sm:$0xff]  }
  0x5d   : > { %3318 = vmatprep.subr.bf16.mxu0 %v5136_v29  ;;  %v5224_v29 = vld [vmem:[%s7094_s1 + $0x67c] ss:$12 sps:$4 sm:$0xff]  }
  0x5f   : > { %3233 = vmatpush1.bf16.msra.mxu1 %v5131_v30  ;;  %v5225_v30 = vld [vmem:[%s7094_s1 + $0x140] ss:$12 sps:$4 sm:$0xff]  }
  0x60   : > { %3319 = vmatpush1.bf16.msra.mxu0 %v5134_v31  ;;  %3234 = vmatprep.subr.bf16.mxu1 %v5139_v32  ;;  %v6122_v31 = vld [vmem:[%s5783_s5 + $0x24] ss:$72 sps:$4 sm:$0xff]  }
  0x61   : > { %3320 = vmatprep.subr.bf16.mxu0 %v5142_v33  ;;  %v5222_v32 = vld [vmem:[%s7094_s1 + $0x678] ss:$12 sps:$4 sm:$0xff]   ;;  %v5226_v33 = vld [vmem:[%s7094_s1 + $0x80] ss:$12 sps:$4 sm:$0xff]  }
  0x63   : > { %3235 = vmatpush1.bf16.msra.mxu1 %v5137_v36  ;;  %v5230_v36 = vld [vmem:[%s7094_s1 + $0x158] ss:$12 sps:$4 sm:$0xff]  }
  0x64   : > { %3321 = vmatpush1.bf16.msra.mxu0 %v5140_v37  ;;  %3236 = vmatprep.subr.bf16.mxu1 %v5145_v38  ;;  %v5227_v37 = vld [vmem:[%s7094_s1 + $0x690] ss:$12 sps:$4 sm:$0xff]   ;;  %v5231_v38 = vld [vmem:[%s7094_s1 + $0x98] ss:$12 sps:$4 sm:$0xff]  }
  0x65   : > { %3322 = vmatprep.subr.bf16.mxu0 %v5148_v39  ;;  %v5234_v39 = vld [vmem:[%s7094_s1 + $0x6ac] ss:$12 sps:$4 sm:$0xff]  }
  0x67   : > { %3237 = vmatpush1.bf16.msra.mxu1 %v5143_v40  ;;  %v5235_v40 = vld [vmem:[%s7094_s1 + $0x170] ss:$12 sps:$4 sm:$0xff]  }
  0x68   : > { %3323 = vmatpush1.bf16.msra.mxu0 %v5146_v41  ;;  %3238 = vmatprep.subr.bf16.mxu1 %v5151_v42  ;;  %v5232_v41 = vld [vmem:[%s7094_s1 + $0x6a8] ss:$12 sps:$4 sm:$0xff]   ;;  %v5236_v42 = vld [vmem:[%s7094_s1 + $0xb0] ss:$12 sps:$4 sm:$0xff]  }
  0x69   : > { %3324 = vmatprep.subr.bf16.mxu0 %v5154_v43  ;;  %v5239_v43 = vld [vmem:[%s7094_s1 + $0x6c4] ss:$12 sps:$4 sm:$0xff]  }
  0x6b   : > { %3239 = vmatpush1.bf16.msra.mxu1 %v5149_v44  ;;  %v5240_v44 = vld [vmem:[%s7094_s1 + $0x248] ss:$12 sps:$4 sm:$0xff]  }
  0x6c   : > { %3325 = vmatpush1.bf16.msra.mxu0 %v5152_v45  ;;  %3240 = vmatprep.subr.bf16.mxu1 %v5157_v46  ;;  %v5237_v45 = vld [vmem:[%s7094_s1 + $0x6c0] ss:$12 sps:$4 sm:$0xff]   ;;  %v5241_v46 = vld [vmem:[%s7094_s1 + $0x188] ss:$12 sps:$4 sm:$0xff]  }
  0x6d   : > { %3326 = vmatprep.subr.bf16.mxu0 %v5160_v47  ;;  %v5244_v47 = vld [vmem:[%s7094_s1 + $0x6dc] ss:$12 sps:$4 sm:$0xff]  }
  0x6f   : > { %3241 = vmatpush1.bf16.msra.mxu1 %v5155_v49  ;;  %v5245_v49 = vld [vmem:[%s7094_s1 + $0x260] ss:$12 sps:$4 sm:$0xff]  }
  0x70   : > { %3327 = vmatpush1.bf16.msra.mxu0 %v5158_v50  ;;  %3242 = vmatprep.subr.bf16.mxu1 %v5163_v51  ;;  %v5242_v50 = vld [vmem:[%s7094_s1 + $0x6d8] ss:$12 sps:$4 sm:$0xff]   ;;  %v5246_v51 = vld [vmem:[%s7094_s1 + $0x1a0] ss:$12 sps:$4 sm:$0xff]  }
  0x71   : > { %3328 = vmatprep.subr.bf16.mxu0 %v5166_v52  ;;  %v5249_v52 = vld [vmem:[%s7094_s1 + $0x6f4] ss:$12 sps:$4 sm:$0xff]  }
  0x73   : > { %3243 = vmatpush1.bf16.msra.mxu1 %v5161_v53  ;;  %v5250_v53 = vld [vmem:[%s7094_s1 + $0x278] ss:$12 sps:$4 sm:$0xff]  }
  0x74   : > { %3329 = vmatpush1.bf16.msra.mxu0 %v5164_v54  ;;  %3244 = vmatprep.subr.bf16.mxu1 %v5169_v55  ;;  %v5251_v54 = vld [vmem:[%s7094_s1 + $0x1b8] ss:$12 sps:$4 sm:$0xff]  }
  0x75   : > { %3330 = vmatprep.subr.bf16.mxu0 %v5172_v56  ;;  %v5254_v55 = vld [vmem:[%s7094_s1 + $0x70c] ss:$12 sps:$4 sm:$0xff]   ;;  %v5252_v56 = vld [vmem:[%s7094_s1 + $0x708] ss:$12 sps:$4 sm:$0xff]  }
  0x77   : > { %3245 = vmatpush1.bf16.msra.mxu1 %v5167_v57  ;;  %v5256_v57 = vld [vmem:[%s7094_s1 + $0x1d0] ss:$12 sps:$4 sm:$0xff]  }
  0x78   : > { %3331 = vmatpush1.bf16.msra.mxu0 %v5170_v58  ;;  %3246 = vmatprep.subr.bf16.mxu1 %v5175_v59  ;;  %v5259_v58 = vld [vmem:[%s7094_s1 + $0x724] ss:$12 sps:$4 sm:$0xff]   ;;  %v5260_v59 = vld [vmem:[%s7094_s1 + $0x2a8] ss:$12 sps:$4 sm:$0xff]  }
  0x79   : > { %3332 = vmatprep.subr.bf16.mxu0 %v5178_v60  ;;  %v5257_v60 = vld [vmem:[%s7094_s1 + $0x720] ss:$12 sps:$4 sm:$0xff]  }
  0x7b   : > { %3247 = vmatpush1.bf16.msra.mxu1 %v5173_v61  ;;  %v5261_v61 = vld [vmem:[%s7094_s1 + $0x1e8] ss:$12 sps:$4 sm:$0xff]  }
  0x7c   : > { %3333 = vmatpush1.bf16.msra.mxu0 %v5176_v62  ;;  %3248 = vmatprep.subr.bf16.mxu1 %v5181_v63  ;;  %v5264_v62 = vld [vmem:[%s7094_s1 + $0x73c] ss:$12 sps:$4 sm:$0xff]   ;;  %v5265_v63 = vld [vmem:[%s7094_s1 + $0x2c0] ss:$12 sps:$4 sm:$0xff]  }
  0x7d   : > { %3334 = vmatprep.subr.bf16.mxu0 %v5184_v0  ;;  %v5262_v0 = vld [vmem:[%s7094_s1 + $0x738] ss:$12 sps:$4 sm:$0xff]  }
  0x7f   : > { %3249 = vmatpush1.bf16.msra.mxu1 %v5179_v1  ;;  %v5266_v1 = vld [vmem:[%s7094_s1 + $0x200] ss:$12 sps:$4 sm:$0xff]  }
  0x80   : > { %3335 = vmatpush1.bf16.msra.mxu0 %v5182_v2  ;;  %3250 = vmatprep.subr.bf16.mxu1 %v5187_v3  ;;  %v5269_v2 = vld [vmem:[%s7094_s1 + $0x754] ss:$12 sps:$4 sm:$0xff]   ;;  %v5270_v3 = vld [vmem:[%s7094_s1 + $0x2d8] ss:$12 sps:$4 sm:$0xff]  }
  0x81   : > { %3336 = vmatprep.subr.bf16.mxu0 %v5190_v5  ;;  %v5267_v5 = vld [vmem:[%s7094_s1 + $0x750] ss:$12 sps:$4 sm:$0xff]  }
  0x83   : > { %3251 = vmatpush1.bf16.msra.mxu1 %v5185_v6  ;;  %v5271_v6 = vld [vmem:[%s7094_s1 + $0x218] ss:$12 sps:$4 sm:$0xff]  }
  0x84   : > { %3337 = vmatpush1.bf16.msra.mxu0 %v5188_v7  ;;  %4747 = vmatprep.subr.bf16.mxu1 %v5200_v10  ;;  %v5274_v7 = vld [vmem:[%s7094_s1 + $0x76c] ss:$12 sps:$4 sm:$0xff]   ;;  %v5272_v10 = vld [vmem:[%s7094_s1 + $0x768] ss:$12 sps:$4 sm:$0xff]  }
  0x85   : > { %3349 = vmatprep.subr.bf16.mxu0 %v5199_v8  ;;  %v5275_v8 = vld [vmem:[%s7094_s1 + $0x2f0] ss:$12 sps:$4 sm:$0xff]  }
  0x86   : > { %3253 = vmatmul.mubr.bf16.vlgmr.msra.gmra.mrb[0].mxu1 %v6053_v9 }
  0x87   : > { %3339 = vmatmul.mubr.bf16.vlgmr.msra.gmra.mrb[0].mxu0 %v5194_v11  ;;  %4748 = vmatpush3.bf16.msra.mxu1 %v5201_v13  ;;  %v5276_v11 = vld [vmem:[%s7094_s1 + $0x230] ss:$12 sps:$4 sm:$0xff]  }
  0x88   : > { %3350 = vmatpush1.bf16.msra.mxu0 %v5197_v12  ;;  %4749 = vmatprep.subr.bf16.mxu1 %v5205_v15  ;;  %v6254_v12 = vld [vmem:[%s5783_s5 + $0x20] ss:$72 sps:$4 sm:$0xff]   ;;  %v5282_v13 = vld [vmem:[%s7094_s1 + $0x784] ss:$12 sps:$4 sm:$0xff]  }
  0x89   : > { %3351 = vmatprep.subr.bf16.mxu0 %v5204_v14  ;;  %3596 = vmatprep.mubr.bf16.mxu1 %v5795_v48  ;;  %v5212_v48 = vld [vmem:[%s7094_s1 + $0x648] ss:$12 sps:$4 sm:$0xff]   ;;  %v5280_v15 = vld [vmem:[%s7094_s1 + $0x780] ss:$12 sps:$4 sm:$0xff]  }
  0x8a   : > { %3381 = vmatprep.mubr.bf16.mxu0 %v6122_v31  ;;  %v5283_v14 = vld [vmem:[%s7094_s1 + $0x3c8] ss:$12 sps:$4 sm:$0xff]  }
  0x8b   : > { %4750 = vmatpush3.bf16.msra.mxu1 %v5206_v17  ;;  %v5287_v17 = vld [vmem:[%s7094_s1 + $0x79c] ss:$12 sps:$4 sm:$0xff]  }
  0x8c   : > { %3352 = vmatpush1.bf16.msra.mxu0 %v5202_v16  ;;  %4751 = vmatprep.subr.bf16.mxu1 %v5210_v19  ;;  %v5284_v16 = vld [vmem:[%s7094_s1 + $0x308] ss:$12 sps:$4 sm:$0xff]   ;;  %v5285_v19 = vld [vmem:[%s7094_s1 + $0x798] ss:$12 sps:$4 sm:$0xff]  }
  0x8d   : > { %3353 = vmatprep.subr.bf16.mxu0 %v5209_v18  ;;  %v5288_v18 = vld [vmem:[%s7094_s1 + $0x3e0] ss:$12 sps:$4 sm:$0xff]  }
  0x8f   : > { %4752 = vmatpush3.bf16.msra.mxu1 %v5211_v21  ;;  %v5292_v21 = vld [vmem:[%s7094_s1 + $0x7b4] ss:$12 sps:$4 sm:$0xff]  }
  0x90   : > { %3354 = vmatpush1.bf16.msra.mxu0 %v5207_v20  ;;  %4753 = vmatprep.subr.bf16.mxu1 %v5215_v23  ;;  %v5289_v20 = vld [vmem:[%s7094_s1 + $0x320] ss:$12 sps:$4 sm:$0xff]   ;;  %v5596_v23 = vld [vmem:[%s5783_s5 + $0x14] ss:$72 sps:$4 sm:$0xff]  }
  0x91   : > { %3355 = vmatprep.subr.bf16.mxu0 %v5214_v22  ;;  %v5290_v22 = vld [vmem:[%s7094_s1 + $0x7b0] ss:$12 sps:$4 sm:$0xff]  }
  0x93   : > { %4754 = vmatpush3.bf16.msra.mxu1 %v5216_v24  ;;  %v6296_v24 = vld [vmem:[%s5783_s5 + $0x2c] ss:$72 sps:$4 sm:$0xff]  }
  0x94   : > { %3356 = vmatpush1.bf16.msra.mxu0 %v5212_v48  ;;  %4755 = vmatprep.subr.bf16.mxu1 %v5220_v26  ;;  %v5294_v48 = vld [vmem:[%s7094_s1 + $0x338] ss:$12 sps:$4 sm:$0xff]   ;;  %v5298_v26 = vld [vmem:[%s7094_s1 + $0x410] ss:$12 sps:$4 sm:$0xff]  }
  0x95   : > { %3357 = vmatprep.subr.bf16.mxu0 %v5219_v25  ;;  %v5297_v25 = vld [vmem:[%s7094_s1 + $0x7cc] ss:$12 sps:$4 sm:$0xff]  }
  0x97   : > { %4756 = vmatpush3.bf16.msra.mxu1 %v5221_v28  ;;  %v5299_v28 = vld [vmem:[%s7094_s1 + $0x350] ss:$12 sps:$4 sm:$0xff]  }
  0x98   : > { %3358 = vmatpush1.bf16.msra.mxu0 %v5217_v27  ;;  %4757 = vmatprep.subr.bf16.mxu1 %v5225_v30  ;;  %v5295_v27 = vld [vmem:[%s7094_s1 + $0x7c8] ss:$12 sps:$4 sm:$0xff]  }
  0x99   : > { %3359 = vmatprep.subr.bf16.mxu0 %v5224_v29  ;;  %v5302_v29 = vld [vmem:[%s7094_s1 + $0x7e4] ss:$12 sps:$4 sm:$0xff]   ;;  %v5303_v30 = vld [vmem:[%s7094_s1 + $0x428] ss:$12 sps:$4 sm:$0xff]  }
  0x9b   : > { %4758 = vmatpush3.bf16.msra.mxu1 %v5226_v33  ;;  %v5304_v33 = vld [vmem:[%s7094_s1 + $0x368] ss:$12 sps:$4 sm:$0xff]  }
  0x9c   : > { %3360 = vmatpush1.bf16.msra.mxu0 %v5222_v32  ;;  %4759 = vmatprep.subr.bf16.mxu1 %v5230_v36  ;;  %v5300_v32 = vld [vmem:[%s7094_s1 + $0x7e0] ss:$12 sps:$4 sm:$0xff]  }
  0x9d   : > { %3361 = vmatprep.subr.bf16.mxu0 %v5229_v35  ;;  %v5307_v35 = vld [vmem:[%s7094_s1 + $0x7fc] ss:$12 sps:$4 sm:$0xff]   ;;  %v5308_v36 = vld [vmem:[%s7094_s1 + $0x440] ss:$12 sps:$4 sm:$0xff]  }
  0x9f   : > { %4760 = vmatpush3.bf16.msra.mxu1 %v5231_v38  ;;  %v5309_v38 = vld [vmem:[%s7094_s1 + $0x380] ss:$12 sps:$4 sm:$0xff]  }
  0xa0   : > { %3362 = vmatpush1.bf16.msra.mxu0 %v5227_v37  ;;  %4761 = vmatprep.subr.bf16.mxu1 %v5235_v40  ;;  %v5305_v37 = vld [vmem:[%s7094_s1 + $0x7f8] ss:$12 sps:$4 sm:$0xff]  }
  0xa1   : > { %3363 = vmatprep.subr.bf16.mxu0 %v5234_v39  ;;  %v5312_v39 = vld [vmem:[%s7094_s1 + $0x814] ss:$12 sps:$4 sm:$0xff]   ;;  %v5313_v40 = vld [vmem:[%s7094_s1 + $0x458] ss:$12 sps:$4 sm:$0xff]  }
  0xa3   : > { %4762 = vmatpush3.bf16.msra.mxu1 %v5236_v42  ;;  %v5314_v42 = vld [vmem:[%s7094_s1 + $0x398] ss:$12 sps:$4 sm:$0xff]  }
  0xa4   : > { %3364 = vmatpush1.bf16.msra.mxu0 %v5232_v41  ;;  %4769 = vmatprep.subr.bf16.mxu1 %v5240_v44  ;;  %v5310_v41 = vld [vmem:[%s7094_s1 + $0x810] ss:$12 sps:$4 sm:$0xff]  }
  0xa5   : > { %3365 = vmatprep.subr.bf16.mxu0 %v5239_v43  ;;  %v5317_v43 = vld [vmem:[%s7094_s1 + $0x82c] ss:$12 sps:$4 sm:$0xff]   ;;  %v5318_v44 = vld [vmem:[%s7094_s1 + $0x470] ss:$12 sps:$4 sm:$0xff]  }
  0xa6   : > { %3597 = vmatmul.mubr.bf16.vlgmr.msra.gmra.mrb[4].mxu1 %v5854_v4  ;;  %v5247_v4 = vld [vmem:[%s7094_s1 + $0x6f0] ss:$12 sps:$4 sm:$0xff]  }
  0xa7   : > { %4770 = vmatpush3.bf16.msra.mxu1 %v5241_v46  ;;  %3637 = vmatprep.mubr.bf16.mxu1 %v5943_v34  ;;  %v5255_v34 = vld [vmem:[%s7094_s1 + $0x290] ss:$12 sps:$4 sm:$0xff]  }
  0xa8   : > { %3366 = vmatpush1.bf16.msra.mxu0 %v5237_v45  ;;  %4771 = vmatprep.subr.bf16.mxu1 %v5245_v49  ;;  %v5315_v45 = vld [vmem:[%s7094_s1 + $0x828] ss:$12 sps:$4 sm:$0xff]   ;;  %v5319_v46 = vld [vmem:[%s7094_s1 + $0x3b0] ss:$12 sps:$4 sm:$0xff]  }
  0xa9   : > { %3367 = vmatprep.subr.bf16.mxu0 %v5244_v47  ;;  %v5322_v47 = vld [vmem:[%s7094_s1 + $0x844] ss:$12 sps:$4 sm:$0xff]   ;;  %v5323_v49 = vld [vmem:[%s7094_s1 + $0x548] ss:$12 sps:$4 sm:$0xff]  }
  0xab   : > { %4772 = vmatpush3.bf16.msra.mxu1 %v5246_v51  ;;  %v5324_v51 = vld [vmem:[%s7094_s1 + $0x488] ss:$12 sps:$4 sm:$0xff]  }
  0xac   : > { %3368 = vmatpush1.bf16.msra.mxu0 %v5242_v50  ;;  %4773 = vmatprep.subr.bf16.mxu1 %v5250_v53  ;;  %v5320_v50 = vld [vmem:[%s7094_s1 + $0x840] ss:$12 sps:$4 sm:$0xff]  }
  0xad   : > { %3369 = vmatprep.subr.bf16.mxu0 %v5249_v52  ;;  %v5327_v52 = vld [vmem:[%s7094_s1 + $0x85c] ss:$12 sps:$4 sm:$0xff]   ;;  %v5328_v53 = vld [vmem:[%s7094_s1 + $0x560] ss:$12 sps:$4 sm:$0xff]  }
  0xaf   : > { %4774 = vmatpush3.bf16.msra.mxu1 %v5251_v54  ;;  %v5325_v54 = vld [vmem:[%s7094_s1 + $0x858] ss:$12 sps:$4 sm:$0xff]  }
  0xb0   : > { %3370 = vmatpush1.bf16.msra.mxu0 %v5247_v4  ;;  %4775 = vmatprep.subr.bf16.mxu1 %v5255_v34  ;;  %v5597_v4 = vld [vmem:[%s5783_s5 + $0x10] ss:$72 sps:$4 sm:$0xff]   ;;  %v5332_v34 = vld [vmem:[%s7094_s1 + $0x874] ss:$12 sps:$4 sm:$0xff]  }
  0xb1   : > { %3371 = vmatprep.subr.bf16.mxu0 %v5254_v55  ;;  %v5329_v55 = vld [vmem:[%s7094_s1 + $0x4a0] ss:$12 sps:$4 sm:$0xff]  }
  0xb3   : > { %4776 = vmatpush3.bf16.msra.mxu1 %v5256_v57  ;;  %v5330_v57 = vld [vmem:[%s7094_s1 + $0x870] ss:$12 sps:$4 sm:$0xff]  }
  0xb4   : > { %3372 = vmatpush1.bf16.msra.mxu0 %v5252_v56  ;;  %4777 = vmatprep.subr.bf16.mxu1 %v5260_v59  ;;  %v5333_v56 = vld [vmem:[%s7094_s1 + $0x578] ss:$12 sps:$4 sm:$0xff]  }
  0xb5   : > { %3373 = vmatprep.subr.bf16.mxu0 %v5259_v58  ;;  %v5598_v58 = vld [vmem:[%s5783_s5 + $0x1c] ss:$72 sps:$4 sm:$0xff]  }
  0xb6   : > { %v5334_v59 = vld [vmem:[%s7094_s1 + $0x4b8] ss:$12 sps:$4 sm:$0xff]  }
  0xb7   : > { %4778 = vmatpush3.bf16.msra.mxu1 %v5261_v61  ;;  %v5338_v61 = vld [vmem:[%s7094_s1 + $0x590] ss:$12 sps:$4 sm:$0xff]  }
  0xb8   : > { %3374 = vmatpush1.bf16.msra.mxu0 %v5257_v60  ;;  %4779 = vmatprep.subr.bf16.mxu1 %v5265_v63  ;;  %v5337_v60 = vld [vmem:[%s7094_s1 + $0x88c] ss:$12 sps:$4 sm:$0xff]   ;;  %v5339_v63 = vld [vmem:[%s7094_s1 + $0x4d0] ss:$12 sps:$4 sm:$0xff]  }
  0xb9   : > { %3375 = vmatprep.subr.bf16.mxu0 %v5264_v62  ;;  %v5335_v62 = vld [vmem:[%s7094_s1 + $0x888] ss:$12 sps:$4 sm:$0xff]  }
  0xbb   : > { %4780 = vmatpush3.bf16.msra.mxu1 %v5266_v1  ;;  %v5343_v1 = vld [vmem:[%s7094_s1 + $0x5a8] ss:$12 sps:$4 sm:$0xff]  }
  0xbc   : > { %3376 = vmatpush1.bf16.msra.mxu0 %v5262_v0  ;;  %4781 = vmatprep.subr.bf16.mxu1 %v5270_v3  ;;  %v5342_v0 = vld [vmem:[%s7094_s1 + $0x8a4] ss:$12 sps:$4 sm:$0xff]   ;;  %v5344_v3 = vld [vmem:[%s7094_s1 + $0x4e8] ss:$12 sps:$4 sm:$0xff]  }
  0xbd   : > { %3377 = vmatprep.subr.bf16.mxu0 %v5269_v2  ;;  %v5340_v2 = vld [vmem:[%s7094_s1 + $0x8a0] ss:$12 sps:$4 sm:$0xff]  }
  0xbf   : > { %4782 = vmatpush3.bf16.msra.mxu1 %v5271_v6  ;;  %v5348_v6 = vld [vmem:[%s7094_s1 + $0x5c0] ss:$12 sps:$4 sm:$0xff]  }
  0xc0   : > { %3378 = vmatpush1.bf16.msra.mxu0 %v5267_v5  ;;  %4783 = vmatprep.subr.bf16.mxu1 %v5275_v8  ;;  %v5347_v5 = vld [vmem:[%s7094_s1 + $0x8bc] ss:$12 sps:$4 sm:$0xff]   ;;  %v5349_v8 = vld [vmem:[%s7094_s1 + $0x500] ss:$12 sps:$4 sm:$0xff]  }
  0xc1   : > { %3379 = vmatprep.subr.bf16.mxu0 %v5274_v7  ;;  %v5345_v7 = vld [vmem:[%s7094_s1 + $0x8b8] ss:$12 sps:$4 sm:$0xff]  }
  0xc3   : > { %4784 = vmatpush3.bf16.msra.mxu1 %v5276_v11  ;;  %v5353_v11 = vld [vmem:[%s7094_s1 + $0x5d8] ss:$12 sps:$4 sm:$0xff]  }
  0xc4   : > { %3380 = vmatpush1.bf16.msra.mxu0 %v5272_v10  ;;  %4791 = vmatprep.subr.bf16.mxu1 %v5283_v14  ;;  %v5352_v10 = vld [vmem:[%s7094_s1 + $0x8d4] ss:$12 sps:$4 sm:$0xff]   ;;  %v5354_v14 = vld [vmem:[%s7094_s1 + $0x518] ss:$12 sps:$4 sm:$0xff]  }
  0xc5   : > { %3392 = vmatprep.subr.bf16.mxu0 %v5282_v13  ;;  %v5350_v13 = vld [vmem:[%s7094_s1 + $0x8d0] ss:$12 sps:$4 sm:$0xff]  }
  0xc6   : > { %3638 = vmatmul.mubr.bf16.vlgmr.msra.gmra.mrb[8].mxu1 %v6053_v9  ;;  %v5293_v9 = vld [vmem:[%s7094_s1 + $0x3f8] ss:$12 sps:$4 sm:$0xff]  }
  0xc7   : > { %3382 = vmatmul.mubr.bf16.vlgmr.msra.gmra.mrb[0].mxu0 %v6254_v12  ;;  %4792 = vmatpush3.bf16.msra.mxu1 %v5284_v16  ;;  %v5358_v16 = vld [vmem:[%s7094_s1 + $0x5f0] ss:$12 sps:$4 sm:$0xff]  }
  0xc8   : > { %3393 = vmatpush1.bf16.msra.mxu0 %v5280_v15  ;;  %4793 = vmatprep.subr.bf16.mxu1 %v5288_v18  ;;  %v5357_v15 = vld [vmem:[%s7094_s1 + $0x8ec] ss:$12 sps:$4 sm:$0xff]   ;;  %v5359_v18 = vld [vmem:[%s7094_s1 + $0x530] ss:$12 sps:$4 sm:$0xff]  }
  0xc9   : > { %3394 = vmatprep.subr.bf16.mxu0 %v5287_v17  ;;  %3678 = vmatprep.mubr.bf16.mxu1 %v5596_v23  ;;  %v5355_v17 = vld [vmem:[%s7094_s1 + $0x8e8] ss:$12 sps:$4 sm:$0xff]  }
  0xca   : > { %3424 = vmatprep.mubr.bf16.mxu0 %v6296_v24  ;;  %v5370_v23 = vld [vmem:[%s7094_s1 + $0x91c] ss:$12 sps:$4 sm:$0xff]  }
  0xcb   : > { %4794 = vmatpush3.bf16.msra.mxu1 %v5289_v20  ;;  %v5366_v20 = vld [vmem:[%s7094_s1 + $0x6c8] ss:$12 sps:$4 sm:$0xff]  }
  0xcc   : > { %3395 = vmatpush1.bf16.msra.mxu0 %v5285_v19  ;;  %4795 = vmatprep.subr.bf16.mxu1 %v5293_v9  ;;  %v5365_v19 = vld [vmem:[%s7094_s1 + $0x904] ss:$12 sps:$4 sm:$0xff]   ;;  %v5363_v9 = vld [vmem:[%s7094_s1 + $0x900] ss:$12 sps:$4 sm:$0xff]  }
  0xcd   : > { %3396 = vmatprep.subr.bf16.mxu0 %v5292_v21  ;;  %v6464_v21 = vld [vmem:[%s5783_s5 + $0x28] ss:$72 sps:$4 sm:$0xff]  }
  0xcf   : > { %4796 = vmatpush3.bf16.msra.mxu1 %v5294_v48  ;;  %v5371_v48 = vld [vmem:[%s7094_s1 + $0x6e0] ss:$12 sps:$4 sm:$0xff]  }
  0xd0   : > { %3397 = vmatpush1.bf16.msra.mxu0 %v5290_v22  ;;  %4797 = vmatprep.subr.bf16.mxu1 %v5298_v26  ;;  %v5367_v22 = vld [vmem:[%s7094_s1 + $0x608] ss:$12 sps:$4 sm:$0xff]  }
  0xd1   : > { %3398 = vmatprep.subr.bf16.mxu0 %v5297_v25  ;;  %v5368_v25 = vld [vmem:[%s7094_s1 + $0x918] ss:$12 sps:$4 sm:$0xff]   ;;  %v6482_v26 = vld [vmem:[%s5783_s5 + $0x34] ss:$72 sps:$4 sm:$0xff]  }
  0xd3   : > { %4798 = vmatpush3.bf16.msra.mxu1 %v5299_v28  ;;  %v5372_v28 = vld [vmem:[%s7094_s1 + $0x620] ss:$12 sps:$4 sm:$0xff]  }
  0xd4   : > { %3399 = vmatpush1.bf16.msra.mxu0 %v5295_v27  ;;  %4799 = vmatprep.subr.bf16.mxu1 %v5303_v30  ;;  %v5599_v27 = vld [vmem:[%s5783_s5 + $0x18] ss:$72 sps:$4 sm:$0xff]  }
  0xd5   : > { %3400 = vmatprep.subr.bf16.mxu0 %v5302_v29  ;;  %v5375_v29 = vld [vmem:[%s7094_s1 + $0x934] ss:$12 sps:$4 sm:$0xff]   ;;  %v5376_v30 = vld [vmem:[%s7094_s1 + $0x6f8] ss:$12 sps:$4 sm:$0xff]  }
  0xd7   : > { %4800 = vmatpush3.bf16.msra.mxu1 %v5304_v33  ;;  %v5377_v33 = vld [vmem:[%s7094_s1 + $0x638] ss:$12 sps:$4 sm:$0xff]  }
  0xd8   : > { %3401 = vmatpush1.bf16.msra.mxu0 %v5300_v32  ;;  %4801 = vmatprep.subr.bf16.mxu1 %v5308_v36  ;;  %v5373_v32 = vld [vmem:[%s7094_s1 + $0x930] ss:$12 sps:$4 sm:$0xff]   ;;  %v5378_v36 = vld [vmem:[%s7094_s1 + $0x948] ss:$12 sps:$4 sm:$0xff]  }
  0xd9   : > { %3402 = vmatprep.subr.bf16.mxu0 %v5307_v35  ;;  %v5380_v35 = vld [vmem:[%s7094_s1 + $0x94c] ss:$12 sps:$4 sm:$0xff]  }
  0xdb   : > { %4802 = vmatpush3.bf16.msra.mxu1 %v5309_v38  ;;  %v5385_v38 = vld [vmem:[%s7094_s1 + $0x964] ss:$12 sps:$4 sm:$0xff]  }
  0xdc   : > { %3403 = vmatpush1.bf16.msra.mxu0 %v5305_v37  ;;  %4803 = vmatprep.subr.bf16.mxu1 %v5313_v40  ;;  %v5382_v37 = vld [vmem:[%s7094_s1 + $0x650] ss:$12 sps:$4 sm:$0xff]   ;;  %v5383_v40 = vld [vmem:[%s7094_s1 + $0x960] ss:$12 sps:$4 sm:$0xff]  }
  0xdd   : > { %3404 = vmatprep.subr.bf16.mxu0 %v5312_v39  ;;  %v5386_v39 = vld [vmem:[%s7094_s1 + $0x728] ss:$12 sps:$4 sm:$0xff]  }
  0xdf   : > { %4804 = vmatpush3.bf16.msra.mxu1 %v5314_v42  ;;  %v5390_v42 = vld [vmem:[%s7094_s1 + $0x97c] ss:$12 sps:$4 sm:$0xff]  }
  0xe0   : > { %3405 = vmatpush1.bf16.msra.mxu0 %v5310_v41  ;;  %4805 = vmatprep.subr.bf16.mxu1 %v5318_v44  ;;  %v5387_v41 = vld [vmem:[%s7094_s1 + $0x668] ss:$12 sps:$4 sm:$0xff]   ;;  %v5388_v44 = vld [vmem:[%s7094_s1 + $0x978] ss:$12 sps:$4 sm:$0xff]  }
  0xe1   : > { %3406 = vmatprep.subr.bf16.mxu0 %v5317_v43  ;;  %v5391_v43 = vld [vmem:[%s7094_s1 + $0x740] ss:$12 sps:$4 sm:$0xff]  }
  0xe3   : > { %4806 = vmatpush3.bf16.msra.mxu1 %v5319_v46  ;;  %v5395_v46 = vld [vmem:[%s7094_s1 + $0x994] ss:$12 sps:$4 sm:$0xff]  }
  0xe4   : > { %3407 = vmatpush1.bf16.msra.mxu0 %v5315_v45  ;;  %4813 = vmatprep.subr.bf16.mxu1 %v5323_v49  ;;  %v5392_v45 = vld [vmem:[%s7094_s1 + $0x680] ss:$12 sps:$4 sm:$0xff]   ;;  %v5393_v49 = vld [vmem:[%s7094_s1 + $0x990] ss:$12 sps:$4 sm:$0xff]  }
  0xe5   : > { %3408 = vmatprep.subr.bf16.mxu0 %v5322_v47  ;;  %v5396_v47 = vld [vmem:[%s7094_s1 + $0x758] ss:$12 sps:$4 sm:$0xff]  }
  0xe6   : > { %3679 = vmatmul.mubr.bf16.vlgmr.msra.gmra.mrb[12].mxu1 %v5597_v4  ;;  %v5402_v4 = vld [vmem:[%s7094_s1 + $0x6b0] ss:$12 sps:$4 sm:$0xff]  }
  0xe7   : > { %4814 = vmatpush3.bf16.msra.mxu1 %v5324_v51  ;;  %3719 = vmatprep.mubr.bf16.mxu1 %v5598_v58  ;;  %v5400_v51 = vld [vmem:[%s7094_s1 + $0x9ac] ss:$12 sps:$4 sm:$0xff]  }
  0xe8   : > { %3409 = vmatpush1.bf16.msra.mxu0 %v5320_v50  ;;  %4815 = vmatprep.subr.bf16.mxu1 %v5328_v53  ;;  %v5397_v50 = vld [vmem:[%s7094_s1 + $0x698] ss:$12 sps:$4 sm:$0xff]   ;;  %v5398_v53 = vld [vmem:[%s7094_s1 + $0x9a8] ss:$12 sps:$4 sm:$0xff]   ;;  %v5411_v58 = vld [vmem:[%s7094_s1 + $0x860] ss:$12 sps:$4 sm:$0xff]  }
  0xe9   : > { %3410 = vmatprep.subr.bf16.mxu0 %v5327_v52  ;;  %v5401_v52 = vld [vmem:[%s7094_s1 + $0x770] ss:$12 sps:$4 sm:$0xff]  }
  0xeb   : > { %4816 = vmatpush3.bf16.msra.mxu1 %v5329_v55  ;;  %v5406_v55 = vld [vmem:[%s7094_s1 + $0x848] ss:$12 sps:$4 sm:$0xff]  }
  0xec   : > { %3411 = vmatpush1.bf16.msra.mxu0 %v5325_v54  ;;  %4817 = vmatprep.subr.bf16.mxu1 %v5333_v56  ;;  %v5405_v54 = vld [vmem:[%s7094_s1 + $0x9c4] ss:$12 sps:$4 sm:$0xff]   ;;  %v5407_v56 = vld [vmem:[%s7094_s1 + $0x788] ss:$12 sps:$4 sm:$0xff]  }
  0xed   : > { %3412 = vmatprep.subr.bf16.mxu0 %v5332_v34  ;;  %v5403_v34 = vld [vmem:[%s7094_s1 + $0x9c0] ss:$12 sps:$4 sm:$0xff]  }
  0xef   : > { %4818 = vmatpush3.bf16.msra.mxu1 %v5334_v59  ;;  %v5408_v59 = vld [vmem:[%s7094_s1 + $0x9d8] ss:$12 sps:$4 sm:$0xff]  }
  0xf0   : > { %3413 = vmatpush1.bf16.msra.mxu0 %v5330_v57  ;;  %4819 = vmatprep.subr.bf16.mxu1 %v5338_v61  ;;  %v5410_v57 = vld [vmem:[%s7094_s1 + $0x9dc] ss:$12 sps:$4 sm:$0xff]   ;;  %v5415_v61 = vld [vmem:[%s7094_s1 + $0x9f4] ss:$12 sps:$4 sm:$0xff]  }
  0xf1   : > { %3414 = vmatprep.subr.bf16.mxu0 %v5337_v60  ;;  %v5412_v60 = vld [vmem:[%s7094_s1 + $0x7a0] ss:$12 sps:$4 sm:$0xff]  }
  0xf3   : > { %4820 = vmatpush3.bf16.msra.mxu1 %v5339_v63  ;;  %v5417_v63 = vld [vmem:[%s7094_s1 + $0x7b8] ss:$12 sps:$4 sm:$0xff]  }
  0xf4   : > { %3415 = vmatpush1.bf16.msra.mxu0 %v5335_v62  ;;  %4821 = vmatprep.subr.bf16.mxu1 %v5343_v1  ;;  %v5413_v62 = vld [vmem:[%s7094_s1 + $0x9f0] ss:$12 sps:$4 sm:$0xff]  }
  0xf5   : > { %3416 = vmatprep.subr.bf16.mxu0 %v5342_v0  ;;  %v5420_v0 = vld [vmem:[%s7094_s1 + $0xa0c] ss:$12 sps:$4 sm:$0xff]   ;;  %v5421_v1 = vld [vmem:[%s7094_s1 + $0x890] ss:$12 sps:$4 sm:$0xff]  }
  0xf7   : > { %4822 = vmatpush3.bf16.msra.mxu1 %v5344_v3  ;;  %v5425_v3 = vld [vmem:[%s7094_s1 + $0xa24] ss:$12 sps:$4 sm:$0xff]  }
  0xf8   : > { %3417 = vmatpush1.bf16.msra.mxu0 %v5340_v2  ;;  %4823 = vmatprep.subr.bf16.mxu1 %v5348_v6  ;;  %v5422_v2 = vld [vmem:[%s7094_s1 + $0x7d0] ss:$12 sps:$4 sm:$0xff]   ;;  %v5423_v6 = vld [vmem:[%s7094_s1 + $0xa20] ss:$12 sps:$4 sm:$0xff]  }
  0xf9   : > { %3418 = vmatprep.subr.bf16.mxu0 %v5347_v5  ;;  %v5426_v5 = vld [vmem:[%s7094_s1 + $0x8a8] ss:$12 sps:$4 sm:$0xff]  }
  0xfb   : > { %4824 = vmatpush3.bf16.msra.mxu1 %v5349_v8  ;;  %v5430_v8 = vld [vmem:[%s7094_s1 + $0xa3c] ss:$12 sps:$4 sm:$0xff]  }
  0xfc   : > { %3419 = vmatpush1.bf16.msra.mxu0 %v5345_v7  ;;  %4825 = vmatprep.subr.bf16.mxu1 %v5353_v11  ;;  %v5427_v7 = vld [vmem:[%s7094_s1 + $0x7e8] ss:$12 sps:$4 sm:$0xff]   ;;  %v5428_v11 = vld [vmem:[%s7094_s1 + $0xa38] ss:$12 sps:$4 sm:$0xff]  }
  0xfd   : > { %3420 = vmatprep.subr.bf16.mxu0 %v5352_v10  ;;  %v5431_v10 = vld [vmem:[%s7094_s1 + $0x8c0] ss:$12 sps:$4 sm:$0xff]  }
  0xff   : > { %4826 = vmatpush3.bf16.msra.mxu1 %v5354_v14  ;;  %v5435_v14 = vld [vmem:[%s7094_s1 + $0xa54] ss:$12 sps:$4 sm:$0xff]  }
 0x100   : > { %3421 = vmatpush1.bf16.msra.mxu0 %v5350_v13  ;;  %4827 = vmatprep.subr.bf16.mxu1 %v5358_v16  ;;  %v5432_v13 = vld [vmem:[%s7094_s1 + $0x800] ss:$12 sps:$4 sm:$0xff]   ;;  %v5433_v16 = vld [vmem:[%s7094_s1 + $0xa50] ss:$12 sps:$4 sm:$0xff]  }
 0x101   : > { %3422 = vmatprep.subr.bf16.mxu0 %v5357_v15  ;;  %v5436_v15 = vld [vmem:[%s7094_s1 + $0x8d8] ss:$12 sps:$4 sm:$0xff]  }
 0x103   : > { %4828 = vmatpush3.bf16.msra.mxu1 %v5359_v18  ;;  %v5440_v18 = vld [vmem:[%s7094_s1 + $0xa6c] ss:$12 sps:$4 sm:$0xff]  }
 0x104   : > { %3423 = vmatpush1.bf16.msra.mxu0 %v5355_v17  ;;  %4835 = vmatprep.subr.bf16.mxu1 %v5366_v20  ;;  %v5437_v17 = vld [vmem:[%s7094_s1 + $0x818] ss:$12 sps:$4 sm:$0xff]   ;;  %v5438_v20 = vld [vmem:[%s7094_s1 + $0xa68] ss:$12 sps:$4 sm:$0xff]  }
 0x105   : > { %3435 = vmatprep.subr.bf16.mxu0 %v5365_v19  ;;  %v5441_v19 = vld [vmem:[%s7094_s1 + $0x8f0] ss:$12 sps:$4 sm:$0xff]  }
 0x106   : > { %3720 = vmatmul.mubr.bf16.vlgmr.msra.gmra.mrb[16].mxu1 %v5599_v27  ;;  %v5450_v27 = vld [vmem:[%s7094_s1 + $0x908] ss:$12 sps:$4 sm:$0xff]  }
 0x107   : > { %3425 = vmatmul.mubr.bf16.vlgmr.msra.gmra.mrb[0].mxu0 %v6464_v21  ;;  %4836 = vmatpush3.bf16.msra.mxu1 %v5367_v22  ;;  %v5448_v22 = vld [vmem:[%s7094_s1 + $0xa84] ss:$12 sps:$4 sm:$0xff]  }
 0x108   : > { %3436 = vmatpush1.bf16.msra.mxu0 %v5363_v9  ;;  %4837 = vmatprep.subr.bf16.mxu1 %v5371_v48  ;;  %v5442_v9 = vld [vmem:[%s7094_s1 + $0x830] ss:$12 sps:$4 sm:$0xff]  }
 0x109   : > { %3437 = vmatprep.subr.bf16.mxu0 %v5370_v23  ;;  %3760 = vmatprep.mubr.bf16.mxu1 %v6122_v31  ;;  %v5381_v31 = vld [vmem:[%s7094_s1 + $0x710] ss:$12 sps:$4 sm:$0xff]   ;;  %v5449_v23 = vld [vmem:[%s7094_s1 + $0x9c8] ss:$12 sps:$4 sm:$0xff]  }
 0x10a   : > { %3467 = vmatprep.mubr.bf16.mxu0 %v6482_v26  ;;  %v6668_v48 = vld [vmem:[%s5783_s5 + $0x30] ss:$72 sps:$4 sm:$0xff]  }
 0x10b   : > { %4838 = vmatpush3.bf16.msra.mxu1 %v5372_v28  ;;  %v5453_v28 = vld [vmem:[%s7094_s1 + $0xa9c] ss:$12 sps:$4 sm:$0xff]  }
 0x10c   : > { %3438 = vmatpush1.bf16.msra.mxu0 %v5368_v25  ;;  %4839 = vmatprep.subr.bf16.mxu1 %v5376_v30  ;;  %v5446_v25 = vld [vmem:[%s7094_s1 + $0xa80] ss:$12 sps:$4 sm:$0xff]   ;;  %v5451_v30 = vld [vmem:[%s7094_s1 + $0xa98] ss:$12 sps:$4 sm:$0xff]  }
 0x10d   : > { %3439 = vmatprep.subr.bf16.mxu0 %v5375_v29  ;;  %v5454_v29 = vld [vmem:[%s7094_s1 + $0x9e0] ss:$12 sps:$4 sm:$0xff]  }
 0x10f   : > { %4840 = vmatpush3.bf16.msra.mxu1 %v5377_v33  ;;  %v5455_v33 = vld [vmem:[%s7094_s1 + $0x920] ss:$12 sps:$4 sm:$0xff]  }
 0x110   : > { %3440 = vmatpush1.bf16.msra.mxu0 %v5373_v32  ;;  %4841 = vmatprep.subr.bf16.mxu1 %v5381_v31  ;;  %v6686_v32 = vld [vmem:[%s5783_s5 + $0x3c] ss:$72 sps:$4 sm:$0xff]  }
 0x111   : > { %3441 = vmatprep.subr.bf16.mxu0 %v5380_v35  ;;  %v5458_v35 = vld [vmem:[%s7094_s1 + $0xab4] ss:$12 sps:$4 sm:$0xff]   ;;  %v5459_v31 = vld [vmem:[%s7094_s1 + $0x9f8] ss:$12 sps:$4 sm:$0xff]  }
 0x113   : > { %4842 = vmatpush3.bf16.msra.mxu1 %v5382_v37  ;;  %v5463_v37 = vld [vmem:[%s7094_s1 + $0xacc] ss:$12 sps:$4 sm:$0xff]  }
 0x114   : > { %3442 = vmatpush1.bf16.msra.mxu0 %v5378_v36  ;;  %4843 = vmatprep.subr.bf16.mxu1 %v5386_v39  ;;  %v5460_v36 = vld [vmem:[%s7094_s1 + $0x938] ss:$12 sps:$4 sm:$0xff]   ;;  %v5465_v39 = vld [vmem:[%s7094_s1 + $0x950] ss:$12 sps:$4 sm:$0xff]  }
 0x115   : > { %3443 = vmatprep.subr.bf16.mxu0 %v5385_v38  ;;  %v5461_v38 = vld [vmem:[%s7094_s1 + $0xac8] ss:$12 sps:$4 sm:$0xff]  }
 0x117   : > { %4844 = vmatpush3.bf16.msra.mxu1 %v5387_v41  ;;  %v5469_v41 = vld [vmem:[%s7094_s1 + $0xa28] ss:$12 sps:$4 sm:$0xff]  }
 0x118   : > { %3444 = vmatpush1.bf16.msra.mxu0 %v5383_v40  ;;  %4845 = vmatprep.subr.bf16.mxu1 %v5391_v43  ;;  %v5468_v40 = vld [vmem:[%s7094_s1 + $0xae4] ss:$12 sps:$4 sm:$0xff]   ;;  %v5470_v43 = vld [vmem:[%s7094_s1 + $0x968] ss:$12 sps:$4 sm:$0xff]  }
 0x119   : > { %3445 = vmatprep.subr.bf16.mxu0 %v5390_v42  ;;  %v5466_v42 = vld [vmem:[%s7094_s1 + $0xae0] ss:$12 sps:$4 sm:$0xff]  }
 0x11b   : > { %4846 = vmatpush3.bf16.msra.mxu1 %v5392_v45  ;;  %v5474_v45 = vld [vmem:[%s7094_s1 + $0xa40] ss:$12 sps:$4 sm:$0xff]  }
 0x11c   : > { %3446 = vmatpush1.bf16.msra.mxu0 %v5388_v44  ;;  %4847 = vmatprep.subr.bf16.mxu1 %v5396_v47  ;;  %v5473_v44 = vld [vmem:[%s7094_s1 + $0xafc] ss:$12 sps:$4 sm:$0xff]   ;;  %v5475_v47 = vld [vmem:[%s7094_s1 + $0x980] ss:$12 sps:$4 sm:$0xff]  }
 0x11d   : > { %3447 = vmatprep.subr.bf16.mxu0 %v5395_v46  ;;  %v5471_v46 = vld [vmem:[%s7094_s1 + $0xaf8] ss:$12 sps:$4 sm:$0xff]  }
 0x11f   : > { %4848 = vmatpush3.bf16.msra.mxu1 %v5397_v50  ;;  %v5479_v50 = vld [vmem:[%s7094_s1 + $0xa58] ss:$12 sps:$4 sm:$0xff]  }
 0x120   : > { %3448 = vmatpush1.bf16.msra.mxu0 %v5393_v49  ;;  %4849 = vmatprep.subr.bf16.mxu1 %v5401_v52  ;;  %v5478_v49 = vld [vmem:[%s7094_s1 + $0xb14] ss:$12 sps:$4 sm:$0xff]  }
 0x121   : > { %3449 = vmatprep.subr.bf16.mxu0 %v5400_v51 }
 0x123   : > { %4850 = vmatpush3.bf16.msra.mxu1 %v5402_v4 }
 0x124   : > { %3450 = vmatpush1.bf16.msra.mxu0 %v5398_v53  ;;  %4857 = vmatprep.subr.bf16.mxu1 %v5406_v55  ;;  %v5476_v53 = vld [vmem:[%s7094_s1 + $0xb10] ss:$12 sps:$4 sm:$0xff]  }
 0x125   : > { %3451 = vmatprep.subr.bf16.mxu0 %v5405_v54  ;;  %v5480_v54 = vld [vmem:[%s7094_s1 + $0x998] ss:$12 sps:$4 sm:$0xff]  }
 0x126   : > { %3761 = vmatmul.mubr.bf16.vlgmr.msra.gmra.mrb[20].mxu1 %v6254_v12  ;;  %v5416_v12 = vld [vmem:[%s7094_s1 + $0x878] ss:$12 sps:$4 sm:$0xff]  }
 0x127   : > { %4858 = vmatpush3.bf16.msra.mxu1 %v5407_v56  ;;  %3801 = vmatprep.mubr.bf16.mxu1 %v6296_v24  ;;  %v5418_v24 = vld [vmem:[%s7094_s1 + $0xa08] ss:$12 sps:$4 sm:$0xff]   ;;  %v5484_v56 = vld [vmem:[%s7094_s1 + $0xa70] ss:$12 sps:$4 sm:$0xff]  }
 0x128   : > { %3452 = vmatpush1.bf16.msra.mxu0 %v5403_v34  ;;  %4859 = vmatprep.subr.bf16.mxu1 %v5411_v58  ;;  %v5483_v34 = vld [vmem:[%s7094_s1 + $0xb2c] ss:$12 sps:$4 sm:$0xff]   ;;  %v5485_v58 = vld [vmem:[%s7094_s1 + $0x9b0] ss:$12 sps:$4 sm:$0xff]  }
 0x129   : > { %3453 = vmatprep.subr.bf16.mxu0 %v5410_v57  ;;  %v5481_v57 = vld [vmem:[%s7094_s1 + $0xb28] ss:$12 sps:$4 sm:$0xff]  }
 0x12b   : > { %4860 = vmatpush3.bf16.msra.mxu1 %v5412_v60  ;;  %v5489_v60 = vld [vmem:[%s7094_s1 + $0xb48] ss:$12 sps:$4 sm:$0xff]  }
 0x12c   : > { %3454 = vmatpush1.bf16.msra.mxu0 %v5408_v59  ;;  %4861 = vmatprep.subr.bf16.mxu1 %v5416_v12  ;;  %v5488_v59 = vld [vmem:[%s7094_s1 + $0xb44] ss:$12 sps:$4 sm:$0xff]   ;;  %v5490_v12 = vld [vmem:[%s7094_s1 + $0xa88] ss:$12 sps:$4 sm:$0xff]  }
 0x12d   : > { %3455 = vmatprep.subr.bf16.mxu0 %v5415_v61  ;;  %v5486_v61 = vld [vmem:[%s7094_s1 + $0xb40] ss:$12 sps:$4 sm:$0xff]  }
 0x12f   : > { %4862 = vmatpush3.bf16.msra.mxu1 %v5417_v63  ;;  %v5494_v63 = vld [vmem:[%s7094_s1 + $0xb60] ss:$12 sps:$4 sm:$0xff]  }
 0x130   : > { %3456 = vmatpush1.bf16.msra.mxu0 %v5413_v62  ;;  %4863 = vmatprep.subr.bf16.mxu1 %v5421_v1  ;;  %v5493_v62 = vld [vmem:[%s7094_s1 + $0xb5c] ss:$12 sps:$4 sm:$0xff]   ;;  %v5495_v1 = vld [vmem:[%s7094_s1 + $0xaa0] ss:$12 sps:$4 sm:$0xff]  }
 0x131   : > { %3457 = vmatprep.subr.bf16.mxu0 %v5420_v0  ;;  %v5491_v0 = vld [vmem:[%s7094_s1 + $0xb58] ss:$12 sps:$4 sm:$0xff]  }
 0x133   : > { %4864 = vmatpush3.bf16.msra.mxu1 %v5422_v2  ;;  %v5499_v2 = vld [vmem:[%s7094_s1 + $0xb78] ss:$12 sps:$4 sm:$0xff]  }
 0x134   : > { %3458 = vmatpush1.bf16.msra.mxu0 %v5418_v24  ;;  %4865 = vmatprep.subr.bf16.mxu1 %v5426_v5  ;;  %v5498_v24 = vld [vmem:[%s7094_s1 + $0xb74] ss:$12 sps:$4 sm:$0xff]   ;;  %v5500_v5 = vld [vmem:[%s7094_s1 + $0xab8] ss:$12 sps:$4 sm:$0xff]  }
 0x135   : > { %3459 = vmatprep.subr.bf16.mxu0 %v5425_v3  ;;  %v5496_v3 = vld [vmem:[%s7094_s1 + $0xb70] ss:$12 sps:$4 sm:$0xff]  }
 0x137   : > { %4866 = vmatpush3.bf16.msra.mxu1 %v5427_v7  ;;  %v5504_v7 = vld [vmem:[%s7094_s1 + $0xb90] ss:$12 sps:$4 sm:$0xff]  }
 0x138   : > { %3460 = vmatpush1.bf16.msra.mxu0 %v5423_v6  ;;  %4867 = vmatprep.subr.bf16.mxu1 %v5431_v10  ;;  %v5503_v6 = vld [vmem:[%s7094_s1 + $0xb8c] ss:$12 sps:$4 sm:$0xff]   ;;  %v5505_v10 = vld [vmem:[%s7094_s1 + $0xad0] ss:$12 sps:$4 sm:$0xff]  }
 0x139   : > { %3461 = vmatprep.subr.bf16.mxu0 %v5430_v8  ;;  %v5501_v8 = vld [vmem:[%s7094_s1 + $0xb88] ss:$12 sps:$4 sm:$0xff]  }
 0x13b   : > { %4868 = vmatpush3.bf16.msra.mxu1 %v5432_v13  ;;  %v5509_v13 = vld [vmem:[%s7094_s1 + $0xba8] ss:$12 sps:$4 sm:$0xff]  }
 0x13c   : > { %3462 = vmatpush1.bf16.msra.mxu0 %v5428_v11  ;;  %4869 = vmatprep.subr.bf16.mxu1 %v5436_v15  ;;  %v5508_v11 = vld [vmem:[%s7094_s1 + $0xba4] ss:$12 sps:$4 sm:$0xff]   ;;  %v5510_v15 = vld [vmem:[%s7094_s1 + $0xae8] ss:$12 sps:$4 sm:$0xff]  }
 0x13d   : > { %3463 = vmatprep.subr.bf16.mxu0 %v5435_v14  ;;  %v5506_v14 = vld [vmem:[%s7094_s1 + $0xba0] ss:$12 sps:$4 sm:$0xff]  }
 0x13f   : > { %4870 = vmatpush3.bf16.msra.mxu1 %v5437_v17  ;;  %v5514_v17 = vld [vmem:[%s7094_s1 + $0xbc0] ss:$12 sps:$4 sm:$0xff]  }
 0x140   : > { %3464 = vmatpush1.bf16.msra.mxu0 %v5433_v16  ;;  %4871 = vmatprep.subr.bf16.mxu1 %v5441_v19  ;;  %v5513_v16 = vld [vmem:[%s7094_s1 + $0xbbc] ss:$12 sps:$4 sm:$0xff]   ;;  %v5515_v19 = vld [vmem:[%s7094_s1 + $0xb00] ss:$12 sps:$4 sm:$0xff]  }
 0x141   : > { %3465 = vmatprep.subr.bf16.mxu0 %v5440_v18  ;;  %v5511_v18 = vld [vmem:[%s7094_s1 + $0xbb8] ss:$12 sps:$4 sm:$0xff]  }
 0x143   : > { %4872 = vmatpush3.bf16.msra.mxu1 %v5442_v9  ;;  %v5519_v9 = vld [vmem:[%s7094_s1 + $0xbd8] ss:$12 sps:$4 sm:$0xff]  }
 0x144   : > { %3466 = vmatpush1.bf16.msra.mxu0 %v5438_v20  ;;  %4879 = vmatprep.subr.bf16.mxu1 %v5449_v23  ;;  %v5518_v20 = vld [vmem:[%s7094_s1 + $0xbd4] ss:$12 sps:$4 sm:$0xff]  }
 0x145   : > { %3478 = vmatprep.subr.bf16.mxu0 %v5448_v22 }
 0x146   : > { %3802 = vmatmul.mubr.bf16.vlgmr.msra.gmra.mrb[24].mxu1 %v6464_v21  ;;  %v5456_v21 = vld [vmem:[%s7094_s1 + $0xab0] ss:$12 sps:$4 sm:$0xff]  }
 0x147   : > { %3468 = vmatmul.mubr.bf16.vlgmr.msra.gmra.mrb[0].mxu0 %v6668_v48  ;;  %4880 = vmatpush3.bf16.msra.mxu1 %v5450_v27 }
 0x148   : > { %3479 = vmatpush1.bf16.msra.mxu0 %v5446_v25  ;;  %4881 = vmatprep.subr.bf16.mxu1 %v5454_v29  ;;  %v5520_v25 = vld [vmem:[%s7094_s1 + $0xb18] ss:$12 sps:$4 sm:$0xff]  }
 0x149   : > { %3480 = vmatprep.subr.bf16.mxu0 %v5453_v28  ;;  %3842 = vmatprep.mubr.bf16.mxu1 %v6482_v26  ;;  %v5464_v26 = vld [vmem:[%s7094_s1 + $0xa10] ss:$12 sps:$4 sm:$0xff]   ;;  %v5523_v29 = vld [vmem:[%s7094_s1 + $0xbec] ss:$12 sps:$4 sm:$0xff]  }
 0x14a   : > { %3510 = vmatprep.mubr.bf16.mxu0 %v6686_v32 }
 0x14b   : > { %4882 = vmatpush3.bf16.msra.mxu1 %v5455_v33 }
 0x14c   : > { %3481 = vmatpush1.bf16.msra.mxu0 %v5451_v30  ;;  %4883 = vmatprep.subr.bf16.mxu1 %v5459_v31  ;;  %v5524_v30 = vld [vmem:[%s7094_s1 + $0xbf0] ss:$12 sps:$4 sm:$0xff]  }
 0x14d   : > { %3482 = vmatprep.subr.bf16.mxu0 %v5458_v35  ;;  %v5521_v35 = vld [vmem:[%s7094_s1 + $0xbe8] ss:$12 sps:$4 sm:$0xff]   ;;  %v5525_v31 = vld [vmem:[%s7094_s1 + $0xb30] ss:$12 sps:$4 sm:$0xff]  }
 0x14f   : > { %4884 = vmatpush3.bf16.msra.mxu1 %v5460_v36  ;;  %v5532_v36 = vld [vmem:[%s7094_s1 + $0xcc8] ss:$12 sps:$4 sm:$0xff]  }
 0x150   : > { %3483 = vmatpush1.bf16.msra.mxu0 %v5456_v21  ;;  %4885 = vmatprep.subr.bf16.mxu1 %v5464_v26  ;;  %v5531_v21 = vld [vmem:[%s7094_s1 + $0xc04] ss:$12 sps:$4 sm:$0xff]   ;;  %v5529_v26 = vld [vmem:[%s7094_s1 + $0xc00] ss:$12 sps:$4 sm:$0xff]  }
 0x151   : > { %3484 = vmatprep.subr.bf16.mxu0 %v5463_v37  ;;  %v5526_v37 = vld [vmem:[%s5783_s5 + $0x38] ss:$72 sps:$4 sm:$0xff]  }
 0x153   : > { %4886 = vmatpush3.bf16.msra.mxu1 %v5465_v39  ;;  %v5536_v39 = vld [vmem:[%s7094_s1 + $0xc1c] ss:$12 sps:$4 sm:$0xff]  }
 0x154   : > { %3485 = vmatpush1.bf16.msra.mxu0 %v5461_v38  ;;  %4887 = vmatprep.subr.bf16.mxu1 %v5469_v41  ;;  %v5533_v38 = vld [vmem:[%s7094_s1 + $0xc08] ss:$12 sps:$4 sm:$0xff]   ;;  %v5571_v41 = vld [vmem:[%s5783_s5 + $0x44] ss:$72 sps:$4 sm:$0xff]  }
 0x155   : > { %3486 = vmatprep.subr.bf16.mxu0 %v5468_v40  ;;  %v5537_v40 = vld [vmem:[%s7094_s1 + $0xce0] ss:$12 sps:$4 sm:$0xff]  }
 0x157   : > { %4888 = vmatpush3.bf16.msra.mxu1 %v5470_v43  ;;  %v5538_v43 = vld [vmem:[%s7094_s1 + $0xc20] ss:$12 sps:$4 sm:$0xff]  }
 0x158   : > { %3487 = vmatpush1.bf16.msra.mxu0 %v5466_v42  ;;  %4889 = vmatprep.subr.bf16.mxu1 %v5474_v45  ;;  %v5534_v42 = vld [vmem:[%s7094_s1 + $0xc18] ss:$12 sps:$4 sm:$0xff]  }
 0x159   : > { %3488 = vmatprep.subr.bf16.mxu0 %v5473_v44  ;;  %v6749_v51 = vpop.f32.mrb[0].mxu1  ;;  %v5541_v44 = vld [vmem:[%s7094_s1 + $0xc34] ss:$12 sps:$4 sm:$0xff]   ;;  %v5542_v45 = vld [vmem:[%s7094_s1 + $0xcf8] ss:$12 sps:$4 sm:$0xff]  }
 0x15a   : > { %v6751_v52 = vpop.f32.mrb[1].mxu1 }
 0x15b   : > { %v6756_v4 = vpop.f32.mrb[2].mxu1  ;;  %4890 = vmatpush3.bf16.msra.mxu1 %v5475_v47  ;;  %v5539_v47 = vld [vmem:[%s7094_s1 + $0xc30] ss:$12 sps:$4 sm:$0xff]  }
 0x15c   : > { %3489 = vmatpush1.bf16.msra.mxu0 %v5471_v46  ;;  %v6761_v55 = vpop.f32.mrb[3].mxu1  ;;  %4891 = vmatprep.subr.bf16.mxu1 %v5479_v50  ;;  %v768_v46 = vlaneseq  ;;  %v5546_v50 = vld [vmem:[%s7094_s1 + $0xc4c] ss:$12 sps:$4 sm:$0xff]  }
 0x15d   : > { %3490 = vmatprep.subr.bf16.mxu0 %v5478_v49  ;;  %v5543_v49 = vld [vmem:[%s7094_s1 + $0xc38] ss:$12 sps:$4 sm:$0xff]  }
 0x15f   : > { %4892 = vmatpush3.bf16.msra.mxu1 %v5480_v54  ;;  %v6921_v54 = vshrl.u32 %v768_v46, 7 }
 0x160   : > { %3491 = vmatpush1.bf16.msra.mxu0 %v5476_v53  ;;  %4893 = vmatprep.subr.bf16.mxu1 %v5484_v56  ;;  %v5547_v53 = vld [vmem:[%s7094_s1 + $0xd10] ss:$12 sps:$4 sm:$0xff]  }
 0x161   : > { %3492 = vmatprep.subr.bf16.mxu0 %v5483_v34  ;;  %v5544_v34 = vld [vmem:[%s7094_s1 + $0xc48] ss:$12 sps:$4 sm:$0xff]   ;;  %v5548_v56 = vld [vmem:[%s7094_s1 + $0xc50] ss:$12 sps:$4 sm:$0xff]  }
 0x163   : > { %4894 = vmatpush3.bf16.msra.mxu1 %v5485_v58  ;;  %v5552_v58 = vld [vmem:[%s7094_s1 + $0xd28] ss:$12 sps:$4 sm:$0xff]  }
 0x164   : > { %3493 = vmatpush1.bf16.msra.mxu0 %v5481_v57  ;;  %4901 = vmatprep.subr.bf16.mxu1 %v5489_v60  ;;  %v5551_v57 = vld [vmem:[%s7094_s1 + $0xc64] ss:$12 sps:$4 sm:$0xff]   ;;  %v5549_v60 = vld [vmem:[%s7094_s1 + $0xc60] ss:$12 sps:$4 sm:$0xff]  }
 0x165   : > { %3494 = vmatprep.subr.bf16.mxu0 %v5488_v59  ;;  %v778_v59 = vsub.s32 2, %v6921_v54 }
 0x166   : > { %3843 = vmatmul.mubr.bf16.vlgmr.msra.gmra.mrb[28].mxu1 %v6668_v48  ;;  %v5516_v48 = vld [vmem:[%s7094_s1 + $0xbd0] ss:$12 sps:$4 sm:$0xff]  }
 0x167   : > { %4902 = vmatpush3.bf16.msra.mxu1 %v5490_v12  ;;  %3883 = vmatprep.mubr.bf16.mxu1 %v6686_v32  ;;  %v6945_v12 = vld [vmem:[%s7095_s2] sm:$0x7] }
 0x168   : > { %3495 = vmatpush1.bf16.msra.mxu0 %v5486_v61  ;;  %4903 = vmatprep.subr.bf16.mxu1 %v5494_v63  ;;  %v5553_v61 = vld [vmem:[%s7094_s1 + $0xc68] ss:$12 sps:$4 sm:$0xff]   ;;  %v5557_v63 = vld [vmem:[%s7094_s1 + $0xd40] ss:$12 sps:$4 sm:$0xff]  }
 0x169   : > { %3496 = vmatprep.subr.bf16.mxu0 %v5493_v62  ;;  %v5556_v62 = vld [vmem:[%s7094_s1 + $0xc7c] ss:$12 sps:$4 sm:$0xff]  }
 0x16b   : > { %4904 = vmatpush3.bf16.msra.mxu1 %v5495_v1  ;;  %v5554_v1 = vld [vmem:[%s7094_s1 + $0xc78] ss:$12 sps:$4 sm:$0xff]  }
 0x16c   : > { %3497 = vmatpush1.bf16.msra.mxu0 %v5491_v0  ;;  %4905 = vmatprep.subr.bf16.mxu1 %v5499_v2  ;;  %v779_v0 = vrot.slane %v6945_v12, %v778_v59  ;;  %v5561_v2 = vld [vmem:[%s7094_s1 + $0xc94] ss:$12 sps:$4 sm:$0xff]  }
 0x16d   : > { %3498 = vmatprep.subr.bf16.mxu0 %v5498_v24  ;;  %v5558_v24 = vld [vmem:[%s7094_s1 + $0xc80] ss:$12 sps:$4 sm:$0xff]  }
 0x16f   : > { %4906 = vmatpush3.bf16.msra.mxu1 %v5500_v5 }
 0x170   : > { %3499 = vmatpush1.bf16.msra.mxu0 %v5496_v3  ;;  %4907 = vmatprep.subr.bf16.mxu1 %v5504_v7  ;;  %v5562_v3 = vld [vmem:[%s7094_s1 + $0xd58] ss:$12 sps:$4 sm:$0xff]  }
 0x171   : > { %3500 = vmatprep.subr.bf16.mxu0 %v5503_v6 }
 0x173   : > { %4908 = vmatpush3.bf16.msra.mxu1 %v5505_v10 }
 0x174   : > { %3501 = vmatpush1.bf16.msra.mxu0 %v5501_v8  ;;  %4909 = vmatprep.subr.bf16.mxu1 %v5509_v13  ;;  %v5559_v13 = vld [vmem:[%s7094_s1 + $0xc90] ss:$12 sps:$4 sm:$0xff]  }
 0x175   : > { %3502 = vmatprep.subr.bf16.mxu0 %v5508_v11 }
 0x177   : > { %4910 = vmatpush3.bf16.msra.mxu1 %v5510_v15 }
 0x178   : > { %3503 = vmatpush1.bf16.msra.mxu0 %v5506_v14  ;;  %4911 = vmatprep.subr.bf16.mxu1 %v5514_v17  ;;  %v5563_v14 = vld [vmem:[%s7094_s1 + $0xc98] ss:$12 sps:$4 sm:$0xff]   ;;  %v5567_v17 = vld [vmem:[%s7094_s1 + $0xd70] ss:$12 sps:$4 sm:$0xff]  }
 0x179   : > { %3504 = vmatprep.subr.bf16.mxu0 %v5513_v16  ;;  %v4763_v22 = vpop.f32.mrb[4].mxu1  ;;  %v5566_v16 = vld [vmem:[%s7094_s1 + $0xcac] ss:$12 sps:$4 sm:$0xff]  }
 0x17a   : > { %v4764_v23 = vpop.f32.mrb[5].mxu1 }
 0x17b   : > { %4912 = vmatpush3.bf16.msra.mxu1 %v5515_v19  ;;  %v6861_v27 = vadd.f32 %v4764_v23, %v4763_v22  ;;  %v4766_v28 = vpop.f32.mrb[6].mxu1  ;;  %v5568_v22 = vld [vmem:[%s7094_s1 + $0xcb0] ss:$12 sps:$4 sm:$0xff]  }
 0x17c   : > { %3505 = vmatpush1.bf16.msra.mxu0 %v5511_v18  ;;  %4913 = vmatprep.subr.bf16.mxu1 %v5519_v9  ;;  %v4767_v32 = vpop.f32.mrb[7].mxu1  ;;  %v5564_v9 = vld [vmem:[%s7094_s1 + $0xca8] ss:$12 sps:$4 sm:$0xff]   ;;  %v5574_v23 = vld [vmem:[%s7094_s1 + $0xcc4] ss:$12 sps:$4 sm:$0xff]  }
 0x17d   : > { %3506 = vmatprep.subr.bf16.mxu0 %v5518_v20  ;;  %v6869_v33 = vadd.f32 %v4767_v32, %v4766_v28  ;;  %v3599_v5 = vadd.f32 %v6861_v27, %v779_v0  ;;  %v5577_v27 = vld [vmem:[%s7094_s1 + $0xcdc] ss:$12 sps:$4 sm:$0xff]   ;;  %v5575_v28 = vld [vmem:[%s7094_s1 + $0xcd8] ss:$12 sps:$4 sm:$0xff]  }
 0x17e   : > { %v5583_v32 = vld [vmem:[%s7094_s1 + $0xd0c] ss:$12 sps:$4 sm:$0xff]  }
 0x17f   : > { %4914 = vmatpush3.bf16.msra.mxu1 %v5520_v25  ;;  %v3602_v8 = vadd.f32 %v6869_v33, %v779_v0  ;;  %v5572_v25 = vld [vmem:[%s7094_s1 + $0xcc0] ss:$12 sps:$4 sm:$0xff]   ;;  %v5581_v33 = vld [vmem:[%s7094_s1 + $0xd08] ss:$12 sps:$4 sm:$0xff]  }
 0x180   : > { %3507 = vmatpush1.bf16.msra.mxu0 %v5516_v48  ;;  %4915 = vmatprep.subr.bf16.mxu1 %v5524_v30  ;;  %v5569_v48 = vld [vmem:[%s5783_s5 + $0x40] ss:$72 sps:$4 sm:$0xff]   ;;  %v5578_v30 = vld [vmem:[%s7094_s1 + $0xcf0] ss:$12 sps:$4 sm:$0xff]   ;;  %s170_s5 = scalar_lea.vmem %s7096_s3, %s4982_s15 }
 0x181   : > { %3508 = vmatprep.subr.bf16.mxu0 %v5523_v29  ;;  %v5580_v29 = vld [vmem:[%s7094_s1 + $0xcf4] ss:$12 sps:$4 sm:$0xff]  }
 0x183   : > { %4916 = vmatpush3.bf16.msra.mxu1 %v5525_v31  ;;  %v5584_v31 = vld [vmem:[%s7094_s1 + $0xd20] ss:$12 sps:$4 sm:$0xff]  }
 0x184   : > { %3509 = vmatpush1.bf16.msra.mxu0 %v5521_v35  ;;  %4923 = vmatprep.subr.bf16.mxu1 %v5532_v36  ;;  %v5586_v35 = vld [vmem:[%s7094_s1 + $0xd24] ss:$12 sps:$4 sm:$0xff]  }
 0x185   : > { %3521 = vmatprep.subr.bf16.mxu0 %v5531_v21  ;;  %v5589_v21 = vld [vmem:[%s7094_s1 + $0xd3c] ss:$12 sps:$4 sm:$0xff]   ;;  %v5587_v36 = vld [vmem:[%s7094_s1 + $0xd38] ss:$12 sps:$4 sm:$0xff]  }
 0x186   : > { %3884 = vmatmul.mubr.bf16.vlgmr.msra.gmra.mrb[32].mxu1 %v5526_v37 }
 0x187   : > { %3511 = vmatmul.mubr.bf16.vlgmr.msra.gmra.mrb[0].mxu0 %v5526_v37  ;;  %4924 = vmatpush3.bf16.msra.mxu1 %v5533_v38  ;;  %v5592_v37 = vld [vmem:[%s7094_s1 + $0xd54] ss:$12 sps:$4 sm:$0xff]  }
 0x188   : > { %3522 = vmatpush1.bf16.msra.mxu0 %v5529_v26  ;;  %4925 = vmatprep.subr.bf16.mxu1 %v5537_v40 }
 0x189   : > { %3523 = vmatprep.subr.bf16.mxu0 %v5536_v39  ;;  %3924 = vmatprep.mubr.bf16.mxu1 %v5571_v41 }
 0x18a   : > { %3553 = vmatprep.mubr.bf16.mxu0 %v5571_v41  ;;  %v5590_v41 = vld [vmem:[%s7094_s1 + $0xd50] ss:$12 sps:$4 sm:$0xff]  }
 0x18b   : > { %4926 = vmatpush3.bf16.msra.mxu1 %v5538_v43  ;;  %v5595_v43 = vld [vmem:[%s7094_s1 + $0xd6c] ss:$12 sps:$4 sm:$0xff]  }
 0x18c   : > { %3524 = vmatpush1.bf16.msra.mxu0 %v5534_v42  ;;  %4927 = vmatprep.subr.bf16.mxu1 %v5542_v45 }
 0x18d   : > { %3525 = vmatprep.subr.bf16.mxu0 %v5541_v44 }
 0x18f   : > { %4928 = vmatpush3.bf16.msra.mxu1 %v5543_v49 }
 0x190   : > { %3526 = vmatpush1.bf16.msra.mxu0 %v5539_v47  ;;  %4929 = vmatprep.subr.bf16.mxu1 %v5547_v53  ;;  %v5593_v47 = vld [vmem:[%s7094_s1 + $0xd68] ss:$12 sps:$4 sm:$0xff]  }
 0x191   : > { %3527 = vmatprep.subr.bf16.mxu0 %v5546_v50 }
 0x193   : > { %4930 = vmatpush3.bf16.msra.mxu1 %v5548_v56 }
 0x194   : > { %3528 = vmatpush1.bf16.msra.mxu0 %v5544_v34  ;;  %4931 = vmatprep.subr.bf16.mxu1 %v5552_v58 }
 0x195   : > { %3529 = vmatprep.subr.bf16.mxu0 %v5551_v57 }
 0x197   : > { %4932 = vmatpush3.bf16.msra.mxu1 %v5553_v61 }
 0x198   : > { %3530 = vmatpush1.bf16.msra.mxu0 %v5549_v60  ;;  %4933 = vmatprep.subr.bf16.mxu1 %v5557_v63 }
 0x199   : > { %3531 = vmatprep.subr.bf16.mxu0 %v5556_v62  ;;  %v4785_v6 = vpop.f32.mrb[8].mxu1 }
 0x19a   : > { %v4786_v7 = vpop.f32.mrb[9].mxu1 }
 0x19b   : > { %v4787_v10 = vadd.f32 %v4786_v7, %v4785_v6  ;;  %v4788_v11 = vpop.f32.mrb[10].mxu1  ;;  %4934 = vmatpush3.bf16.msra.mxu1 %v5558_v24 }
 0x19c   : > { %3532 = vmatpush1.bf16.msra.mxu0 %v5554_v1  ;;  %v4789_v15 = vpop.f32.mrb[11].mxu1  ;;  %4935 = vmatprep.subr.bf16.mxu1 %v5562_v3 }
 0x19d   : > { %3533 = vmatprep.subr.bf16.mxu0 %v5561_v2  ;;  %v3640_v18 = vadd.f32 %v4787_v10, %v3599_v5  ;;  %v4790_v19 = vadd.f32 %v4789_v15, %v4788_v11 }
 0x19f   : > { %v3643_v20 = vadd.f32 %v4790_v19, %v3602_v8  ;;  %4936 = vmatpush3.bf16.msra.mxu1 %v5563_v14 }
 0x1a0   : > { %3534 = vmatpush1.bf16.msra.mxu0 %v5559_v13  ;;  %4937 = vmatprep.subr.bf16.mxu1 %v5567_v17 }
 0x1a1   : > { %3535 = vmatprep.subr.bf16.mxu0 %v5566_v16 }
 0x1a3   : > { %4938 = vmatpush3.bf16.msra.mxu1 %v5568_v22 }
 0x1a4   : > { %3536 = vmatpush1.bf16.msra.mxu0 %v5564_v9 }
 0x1a5   : > { %3537 = vmatprep.subr.bf16.mxu0 %v5574_v23 }
 0x1a6   : > { %3925 = vmatmul.mubr.bf16.vlgmr.msra.gmra.mrb[36].mxu1 %v5569_v48 }
 0x1a8   : > { %3538 = vmatpush1.bf16.msra.mxu0 %v5572_v25 }
 0x1a9   : > { %3539 = vmatprep.subr.bf16.mxu0 %v5577_v27 }
 0x1ac   : > { %3540 = vmatpush1.bf16.msra.mxu0 %v5575_v28 }
 0x1ad   : > { %3541 = vmatprep.subr.bf16.mxu0 %v5580_v29 }
 0x1b0   : > { %3542 = vmatpush1.bf16.msra.mxu0 %v5578_v30 }
 0x1b1   : > { %3543 = vmatprep.subr.bf16.mxu0 %v5583_v32 }
 0x1b4   : > { %3544 = vmatpush1.bf16.msra.mxu0 %v5581_v33 }
 0x1b5   : > { %3545 = vmatprep.subr.bf16.mxu0 %v5586_v35 }
 0x1b8   : > { %3546 = vmatpush1.bf16.msra.mxu0 %v5584_v31 }
 0x1b9   : > { %3547 = vmatprep.subr.bf16.mxu0 %v5589_v21  ;;  %v4807_v26 = vpop.f32.mrb[12].mxu1 }
 0x1ba   : > { %v4808_v38 = vpop.f32.mrb[13].mxu1 }
 0x1bb   : > { %v4809_v39 = vadd.f32 %v4808_v38, %v4807_v26  ;;  %v4810_v40 = vpop.f32.mrb[14].mxu1  ;;  %v770_v38 = vsub.s32 0, %v6921_v54 }
 0x1bc   : > { %3548 = vmatpush1.bf16.msra.mxu0 %v5587_v36  ;;  %v4811_v42 = vpop.f32.mrb[15].mxu1 }
 0x1bd   : > { %3549 = vmatprep.subr.bf16.mxu0 %v5592_v37  ;;  %v3681_v44 = vadd.f32 %v4809_v39, %v3640_v18  ;;  %v4812_v45 = vadd.f32 %v4811_v42, %v4810_v40  ;;  %v774_v39 = vsub.s32 1, %v6921_v54  ;;  %v771_v40 = vrot.slane %v6945_v12, %v770_v38 }
 0x1bf   : > { %v3684_v46 = vadd.f32 %v4812_v45, %v3643_v20 }
 0x1c0   : > { %3550 = vmatpush1.bf16.msra.mxu0 %v5590_v41  ;;  %v5608_v41 = vmov 1966171168  }
 0x1c1   : > { %3551 = vmatprep.subr.bf16.mxu0 %v5595_v43  ;;  %v3949_v42 = vunpack.c.l.s4 %v5608_v41  ;;  %v775_v43 = vrot.slane %v6945_v12, %v774_v39 }
 0x1c3   : > { %v3950_v45 = vunpack.c.0.s8 %v3949_v42 }
 0x1c4   : > { %3552 = vmatpush1.bf16.msra.mxu0 %v5593_v47 }
 0x1c7   : > { %3554 = vmatmul.mubr.bf16.vlgmr.msra.gmra.mrb[0].mxu0 %v5569_v48 }
 0x1d9   : > { %v4829_v49 = vpop.f32.mrb[16].mxu1 }
 0x1da   : > { %v4830_v50 = vpop.f32.mrb[17].mxu1 }
 0x1db   : > { %v4831_v53 = vadd.f32 %v4830_v50, %v4829_v49  ;;  %v4832_v34 = vpop.f32.mrb[18].mxu1  ;;  %v4949_v50 = vadd.f32 %v6756_v4, %v771_v40 }
 0x1dc   : > { %v4833_v56 = vpop.f32.mrb[19].mxu1 }
 0x1dd   : > { %v3722_v57 = vadd.f32 %v4831_v53, %v3681_v44  ;;  %v4834_v58 = vadd.f32 %v4833_v56, %v4832_v34  ;;  %v4945_v44 = vadd.f32 %v6749_v51, %v771_v40  ;;  %v4951_v56 = vadd.f32 %v6761_v55, %v775_v43 }
 0x1df   : > { %v3725_v59 = vadd.f32 %v4834_v58, %v3684_v46  ;;  %v4947_v46 = vadd.f32 %v6751_v52, %v775_v43 }
 0x1f9   : > { %v4851_v60 = vpop.f32.mrb[20].mxu1 }
 0x1fa   : > { %v4852_v61 = vpop.f32.mrb[21].mxu1 }
 0x1fb   : > { %v4853_v62 = vadd.f32 %v4852_v61, %v4851_v60  ;;  %v4854_v63 = vpop.f32.mrb[22].mxu1 }
 0x1fc   : > { %v4855_v0 = vpop.f32.mrb[23].mxu1 }
 0x1fd   : > { %v3763_v1 = vadd.f32 %v4853_v62, %v3722_v57  ;;  %v4856_v24 = vadd.f32 %v4855_v0, %v4854_v63 }
 0x1ff   : > { %v3766_v2 = vadd.f32 %v4856_v24, %v3725_v59  ;;  %v7044_v59 = vsub.s32 %v3950_v45, %v6921_v54 }
 0x219   : > { %v4873_v3 = vpop.f32.mrb[24].mxu1 }
 0x21a   : > { %v4874_v5 = vpop.f32.mrb[25].mxu1 }
 0x21b   : > { %v4875_v6 = vadd.f32 %v4874_v5, %v4873_v3  ;;  %v4876_v7 = vpop.f32.mrb[26].mxu1 }
 0x21c   : > { %v4877_v8 = vpop.f32.mrb[27].mxu1 }
 0x21d   : > { %v3804_v10 = vadd.f32 %v4875_v6, %v3763_v1  ;;  %v4878_v11 = vadd.f32 %v4877_v8, %v4876_v7 }
 0x21f   : > { %v3807_v13 = vadd.f32 %v4878_v11, %v3766_v2 }
 0x239   : > { %v4895_v14 = vpop.f32.mrb[28].mxu1 }
 0x23a   : > { %v4896_v15 = vpop.f32.mrb[29].mxu1 }
 0x23b   : > { %v4897_v16 = vadd.f32 %v4896_v15, %v4895_v14  ;;  %v4898_v17 = vpop.f32.mrb[30].mxu1 }
 0x23c   : > { %v4899_v18 = vpop.f32.mrb[31].mxu1 }
 0x23d   : > { %v3845_v19 = vadd.f32 %v4897_v16, %v3804_v10  ;;  %v4900_v20 = vadd.f32 %v4899_v18, %v4898_v17 }
 0x23f   : > { %v3848_v9 = vadd.f32 %v4900_v20, %v3807_v13  ;;  %v5609_v13 = vmov 1983009808  }
 0x240   : > { %v4160_v14 = vunpack.c.l.s4 %v5609_v13 }
 0x259   : > { %v4917_v22 = vpop.f32.mrb[32].mxu1 }
 0x25a   : > { %v4918_v23 = vpop.f32.mrb[33].mxu1 }
 0x25b   : > { %v4919_v48 = vadd.f32 %v4918_v23, %v4917_v22  ;;  %v4920_v25 = vpop.f32.mrb[34].mxu1 }
 0x25c   : > { %v4921_v27 = vpop.f32.mrb[35].mxu1 }
 0x25d   : > { %v3886_v28 = vadd.f32 %v4919_v48, %v3845_v19  ;;  %v4922_v29 = vadd.f32 %v4921_v27, %v4920_v25  ;;  %v4161_v25 = vunpack.c.0.s8 %v4160_v14 }
 0x25f   : > { %v3889_v30 = vadd.f32 %v4922_v29, %v3848_v9 }
 0x279   : > { %v4939_v32 = vpop.f32.mrb[36].mxu1 }
 0x27a   : > { %v4940_v33 = vpop.f32.mrb[37].mxu1 }
 0x27b   : > { %v4941_v35 = vadd.f32 %v4940_v33, %v4939_v32  ;;  %v4942_v31 = vpop.f32.mrb[38].mxu1 }
 0x27c   : > { %v4943_v21 = vpop.f32.mrb[39].mxu1 }
 0x27d   : > { %v3927_v36 = vadd.f32 %v4941_v35, %v3886_v28  ;;  %v4944_v37 = vadd.f32 %v4943_v21, %v4942_v31 }
 0x27f   : > { %v3930_v26 = vadd.f32 %v4944_v37, %v3889_v30  ;;  %v3935_v47 = vmax.f32 %v3927_v36, 0.0 }
 0x281   : > { %v3947_v51 = vcombine.high %v3935_v47, %v3935_v47  ;;  %v3968_v4 = vrot.slane %v3935_v47, %v7044_v59  ;;  %v3938_v2 = vmax.f32 %v3930_v26, 0.0  ;;  %v4164_v26 = vsub.s32 %v4161_v25, %v6921_v54 }
 0x283   : > { %v3975_v55 = vrot.slane %v3947_v51, %v7044_v59  ;;  %v4026_v15 = vrot.slane %v3938_v2, %v7044_v59  ;;  %v4223_v2 = vld [vmem:[%s170_s5 + $0x6] sm:$0x3f] }
 0x29a   : > { %v3555_v49 = vpop.f32.mrb[0].mxu0 }
 0x29b   : > { %v4946_v53 = vadd.f32 %v4945_v44, %v3555_v49  ;;  %v3557_v34 = vpop.f32.mrb[1].mxu0 }
 0x29c   : > { %v4948_v57 = vadd.f32 %v4947_v46, %v3557_v34  ;;  %v3559_v58 = vpop.f32.mrb[2].mxu0 }
 0x29d   : > { %v3933_v60 = vmax.f32 %v4946_v53, 0.0  ;;  %v4950_v12 = vadd.f32 %v4949_v50, %v3559_v58  ;;  %v3561_v61 = vpop.f32.mrb[3].mxu0 }
 0x29e   : > { %v3934_v62 = vmax.f32 %v4948_v57, 0.0  ;;  %v4952_v63 = vadd.f32 %v4951_v56, %v3561_v61 }
 0x29f   : > { %v3936_v52 = vmax.f32 %v4950_v12, 0.0 }
 0x2a0   : > { %v3945_v0 = vcombine.low %v3933_v60, %v3934_v62  ;;  %v3946_v1 = vcombine.high %v3933_v60, %v3934_v62  ;;  %v3937_v24 = vmax.f32 %v4952_v63, 0.0  ;;  %v4220_v62 = vld [vmem:[%s170_s5] sm:$0x3f] }
 0x2a2   : > { %v3954_v3 = vrot.slane %v3945_v0, %v7044_v59  ;;  %v3961_v5 = vrot.slane %v3946_v1, %v7044_v59  ;;  %v4012_v6 = vcombine.low %v3936_v52, %v3937_v24 }
 0x2a4   : > { %v3976_v7 = vcombine.low %v3954_v3, %v3968_v4  ;;  %v3977_v8 = vcombine.high %v3954_v3, %v3968_v4  ;;  %v3978_v10 = vcombine.low %v3961_v5, %v3975_v55  ;;  %v3979_v11 = vcombine.high %v3961_v5, %v3975_v55  ;;  %v4226_v4 = vld [vmem:[%s170_s5 + $0xc] sm:$0x3f] }
 0x2a5   : > { %v4019_v16 = vrot.slane %v4012_v6, %v7044_v59 }
 0x2a6   : > { %v3986_v17 = vrot.slane %v3976_v7, %v7044_v59  ;;  %v3993_v18 = vrot.slane %v3978_v10, %v7044_v59  ;;  %v4000_v19 = vrot.slane %v3977_v8, %v7044_v59  ;;  %v4007_v20 = vrot.slane %v3979_v11, %v7044_v59 }
 0x2a7   : > { %v4027_v9 = vcombine.low %v4019_v16, %v4026_v15 }
 0x2a8   : > { %v4008_v22 = vcombine.high %v3986_v17, %v3986_v17  ;;  %v4010_v23 = vcombine.high %v4000_v19, %v4000_v19  ;;  %v4035_v48 = vcombine.low %v3986_v17, %v4000_v19  ;;  %v4741_v27 = vcombine.high %v3993_v18, %v4007_v20 }
 0x2a9   : > { %v4034_v28 = vrot.slane %v4027_v9, %v7044_v59  ;;  %v4081_v37 = vrot.slane %v4007_v20, %v7044_v59 }
 0x2aa   : > { %v4042_v29 = vrot.slane %v4035_v48, %v7044_v59  ;;  %v4049_v30 = vrot.slane %v4008_v22, %v7044_v59  ;;  %v4067_v32 = vcombine.low %v4010_v23, %v3993_v18  ;;  %v4106_v33 = vrot.slane %v4741_v27, %v7044_v59 }
 0x2ab   : > { %v4113_v35 = vrot.slane %v4034_v28, %v7044_v59 }
 0x2ac   : > { %v4050_v31 = vcombine.low %v4042_v29, %v4049_v30  ;;  %v4051_v21 = vcombine.high %v4042_v29, %v4049_v30  ;;  %v4074_v36 = vrot.slane %v4067_v32, %v7044_v59 }
 0x2ad   : > { %v4114_v39 = vcombine.low %v4106_v33, %v4113_v35  ;;  %v4115_v40 = vcombine.high %v4106_v33, %v4113_v35 }
 0x2ae   : > { %v4058_v41 = vrot.slane %v4050_v31, %v7044_v59  ;;  %v4065_v42 = vrot.slane %v4051_v21, %v7044_v59  ;;  %v4082_v43 = vcombine.low %v4074_v36, %v4081_v37  ;;  %v4083_v44 = vcombine.high %v4074_v36, %v4081_v37 }
 0x2af   : > { %v4122_v54 = vrot.slane %v4114_v39, %v7044_v59  ;;  %v4129_v46 = vrot.slane %v4115_v40, %v7044_v59 }
 0x2b0   : > { %v4066_v47 = vcombine.high %v4058_v41, %v4058_v41  ;;  %v4090_v49 = vrot.slane %v4082_v43, %v7044_v59  ;;  %v4097_v50 = vrot.slane %v4083_v44, %v7044_v59  ;;  %v4742_v53 = vpack.c.bf16 %v4065_v42, %v4058_v41 }
 0x2b1   : > { %v4130_v34 = vcombine.high %v4122_v54, %v4122_v54  ;;  %v4744_v56 = vpack.c.bf16 %v4129_v46, %v4122_v54 }
 0x2b2   : > { %v4098_v57 = vcombine.high %v4090_v49, %v4090_v49  ;;  %v4142_v58 = vpack.c.bf16 %v4066_v47, %v4066_v47  ;;  %v4743_v60 = vpack.c.bf16 %v4097_v50, %v4090_v49  ;;  %v4165_v59 = vrot.slane %v4742_v53, %v4164_v26 }
 0x2b3   : > { %v4148_v12 = vpack.c.bf16 %v4130_v34, %v4130_v34  ;;  %v4197_v63 = vrot.slane %v4744_v56, %v4164_v26 }
 0x2b4   : > { %v4145_v61 = vpack.c.bf16 %v4098_v57, %v4098_v57  ;;  %v4172_v51 = vrot.slane %v4142_v58, %v4164_v26  ;;  %v4181_v1 = vrot.slane %v4743_v60, %v4164_v26 }
 0x2b5   : > { %v4204_v52 = vrot.slane %v4148_v12, %v4164_v26 }
 0x2b6   : > { %v4173_v0 = vcombine.low %v4165_v59, %v4172_v51  ;;  %v4188_v24 = vrot.slane %v4145_v61, %v4164_v26 }
 0x2b7   : > { %v4205_v55 = vcombine.low %v4197_v63, %v4204_v52 }
 0x2b8   : > { %v4189_v3 = vcombine.low %v4181_v1, %v4188_v24  ;;  %v4221_v5 = vsel %vm4219_vm10, %v4173_v0, %v4220_v62 }
 0x2b9   : > { %4222 = vst [vmem:[%s170_s5] sm:$0x3f] %v4221_v5  ;;  %v4227_v6 = vsel %vm4219_vm10, %v4205_v55, %v4226_v4 }
 0x2ba   : > { %v4224_v7 = vsel %vm4219_vm10, %v4189_v3, %v4223_v2  ;;  %4228 = vst [vmem:[%s170_s5 + $0xc] sm:$0x3f] %v4227_v6 }
 0x2bb   : > { %4225 = vst [vmem:[%s170_s5 + $0x6] sm:$0x3f] %v4224_v7 }
 0x2bc PF: > { %s13_s12 = sadd.s32 1, %s5606_s12  }
 0x2bd   : > { %p10_p4 = scmp.ge.s32.totalorder %s13_s12, 4  }
 0x2bf   :  { %12 = sbr.rel (!%p10_p4) target bundleno = 1 (0x1), region = 62 }

// kernel: alexnet_forward.8
= control target key start
LH: loop header
LB: loop body
LE: loop exit
PB: predicated region body
PF: predicated region fallthrough
CT: control target
= control target key end

     0   :  { %s5084_s12 = smov 0   ;;  %s6440_s0 = inlined_call_operand.vmem [shape: bf16[2,16,3456], index: 0, kind: input, shape index: {}]   ;;  %s6441_s1 = inlined_call_operand.vmem [shape: bf16[3456,256], index: 1, kind: input, shape index: {}]   ;;  %s6442_s2 = inlined_call_operand.vmem [shape: f32[1,256], index: 2, kind: input, shape index: {}]   ;;  %s6443_s3 = inlined_call_operand.vmem [shape: bf16[2,3,3,256], index: 3, kind: output, shape index: {}]  }
   0x1 LB: > { %s3824_s13 = sadd.s32 4294967295, %s5059_s12   ;;  %p3828_p0 = scmp.ge.s32.totalorder %s5059_s12, 1  ;;  %s5059_s12 = sphi %s5084_s12, %s13_s12  }
   0x2   : > { %p137_p1 = scmp.lt.s32.totalorder %s5059_s12, 3 }
   0x4   : > { %p138_p2 = pnand %p3828_p0, %p137_p1 }
   0x5   : > { %v4365_v0 = vld [vmem:[%s6441_s1 + $0x4] ss:$8 sps:$4 sm:$0xff] (!%p138_p2)   ;;  %v4369_v2 = vld [vmem:[%s6441_s1] ss:$8 sps:$4 sm:$0xff] (!%p138_p2)   ;;  %v4371_v4 = vld [vmem:[%s6441_s1 + $0x14] ss:$8 sps:$4 sm:$0xff] (!%p138_p2)  }
   0x6   : > { %141 = sbr.rel (%p138_p2) target bundleno = 697 (0x2b9), region = 32  ;;  %v4367_v1 = vld [vmem:[%s6441_s1 + $0x704] ss:$8 sps:$4 sm:$0xff] (!%p138_p2)   ;;  %2940 = vmatprep.subr.bf16.mxu1 (!%p138_p2), %v4365_v0  ;;  %v4370_v3 = vld [vmem:[%s6441_s1 + $0x700] ss:$8 sps:$4 sm:$0xff] (!%p138_p2)   ;;  %p161_p3 = scmp.lt.s32.totalorder (!%p138_p2), %s3824_s13, 1 }
   0x7   : > { %3241 = vmatprep.subr.bf16.mxu0 (!%p138_p2), %v4367_v1  ;;  %2941 = vmatpush1.bf16.msra.mxu1 (!%p138_p2), %v4369_v2  ;;  %v4373_v5 = vld [vmem:[%s6441_s1 + $0x714] ss:$8 sps:$4 sm:$0xff] (!%p138_p2)   ;;  %v4375_v6 = vld [vmem:[%s6441_s1 + $0x10] ss:$8 sps:$4 sm:$0xff] (!%p138_p2)   ;;  %v4377_v8 = vld [vmem:[%s6441_s1 + $0x24] ss:$8 sps:$4 sm:$0xff] (!%p138_p2)  }
   0x8   : > { %3242 = vmatpush1.bf16.msra.mxu0 (!%p138_p2), %v4370_v3  ;;  %2942 = vmatprep.subr.bf16.mxu1 (!%p138_p2), %v4371_v4  ;;  %v4376_v7 = vld [vmem:[%s6441_s1 + $0x710] ss:$8 sps:$4 sm:$0xff] (!%p138_p2)   ;;  %v4379_v9 = vld [vmem:[%s6441_s1 + $0x724] ss:$8 sps:$4 sm:$0xff] (!%p138_p2)   ;;  %v4381_v10 = vld [vmem:[%s6441_s1 + $0x20] ss:$8 sps:$4 sm:$0xff] (!%p138_p2)  }
   0x9   : > { %3243 = vmatprep.subr.bf16.mxu0 (!%p138_p2), %v4373_v5  ;;  %v4382_v11 = vld [vmem:[%s6441_s1 + $0x720] ss:$8 sps:$4 sm:$0xff] (!%p138_p2)   ;;  %v4383_v12 = vld [vmem:[%s6441_s1 + $0x34] ss:$8 sps:$4 sm:$0xff] (!%p138_p2)   ;;  %v4387_v14 = vld [vmem:[%s6441_s1 + $0x30] ss:$8 sps:$4 sm:$0xff] (!%p138_p2)  }
   0xa   : > { %v4385_v13 = vld [vmem:[%s6441_s1 + $0x734] ss:$8 sps:$4 sm:$0xff] (!%p138_p2)   ;;  %v4388_v15 = vld [vmem:[%s6441_s1 + $0x730] ss:$8 sps:$4 sm:$0xff] (!%p138_p2)   ;;  %v4389_v16 = vld [vmem:[%s6441_s1 + $0x44] ss:$8 sps:$4 sm:$0xff] (!%p138_p2)  }
   0xb   : > { %2943 = vmatpush1.bf16.msra.mxu1 (!%p138_p2), %v4375_v6  ;;  %v4391_v17 = vld [vmem:[%s6441_s1 + $0x744] ss:$8 sps:$4 sm:$0xff] (!%p138_p2)   ;;  %v4393_v18 = vld [vmem:[%s6441_s1 + $0x40] ss:$8 sps:$4 sm:$0xff] (!%p138_p2)   ;;  %v4395_v20 = vld [vmem:[%s6441_s1 + $0x54] ss:$8 sps:$4 sm:$0xff] (!%p138_p2)  }
   0xc   : > { %3244 = vmatpush1.bf16.msra.mxu0 (!%p138_p2), %v4376_v7  ;;  %2944 = vmatprep.subr.bf16.mxu1 (!%p138_p2), %v4377_v8  ;;  %v4394_v19 = vld [vmem:[%s6441_s1 + $0x740] ss:$8 sps:$4 sm:$0xff] (!%p138_p2)   ;;  %v4397_v21 = vld [vmem:[%s6441_s1 + $0x754] ss:$8 sps:$4 sm:$0xff] (!%p138_p2)   ;;  %v4399_v22 = vld [vmem:[%s6441_s1 + $0x50] ss:$8 sps:$4 sm:$0xff] (!%p138_p2)  }
   0xd   : > { %3245 = vmatprep.subr.bf16.mxu0 %v4379_v9  ;;  %v4400_v23 = vld [vmem:[%s6441_s1 + $0x750] ss:$8 sps:$4 sm:$0xff]   ;;  %v4401_v24 = vld [vmem:[%s6441_s1 + $0x64] ss:$8 sps:$4 sm:$0xff]   ;;  %v4405_v26 = vld [vmem:[%s6441_s1 + $0x60] ss:$8 sps:$4 sm:$0xff]  }
   0xe   : > { %v4403_v25 = vld [vmem:[%s6441_s1 + $0x764] ss:$8 sps:$4 sm:$0xff]   ;;  %v4406_v27 = vld [vmem:[%s6441_s1 + $0x760] ss:$8 sps:$4 sm:$0xff]   ;;  %v4407_v28 = vld [vmem:[%s6441_s1 + $0x74] ss:$8 sps:$4 sm:$0xff]  }
   0xf   : > { %2945 = vmatpush1.bf16.msra.mxu1 %v4381_v10  ;;  %v4409_v29 = vld [vmem:[%s6441_s1 + $0x774] ss:$8 sps:$4 sm:$0xff]   ;;  %v4411_v30 = vld [vmem:[%s6441_s1 + $0x70] ss:$8 sps:$4 sm:$0xff]   ;;  %v4413_v32 = vld [vmem:[%s6441_s1 + $0x84] ss:$8 sps:$4 sm:$0xff]  }
  0x10   : > { %3246 = vmatpush1.bf16.msra.mxu0 %v4382_v11  ;;  %2946 = vmatprep.subr.bf16.mxu1 %v4383_v12  ;;  %v4412_v31 = vld [vmem:[%s6441_s1 + $0x770] ss:$8 sps:$4 sm:$0xff]   ;;  %v4415_v33 = vld [vmem:[%s6441_s1 + $0x784] ss:$8 sps:$4 sm:$0xff]   ;;  %v4417_v34 = vld [vmem:[%s6441_s1 + $0x80] ss:$8 sps:$4 sm:$0xff]  }
  0x11   : > { %3247 = vmatprep.subr.bf16.mxu0 %v4385_v13  ;;  %v4418_v35 = vld [vmem:[%s6441_s1 + $0x780] ss:$8 sps:$4 sm:$0xff]   ;;  %v4419_v36 = vld [vmem:[%s6441_s1 + $0x94] ss:$8 sps:$4 sm:$0xff]   ;;  %s6445_s13 = smov (!%p161_p3, %s3824_s13), 1  ;;  %vm3753_vm0 = vcmask 1041408  }
  0x12   : > { %v4421_v37 = vld [vmem:[%s6441_s1 + $0x794] ss:$8 sps:$4 sm:$0xff]   ;;  %v4423_v38 = vld [vmem:[%s6441_s1 + $0x90] ss:$8 sps:$4 sm:$0xff]   ;;  %v4425_v40 = vld [vmem:[%s6441_s1 + $0xa4] ss:$8 sps:$4 sm:$0xff]  }
  0x13   : > { %2947 = vmatpush1.bf16.msra.mxu1 %v4387_v14  ;;  %v4424_v39 = vld [vmem:[%s6441_s1 + $0x790] ss:$8 sps:$4 sm:$0xff]   ;;  %s4352_s21 = smul.u32 216, %s6445_s13  ;;  %v4427_v41 = vld [vmem:[%s6441_s1 + $0x7a4] ss:$8 sps:$4 sm:$0xff]   ;;  %vm3756_vm2 = vcmask 1043458  }
  0x14   : > { %3248 = vmatpush1.bf16.msra.mxu0 %v4388_v15  ;;  %2948 = vmatprep.subr.bf16.mxu1 %v4389_v16  ;;  %v4429_v42 = vld [vmem:[%s6441_s1 + $0xa0] ss:$8 sps:$4 sm:$0xff]   ;;  %v4431_v44 = vld [vmem:[%s6441_s1 + $0xb4] ss:$8 sps:$4 sm:$0xff]   ;;  %v4435_v46 = vld [vmem:[%s6441_s1 + $0xb0] ss:$8 sps:$4 sm:$0xff]  }
  0x15   : > { %3249 = vmatprep.subr.bf16.mxu0 %v4391_v17  ;;  %v4430_v43 = vld [vmem:[%s6441_s1 + $0x7a0] ss:$8 sps:$4 sm:$0xff]   ;;  %s5237_s5 = scalar_lea.vmem %s6440_s0, %s4352_s21  ;;  %v4433_v45 = vld [vmem:[%s6441_s1 + $0x7b4] ss:$8 sps:$4 sm:$0xff]   ;;  %v4436_v47 = vld [vmem:[%s6441_s1 + $0x7b0] ss:$8 sps:$4 sm:$0xff]  }
  0x16   : > { %v4463_v48 = vld [vmem:[%s5237_s5 + $0x4] ss:$108 sps:$4 sm:$0xff]   ;;  %v4469_v51 = vld [vmem:[%s5237_s5 + $0x3c] ss:$108 sps:$4 sm:$0xff]   ;;  %v4461_v4 = vld [vmem:[%s5237_s5] ss:$108 sps:$4 sm:$0xff]  }
  0x17   : > { %2949 = vmatpush1.bf16.msra.mxu1 %v4393_v18  ;;  %v4437_v49 = vld [vmem:[%s6441_s1 + $0xc4] ss:$8 sps:$4 sm:$0xff]   ;;  %2972 = vmatprep.mubr.bf16.mxu1 %v4463_v48  ;;  %v4441_v52 = vld [vmem:[%s6441_s1 + $0xc0] ss:$8 sps:$4 sm:$0xff]   ;;  %v4443_v54 = vld [vmem:[%s6441_s1 + $0xd4] ss:$8 sps:$4 sm:$0xff]  }
  0x18   : > { %3250 = vmatpush1.bf16.msra.mxu0 %v4394_v19  ;;  %2950 = vmatprep.subr.bf16.mxu1 %v4395_v20  ;;  %v4439_v50 = vld [vmem:[%s6441_s1 + $0x7c4] ss:$8 sps:$4 sm:$0xff]   ;;  %v4442_v53 = vld [vmem:[%s6441_s1 + $0x7c0] ss:$8 sps:$4 sm:$0xff]   ;;  %v4445_v55 = vld [vmem:[%s6441_s1 + $0x7d4] ss:$8 sps:$4 sm:$0xff]  }
  0x19   : > { %3251 = vmatprep.subr.bf16.mxu0 %v4397_v21  ;;  %3273 = vmatprep.mubr.bf16.mxu0 %v4469_v51  ;;  %v4447_v56 = vld [vmem:[%s6441_s1 + $0xd0] ss:$8 sps:$4 sm:$0xff]   ;;  %v4449_v58 = vld [vmem:[%s6441_s1 + $0xe4] ss:$8 sps:$4 sm:$0xff]   ;;  %v4453_v60 = vld [vmem:[%s6441_s1 + $0xe0] ss:$8 sps:$4 sm:$0xff]  }
  0x1a   : > { %v4448_v57 = vld [vmem:[%s6441_s1 + $0x7d0] ss:$8 sps:$4 sm:$0xff]   ;;  %v4451_v59 = vld [vmem:[%s6441_s1 + $0x7e4] ss:$8 sps:$4 sm:$0xff]   ;;  %v4454_v61 = vld [vmem:[%s6441_s1 + $0x7e0] ss:$8 sps:$4 sm:$0xff]  }
  0x1b   : > { %2951 = vmatpush1.bf16.msra.mxu1 %v4399_v22  ;;  %v4455_v62 = vld [vmem:[%s6441_s1 + $0xf4] ss:$8 sps:$4 sm:$0xff]   ;;  %v4459_v0 = vld [vmem:[%s6441_s1 + $0xf0] ss:$8 sps:$4 sm:$0xff]   ;;  %v4466_v2 = vld [vmem:[%s6441_s1 + $0x104] ss:$8 sps:$4 sm:$0xff]  }
  0x1c   : > { %3252 = vmatpush1.bf16.msra.mxu0 %v4400_v23  ;;  %2952 = vmatprep.subr.bf16.mxu1 %v4401_v24  ;;  %v4457_v63 = vld [vmem:[%s6441_s1 + $0x7f4] ss:$8 sps:$4 sm:$0xff]   ;;  %v4460_v1 = vld [vmem:[%s6441_s1 + $0x7f0] ss:$8 sps:$4 sm:$0xff]   ;;  %v4472_v3 = vld [vmem:[%s6441_s1 + $0x804] ss:$8 sps:$4 sm:$0xff]  }
  0x1d   : > { %3253 = vmatprep.subr.bf16.mxu0 %v4403_v25  ;;  %v4464_v5 = vld [vmem:[%s6441_s1 + $0x100] ss:$8 sps:$4 sm:$0xff]   ;;  %v4467_v6 = vld [vmem:[%s5237_s5 + $0x38] ss:$108 sps:$4 sm:$0xff]   ;;  %v4475_v8 = vld [vmem:[%s6441_s1 + $0x114] ss:$8 sps:$4 sm:$0xff]  }
  0x1e   : > { %v4470_v7 = vld [vmem:[%s6441_s1 + $0x800] ss:$8 sps:$4 sm:$0xff]   ;;  %v4478_v9 = vld [vmem:[%s6441_s1 + $0x814] ss:$8 sps:$4 sm:$0xff]   ;;  %v4473_v10 = vld [vmem:[%s6441_s1 + $0x110] ss:$8 sps:$4 sm:$0xff]  }
  0x1f   : > { %2953 = vmatpush1.bf16.msra.mxu1 %v4405_v26  ;;  %v4476_v11 = vld [vmem:[%s6441_s1 + $0x810] ss:$8 sps:$4 sm:$0xff]   ;;  %v4481_v12 = vld [vmem:[%s6441_s1 + $0x124] ss:$8 sps:$4 sm:$0xff]   ;;  %v4479_v14 = vld [vmem:[%s6441_s1 + $0x120] ss:$8 sps:$4 sm:$0xff]  }
  0x20   : > { %3254 = vmatpush1.bf16.msra.mxu0 %v4406_v27  ;;  %2954 = vmatprep.subr.bf16.mxu1 %v4407_v28  ;;  %v4484_v13 = vld [vmem:[%s6441_s1 + $0x824] ss:$8 sps:$4 sm:$0xff]   ;;  %v4482_v15 = vld [vmem:[%s6441_s1 + $0x820] ss:$8 sps:$4 sm:$0xff]   ;;  %v4487_v16 = vld [vmem:[%s6441_s1 + $0x134] ss:$8 sps:$4 sm:$0xff]  }
  0x21   : > { %3255 = vmatprep.subr.bf16.mxu0 %v4409_v29  ;;  %v4490_v17 = vld [vmem:[%s6441_s1 + $0x834] ss:$8 sps:$4 sm:$0xff]   ;;  %v4485_v18 = vld [vmem:[%s6441_s1 + $0x130] ss:$8 sps:$4 sm:$0xff]   ;;  %v4493_v20 = vld [vmem:[%s6441_s1 + $0x144] ss:$8 sps:$4 sm:$0xff]  }
  0x22   : > { %v4488_v19 = vld [vmem:[%s6441_s1 + $0x830] ss:$8 sps:$4 sm:$0xff]   ;;  %v4496_v21 = vld [vmem:[%s6441_s1 + $0x844] ss:$8 sps:$4 sm:$0xff]   ;;  %v4491_v22 = vld [vmem:[%s6441_s1 + $0x140] ss:$8 sps:$4 sm:$0xff]  }
  0x23   : > { %2955 = vmatpush1.bf16.msra.mxu1 %v4411_v30  ;;  %v4494_v23 = vld [vmem:[%s6441_s1 + $0x840] ss:$8 sps:$4 sm:$0xff]   ;;  %v4499_v24 = vld [vmem:[%s6441_s1 + $0x154] ss:$8 sps:$4 sm:$0xff]   ;;  %v4497_v26 = vld [vmem:[%s6441_s1 + $0x150] ss:$8 sps:$4 sm:$0xff]  }
  0x24   : > { %3256 = vmatpush1.bf16.msra.mxu0 %v4412_v31  ;;  %2956 = vmatprep.subr.bf16.mxu1 %v4413_v32  ;;  %v4502_v25 = vld [vmem:[%s6441_s1 + $0x854] ss:$8 sps:$4 sm:$0xff]   ;;  %v4500_v27 = vld [vmem:[%s6441_s1 + $0x850] ss:$8 sps:$4 sm:$0xff]   ;;  %v4505_v28 = vld [vmem:[%s6441_s1 + $0x164] ss:$8 sps:$4 sm:$0xff]  }
  0x25   : > { %3257 = vmatprep.subr.bf16.mxu0 %v4415_v33  ;;  %v4508_v29 = vld [vmem:[%s6441_s1 + $0x864] ss:$8 sps:$4 sm:$0xff]   ;;  %v4503_v30 = vld [vmem:[%s6441_s1 + $0x160] ss:$8 sps:$4 sm:$0xff]   ;;  %v4511_v32 = vld [vmem:[%s6441_s1 + $0x174] ss:$8 sps:$4 sm:$0xff]  }
  0x26   : > { %v4506_v31 = vld [vmem:[%s6441_s1 + $0x860] ss:$8 sps:$4 sm:$0xff]   ;;  %v4514_v33 = vld [vmem:[%s6441_s1 + $0x874] ss:$8 sps:$4 sm:$0xff]   ;;  %vm3754_vm1 = vsmask.f32 1280 }
  0x27   : > { %2957 = vmatpush1.bf16.msra.mxu1 %v4417_v34  ;;  %v4565_v34 = vld [vmem:[%s5237_s5 + $0xc] ss:$108 sps:$4 sm:$0xff]   ;;  %v4527_v48 = vld [vmem:[%s6441_s1 + $0x1a0] ss:$8 sps:$4 sm:$0xff]   ;;  %v4538_v51 = vld [vmem:[%s6441_s1 + $0x8b4] ss:$8 sps:$4 sm:$0xff]  }
  0x28   : > { %3258 = vmatpush1.bf16.msra.mxu0 %v4418_v35  ;;  %2958 = vmatprep.subr.bf16.mxu1 %v4419_v36  ;;  %v4509_v35 = vld [vmem:[%s6441_s1 + $0x170] ss:$8 sps:$4 sm:$0xff]   ;;  %vm3757_vm3 = vsmask.f32 3328  ;;  %vm3755_vm4 = vmand %vm3753_vm0, %vm3754_vm1 }
  0x29   : > { %3259 = vmatprep.subr.bf16.mxu0 %v4421_v37  ;;  %v4512_v36 = vld [vmem:[%s6441_s1 + $0x870] ss:$8 sps:$4 sm:$0xff]   ;;  %vm3758_vm5 = vmand %vm3756_vm2, %vm3757_vm3 }
  0x2a   : > { %v4571_v37 = vld [vmem:[%s5237_s5 + $0x44] ss:$108 sps:$4 sm:$0xff]   ;;  %vm3759_vm6 = vmor %vm3758_vm5, %vm3755_vm4 }
  0x2b   : > { %2959 = vmatpush1.bf16.msra.mxu1 %v4423_v38  ;;  %v4517_v38 = vld [vmem:[%s6441_s1 + $0x184] ss:$8 sps:$4 sm:$0xff]  }
  0x2c   : > { %3260 = vmatpush1.bf16.msra.mxu0 %v4424_v39  ;;  %2960 = vmatprep.subr.bf16.mxu1 %v4425_v40  ;;  %v4520_v39 = vld [vmem:[%s6441_s1 + $0x884] ss:$8 sps:$4 sm:$0xff]   ;;  %v4515_v40 = vld [vmem:[%s6441_s1 + $0x180] ss:$8 sps:$4 sm:$0xff]  }
  0x2d   : > { %3261 = vmatprep.subr.bf16.mxu0 %v4427_v41  ;;  %v4518_v41 = vld [vmem:[%s6441_s1 + $0x880] ss:$8 sps:$4 sm:$0xff]  }
  0x2f   : > { %2961 = vmatpush1.bf16.msra.mxu1 %v4429_v42  ;;  %v4523_v42 = vld [vmem:[%s6441_s1 + $0x194] ss:$8 sps:$4 sm:$0xff]  }
  0x30   : > { %3262 = vmatpush1.bf16.msra.mxu0 %v4430_v43  ;;  %2962 = vmatprep.subr.bf16.mxu1 %v4431_v44  ;;  %v4526_v43 = vld [vmem:[%s6441_s1 + $0x894] ss:$8 sps:$4 sm:$0xff]   ;;  %v4521_v44 = vld [vmem:[%s6441_s1 + $0x190] ss:$8 sps:$4 sm:$0xff]  }
  0x31   : > { %3263 = vmatprep.subr.bf16.mxu0 %v4433_v45  ;;  %v4524_v45 = vld [vmem:[%s6441_s1 + $0x890] ss:$8 sps:$4 sm:$0xff]  }
  0x33   : > { %2963 = vmatpush1.bf16.msra.mxu1 %v4435_v46  ;;  %v4529_v46 = vld [vmem:[%s6441_s1 + $0x1a4] ss:$8 sps:$4 sm:$0xff]  }
  0x34   : > { %3264 = vmatpush1.bf16.msra.mxu0 %v4436_v47  ;;  %2964 = vmatprep.subr.bf16.mxu1 %v4437_v49  ;;  %v4532_v47 = vld [vmem:[%s6441_s1 + $0x8a4] ss:$8 sps:$4 sm:$0xff]   ;;  %v4530_v49 = vld [vmem:[%s6441_s1 + $0x8a0] ss:$8 sps:$4 sm:$0xff]  }
  0x35   : > { %3265 = vmatprep.subr.bf16.mxu0 %v4439_v50  ;;  %v4535_v50 = vld [vmem:[%s6441_s1 + $0x1b4] ss:$8 sps:$4 sm:$0xff]  }
  0x37   : > { %2965 = vmatpush1.bf16.msra.mxu1 %v4441_v52  ;;  %v4533_v52 = vld [vmem:[%s6441_s1 + $0x1b0] ss:$8 sps:$4 sm:$0xff]  }
  0x38   : > { %3266 = vmatpush1.bf16.msra.mxu0 %v4442_v53  ;;  %2966 = vmatprep.subr.bf16.mxu1 %v4443_v54  ;;  %v4536_v53 = vld [vmem:[%s6441_s1 + $0x8b0] ss:$8 sps:$4 sm:$0xff]   ;;  %v4541_v54 = vld [vmem:[%s6441_s1 + $0x1c4] ss:$8 sps:$4 sm:$0xff]  }
  0x39   : > { %3267 = vmatprep.subr.bf16.mxu0 %v4445_v55  ;;  %v4544_v55 = vld [vmem:[%s6441_s1 + $0x8c4] ss:$8 sps:$4 sm:$0xff]  }
  0x3b   : > { %2967 = vmatpush1.bf16.msra.mxu1 %v4447_v56  ;;  %v4539_v56 = vld [vmem:[%s6441_s1 + $0x1c0] ss:$8 sps:$4 sm:$0xff]  }
  0x3c   : > { %3268 = vmatpush1.bf16.msra.mxu0 %v4448_v57  ;;  %2968 = vmatprep.subr.bf16.mxu1 %v4449_v58  ;;  %v4542_v57 = vld [vmem:[%s6441_s1 + $0x8c0] ss:$8 sps:$4 sm:$0xff]   ;;  %v4547_v58 = vld [vmem:[%s6441_s1 + $0x1d4] ss:$8 sps:$4 sm:$0xff]  }
  0x3d   : > { %3269 = vmatprep.subr.bf16.mxu0 %v4451_v59  ;;  %v4550_v59 = vld [vmem:[%s6441_s1 + $0x8d4] ss:$8 sps:$4 sm:$0xff]  }
  0x3f   : > { %2969 = vmatpush1.bf16.msra.mxu1 %v4453_v60  ;;  %v4545_v60 = vld [vmem:[%s6441_s1 + $0x1d0] ss:$8 sps:$4 sm:$0xff]  }
  0x40   : > { %3270 = vmatpush1.bf16.msra.mxu0 %v4454_v61  ;;  %2970 = vmatprep.subr.bf16.mxu1 %v4455_v62  ;;  %v4548_v61 = vld [vmem:[%s6441_s1 + $0x8d0] ss:$8 sps:$4 sm:$0xff]   ;;  %v4553_v62 = vld [vmem:[%s6441_s1 + $0x1e4] ss:$8 sps:$4 sm:$0xff]  }
  0x41   : > { %3271 = vmatprep.subr.bf16.mxu0 %v4457_v63  ;;  %v4556_v63 = vld [vmem:[%s6441_s1 + $0x8e4] ss:$8 sps:$4 sm:$0xff]  }
  0x43   : > { %2971 = vmatpush1.bf16.msra.mxu1 %v4459_v0  ;;  %v4551_v0 = vld [vmem:[%s6441_s1 + $0x1e0] ss:$8 sps:$4 sm:$0xff]  }
  0x44   : > { %3272 = vmatpush1.bf16.msra.mxu0 %v4460_v1  ;;  %2983 = vmatprep.subr.bf16.mxu1 %v4466_v2  ;;  %v4554_v1 = vld [vmem:[%s6441_s1 + $0x8e0] ss:$8 sps:$4 sm:$0xff]   ;;  %v4559_v2 = vld [vmem:[%s6441_s1 + $0x1f4] ss:$8 sps:$4 sm:$0xff]  }
  0x45   : > { %3284 = vmatprep.subr.bf16.mxu0 %v4472_v3  ;;  %v4562_v3 = vld [vmem:[%s6441_s1 + $0x8f4] ss:$8 sps:$4 sm:$0xff]  }
  0x46   : > { %2973 = vmatmul.mubr.bf16.vlgmr.msra.gmra.mrb[0].mxu1 %v4461_v4  ;;  %v4557_v4 = vld [vmem:[%s6441_s1 + $0x1f0] ss:$8 sps:$4 sm:$0xff]  }
  0x47   : > { %3274 = vmatmul.mubr.bf16.vlgmr.msra.gmra.mrb[0].mxu0 %v4467_v6  ;;  %2984 = vmatpush1.bf16.msra.mxu1 %v4464_v5  ;;  %v4560_v5 = vld [vmem:[%s6441_s1 + $0x8f0] ss:$8 sps:$4 sm:$0xff]   ;;  %v4568_v6 = vld [vmem:[%s6441_s1 + $0x204] ss:$8 sps:$4 sm:$0xff]  }
  0x48   : > { %3285 = vmatpush1.bf16.msra.mxu0 %v4470_v7  ;;  %2985 = vmatprep.subr.bf16.mxu1 %v4475_v8  ;;  %v4574_v7 = vld [vmem:[%s6441_s1 + $0x904] ss:$8 sps:$4 sm:$0xff]   ;;  %v4563_v8 = vld [vmem:[%s5237_s5 + $0x8] ss:$108 sps:$4 sm:$0xff]  }
  0x49   : > { %3286 = vmatprep.subr.bf16.mxu0 %v4478_v9  ;;  %3015 = vmatprep.mubr.bf16.mxu1 %v4565_v34  ;;  %v4566_v9 = vld [vmem:[%s6441_s1 + $0x200] ss:$8 sps:$4 sm:$0xff]   ;;  %v4607_v34 = vld [vmem:[%s6441_s1 + $0x264] ss:$8 sps:$4 sm:$0xff]  }
  0x4a   : > { %3316 = vmatprep.mubr.bf16.mxu0 %v4571_v37  ;;  %v4608_v37 = vld [vmem:[%s6441_s1 + $0x960] ss:$8 sps:$4 sm:$0xff]  }
  0x4b   : > { %2986 = vmatpush1.bf16.msra.mxu1 %v4473_v10  ;;  %v4569_v10 = vld [vmem:[%s5237_s5 + $0x40] ss:$108 sps:$4 sm:$0xff]  }
  0x4c   : > { %3287 = vmatpush1.bf16.msra.mxu0 %v4476_v11  ;;  %2987 = vmatprep.subr.bf16.mxu1 %v4481_v12  ;;  %v4572_v11 = vld [vmem:[%s6441_s1 + $0x900] ss:$8 sps:$4 sm:$0xff]   ;;  %v4577_v12 = vld [vmem:[%s6441_s1 + $0x214] ss:$8 sps:$4 sm:$0xff]  }
  0x4d   : > { %3288 = vmatprep.subr.bf16.mxu0 %v4484_v13  ;;  %v4580_v13 = vld [vmem:[%s6441_s1 + $0x914] ss:$8 sps:$4 sm:$0xff]  }
  0x4f   : > { %2988 = vmatpush1.bf16.msra.mxu1 %v4479_v14  ;;  %v4575_v14 = vld [vmem:[%s6441_s1 + $0x210] ss:$8 sps:$4 sm:$0xff]  }
  0x50   : > { %3289 = vmatpush1.bf16.msra.mxu0 %v4482_v15  ;;  %2989 = vmatprep.subr.bf16.mxu1 %v4487_v16  ;;  %v4578_v15 = vld [vmem:[%s6441_s1 + $0x910] ss:$8 sps:$4 sm:$0xff]   ;;  %v4583_v16 = vld [vmem:[%s6441_s1 + $0x224] ss:$8 sps:$4 sm:$0xff]  }
  0x51   : > { %3290 = vmatprep.subr.bf16.mxu0 %v4490_v17  ;;  %v4586_v17 = vld [vmem:[%s6441_s1 + $0x924] ss:$8 sps:$4 sm:$0xff]  }
  0x53   : > { %2990 = vmatpush1.bf16.msra.mxu1 %v4485_v18  ;;  %v4581_v18 = vld [vmem:[%s6441_s1 + $0x220] ss:$8 sps:$4 sm:$0xff]  }
  0x54   : > { %3291 = vmatpush1.bf16.msra.mxu0 %v4488_v19  ;;  %2991 = vmatprep.subr.bf16.mxu1 %v4493_v20  ;;  %v4667_v19 = vld [vmem:[%s5237_s5 + $0x14] ss:$108 sps:$4 sm:$0xff]  }
  0x55   : > { %3292 = vmatprep.subr.bf16.mxu0 %v4496_v21  ;;  %v4584_v20 = vld [vmem:[%s6441_s1 + $0x920] ss:$8 sps:$4 sm:$0xff]   ;;  %v4589_v21 = vld [vmem:[%s6441_s1 + $0x234] ss:$8 sps:$4 sm:$0xff]  }
  0x57   : > { %2992 = vmatpush1.bf16.msra.mxu1 %v4491_v22  ;;  %v4592_v22 = vld [vmem:[%s6441_s1 + $0x934] ss:$8 sps:$4 sm:$0xff]  }
  0x58   : > { %3293 = vmatpush1.bf16.msra.mxu0 %v4494_v23  ;;  %2993 = vmatprep.subr.bf16.mxu1 %v4499_v24  ;;  %v4673_v23 = vld [vmem:[%s5237_s5 + $0x4c] ss:$108 sps:$4 sm:$0xff]  }
  0x59   : > { %3294 = vmatprep.subr.bf16.mxu0 %v4502_v25  ;;  %v4587_v24 = vld [vmem:[%s6441_s1 + $0x230] ss:$8 sps:$4 sm:$0xff]  }
  0x5a   : > { %v4590_v25 = vld [vmem:[%s6441_s1 + $0x930] ss:$8 sps:$4 sm:$0xff]  }
  0x5b   : > { %2994 = vmatpush1.bf16.msra.mxu1 %v4497_v26  ;;  %v4595_v26 = vld [vmem:[%s6441_s1 + $0x244] ss:$8 sps:$4 sm:$0xff]  }
  0x5c   : > { %3295 = vmatpush1.bf16.msra.mxu0 %v4500_v27  ;;  %2995 = vmatprep.subr.bf16.mxu1 %v4505_v28  ;;  %v4598_v27 = vld [vmem:[%s6441_s1 + $0x944] ss:$8 sps:$4 sm:$0xff]   ;;  %v4593_v28 = vld [vmem:[%s6441_s1 + $0x240] ss:$8 sps:$4 sm:$0xff]  }
  0x5d   : > { %3296 = vmatprep.subr.bf16.mxu0 %v4508_v29  ;;  %v4596_v29 = vld [vmem:[%s6441_s1 + $0x940] ss:$8 sps:$4 sm:$0xff]  }
  0x5f   : > { %2996 = vmatpush1.bf16.msra.mxu1 %v4503_v30  ;;  %v4601_v30 = vld [vmem:[%s6441_s1 + $0x254] ss:$8 sps:$4 sm:$0xff]  }
  0x60   : > { %3297 = vmatpush1.bf16.msra.mxu0 %v4506_v31  ;;  %2997 = vmatprep.subr.bf16.mxu1 %v4511_v32  ;;  %v4604_v31 = vld [vmem:[%s6441_s1 + $0x954] ss:$8 sps:$4 sm:$0xff]   ;;  %v4599_v32 = vld [vmem:[%s6441_s1 + $0x250] ss:$8 sps:$4 sm:$0xff]  }
  0x61   : > { %3298 = vmatprep.subr.bf16.mxu0 %v4514_v33  ;;  %v4602_v33 = vld [vmem:[%s6441_s1 + $0x950] ss:$8 sps:$4 sm:$0xff]  }
  0x63   : > { %2998 = vmatpush1.bf16.msra.mxu1 %v4509_v35  ;;  %v4610_v35 = vld [vmem:[%s6441_s1 + $0x964] ss:$8 sps:$4 sm:$0xff]  }
  0x64   : > { %3299 = vmatpush1.bf16.msra.mxu0 %v4512_v36  ;;  %2999 = vmatprep.subr.bf16.mxu1 %v4517_v38  ;;  %v4605_v36 = vld [vmem:[%s6441_s1 + $0x260] ss:$8 sps:$4 sm:$0xff]   ;;  %v4613_v38 = vld [vmem:[%s6441_s1 + $0x274] ss:$8 sps:$4 sm:$0xff]  }
  0x65   : > { %3300 = vmatprep.subr.bf16.mxu0 %v4520_v39  ;;  %v4616_v39 = vld [vmem:[%s6441_s1 + $0x974] ss:$8 sps:$4 sm:$0xff]  }
  0x67   : > { %3000 = vmatpush1.bf16.msra.mxu1 %v4515_v40  ;;  %v4611_v40 = vld [vmem:[%s6441_s1 + $0x270] ss:$8 sps:$4 sm:$0xff]  }
  0x68   : > { %3301 = vmatpush1.bf16.msra.mxu0 %v4518_v41  ;;  %3001 = vmatprep.subr.bf16.mxu1 %v4523_v42  ;;  %v4614_v41 = vld [vmem:[%s6441_s1 + $0x970] ss:$8 sps:$4 sm:$0xff]   ;;  %v4619_v42 = vld [vmem:[%s6441_s1 + $0x284] ss:$8 sps:$4 sm:$0xff]  }
  0x69   : > { %3302 = vmatprep.subr.bf16.mxu0 %v4526_v43  ;;  %v4622_v43 = vld [vmem:[%s6441_s1 + $0x984] ss:$8 sps:$4 sm:$0xff]  }
  0x6b   : > { %3002 = vmatpush1.bf16.msra.mxu1 %v4521_v44  ;;  %v4617_v44 = vld [vmem:[%s6441_s1 + $0x280] ss:$8 sps:$4 sm:$0xff]  }
  0x6c   : > { %3303 = vmatpush1.bf16.msra.mxu0 %v4524_v45  ;;  %3003 = vmatprep.subr.bf16.mxu1 %v4529_v46  ;;  %v4620_v45 = vld [vmem:[%s6441_s1 + $0x980] ss:$8 sps:$4 sm:$0xff]   ;;  %v4625_v46 = vld [vmem:[%s6441_s1 + $0x294] ss:$8 sps:$4 sm:$0xff]  }
  0x6d   : > { %3304 = vmatprep.subr.bf16.mxu0 %v4532_v47  ;;  %v4628_v47 = vld [vmem:[%s6441_s1 + $0x994] ss:$8 sps:$4 sm:$0xff]  }
  0x6f   : > { %3004 = vmatpush1.bf16.msra.mxu1 %v4527_v48  ;;  %v4623_v48 = vld [vmem:[%s6441_s1 + $0x290] ss:$8 sps:$4 sm:$0xff]  }
  0x70   : > { %3305 = vmatpush1.bf16.msra.mxu0 %v4530_v49  ;;  %3005 = vmatprep.subr.bf16.mxu1 %v4535_v50  ;;  %v4626_v49 = vld [vmem:[%s6441_s1 + $0x990] ss:$8 sps:$4 sm:$0xff]   ;;  %v4631_v50 = vld [vmem:[%s6441_s1 + $0x2a4] ss:$8 sps:$4 sm:$0xff]  }
  0x71   : > { %3306 = vmatprep.subr.bf16.mxu0 %v4538_v51  ;;  %v4634_v51 = vld [vmem:[%s6441_s1 + $0x9a4] ss:$8 sps:$4 sm:$0xff]  }
  0x73   : > { %3006 = vmatpush1.bf16.msra.mxu1 %v4533_v52  ;;  %v4629_v52 = vld [vmem:[%s6441_s1 + $0x2a0] ss:$8 sps:$4 sm:$0xff]  }
  0x74   : > { %3307 = vmatpush1.bf16.msra.mxu0 %v4536_v53  ;;  %3007 = vmatprep.subr.bf16.mxu1 %v4541_v54  ;;  %v4632_v53 = vld [vmem:[%s6441_s1 + $0x9a0] ss:$8 sps:$4 sm:$0xff]   ;;  %v4637_v54 = vld [vmem:[%s6441_s1 + $0x2b4] ss:$8 sps:$4 sm:$0xff]  }
  0x75   : > { %3308 = vmatprep.subr.bf16.mxu0 %v4544_v55  ;;  %v4640_v55 = vld [vmem:[%s6441_s1 + $0x9b4] ss:$8 sps:$4 sm:$0xff]  }
  0x77   : > { %3008 = vmatpush1.bf16.msra.mxu1 %v4539_v56  ;;  %v4635_v56 = vld [vmem:[%s6441_s1 + $0x2b0] ss:$8 sps:$4 sm:$0xff]  }
  0x78   : > { %3309 = vmatpush1.bf16.msra.mxu0 %v4542_v57  ;;  %3009 = vmatprep.subr.bf16.mxu1 %v4547_v58  ;;  %v4638_v57 = vld [vmem:[%s6441_s1 + $0x9b0] ss:$8 sps:$4 sm:$0xff]   ;;  %v4643_v58 = vld [vmem:[%s6441_s1 + $0x2c4] ss:$8 sps:$4 sm:$0xff]  }
  0x79   : > { %3310 = vmatprep.subr.bf16.mxu0 %v4550_v59  ;;  %v4646_v59 = vld [vmem:[%s6441_s1 + $0x9c4] ss:$8 sps:$4 sm:$0xff]  }
  0x7b   : > { %3010 = vmatpush1.bf16.msra.mxu1 %v4545_v60  ;;  %v4641_v60 = vld [vmem:[%s6441_s1 + $0x2c0] ss:$8 sps:$4 sm:$0xff]  }
  0x7c   : > { %3311 = vmatpush1.bf16.msra.mxu0 %v4548_v61  ;;  %3011 = vmatprep.subr.bf16.mxu1 %v4553_v62  ;;  %v4644_v61 = vld [vmem:[%s6441_s1 + $0x9c0] ss:$8 sps:$4 sm:$0xff]   ;;  %v4649_v62 = vld [vmem:[%s6441_s1 + $0x2d4] ss:$8 sps:$4 sm:$0xff]  }
  0x7d   : > { %3312 = vmatprep.subr.bf16.mxu0 %v4556_v63  ;;  %v4652_v63 = vld [vmem:[%s6441_s1 + $0x9d4] ss:$8 sps:$4 sm:$0xff]  }
  0x7f   : > { %3012 = vmatpush1.bf16.msra.mxu1 %v4551_v0  ;;  %v4647_v0 = vld [vmem:[%s6441_s1 + $0x2d0] ss:$8 sps:$4 sm:$0xff]  }
  0x80   : > { %3313 = vmatpush1.bf16.msra.mxu0 %v4554_v1  ;;  %3013 = vmatprep.subr.bf16.mxu1 %v4559_v2  ;;  %v4650_v1 = vld [vmem:[%s6441_s1 + $0x9d0] ss:$8 sps:$4 sm:$0xff]   ;;  %v4655_v2 = vld [vmem:[%s6441_s1 + $0x2e4] ss:$8 sps:$4 sm:$0xff]  }
  0x81   : > { %3314 = vmatprep.subr.bf16.mxu0 %v4562_v3  ;;  %v4658_v3 = vld [vmem:[%s6441_s1 + $0x9e4] ss:$8 sps:$4 sm:$0xff]  }
  0x83   : > { %3014 = vmatpush1.bf16.msra.mxu1 %v4557_v4  ;;  %v4653_v4 = vld [vmem:[%s6441_s1 + $0x2e0] ss:$8 sps:$4 sm:$0xff]  }
  0x84   : > { %3315 = vmatpush1.bf16.msra.mxu0 %v4560_v5  ;;  %3026 = vmatprep.subr.bf16.mxu1 %v4568_v6  ;;  %v4656_v5 = vld [vmem:[%s6441_s1 + $0x9e0] ss:$8 sps:$4 sm:$0xff]   ;;  %v4661_v6 = vld [vmem:[%s6441_s1 + $0x2f4] ss:$8 sps:$4 sm:$0xff]  }
  0x85   : > { %3327 = vmatprep.subr.bf16.mxu0 %v4574_v7  ;;  %v4664_v7 = vld [vmem:[%s6441_s1 + $0x9f4] ss:$8 sps:$4 sm:$0xff]  }
  0x86   : > { %3016 = vmatmul.mubr.bf16.vlgmr.msra.gmra.mrb[0].mxu1 %v4563_v8  ;;  %v4659_v8 = vld [vmem:[%s6441_s1 + $0x2f0] ss:$8 sps:$4 sm:$0xff]  }
  0x87   : > { %3317 = vmatmul.mubr.bf16.vlgmr.msra.gmra.mrb[0].mxu0 %v4569_v10  ;;  %3027 = vmatpush1.bf16.msra.mxu1 %v4566_v9  ;;  %v4662_v9 = vld [vmem:[%s6441_s1 + $0x9f0] ss:$8 sps:$4 sm:$0xff]   ;;  %v4670_v10 = vld [vmem:[%s6441_s1 + $0x304] ss:$8 sps:$4 sm:$0xff]  }
  0x88   : > { %3328 = vmatpush1.bf16.msra.mxu0 %v4572_v11  ;;  %3028 = vmatprep.subr.bf16.mxu1 %v4577_v12  ;;  %v4676_v11 = vld [vmem:[%s6441_s1 + $0xa04] ss:$8 sps:$4 sm:$0xff]   ;;  %v4665_v12 = vld [vmem:[%s5237_s5 + $0x10] ss:$108 sps:$4 sm:$0xff]  }
  0x89   : > { %3329 = vmatprep.subr.bf16.mxu0 %v4580_v13  ;;  %3058 = vmatprep.mubr.bf16.mxu1 %v4667_v19  ;;  %v4668_v13 = vld [vmem:[%s6441_s1 + $0x300] ss:$8 sps:$4 sm:$0xff]  }
  0x8a   : > { %3359 = vmatprep.mubr.bf16.mxu0 %v4673_v23  ;;  %v4775_v19 = vld [vmem:[%s5237_s5 + $0x54] ss:$108 sps:$4 sm:$0xff]   ;;  %v4688_v23 = vld [vmem:[%s6441_s1 + $0xa24] ss:$8 sps:$4 sm:$0xff]  }
  0x8b   : > { %3029 = vmatpush1.bf16.msra.mxu1 %v4575_v14  ;;  %v4671_v14 = vld [vmem:[%s5237_s5 + $0x48] ss:$108 sps:$4 sm:$0xff]  }
  0x8c   : > { %3330 = vmatpush1.bf16.msra.mxu0 %v4578_v15  ;;  %3030 = vmatprep.subr.bf16.mxu1 %v4583_v16  ;;  %v4674_v15 = vld [vmem:[%s6441_s1 + $0xa00] ss:$8 sps:$4 sm:$0xff]   ;;  %v4679_v16 = vld [vmem:[%s6441_s1 + $0x314] ss:$8 sps:$4 sm:$0xff]  }
  0x8d   : > { %3331 = vmatprep.subr.bf16.mxu0 %v4586_v17  ;;  %v4682_v17 = vld [vmem:[%s6441_s1 + $0xa14] ss:$8 sps:$4 sm:$0xff]  }
  0x8f   : > { %3031 = vmatpush1.bf16.msra.mxu1 %v4581_v18  ;;  %v4769_v18 = vld [vmem:[%s5237_s5 + $0x1c] ss:$108 sps:$4 sm:$0xff]  }
  0x90   : > { %3332 = vmatpush1.bf16.msra.mxu0 %v4584_v20  ;;  %3032 = vmatprep.subr.bf16.mxu1 %v4589_v21  ;;  %v4677_v20 = vld [vmem:[%s6441_s1 + $0x310] ss:$8 sps:$4 sm:$0xff]  }
  0x91   : > { %3333 = vmatprep.subr.bf16.mxu0 %v4592_v22  ;;  %v4680_v21 = vld [vmem:[%s6441_s1 + $0xa10] ss:$8 sps:$4 sm:$0xff]   ;;  %v4685_v22 = vld [vmem:[%s6441_s1 + $0x324] ss:$8 sps:$4 sm:$0xff]  }
  0x93   : > { %3033 = vmatpush1.bf16.msra.mxu1 %v4587_v24  ;;  %v4683_v24 = vld [vmem:[%s6441_s1 + $0x320] ss:$8 sps:$4 sm:$0xff]  }
  0x94   : > { %3334 = vmatpush1.bf16.msra.mxu0 %v4590_v25  ;;  %3034 = vmatprep.subr.bf16.mxu1 %v4595_v26  ;;  %v4686_v25 = vld [vmem:[%s6441_s1 + $0xa20] ss:$8 sps:$4 sm:$0xff]   ;;  %v4691_v26 = vld [vmem:[%s6441_s1 + $0x334] ss:$8 sps:$4 sm:$0xff]  }
  0x95   : > { %3335 = vmatprep.subr.bf16.mxu0 %v4598_v27  ;;  %v4694_v27 = vld [vmem:[%s6441_s1 + $0xa34] ss:$8 sps:$4 sm:$0xff]  }
  0x97   : > { %3035 = vmatpush1.bf16.msra.mxu1 %v4593_v28  ;;  %v4689_v28 = vld [vmem:[%s6441_s1 + $0x330] ss:$8 sps:$4 sm:$0xff]  }
  0x98   : > { %3336 = vmatpush1.bf16.msra.mxu0 %v4596_v29  ;;  %3036 = vmatprep.subr.bf16.mxu1 %v4601_v30  ;;  %v4692_v29 = vld [vmem:[%s6441_s1 + $0xa30] ss:$8 sps:$4 sm:$0xff]   ;;  %v4697_v30 = vld [vmem:[%s6441_s1 + $0x344] ss:$8 sps:$4 sm:$0xff]  }
  0x99   : > { %3337 = vmatprep.subr.bf16.mxu0 %v4604_v31  ;;  %v4700_v31 = vld [vmem:[%s6441_s1 + $0xa44] ss:$8 sps:$4 sm:$0xff]  }
  0x9b   : > { %3037 = vmatpush1.bf16.msra.mxu1 %v4599_v32  ;;  %v4695_v32 = vld [vmem:[%s6441_s1 + $0x340] ss:$8 sps:$4 sm:$0xff]  }
  0x9c   : > { %3338 = vmatpush1.bf16.msra.mxu0 %v4602_v33  ;;  %3038 = vmatprep.subr.bf16.mxu1 %v4607_v34  ;;  %v4698_v33 = vld [vmem:[%s6441_s1 + $0xa40] ss:$8 sps:$4 sm:$0xff]   ;;  %v4703_v34 = vld [vmem:[%s6441_s1 + $0x354] ss:$8 sps:$4 sm:$0xff]  }
  0x9d   : > { %3339 = vmatprep.subr.bf16.mxu0 %v4610_v35  ;;  %v4706_v35 = vld [vmem:[%s6441_s1 + $0xa54] ss:$8 sps:$4 sm:$0xff]  }
  0x9f   : > { %3039 = vmatpush1.bf16.msra.mxu1 %v4605_v36  ;;  %v4701_v36 = vld [vmem:[%s6441_s1 + $0x350] ss:$8 sps:$4 sm:$0xff]  }
  0xa0   : > { %3340 = vmatpush1.bf16.msra.mxu0 %v4608_v37  ;;  %3040 = vmatprep.subr.bf16.mxu1 %v4613_v38  ;;  %v4704_v37 = vld [vmem:[%s6441_s1 + $0xa50] ss:$8 sps:$4 sm:$0xff]   ;;  %v4709_v38 = vld [vmem:[%s6441_s1 + $0x364] ss:$8 sps:$4 sm:$0xff]  }
  0xa1   : > { %3341 = vmatprep.subr.bf16.mxu0 %v4616_v39  ;;  %v4712_v39 = vld [vmem:[%s6441_s1 + $0xa64] ss:$8 sps:$4 sm:$0xff]  }
  0xa3   : > { %3041 = vmatpush1.bf16.msra.mxu1 %v4611_v40  ;;  %v4707_v40 = vld [vmem:[%s6441_s1 + $0x360] ss:$8 sps:$4 sm:$0xff]  }
  0xa4   : > { %3342 = vmatpush1.bf16.msra.mxu0 %v4614_v41  ;;  %3042 = vmatprep.subr.bf16.mxu1 %v4619_v42  ;;  %v4710_v41 = vld [vmem:[%s6441_s1 + $0xa60] ss:$8 sps:$4 sm:$0xff]   ;;  %v4715_v42 = vld [vmem:[%s6441_s1 + $0x374] ss:$8 sps:$4 sm:$0xff]  }
  0xa5   : > { %3343 = vmatprep.subr.bf16.mxu0 %v4622_v43  ;;  %v4718_v43 = vld [vmem:[%s6441_s1 + $0xa74] ss:$8 sps:$4 sm:$0xff]  }
  0xa7   : > { %3043 = vmatpush1.bf16.msra.mxu1 %v4617_v44  ;;  %v4713_v44 = vld [vmem:[%s6441_s1 + $0x370] ss:$8 sps:$4 sm:$0xff]  }
  0xa8   : > { %3344 = vmatpush1.bf16.msra.mxu0 %v4620_v45  ;;  %3044 = vmatprep.subr.bf16.mxu1 %v4625_v46  ;;  %v4716_v45 = vld [vmem:[%s6441_s1 + $0xa70] ss:$8 sps:$4 sm:$0xff]   ;;  %v4721_v46 = vld [vmem:[%s6441_s1 + $0x384] ss:$8 sps:$4 sm:$0xff]  }
  0xa9   : > { %3345 = vmatprep.subr.bf16.mxu0 %v4628_v47  ;;  %v4724_v47 = vld [vmem:[%s6441_s1 + $0xa84] ss:$8 sps:$4 sm:$0xff]  }
  0xab   : > { %3045 = vmatpush1.bf16.msra.mxu1 %v4623_v48  ;;  %v4719_v48 = vld [vmem:[%s6441_s1 + $0x380] ss:$8 sps:$4 sm:$0xff]  }
  0xac   : > { %3346 = vmatpush1.bf16.msra.mxu0 %v4626_v49  ;;  %3046 = vmatprep.subr.bf16.mxu1 %v4631_v50  ;;  %v4722_v49 = vld [vmem:[%s6441_s1 + $0xa80] ss:$8 sps:$4 sm:$0xff]   ;;  %v4727_v50 = vld [vmem:[%s6441_s1 + $0x394] ss:$8 sps:$4 sm:$0xff]  }
  0xad   : > { %3347 = vmatprep.subr.bf16.mxu0 %v4634_v51  ;;  %v4730_v51 = vld [vmem:[%s6441_s1 + $0xa94] ss:$8 sps:$4 sm:$0xff]  }
  0xaf   : > { %3047 = vmatpush1.bf16.msra.mxu1 %v4629_v52  ;;  %v4725_v52 = vld [vmem:[%s6441_s1 + $0x390] ss:$8 sps:$4 sm:$0xff]  }
  0xb0   : > { %3348 = vmatpush1.bf16.msra.mxu0 %v4632_v53  ;;  %3048 = vmatprep.subr.bf16.mxu1 %v4637_v54  ;;  %v4728_v53 = vld [vmem:[%s6441_s1 + $0xa90] ss:$8 sps:$4 sm:$0xff]   ;;  %v4733_v54 = vld [vmem:[%s6441_s1 + $0x3a4] ss:$8 sps:$4 sm:$0xff]  }
  0xb1   : > { %3349 = vmatprep.subr.bf16.mxu0 %v4640_v55  ;;  %v4736_v55 = vld [vmem:[%s6441_s1 + $0xaa4] ss:$8 sps:$4 sm:$0xff]  }
  0xb3   : > { %3049 = vmatpush1.bf16.msra.mxu1 %v4635_v56  ;;  %v4731_v56 = vld [vmem:[%s6441_s1 + $0x3a0] ss:$8 sps:$4 sm:$0xff]  }
  0xb4   : > { %3350 = vmatpush1.bf16.msra.mxu0 %v4638_v57  ;;  %3050 = vmatprep.subr.bf16.mxu1 %v4643_v58  ;;  %v4734_v57 = vld [vmem:[%s6441_s1 + $0xaa0] ss:$8 sps:$4 sm:$0xff]   ;;  %v4739_v58 = vld [vmem:[%s6441_s1 + $0x3b4] ss:$8 sps:$4 sm:$0xff]  }
  0xb5   : > { %3351 = vmatprep.subr.bf16.mxu0 %v4646_v59  ;;  %v4742_v59 = vld [vmem:[%s6441_s1 + $0xab4] ss:$8 sps:$4 sm:$0xff]  }
  0xb7   : > { %3051 = vmatpush1.bf16.msra.mxu1 %v4641_v60  ;;  %v4737_v60 = vld [vmem:[%s6441_s1 + $0x3b0] ss:$8 sps:$4 sm:$0xff]  }
  0xb8   : > { %3352 = vmatpush1.bf16.msra.mxu0 %v4644_v61  ;;  %3052 = vmatprep.subr.bf16.mxu1 %v4649_v62  ;;  %v4740_v61 = vld [vmem:[%s6441_s1 + $0xab0] ss:$8 sps:$4 sm:$0xff]   ;;  %v4745_v62 = vld [vmem:[%s6441_s1 + $0x3c4] ss:$8 sps:$4 sm:$0xff]  }
  0xb9   : > { %3353 = vmatprep.subr.bf16.mxu0 %v4652_v63  ;;  %v4748_v63 = vld [vmem:[%s6441_s1 + $0xac4] ss:$8 sps:$4 sm:$0xff]  }
  0xbb   : > { %3053 = vmatpush1.bf16.msra.mxu1 %v4647_v0  ;;  %v4743_v0 = vld [vmem:[%s6441_s1 + $0x3c0] ss:$8 sps:$4 sm:$0xff]  }
  0xbc   : > { %3354 = vmatpush1.bf16.msra.mxu0 %v4650_v1  ;;  %3054 = vmatprep.subr.bf16.mxu1 %v4655_v2  ;;  %v4746_v1 = vld [vmem:[%s6441_s1 + $0xac0] ss:$8 sps:$4 sm:$0xff]   ;;  %v4751_v2 = vld [vmem:[%s6441_s1 + $0x3d4] ss:$8 sps:$4 sm:$0xff]  }
  0xbd   : > { %3355 = vmatprep.subr.bf16.mxu0 %v4658_v3  ;;  %v4754_v3 = vld [vmem:[%s6441_s1 + $0xad4] ss:$8 sps:$4 sm:$0xff]  }
  0xbf   : > { %3055 = vmatpush1.bf16.msra.mxu1 %v4653_v4  ;;  %v4749_v4 = vld [vmem:[%s6441_s1 + $0x3d0] ss:$8 sps:$4 sm:$0xff]  }
  0xc0   : > { %3356 = vmatpush1.bf16.msra.mxu0 %v4656_v5  ;;  %3056 = vmatprep.subr.bf16.mxu1 %v4661_v6  ;;  %v4752_v5 = vld [vmem:[%s6441_s1 + $0xad0] ss:$8 sps:$4 sm:$0xff]   ;;  %v4757_v6 = vld [vmem:[%s6441_s1 + $0x3e4] ss:$8 sps:$4 sm:$0xff]  }
  0xc1   : > { %3357 = vmatprep.subr.bf16.mxu0 %v4664_v7  ;;  %v4760_v7 = vld [vmem:[%s6441_s1 + $0xae4] ss:$8 sps:$4 sm:$0xff]  }
  0xc3   : > { %3057 = vmatpush1.bf16.msra.mxu1 %v4659_v8  ;;  %v4755_v8 = vld [vmem:[%s6441_s1 + $0x3e0] ss:$8 sps:$4 sm:$0xff]  }
  0xc4   : > { %3358 = vmatpush1.bf16.msra.mxu0 %v4662_v9  ;;  %3069 = vmatprep.subr.bf16.mxu1 %v4670_v10  ;;  %v4758_v9 = vld [vmem:[%s6441_s1 + $0xae0] ss:$8 sps:$4 sm:$0xff]   ;;  %v4763_v10 = vld [vmem:[%s6441_s1 + $0x3f4] ss:$8 sps:$4 sm:$0xff]  }
  0xc5   : > { %3370 = vmatprep.subr.bf16.mxu0 %v4676_v11  ;;  %v4766_v11 = vld [vmem:[%s6441_s1 + $0xaf4] ss:$8 sps:$4 sm:$0xff]  }
  0xc6   : > { %3059 = vmatmul.mubr.bf16.vlgmr.msra.gmra.mrb[0].mxu1 %v4665_v12  ;;  %v4761_v12 = vld [vmem:[%s6441_s1 + $0x3f0] ss:$8 sps:$4 sm:$0xff]  }
  0xc7   : > { %3360 = vmatmul.mubr.bf16.vlgmr.msra.gmra.mrb[0].mxu0 %v4671_v14  ;;  %3070 = vmatpush1.bf16.msra.mxu1 %v4668_v13  ;;  %v4764_v13 = vld [vmem:[%s6441_s1 + $0xaf0] ss:$8 sps:$4 sm:$0xff]   ;;  %v4772_v14 = vld [vmem:[%s6441_s1 + $0x404] ss:$8 sps:$4 sm:$0xff]  }
  0xc8   : > { %3371 = vmatpush1.bf16.msra.mxu0 %v4674_v15  ;;  %3071 = vmatprep.subr.bf16.mxu1 %v4679_v16  ;;  %v4778_v15 = vld [vmem:[%s6441_s1 + $0xb04] ss:$8 sps:$4 sm:$0xff]  }
  0xc9   : > { %3372 = vmatprep.subr.bf16.mxu0 %v4682_v17  ;;  %3101 = vmatprep.mubr.bf16.mxu1 %v4769_v18  ;;  %v4767_v16 = vld [vmem:[%s5237_s5 + $0x18] ss:$108 sps:$4 sm:$0xff]   ;;  %v4770_v17 = vld [vmem:[%s6441_s1 + $0x400] ss:$8 sps:$4 sm:$0xff]   ;;  %v4773_v18 = vld [vmem:[%s5237_s5 + $0x50] ss:$108 sps:$4 sm:$0xff]  }
  0xca   : > { %3402 = vmatprep.mubr.bf16.mxu0 %v4775_v19  ;;  %v4776_v19 = vld [vmem:[%s6441_s1 + $0xb00] ss:$8 sps:$4 sm:$0xff]  }
  0xcb   : > { %3072 = vmatpush1.bf16.msra.mxu1 %v4677_v20  ;;  %v4781_v20 = vld [vmem:[%s6441_s1 + $0x414] ss:$8 sps:$4 sm:$0xff]  }
  0xcc   : > { %3373 = vmatpush1.bf16.msra.mxu0 %v4680_v21  ;;  %3073 = vmatprep.subr.bf16.mxu1 %v4685_v22  ;;  %v4784_v21 = vld [vmem:[%s6441_s1 + $0xb14] ss:$8 sps:$4 sm:$0xff]   ;;  %v4871_v22 = vld [vmem:[%s5237_s5 + $0x24] ss:$108 sps:$4 sm:$0xff]  }
  0xcd   : > { %3374 = vmatprep.subr.bf16.mxu0 %v4688_v23  ;;  %v4877_v23 = vld [vmem:[%s5237_s5 + $0x5c] ss:$108 sps:$4 sm:$0xff]  }
  0xcf   : > { %3074 = vmatpush1.bf16.msra.mxu1 %v4683_v24  ;;  %v4779_v24 = vld [vmem:[%s6441_s1 + $0x410] ss:$8 sps:$4 sm:$0xff]  }
  0xd0   : > { %3375 = vmatpush1.bf16.msra.mxu0 %v4686_v25  ;;  %3075 = vmatprep.subr.bf16.mxu1 %v4691_v26  ;;  %v4782_v25 = vld [vmem:[%s6441_s1 + $0xb10] ss:$8 sps:$4 sm:$0xff]   ;;  %v4787_v26 = vld [vmem:[%s6441_s1 + $0x424] ss:$8 sps:$4 sm:$0xff]  }
  0xd1   : > { %3376 = vmatprep.subr.bf16.mxu0 %v4694_v27  ;;  %v4790_v27 = vld [vmem:[%s6441_s1 + $0xb24] ss:$8 sps:$4 sm:$0xff]  }
  0xd3   : > { %3076 = vmatpush1.bf16.msra.mxu1 %v4689_v28  ;;  %v4785_v28 = vld [vmem:[%s6441_s1 + $0x420] ss:$8 sps:$4 sm:$0xff]  }
  0xd4   : > { %3377 = vmatpush1.bf16.msra.mxu0 %v4692_v29  ;;  %3077 = vmatprep.subr.bf16.mxu1 %v4697_v30  ;;  %v4788_v29 = vld [vmem:[%s6441_s1 + $0xb20] ss:$8 sps:$4 sm:$0xff]   ;;  %v4793_v30 = vld [vmem:[%s6441_s1 + $0x434] ss:$8 sps:$4 sm:$0xff]  }
  0xd5   : > { %3378 = vmatprep.subr.bf16.mxu0 %v4700_v31  ;;  %v4796_v31 = vld [vmem:[%s6441_s1 + $0xb34] ss:$8 sps:$4 sm:$0xff]  }
  0xd7   : > { %3078 = vmatpush1.bf16.msra.mxu1 %v4695_v32  ;;  %v4791_v32 = vld [vmem:[%s6441_s1 + $0x430] ss:$8 sps:$4 sm:$0xff]  }
  0xd8   : > { %3379 = vmatpush1.bf16.msra.mxu0 %v4698_v33  ;;  %3079 = vmatprep.subr.bf16.mxu1 %v4703_v34  ;;  %v4794_v33 = vld [vmem:[%s6441_s1 + $0xb30] ss:$8 sps:$4 sm:$0xff]   ;;  %v4799_v34 = vld [vmem:[%s6441_s1 + $0x444] ss:$8 sps:$4 sm:$0xff]  }
  0xd9   : > { %3380 = vmatprep.subr.bf16.mxu0 %v4706_v35  ;;  %v4802_v35 = vld [vmem:[%s6441_s1 + $0xb44] ss:$8 sps:$4 sm:$0xff]  }
  0xdb   : > { %3080 = vmatpush1.bf16.msra.mxu1 %v4701_v36  ;;  %v4797_v36 = vld [vmem:[%s6441_s1 + $0x440] ss:$8 sps:$4 sm:$0xff]  }
  0xdc   : > { %3381 = vmatpush1.bf16.msra.mxu0 %v4704_v37  ;;  %3081 = vmatprep.subr.bf16.mxu1 %v4709_v38  ;;  %v4800_v37 = vld [vmem:[%s6441_s1 + $0xb40] ss:$8 sps:$4 sm:$0xff]   ;;  %v4805_v38 = vld [vmem:[%s6441_s1 + $0x454] ss:$8 sps:$4 sm:$0xff]  }
  0xdd   : > { %3382 = vmatprep.subr.bf16.mxu0 %v4712_v39  ;;  %v4808_v39 = vld [vmem:[%s6441_s1 + $0xb54] ss:$8 sps:$4 sm:$0xff]  }
  0xdf   : > { %3082 = vmatpush1.bf16.msra.mxu1 %v4707_v40  ;;  %v4803_v40 = vld [vmem:[%s6441_s1 + $0x450] ss:$8 sps:$4 sm:$0xff]  }
  0xe0   : > { %3383 = vmatpush1.bf16.msra.mxu0 %v4710_v41  ;;  %3083 = vmatprep.subr.bf16.mxu1 %v4715_v42  ;;  %v4806_v41 = vld [vmem:[%s6441_s1 + $0xb50] ss:$8 sps:$4 sm:$0xff]   ;;  %v4811_v42 = vld [vmem:[%s6441_s1 + $0x464] ss:$8 sps:$4 sm:$0xff]  }
  0xe1   : > { %3384 = vmatprep.subr.bf16.mxu0 %v4718_v43  ;;  %v4814_v43 = vld [vmem:[%s6441_s1 + $0xb64] ss:$8 sps:$4 sm:$0xff]  }
  0xe3   : > { %3084 = vmatpush1.bf16.msra.mxu1 %v4713_v44  ;;  %v4809_v44 = vld [vmem:[%s6441_s1 + $0x460] ss:$8 sps:$4 sm:$0xff]  }
  0xe4   : > { %3385 = vmatpush1.bf16.msra.mxu0 %v4716_v45  ;;  %3085 = vmatprep.subr.bf16.mxu1 %v4721_v46  ;;  %v4812_v45 = vld [vmem:[%s6441_s1 + $0xb60] ss:$8 sps:$4 sm:$0xff]   ;;  %v4817_v46 = vld [vmem:[%s6441_s1 + $0x474] ss:$8 sps:$4 sm:$0xff]  }
  0xe5   : > { %3386 = vmatprep.subr.bf16.mxu0 %v4724_v47  ;;  %v4820_v47 = vld [vmem:[%s6441_s1 + $0xb74] ss:$8 sps:$4 sm:$0xff]  }
  0xe7   : > { %3086 = vmatpush1.bf16.msra.mxu1 %v4719_v48  ;;  %v4815_v48 = vld [vmem:[%s6441_s1 + $0x470] ss:$8 sps:$4 sm:$0xff]  }
  0xe8   : > { %3387 = vmatpush1.bf16.msra.mxu0 %v4722_v49  ;;  %3087 = vmatprep.subr.bf16.mxu1 %v4727_v50  ;;  %v4818_v49 = vld [vmem:[%s6441_s1 + $0xb70] ss:$8 sps:$4 sm:$0xff]   ;;  %v4823_v50 = vld [vmem:[%s6441_s1 + $0x484] ss:$8 sps:$4 sm:$0xff]  }
  0xe9   : > { %3388 = vmatprep.subr.bf16.mxu0 %v4730_v51  ;;  %v4826_v51 = vld [vmem:[%s6441_s1 + $0xb84] ss:$8 sps:$4 sm:$0xff]  }
  0xeb   : > { %3088 = vmatpush1.bf16.msra.mxu1 %v4725_v52  ;;  %v4821_v52 = vld [vmem:[%s6441_s1 + $0x480] ss:$8 sps:$4 sm:$0xff]  }
  0xec   : > { %3389 = vmatpush1.bf16.msra.mxu0 %v4728_v53  ;;  %3089 = vmatprep.subr.bf16.mxu1 %v4733_v54  ;;  %v4824_v53 = vld [vmem:[%s6441_s1 + $0xb80] ss:$8 sps:$4 sm:$0xff]   ;;  %v4829_v54 = vld [vmem:[%s6441_s1 + $0x494] ss:$8 sps:$4 sm:$0xff]  }
  0xed   : > { %3390 = vmatprep.subr.bf16.mxu0 %v4736_v55  ;;  %v4832_v55 = vld [vmem:[%s6441_s1 + $0xb94] ss:$8 sps:$4 sm:$0xff]  }
  0xef   : > { %3090 = vmatpush1.bf16.msra.mxu1 %v4731_v56  ;;  %v4827_v56 = vld [vmem:[%s6441_s1 + $0x490] ss:$8 sps:$4 sm:$0xff]  }
  0xf0   : > { %3391 = vmatpush1.bf16.msra.mxu0 %v4734_v57  ;;  %3091 = vmatprep.subr.bf16.mxu1 %v4739_v58  ;;  %v4830_v57 = vld [vmem:[%s6441_s1 + $0xb90] ss:$8 sps:$4 sm:$0xff]   ;;  %v4835_v58 = vld [vmem:[%s6441_s1 + $0x4a4] ss:$8 sps:$4 sm:$0xff]  }
  0xf1   : > { %3392 = vmatprep.subr.bf16.mxu0 %v4742_v59  ;;  %v4838_v59 = vld [vmem:[%s6441_s1 + $0xba4] ss:$8 sps:$4 sm:$0xff]  }
  0xf3   : > { %3092 = vmatpush1.bf16.msra.mxu1 %v4737_v60  ;;  %v4833_v60 = vld [vmem:[%s6441_s1 + $0x4a0] ss:$8 sps:$4 sm:$0xff]  }
  0xf4   : > { %3393 = vmatpush1.bf16.msra.mxu0 %v4740_v61  ;;  %3093 = vmatprep.subr.bf16.mxu1 %v4745_v62  ;;  %v4836_v61 = vld [vmem:[%s6441_s1 + $0xba0] ss:$8 sps:$4 sm:$0xff]   ;;  %v4841_v62 = vld [vmem:[%s6441_s1 + $0x4b4] ss:$8 sps:$4 sm:$0xff]  }
  0xf5   : > { %3394 = vmatprep.subr.bf16.mxu0 %v4748_v63  ;;  %v4844_v63 = vld [vmem:[%s6441_s1 + $0xbb4] ss:$8 sps:$4 sm:$0xff]  }
  0xf7   : > { %3094 = vmatpush1.bf16.msra.mxu1 %v4743_v0  ;;  %v4839_v0 = vld [vmem:[%s6441_s1 + $0x4b0] ss:$8 sps:$4 sm:$0xff]  }
  0xf8   : > { %3395 = vmatpush1.bf16.msra.mxu0 %v4746_v1  ;;  %3095 = vmatprep.subr.bf16.mxu1 %v4751_v2  ;;  %v4842_v1 = vld [vmem:[%s6441_s1 + $0xbb0] ss:$8 sps:$4 sm:$0xff]   ;;  %v4847_v2 = vld [vmem:[%s6441_s1 + $0x4c4] ss:$8 sps:$4 sm:$0xff]  }
  0xf9   : > { %3396 = vmatprep.subr.bf16.mxu0 %v4754_v3  ;;  %v4850_v3 = vld [vmem:[%s6441_s1 + $0xbc4] ss:$8 sps:$4 sm:$0xff]  }
  0xfb   : > { %3096 = vmatpush1.bf16.msra.mxu1 %v4749_v4  ;;  %v4845_v4 = vld [vmem:[%s6441_s1 + $0x4c0] ss:$8 sps:$4 sm:$0xff]  }
  0xfc   : > { %3397 = vmatpush1.bf16.msra.mxu0 %v4752_v5  ;;  %3097 = vmatprep.subr.bf16.mxu1 %v4757_v6  ;;  %v4848_v5 = vld [vmem:[%s6441_s1 + $0xbc0] ss:$8 sps:$4 sm:$0xff]   ;;  %v4853_v6 = vld [vmem:[%s6441_s1 + $0x4d4] ss:$8 sps:$4 sm:$0xff]  }
  0xfd   : > { %3398 = vmatprep.subr.bf16.mxu0 %v4760_v7  ;;  %v4856_v7 = vld [vmem:[%s6441_s1 + $0xbd4] ss:$8 sps:$4 sm:$0xff]  }
  0xff   : > { %3098 = vmatpush1.bf16.msra.mxu1 %v4755_v8  ;;  %v4851_v8 = vld [vmem:[%s6441_s1 + $0x4d0] ss:$8 sps:$4 sm:$0xff]  }
 0x100   : > { %3399 = vmatpush1.bf16.msra.mxu0 %v4758_v9  ;;  %3099 = vmatprep.subr.bf16.mxu1 %v4763_v10  ;;  %v4854_v9 = vld [vmem:[%s6441_s1 + $0xbd0] ss:$8 sps:$4 sm:$0xff]   ;;  %v4859_v10 = vld [vmem:[%s6441_s1 + $0x4e4] ss:$8 sps:$4 sm:$0xff]  }
 0x101   : > { %3400 = vmatprep.subr.bf16.mxu0 %v4766_v11  ;;  %v4862_v11 = vld [vmem:[%s6441_s1 + $0xbe4] ss:$8 sps:$4 sm:$0xff]  }
 0x103   : > { %3100 = vmatpush1.bf16.msra.mxu1 %v4761_v12  ;;  %v4857_v12 = vld [vmem:[%s6441_s1 + $0x4e0] ss:$8 sps:$4 sm:$0xff]  }
 0x104   : > { %3401 = vmatpush1.bf16.msra.mxu0 %v4764_v13  ;;  %3112 = vmatprep.subr.bf16.mxu1 %v4772_v14  ;;  %v4860_v13 = vld [vmem:[%s6441_s1 + $0xbe0] ss:$8 sps:$4 sm:$0xff]   ;;  %v4865_v14 = vld [vmem:[%s6441_s1 + $0x4f4] ss:$8 sps:$4 sm:$0xff]  }
 0x105   : > { %3413 = vmatprep.subr.bf16.mxu0 %v4778_v15  ;;  %v4868_v15 = vld [vmem:[%s6441_s1 + $0xbf4] ss:$8 sps:$4 sm:$0xff]  }
 0x106   : > { %3102 = vmatmul.mubr.bf16.vlgmr.msra.gmra.mrb[0].mxu1 %v4767_v16  ;;  %v4863_v16 = vld [vmem:[%s6441_s1 + $0x4f0] ss:$8 sps:$4 sm:$0xff]  }
 0x107   : > { %3403 = vmatmul.mubr.bf16.vlgmr.msra.gmra.mrb[0].mxu0 %v4773_v18  ;;  %3113 = vmatpush1.bf16.msra.mxu1 %v4770_v17  ;;  %v4866_v17 = vld [vmem:[%s6441_s1 + $0xbf0] ss:$8 sps:$4 sm:$0xff]   ;;  %v4874_v18 = vld [vmem:[%s6441_s1 + $0x504] ss:$8 sps:$4 sm:$0xff]  }
 0x108   : > { %3414 = vmatpush1.bf16.msra.mxu0 %v4776_v19  ;;  %3114 = vmatprep.subr.bf16.mxu1 %v4781_v20  ;;  %v4880_v19 = vld [vmem:[%s6441_s1 + $0xc04] ss:$8 sps:$4 sm:$0xff]  }
 0x109   : > { %3415 = vmatprep.subr.bf16.mxu0 %v4784_v21  ;;  %3144 = vmatprep.mubr.bf16.mxu1 %v4871_v22  ;;  %v4869_v20 = vld [vmem:[%s5237_s5 + $0x20] ss:$108 sps:$4 sm:$0xff]   ;;  %v4875_v21 = vld [vmem:[%s5237_s5 + $0x58] ss:$108 sps:$4 sm:$0xff]  }
 0x10a   : > { %3445 = vmatprep.mubr.bf16.mxu0 %v4877_v23  ;;  %v4872_v22 = vld [vmem:[%s6441_s1 + $0x500] ss:$8 sps:$4 sm:$0xff]  }
 0x10b   : > { %3115 = vmatpush1.bf16.msra.mxu1 %v4779_v24  ;;  %v4878_v23 = vld [vmem:[%s6441_s1 + $0xc00] ss:$8 sps:$4 sm:$0xff]   ;;  %v4883_v24 = vld [vmem:[%s6441_s1 + $0x514] ss:$8 sps:$4 sm:$0xff]  }
 0x10c   : > { %3416 = vmatpush1.bf16.msra.mxu0 %v4782_v25  ;;  %3116 = vmatprep.subr.bf16.mxu1 %v4787_v26  ;;  %v4886_v25 = vld [vmem:[%s6441_s1 + $0xc14] ss:$8 sps:$4 sm:$0xff]   ;;  %v4973_v26 = vld [vmem:[%s5237_s5 + $0x2c] ss:$108 sps:$4 sm:$0xff]  }
 0x10d   : > { %3417 = vmatprep.subr.bf16.mxu0 %v4790_v27  ;;  %v4979_v27 = vld [vmem:[%s5237_s5 + $0x64] ss:$108 sps:$4 sm:$0xff]  }
 0x10f   : > { %3117 = vmatpush1.bf16.msra.mxu1 %v4785_v28  ;;  %v4881_v28 = vld [vmem:[%s6441_s1 + $0x510] ss:$8 sps:$4 sm:$0xff]  }
 0x110   : > { %3418 = vmatpush1.bf16.msra.mxu0 %v4788_v29  ;;  %3118 = vmatprep.subr.bf16.mxu1 %v4793_v30  ;;  %v4884_v29 = vld [vmem:[%s6441_s1 + $0xc10] ss:$8 sps:$4 sm:$0xff]   ;;  %v4889_v30 = vld [vmem:[%s6441_s1 + $0x524] ss:$8 sps:$4 sm:$0xff]  }
 0x111   : > { %3419 = vmatprep.subr.bf16.mxu0 %v4796_v31  ;;  %v4892_v31 = vld [vmem:[%s6441_s1 + $0xc24] ss:$8 sps:$4 sm:$0xff]  }
 0x113   : > { %3119 = vmatpush1.bf16.msra.mxu1 %v4791_v32  ;;  %v4887_v32 = vld [vmem:[%s6441_s1 + $0x520] ss:$8 sps:$4 sm:$0xff]  }
 0x114   : > { %3420 = vmatpush1.bf16.msra.mxu0 %v4794_v33  ;;  %3120 = vmatprep.subr.bf16.mxu1 %v4799_v34  ;;  %v4890_v33 = vld [vmem:[%s6441_s1 + $0xc20] ss:$8 sps:$4 sm:$0xff]   ;;  %v4895_v34 = vld [vmem:[%s6441_s1 + $0x534] ss:$8 sps:$4 sm:$0xff]  }
 0x115   : > { %3421 = vmatprep.subr.bf16.mxu0 %v4802_v35  ;;  %v4898_v35 = vld [vmem:[%s6441_s1 + $0xc34] ss:$8 sps:$4 sm:$0xff]  }
 0x117   : > { %3121 = vmatpush1.bf16.msra.mxu1 %v4797_v36  ;;  %v4893_v36 = vld [vmem:[%s6441_s1 + $0x530] ss:$8 sps:$4 sm:$0xff]  }
 0x118   : > { %3422 = vmatpush1.bf16.msra.mxu0 %v4800_v37  ;;  %3122 = vmatprep.subr.bf16.mxu1 %v4805_v38  ;;  %v4896_v37 = vld [vmem:[%s6441_s1 + $0xc30] ss:$8 sps:$4 sm:$0xff]   ;;  %v4901_v38 = vld [vmem:[%s6441_s1 + $0x544] ss:$8 sps:$4 sm:$0xff]  }
 0x119   : > { %3423 = vmatprep.subr.bf16.mxu0 %v4808_v39  ;;  %v4904_v39 = vld [vmem:[%s6441_s1 + $0xc44] ss:$8 sps:$4 sm:$0xff]  }
 0x11b   : > { %3123 = vmatpush1.bf16.msra.mxu1 %v4803_v40  ;;  %v4899_v40 = vld [vmem:[%s6441_s1 + $0x540] ss:$8 sps:$4 sm:$0xff]  }
 0x11c   : > { %3424 = vmatpush1.bf16.msra.mxu0 %v4806_v41  ;;  %3124 = vmatprep.subr.bf16.mxu1 %v4811_v42  ;;  %v4902_v41 = vld [vmem:[%s6441_s1 + $0xc40] ss:$8 sps:$4 sm:$0xff]   ;;  %v4907_v42 = vld [vmem:[%s6441_s1 + $0x554] ss:$8 sps:$4 sm:$0xff]  }
 0x11d   : > { %3425 = vmatprep.subr.bf16.mxu0 %v4814_v43  ;;  %v4910_v43 = vld [vmem:[%s6441_s1 + $0xc54] ss:$8 sps:$4 sm:$0xff]  }
 0x11f   : > { %3125 = vmatpush1.bf16.msra.mxu1 %v4809_v44  ;;  %v4905_v44 = vld [vmem:[%s6441_s1 + $0x550] ss:$8 sps:$4 sm:$0xff]  }
 0x120   : > { %3426 = vmatpush1.bf16.msra.mxu0 %v4812_v45  ;;  %3126 = vmatprep.subr.bf16.mxu1 %v4817_v46  ;;  %v4908_v45 = vld [vmem:[%s6441_s1 + $0xc50] ss:$8 sps:$4 sm:$0xff]   ;;  %v4913_v46 = vld [vmem:[%s6441_s1 + $0x564] ss:$8 sps:$4 sm:$0xff]  }
 0x121   : > { %3427 = vmatprep.subr.bf16.mxu0 %v4820_v47  ;;  %v4916_v47 = vld [vmem:[%s6441_s1 + $0xc64] ss:$8 sps:$4 sm:$0xff]  }
 0x123   : > { %3127 = vmatpush1.bf16.msra.mxu1 %v4815_v48  ;;  %v4911_v48 = vld [vmem:[%s6441_s1 + $0x560] ss:$8 sps:$4 sm:$0xff]  }
 0x124   : > { %3428 = vmatpush1.bf16.msra.mxu0 %v4818_v49  ;;  %3128 = vmatprep.subr.bf16.mxu1 %v4823_v50  ;;  %v4914_v49 = vld [vmem:[%s6441_s1 + $0xc60] ss:$8 sps:$4 sm:$0xff]   ;;  %v4919_v50 = vld [vmem:[%s6441_s1 + $0x574] ss:$8 sps:$4 sm:$0xff]  }
 0x125   : > { %3429 = vmatprep.subr.bf16.mxu0 %v4826_v51  ;;  %v4922_v51 = vld [vmem:[%s6441_s1 + $0xc74] ss:$8 sps:$4 sm:$0xff]  }
 0x127   : > { %3129 = vmatpush1.bf16.msra.mxu1 %v4821_v52  ;;  %v4917_v52 = vld [vmem:[%s6441_s1 + $0x570] ss:$8 sps:$4 sm:$0xff]  }
 0x128   : > { %3430 = vmatpush1.bf16.msra.mxu0 %v4824_v53  ;;  %3130 = vmatprep.subr.bf16.mxu1 %v4829_v54  ;;  %v4920_v53 = vld [vmem:[%s6441_s1 + $0xc70] ss:$8 sps:$4 sm:$0xff]   ;;  %v4925_v54 = vld [vmem:[%s6441_s1 + $0x584] ss:$8 sps:$4 sm:$0xff]  }
 0x129   : > { %3431 = vmatprep.subr.bf16.mxu0 %v4832_v55  ;;  %v4928_v55 = vld [vmem:[%s6441_s1 + $0xc84] ss:$8 sps:$4 sm:$0xff]  }
 0x12b   : > { %3131 = vmatpush1.bf16.msra.mxu1 %v4827_v56  ;;  %v4923_v56 = vld [vmem:[%s6441_s1 + $0x580] ss:$8 sps:$4 sm:$0xff]  }
 0x12c   : > { %3432 = vmatpush1.bf16.msra.mxu0 %v4830_v57  ;;  %3132 = vmatprep.subr.bf16.mxu1 %v4835_v58  ;;  %v4926_v57 = vld [vmem:[%s6441_s1 + $0xc80] ss:$8 sps:$4 sm:$0xff]   ;;  %v4931_v58 = vld [vmem:[%s6441_s1 + $0x594] ss:$8 sps:$4 sm:$0xff]  }
 0x12d   : > { %3433 = vmatprep.subr.bf16.mxu0 %v4838_v59  ;;  %v4934_v59 = vld [vmem:[%s6441_s1 + $0xc94] ss:$8 sps:$4 sm:$0xff]  }
 0x12f   : > { %3133 = vmatpush1.bf16.msra.mxu1 %v4833_v60  ;;  %v4929_v60 = vld [vmem:[%s6441_s1 + $0x590] ss:$8 sps:$4 sm:$0xff]  }
 0x130   : > { %3434 = vmatpush1.bf16.msra.mxu0 %v4836_v61  ;;  %3134 = vmatprep.subr.bf16.mxu1 %v4841_v62  ;;  %v4932_v61 = vld [vmem:[%s6441_s1 + $0xc90] ss:$8 sps:$4 sm:$0xff]   ;;  %v4937_v62 = vld [vmem:[%s6441_s1 + $0x5a4] ss:$8 sps:$4 sm:$0xff]  }
 0x131   : > { %3435 = vmatprep.subr.bf16.mxu0 %v4844_v63  ;;  %v4940_v63 = vld [vmem:[%s6441_s1 + $0xca4] ss:$8 sps:$4 sm:$0xff]  }
 0x133   : > { %3135 = vmatpush1.bf16.msra.mxu1 %v4839_v0  ;;  %v4935_v0 = vld [vmem:[%s6441_s1 + $0x5a0] ss:$8 sps:$4 sm:$0xff]  }
 0x134   : > { %3436 = vmatpush1.bf16.msra.mxu0 %v4842_v1  ;;  %3136 = vmatprep.subr.bf16.mxu1 %v4847_v2  ;;  %v4938_v1 = vld [vmem:[%s6441_s1 + $0xca0] ss:$8 sps:$4 sm:$0xff]   ;;  %v4943_v2 = vld [vmem:[%s6441_s1 + $0x5b4] ss:$8 sps:$4 sm:$0xff]  }
 0x135   : > { %3437 = vmatprep.subr.bf16.mxu0 %v4850_v3  ;;  %v4946_v3 = vld [vmem:[%s6441_s1 + $0xcb4] ss:$8 sps:$4 sm:$0xff]  }
 0x137   : > { %3137 = vmatpush1.bf16.msra.mxu1 %v4845_v4  ;;  %v4941_v4 = vld [vmem:[%s6441_s1 + $0x5b0] ss:$8 sps:$4 sm:$0xff]  }
 0x138   : > { %3438 = vmatpush1.bf16.msra.mxu0 %v4848_v5  ;;  %3138 = vmatprep.subr.bf16.mxu1 %v4853_v6  ;;  %v4944_v5 = vld [vmem:[%s6441_s1 + $0xcb0] ss:$8 sps:$4 sm:$0xff]   ;;  %v4949_v6 = vld [vmem:[%s6441_s1 + $0x5c4] ss:$8 sps:$4 sm:$0xff]  }
 0x139   : > { %3439 = vmatprep.subr.bf16.mxu0 %v4856_v7  ;;  %v4952_v7 = vld [vmem:[%s6441_s1 + $0xcc4] ss:$8 sps:$4 sm:$0xff]  }
 0x13b   : > { %3139 = vmatpush1.bf16.msra.mxu1 %v4851_v8  ;;  %v4947_v8 = vld [vmem:[%s6441_s1 + $0x5c0] ss:$8 sps:$4 sm:$0xff]  }
 0x13c   : > { %3440 = vmatpush1.bf16.msra.mxu0 %v4854_v9  ;;  %3140 = vmatprep.subr.bf16.mxu1 %v4859_v10  ;;  %v4950_v9 = vld [vmem:[%s6441_s1 + $0xcc0] ss:$8 sps:$4 sm:$0xff]   ;;  %v4955_v10 = vld [vmem:[%s6441_s1 + $0x5d4] ss:$8 sps:$4 sm:$0xff]  }
 0x13d   : > { %3441 = vmatprep.subr.bf16.mxu0 %v4862_v11  ;;  %v4958_v11 = vld [vmem:[%s6441_s1 + $0xcd4] ss:$8 sps:$4 sm:$0xff]  }
 0x13f   : > { %3141 = vmatpush1.bf16.msra.mxu1 %v4857_v12  ;;  %v4953_v12 = vld [vmem:[%s6441_s1 + $0x5d0] ss:$8 sps:$4 sm:$0xff]  }
 0x140   : > { %3442 = vmatpush1.bf16.msra.mxu0 %v4860_v13  ;;  %3142 = vmatprep.subr.bf16.mxu1 %v4865_v14  ;;  %v4956_v13 = vld [vmem:[%s6441_s1 + $0xcd0] ss:$8 sps:$4 sm:$0xff]   ;;  %v4961_v14 = vld [vmem:[%s6441_s1 + $0x5e4] ss:$8 sps:$4 sm:$0xff]  }
 0x141   : > { %3443 = vmatprep.subr.bf16.mxu0 %v4868_v15  ;;  %v4964_v15 = vld [vmem:[%s6441_s1 + $0xce4] ss:$8 sps:$4 sm:$0xff]  }
 0x143   : > { %3143 = vmatpush1.bf16.msra.mxu1 %v4863_v16  ;;  %v4959_v16 = vld [vmem:[%s6441_s1 + $0x5e0] ss:$8 sps:$4 sm:$0xff]  }
 0x144   : > { %3444 = vmatpush1.bf16.msra.mxu0 %v4866_v17  ;;  %3155 = vmatprep.subr.bf16.mxu1 %v4874_v18  ;;  %v4962_v17 = vld [vmem:[%s6441_s1 + $0xce0] ss:$8 sps:$4 sm:$0xff]   ;;  %v4967_v18 = vld [vmem:[%s6441_s1 + $0x5f4] ss:$8 sps:$4 sm:$0xff]  }
 0x145   : > { %3456 = vmatprep.subr.bf16.mxu0 %v4880_v19  ;;  %v4970_v19 = vld [vmem:[%s6441_s1 + $0xcf4] ss:$8 sps:$4 sm:$0xff]  }
 0x146   : > { %3145 = vmatmul.mubr.bf16.vlgmr.msra.gmra.mrb[0].mxu1 %v4869_v20  ;;  %v4965_v20 = vld [vmem:[%s6441_s1 + $0x5f0] ss:$8 sps:$4 sm:$0xff]  }
 0x147   : > { %3446 = vmatmul.mubr.bf16.vlgmr.msra.gmra.mrb[0].mxu0 %v4875_v21  ;;  %3156 = vmatpush1.bf16.msra.mxu1 %v4872_v22  ;;  %v4968_v21 = vld [vmem:[%s6441_s1 + $0xcf0] ss:$8 sps:$4 sm:$0xff]   ;;  %v4976_v22 = vld [vmem:[%s6441_s1 + $0x604] ss:$8 sps:$4 sm:$0xff]  }
 0x148   : > { %3457 = vmatpush1.bf16.msra.mxu0 %v4878_v23  ;;  %3157 = vmatprep.subr.bf16.mxu1 %v4883_v24  ;;  %v4982_v23 = vld [vmem:[%s6441_s1 + $0xd04] ss:$8 sps:$4 sm:$0xff]   ;;  %v4971_v24 = vld [vmem:[%s5237_s5 + $0x28] ss:$108 sps:$4 sm:$0xff]  }
 0x149   : > { %3458 = vmatprep.subr.bf16.mxu0 %v4886_v25  ;;  %3187 = vmatprep.mubr.bf16.mxu1 %v4973_v26  ;;  %v4977_v25 = vld [vmem:[%s5237_s5 + $0x60] ss:$108 sps:$4 sm:$0xff]  }
 0x14a   : > { %3488 = vmatprep.mubr.bf16.mxu0 %v4979_v27  ;;  %v4974_v26 = vld [vmem:[%s6441_s1 + $0x600] ss:$8 sps:$4 sm:$0xff]  }
 0x14b   : > { %3158 = vmatpush1.bf16.msra.mxu1 %v4881_v28  ;;  %v4980_v27 = vld [vmem:[%s6441_s1 + $0xd00] ss:$8 sps:$4 sm:$0xff]   ;;  %v4985_v28 = vld [vmem:[%s6441_s1 + $0x614] ss:$8 sps:$4 sm:$0xff]  }
 0x14c   : > { %3459 = vmatpush1.bf16.msra.mxu0 %v4884_v29  ;;  %3159 = vmatprep.subr.bf16.mxu1 %v4889_v30  ;;  %v4988_v29 = vld [vmem:[%s6441_s1 + $0xd14] ss:$8 sps:$4 sm:$0xff]  }
 0x14d   : > { %3460 = vmatprep.subr.bf16.mxu0 %v4892_v31  ;;  %v5052_v30 = vld [vmem:[%s5237_s5 + $0x34] ss:$108 sps:$4 sm:$0xff]   ;;  %v4983_v31 = vld [vmem:[%s6441_s1 + $0x610] ss:$8 sps:$4 sm:$0xff]  }
 0x14f   : > { %3160 = vmatpush1.bf16.msra.mxu1 %v4887_v32  ;;  %v4986_v32 = vld [vmem:[%s6441_s1 + $0xd10] ss:$8 sps:$4 sm:$0xff]  }
 0x150   : > { %3461 = vmatpush1.bf16.msra.mxu0 %v4890_v33  ;;  %3161 = vmatprep.subr.bf16.mxu1 %v4895_v34  ;;  %v4991_v33 = vld [vmem:[%s6441_s1 + $0x624] ss:$8 sps:$4 sm:$0xff]  }
 0x151   : > { %3462 = vmatprep.subr.bf16.mxu0 %v4898_v35  ;;  %v4994_v34 = vld [vmem:[%s6441_s1 + $0xd24] ss:$8 sps:$4 sm:$0xff]   ;;  %v5061_v35 = vmov 0  }
 0x153   : > { %3162 = vmatpush1.bf16.msra.mxu1 %v4893_v36  ;;  %v4989_v36 = vld [vmem:[%s6441_s1 + $0x620] ss:$8 sps:$4 sm:$0xff]  }
 0x154   : > { %3463 = vmatpush1.bf16.msra.mxu0 %v4896_v37  ;;  %3163 = vmatprep.subr.bf16.mxu1 %v4901_v38  ;;  %v4992_v37 = vld [vmem:[%s6441_s1 + $0xd20] ss:$8 sps:$4 sm:$0xff]   ;;  %v4997_v38 = vld [vmem:[%s6441_s1 + $0x634] ss:$8 sps:$4 sm:$0xff]  }
 0x155   : > { %3464 = vmatprep.subr.bf16.mxu0 %v4904_v39  ;;  %v5000_v39 = vld [vmem:[%s6441_s1 + $0xd34] ss:$8 sps:$4 sm:$0xff]  }
 0x157   : > { %3164 = vmatpush1.bf16.msra.mxu1 %v4899_v40  ;;  %v4995_v40 = vld [vmem:[%s6441_s1 + $0x630] ss:$8 sps:$4 sm:$0xff]  }
 0x158   : > { %3465 = vmatpush1.bf16.msra.mxu0 %v4902_v41  ;;  %3165 = vmatprep.subr.bf16.mxu1 %v4907_v42  ;;  %v4998_v41 = vld [vmem:[%s6441_s1 + $0xd30] ss:$8 sps:$4 sm:$0xff]   ;;  %v5003_v42 = vld [vmem:[%s6441_s1 + $0x644] ss:$8 sps:$4 sm:$0xff]  }
 0x159   : > { %3466 = vmatprep.subr.bf16.mxu0 %v4910_v43  ;;  %v5006_v43 = vld [vmem:[%s6441_s1 + $0xd44] ss:$8 sps:$4 sm:$0xff]  }
 0x15b   : > { %3166 = vmatpush1.bf16.msra.mxu1 %v4905_v44  ;;  %v5001_v44 = vld [vmem:[%s6441_s1 + $0x640] ss:$8 sps:$4 sm:$0xff]  }
 0x15c   : > { %3467 = vmatpush1.bf16.msra.mxu0 %v4908_v45  ;;  %3167 = vmatprep.subr.bf16.mxu1 %v4913_v46  ;;  %v5004_v45 = vld [vmem:[%s6441_s1 + $0xd40] ss:$8 sps:$4 sm:$0xff]   ;;  %v5009_v46 = vld [vmem:[%s6441_s1 + $0x654] ss:$8 sps:$4 sm:$0xff]  }
 0x15d   : > { %3468 = vmatprep.subr.bf16.mxu0 %v4916_v47  ;;  %v5012_v47 = vld [vmem:[%s6441_s1 + $0xd54] ss:$8 sps:$4 sm:$0xff]  }
 0x15f   : > { %3168 = vmatpush1.bf16.msra.mxu1 %v4911_v48  ;;  %v5007_v48 = vld [vmem:[%s6441_s1 + $0x650] ss:$8 sps:$4 sm:$0xff]  }
 0x160   : > { %3469 = vmatpush1.bf16.msra.mxu0 %v4914_v49  ;;  %3169 = vmatprep.subr.bf16.mxu1 %v4919_v50  ;;  %v5010_v49 = vld [vmem:[%s6441_s1 + $0xd50] ss:$8 sps:$4 sm:$0xff]   ;;  %v5015_v50 = vld [vmem:[%s6441_s1 + $0x664] ss:$8 sps:$4 sm:$0xff]  }
 0x161   : > { %3470 = vmatprep.subr.bf16.mxu0 %v4922_v51  ;;  %v5018_v51 = vld [vmem:[%s6441_s1 + $0xd64] ss:$8 sps:$4 sm:$0xff]  }
 0x163   : > { %3170 = vmatpush1.bf16.msra.mxu1 %v4917_v52  ;;  %v5013_v52 = vld [vmem:[%s6441_s1 + $0x660] ss:$8 sps:$4 sm:$0xff]  }
 0x164   : > { %3471 = vmatpush1.bf16.msra.mxu0 %v4920_v53  ;;  %3171 = vmatprep.subr.bf16.mxu1 %v4925_v54  ;;  %v5016_v53 = vld [vmem:[%s6441_s1 + $0xd60] ss:$8 sps:$4 sm:$0xff]   ;;  %v5021_v54 = vld [vmem:[%s6441_s1 + $0x674] ss:$8 sps:$4 sm:$0xff]  }
 0x165   : > { %3472 = vmatprep.subr.bf16.mxu0 %v4928_v55  ;;  %v5024_v55 = vld [vmem:[%s6441_s1 + $0xd74] ss:$8 sps:$4 sm:$0xff]  }
 0x167   : > { %3172 = vmatpush1.bf16.msra.mxu1 %v4923_v56  ;;  %v5019_v56 = vld [vmem:[%s6441_s1 + $0x670] ss:$8 sps:$4 sm:$0xff]  }
 0x168   : > { %3473 = vmatpush1.bf16.msra.mxu0 %v4926_v57  ;;  %3173 = vmatprep.subr.bf16.mxu1 %v4931_v58  ;;  %v5022_v57 = vld [vmem:[%s6441_s1 + $0xd70] ss:$8 sps:$4 sm:$0xff]   ;;  %v5027_v58 = vld [vmem:[%s6441_s1 + $0x684] ss:$8 sps:$4 sm:$0xff]  }
 0x169   : > { %3474 = vmatprep.subr.bf16.mxu0 %v4934_v59  ;;  %v5028_v59 = vld [vmem:[%s5237_s5 + $0x68] ss:$108 sps:$4 sm:$0xff]  }
 0x16b   : > { %3174 = vmatpush1.bf16.msra.mxu1 %v4929_v60  ;;  %v5025_v60 = vld [vmem:[%s6441_s1 + $0x680] ss:$8 sps:$4 sm:$0xff]  }
 0x16c   : > { %3475 = vmatpush1.bf16.msra.mxu0 %v4932_v61  ;;  %3175 = vmatprep.subr.bf16.mxu1 %v4937_v62  ;;  %v5031_v61 = vld [vmem:[%s6441_s1 + $0x694] ss:$8 sps:$4 sm:$0xff]   ;;  %v5029_v62 = vld [vmem:[%s6441_s1 + $0x690] ss:$8 sps:$4 sm:$0xff]  }
 0x16d   : > { %3476 = vmatprep.subr.bf16.mxu0 %v4940_v63  ;;  %v5034_v63 = vld [vmem:[%s6441_s1 + $0x6a4] ss:$8 sps:$4 sm:$0xff]  }
 0x16f   : > { %3176 = vmatpush1.bf16.msra.mxu1 %v4935_v0  ;;  %v5032_v0 = vld [vmem:[%s6441_s1 + $0x6a0] ss:$8 sps:$4 sm:$0xff]  }
 0x170   : > { %3477 = vmatpush1.bf16.msra.mxu0 %v4938_v1  ;;  %3177 = vmatprep.subr.bf16.mxu1 %v4943_v2  ;;  %v5037_v1 = vld [vmem:[%s6441_s1 + $0x6b4] ss:$8 sps:$4 sm:$0xff]   ;;  %v5035_v2 = vld [vmem:[%s6441_s1 + $0x6b0] ss:$8 sps:$4 sm:$0xff]  }
 0x171   : > { %3478 = vmatprep.subr.bf16.mxu0 %v4946_v3  ;;  %v5040_v3 = vld [vmem:[%s6441_s1 + $0x6c4] ss:$8 sps:$4 sm:$0xff]  }
 0x173   : > { %3178 = vmatpush1.bf16.msra.mxu1 %v4941_v4  ;;  %v5038_v4 = vld [vmem:[%s6441_s1 + $0x6c0] ss:$8 sps:$4 sm:$0xff]  }
 0x174   : > { %3479 = vmatpush1.bf16.msra.mxu0 %v4944_v5  ;;  %3179 = vmatprep.subr.bf16.mxu1 %v4949_v6  ;;  %v5043_v5 = vld [vmem:[%s6441_s1 + $0x6d4] ss:$8 sps:$4 sm:$0xff]   ;;  %v5041_v6 = vld [vmem:[%s6441_s1 + $0x6d0] ss:$8 sps:$4 sm:$0xff]  }
 0x175   : > { %3480 = vmatprep.subr.bf16.mxu0 %v4952_v7  ;;  %v5046_v7 = vld [vmem:[%s6441_s1 + $0x6e4] ss:$8 sps:$4 sm:$0xff]  }
 0x177   : > { %3180 = vmatpush1.bf16.msra.mxu1 %v4947_v8  ;;  %v5044_v8 = vld [vmem:[%s6441_s1 + $0x6e0] ss:$8 sps:$4 sm:$0xff]  }
 0x178   : > { %3481 = vmatpush1.bf16.msra.mxu0 %v4950_v9  ;;  %3181 = vmatprep.subr.bf16.mxu1 %v4955_v10  ;;  %v5049_v9 = vld [vmem:[%s6441_s1 + $0x6f4] ss:$8 sps:$4 sm:$0xff]   ;;  %v5047_v10 = vld [vmem:[%s6441_s1 + $0x6f0] ss:$8 sps:$4 sm:$0xff]  }
 0x179   : > { %3482 = vmatprep.subr.bf16.mxu0 %v4958_v11  ;;  %v5050_v11 = vld [vmem:[%s5237_s5 + $0x30] ss:$108 sps:$4 sm:$0xff]   ;;  %s4353_s5 = smul.u32 12, %s6445_s13 }
 0x17b   : > { %3182 = vmatpush1.bf16.msra.mxu1 %v4953_v12  ;;  %s170_s13 = scalar_lea.vmem %s6443_s3, %s4353_s5 }
 0x17c   : > { %3483 = vmatpush1.bf16.msra.mxu0 %v4956_v13  ;;  %3183 = vmatprep.subr.bf16.mxu1 %v4961_v14 }
 0x17d   : > { %3484 = vmatprep.subr.bf16.mxu0 %v4964_v15 }
 0x17f   : > { %3184 = vmatpush1.bf16.msra.mxu1 %v4959_v16  ;;  %v634_v16 = vlaneseq }
 0x180   : > { %3485 = vmatpush1.bf16.msra.mxu0 %v4962_v17  ;;  %3185 = vmatprep.subr.bf16.mxu1 %v4967_v18 }
 0x181   : > { %3486 = vmatprep.subr.bf16.mxu0 %v4970_v19  ;;  %v635_v17 = vshrl.u32 %v634_v16, 7  ;;  %v632_v19 = vld [vmem:[%s6442_s2] sm:$0x3] }
 0x183   : > { %3186 = vmatpush1.bf16.msra.mxu1 %v4965_v20  ;;  %v636_v18 = vsub.s32 0, %v635_v17  ;;  %v640_v20 = vsub.s32 1, %v635_v17 }
 0x184   : > { %3487 = vmatpush1.bf16.msra.mxu0 %v4968_v21  ;;  %3198 = vmatprep.subr.bf16.mxu1 %v4976_v22  ;;  %v5062_v22 = vmov 1966171168  }
 0x185   : > { %3499 = vmatprep.subr.bf16.mxu0 %v4982_v23  ;;  %v637_v21 = vrot.slane %v632_v19, %v636_v18  ;;  %v3553_v23 = vunpack.c.l.s4 %v5062_v22 }
 0x186   : > { %3188 = vmatmul.mubr.bf16.vlgmr.msra.gmra.mrb[0].mxu1 %v4971_v24  ;;  %v641_v24 = vrot.slane %v632_v19, %v640_v20  ;;  %v3760_v20 = vld [vmem:[%s170_s13] sm:$0xf] }
 0x187   : > { %3489 = vmatmul.mubr.bf16.vlgmr.msra.gmra.mrb[0].mxu0 %v4977_v25  ;;  %3199 = vmatpush1.bf16.msra.mxu1 %v4974_v26 }
 0x188   : > { %3500 = vmatpush1.bf16.msra.mxu0 %v4980_v27  ;;  %3200 = vmatprep.subr.bf16.mxu1 %v4985_v28  ;;  %v3554_v28 = vunpack.c.0.s8 %v3553_v23 }
 0x189   : > { %3501 = vmatprep.subr.bf16.mxu0 %v4988_v29  ;;  %3531 = vmatprep.mubr.bf16.mxu0 %v5061_v35 }
 0x18a   : > { %3230 = vmatprep.mubr.bf16.mxu1 %v5052_v30 }
 0x18b   : > { %3201 = vmatpush1.bf16.msra.mxu1 %v4983_v31 }
 0x18c   : > { %3502 = vmatpush1.bf16.msra.mxu0 %v4986_v32  ;;  %3202 = vmatprep.subr.bf16.mxu1 %v4991_v33 }
 0x18d   : > { %3503 = vmatprep.subr.bf16.mxu0 %v4994_v34 }
 0x18f   : > { %3203 = vmatpush1.bf16.msra.mxu1 %v4989_v36 }
 0x190   : > { %3504 = vmatpush1.bf16.msra.mxu0 %v4992_v37  ;;  %3204 = vmatprep.subr.bf16.mxu1 %v4997_v38  ;;  %v3557_v38 = vsub.s32 %v3554_v28, %v635_v17 }
 0x191   : > { %3505 = vmatprep.subr.bf16.mxu0 %v5000_v39 }
 0x193   : > { %3205 = vmatpush1.bf16.msra.mxu1 %v4995_v40 }
 0x194   : > { %3506 = vmatpush1.bf16.msra.mxu0 %v4998_v41  ;;  %3206 = vmatprep.subr.bf16.mxu1 %v5003_v42 }
 0x195   : > { %3507 = vmatprep.subr.bf16.mxu0 %v5006_v43 }
 0x197   : > { %3207 = vmatpush1.bf16.msra.mxu1 %v5001_v44 }
 0x198   : > { %3508 = vmatpush1.bf16.msra.mxu0 %v5004_v45  ;;  %3208 = vmatprep.subr.bf16.mxu1 %v5009_v46 }
 0x199   : > { %3509 = vmatprep.subr.bf16.mxu0 %v5012_v47 }
 0x19b   : > { %3209 = vmatpush1.bf16.msra.mxu1 %v5007_v48 }
 0x19c   : > { %3510 = vmatpush1.bf16.msra.mxu0 %v5010_v49  ;;  %3210 = vmatprep.subr.bf16.mxu1 %v5015_v50 }
 0x19d   : > { %3511 = vmatprep.subr.bf16.mxu0 %v5018_v51  ;;  %v5063_v51 = vmov 1983009808  }
 0x19f   : > { %3211 = vmatpush1.bf16.msra.mxu1 %v5013_v52  ;;  %v3728_v52 = vunpack.c.l.s4 %v5063_v51 }
 0x1a0   : > { %3512 = vmatpush1.bf16.msra.mxu0 %v5016_v53  ;;  %3212 = vmatprep.subr.bf16.mxu1 %v5021_v54 }
 0x1a1   : > { %3513 = vmatprep.subr.bf16.mxu0 %v5024_v55 }
 0x1a3   : > { %3213 = vmatpush1.bf16.msra.mxu1 %v5019_v56 }
 0x1a4   : > { %3514 = vmatpush1.bf16.msra.mxu0 %v5022_v57  ;;  %3214 = vmatprep.subr.bf16.mxu1 %v5027_v58 }
 0x1a7   : > { %3532 = vmatmul.mubr.bf16.vlgmr.msra.gmra.mrb[0].mxu0 %v5028_v59  ;;  %3215 = vmatpush1.bf16.msra.mxu1 %v5025_v60 }
 0x1a8   : > { %3216 = vmatprep.subr.bf16.mxu1 %v5031_v61  ;;  %v3729_v61 = vunpack.c.0.s8 %v3728_v52 }
 0x1ab   : > { %3217 = vmatpush1.bf16.msra.mxu1 %v5029_v62 }
 0x1ac   : > { %3218 = vmatprep.subr.bf16.mxu1 %v5034_v63 }
 0x1af   : > { %3219 = vmatpush1.bf16.msra.mxu1 %v5032_v0 }
 0x1b0   : > { %3220 = vmatprep.subr.bf16.mxu1 %v5037_v1 }
 0x1b3   : > { %3221 = vmatpush1.bf16.msra.mxu1 %v5035_v2 }
 0x1b4   : > { %3222 = vmatprep.subr.bf16.mxu1 %v5040_v3 }
 0x1b7   : > { %3223 = vmatpush1.bf16.msra.mxu1 %v5038_v4 }
 0x1b8   : > { %3224 = vmatprep.subr.bf16.mxu1 %v5043_v5 }
 0x1bb   : > { %3225 = vmatpush1.bf16.msra.mxu1 %v5041_v6 }
 0x1bc   : > { %3226 = vmatprep.subr.bf16.mxu1 %v5046_v7 }
 0x1bf   : > { %3227 = vmatpush1.bf16.msra.mxu1 %v5044_v8  ;;  %v3732_v8 = vsub.s32 %v3729_v61, %v635_v17 }
 0x1c0   : > { %3228 = vmatprep.subr.bf16.mxu1 %v5049_v9 }
 0x1c3   : > { %3229 = vmatpush1.bf16.msra.mxu1 %v5047_v10 }
 0x1c6   : > { %3231 = vmatmul.mubr.bf16.vlgmr.msra.gmra.mrb[0].mxu1 %v5050_v11 }
 0x27a   : > { %v3533_v12 = vpop.f32.mrb[0].mxu0 }
 0x27b   : > { %v3535_v13 = vpop.f32.mrb[1].mxu0 }
 0x27c   : > { %v3537_v14 = vpop.f32.mrb[2].mxu0 }
 0x27d   : > { %v3539_v15 = vpop.f32.mrb[3].mxu0 }
 0x299   : > { %v3232_v25 = vpop.f32.mrb[0].mxu1 }
 0x29a   : > { %v4296_v26 = vadd.f32 %v3232_v25, %v637_v21  ;;  %v3234_v27 = vpop.f32.mrb[1].mxu1  ;;  %v3763_v25 = vld [vmem:[%s170_s13 + $0x4] sm:$0xf] }
 0x29b   : > { %v4298_v29 = vadd.f32 %v3234_v27, %v641_v24  ;;  %v3236_v30 = vpop.f32.mrb[2].mxu1 }
 0x29c   : > { %v4297_v31 = vadd.f32 %v4296_v26, %v3533_v12  ;;  %v4300_v32 = vadd.f32 %v3236_v30, %v637_v21  ;;  %v3238_v33 = vpop.f32.mrb[3].mxu1 }
 0x29d   : > { %v4299_v34 = vadd.f32 %v4298_v29, %v3535_v13  ;;  %v4302_v35 = vadd.f32 %v3238_v33, %v641_v24  ;;  %v3766_v24 = vld [vmem:[%s170_s13 + $0x8] sm:$0xf] }
 0x29e   : > { %v3542_v36 = vmax.f32 %v4297_v31, 0.0  ;;  %v4301_v37 = vadd.f32 %v4300_v32, %v3537_v14 }
 0x29f   : > { %v3543_v39 = vmax.f32 %v4299_v34, 0.0  ;;  %v4303_v40 = vadd.f32 %v4302_v35, %v3539_v15 }
 0x2a0   : > { %v3544_v41 = vmax.f32 %v4301_v37, 0.0 }
 0x2a1   : > { %v3550_v42 = vcombine.low %v3542_v36, %v3543_v39  ;;  %v3551_v43 = vcombine.high %v3542_v36, %v3543_v39  ;;  %v3545_v44 = vmax.f32 %v4303_v40, 0.0 }
 0x2a3   : > { %v3558_v45 = vrot.slane %v3550_v42, %v3557_v38  ;;  %v3565_v46 = vrot.slane %v3551_v43, %v3557_v38  ;;  %v3600_v47 = vcombine.low %v3544_v41, %v3545_v44 }
 0x2a5   : > { %v3566_v48 = vcombine.high %v3558_v45, %v3558_v45  ;;  %v3567_v49 = vcombine.high %v3565_v46, %v3565_v46  ;;  %v3574_v50 = vrot.slane %v3558_v45, %v3557_v38  ;;  %v3607_v53 = vrot.slane %v3600_v47, %v3557_v38 }
 0x2a6   : > { %v3581_v57 = vrot.slane %v3565_v46, %v3557_v38 }
 0x2a7   : > { %v3588_v54 = vrot.slane %v3566_v48, %v3557_v38  ;;  %v3595_v55 = vrot.slane %v3567_v49, %v3557_v38  ;;  %v3596_v56 = vcombine.high %v3574_v50, %v3574_v50  ;;  %v3614_v58 = vrot.slane %v3607_v53, %v3557_v38 }
 0x2a9   : > { %v3598_v59 = vcombine.high %v3588_v54, %v3588_v54  ;;  %v3615_v60 = vcombine.low %v3574_v50, %v3588_v54  ;;  %v4290_v62 = vcombine.high %v3581_v57, %v3595_v55  ;;  %v3629_v0 = vrot.slane %v3596_v56, %v3557_v38 }
 0x2aa   : > { %v3691_v3 = vrot.slane %v3614_v58, %v3557_v38  ;;  %v3660_v7 = vrot.slane %v3595_v55, %v3557_v38 }
 0x2ab   : > { %v3622_v63 = vrot.slane %v3615_v60, %v3557_v38  ;;  %v3646_v1 = vcombine.low %v3598_v59, %v3581_v57  ;;  %v3684_v2 = vrot.slane %v4290_v62, %v3557_v38 }
 0x2ad   : > { %v3630_v4 = vcombine.low %v3622_v63, %v3629_v0  ;;  %v3631_v5 = vcombine.high %v3622_v63, %v3629_v0  ;;  %v3653_v6 = vrot.slane %v3646_v1, %v3557_v38  ;;  %v3692_v9 = vcombine.low %v3684_v2, %v3691_v3 }
 0x2ae   : > { %v3693_v10 = vcombine.high %v3684_v2, %v3691_v3 }
 0x2af   : > { %v3638_v11 = vrot.slane %v3630_v4, %v3557_v38  ;;  %v3645_v12 = vrot.slane %v3631_v5, %v3557_v38  ;;  %v3661_v13 = vcombine.low %v3653_v6, %v3660_v7  ;;  %v3662_v14 = vcombine.high %v3653_v6, %v3660_v7 }
 0x2b0   : > { %v3700_v15 = vrot.slane %v3692_v9, %v3557_v38  ;;  %v3707_v16 = vrot.slane %v3693_v10, %v3557_v38 }
 0x2b1   : > { %v3669_v18 = vrot.slane %v3661_v13, %v3557_v38  ;;  %v3676_v19 = vrot.slane %v3662_v14, %v3557_v38  ;;  %v4291_v17 = vpack.c.bf16 %v3645_v12, %v3638_v11 }
 0x2b2   : > { %v4293_v21 = vpack.c.bf16 %v3707_v16, %v3700_v15 }
 0x2b3   : > { %v3733_v22 = vrot.slane %v4291_v17, %v3732_v8  ;;  %v4292_v23 = vpack.c.bf16 %v3676_v19, %v3669_v18 }
 0x2b4   : > { %v3749_v26 = vrot.slane %v4293_v21, %v3732_v8 }
 0x2b5   : > { %v3741_v27 = vrot.slane %v4292_v23, %v3732_v8  ;;  %v3761_v28 = vsel %vm3759_vm6, %v3733_v22, %v3760_v20 }
 0x2b6   : > { %3762 = vst [vmem:[%s170_s13] sm:$0xf] %v3761_v28  ;;  %v3767_v29 = vsel %vm3759_vm6, %v3749_v26, %v3766_v24 }
 0x2b7   : > { %v3764_v30 = vsel %vm3759_vm6, %v3741_v27, %v3763_v25  ;;  %3768 = vst [vmem:[%s170_s13 + $0x8] sm:$0xf] %v3767_v29 }
 0x2b8   : > { %3765 = vst [vmem:[%s170_s13 + $0x4] sm:$0xf] %v3764_v30 }
 0x2b9 PF: > { %s13_s12 = sadd.s32 1, %s5059_s12  }
 0x2ba   : > { %p10_p4 = scmp.ge.s32.totalorder %s13_s12, 4  }
 0x2bc   :  { %12 = sbr.rel (!%p10_p4) target bundleno = 1 (0x1), region = 62 }

// kernel: alexnet_forward.9
= control target key start
LH: loop header
LB: loop body
LE: loop exit
PB: predicated region body
PF: predicated region fallthrough
CT: control target
= control target key end

     0   :  { %14 = vsyncpa [#allocation3], 0  ;;  %s7821_s0 = inlined_call_operand.vmem [shape: bf16[2,16,2304], index: 0, kind: input, shape index: {}]   ;;  %s7822_s1 = inlined_call_operand.vmem [shape: bf16[2304,256], index: 1, kind: input, shape index: {}]   ;;  %s7823_s2 = inlined_call_operand.vmem [shape: f32[1,256], index: 2, kind: input, shape index: {}]   ;;  %s7824_s3 = inlined_call_operand.vmem [shape: bf16[256,512], index: 3, kind: input, shape index: {}]   ;;  %s7825_s4 = inlined_call_operand.vmem [shape: f32[1,512], index: 4, kind: input, shape index: {}]   ;;  %s7826_s5 = inlined_call_operand.vmem [shape: bf16[512,512], index: 5, kind: input, shape index: {}]   ;;  %s7827_s6 = inlined_call_operand.vmem [shape: f32[1,512], index: 6, kind: input, shape index: {}]   ;;  %s7828_s7 = inlined_call_operand.vmem [shape: bf16[512,128], index: 7, kind: input, shape index: {}]   ;;  %s7829_s8 = inlined_call_operand.vmem [shape: f32[1,128], index: 8, kind: input, shape index: {}]   ;;  %s7830_s9 = inlined_call_operand.hbm [shape: f32[2,1,128], index: 9, kind: output, shape index: {}]  }
   0x1   :  { %16 = vsyncpa [#allocation3 + $0x1], 0  ;;  %s6100_s30 = smov 0   ;;  %s6102_s10 = smov 0  }
   0x2   :  { %s6104_s11 = smov 0   ;;  %s6106_s12 = smov 0  }
   0x3 LB: > { %s6121_s13 = sadd.s32 4294967295, %s6046_s12   ;;  %s4534_s14 = sadd.s32 4294967294, %s6046_s12   ;;  %s6046_s12 = sphi %s6106_s12, %s7836_s12   ;;  %s6042_s11 = sphi %s6104_s11, %s7835_s11   ;;  %s6038_s10 = sphi %s6102_s10, %s7834_s10   ;;  %s6034_s30 = sphi %s6100_s30, %s7833_s30  }
   0x4   : > { %s6125_s15 = sadd.s32 1, %s6046_s12   ;;  %s223_s16 = sadd.s32 1, %s6042_s11 }
   0x5   : > { %s220_s17 = ssub.s32 %s6046_s12, %s6125_s15  ;;  %p233_p0 = scmp.ne.s32.totalorder %s6042_s11, %s6038_s10 }
   0x6   : > { %p221_p1 = scmp.eq.s32.totalorder %s220_s17, 0  ;;  %p234_p2 = scmp.eq.s32.totalorder %s6121_s13, 1 }
   0x7   : > { %p239_p3 = scmp.ne.s32.totalorder %s6038_s10, %s6034_s30  ;;  %p240_p4 = scmp.eq.s32.totalorder %s4534_s14, 1 }
   0x8   : > { %s6136_s18 = scalar_select %p221_p1, %s6042_s11, %s223_s16  }
   0x9   : > { %p6138_p5 = por %p234_p2, %p233_p0  ;;  %p6142_p6 = por %p240_p4, %p239_p3 }
   0xa   : > { %p4537_p7 = scmp.ge.s32.totalorder %s6046_s12, 1  ;;  %p290_p8 = scmp.lt.s32.totalorder %s6046_s12, 3 }
   0xc   : > { %p291_p9 = pnand %p4537_p7, %p290_p8 }
   0xd   : > { %v5205_v0 = vld [vmem:[%s7822_s1 + $0x104] ss:$8 sps:$4 sm:$0xff] (!%p291_p9)   ;;  %v5207_v1 = vld [vmem:[%s7822_s1 + $0x100] ss:$8 sps:$4 sm:$0xff] (!%p291_p9)   ;;  %v5208_v2 = vld [vmem:[%s7822_s1 + $0x114] ss:$8 sps:$4 sm:$0xff] (!%p291_p9)  }
   0xe   : > { %294 = sbr.rel (%p291_p9) target bundleno = 1629 (0x65d), region = 56  ;;  %2222 = vmatprep.subr.bf16.mxu0 (!%p291_p9), %v5205_v0  ;;  %v5210_v3 = vld [vmem:[%s7822_s1 + $0x110] ss:$8 sps:$4 sm:$0xff] (!%p291_p9)   ;;  %v5211_v4 = vld [vmem:[%s7822_s1 + $0x124] ss:$8 sps:$4 sm:$0xff] (!%p291_p9)   ;;  %p325_p10 = scmp.lt.s32.totalorder (!%p291_p9), %s6121_s13, 1 }
   0xf   : > { %2223 = vmatpush1.bf16.msra.mxu0 (!%p291_p9), %v5207_v1  ;;  %v5213_v5 = vld [vmem:[%s7822_s1 + $0x120] ss:$8 sps:$4 sm:$0xff] (!%p291_p9)   ;;  %v5214_v6 = vld [vmem:[%s7822_s1 + $0x134] ss:$8 sps:$4 sm:$0xff] (!%p291_p9)   ;;  %v5216_v7 = vld [vmem:[%s7822_s1 + $0x130] ss:$8 sps:$4 sm:$0xff] (!%p291_p9)  }
  0x10   : > { %2224 = vmatprep.subr.bf16.mxu0 (!%p291_p9), %v5208_v2  ;;  %v5217_v8 = vld [vmem:[%s7822_s1 + $0x144] ss:$8 sps:$4 sm:$0xff] (!%p291_p9)   ;;  %v5219_v9 = vld [vmem:[%s7822_s1 + $0x140] ss:$8 sps:$4 sm:$0xff] (!%p291_p9)   ;;  %v5220_v10 = vld [vmem:[%s7822_s1 + $0x154] ss:$8 sps:$4 sm:$0xff] (!%p291_p9)  }
  0x11   : > { %v5222_v11 = vld [vmem:[%s7822_s1 + $0x150] ss:$8 sps:$4 sm:$0xff] (!%p291_p9)   ;;  %v5223_v12 = vld [vmem:[%s7822_s1 + $0x164] ss:$8 sps:$4 sm:$0xff] (!%p291_p9)   ;;  %v5225_v14 = vld [vmem:[%s7822_s1 + $0x160] ss:$8 sps:$4 sm:$0xff] (!%p291_p9)  }
  0x12   : > { %v5226_v15 = vld [vmem:[%s7822_s1 + $0x174] ss:$8 sps:$4 sm:$0xff] (!%p291_p9)   ;;  %v5228_v16 = vld [vmem:[%s7822_s1 + $0x170] ss:$8 sps:$4 sm:$0xff] (!%p291_p9)   ;;  %v5229_v17 = vld [vmem:[%s7822_s1 + $0x184] ss:$8 sps:$4 sm:$0xff] (!%p291_p9)  }
  0x13   : > { %2225 = vmatpush1.bf16.msra.mxu0 (!%p291_p9), %v5210_v3  ;;  %v5231_v18 = vld [vmem:[%s7822_s1 + $0x180] ss:$8 sps:$4 sm:$0xff] (!%p291_p9)   ;;  %v5232_v19 = vld [vmem:[%s7822_s1 + $0x194] ss:$8 sps:$4 sm:$0xff] (!%p291_p9)   ;;  %v5234_v20 = vld [vmem:[%s7822_s1 + $0x190] ss:$8 sps:$4 sm:$0xff] (!%p291_p9)  }
  0x14   : > { %2226 = vmatprep.subr.bf16.mxu0 (!%p291_p9), %v5211_v4  ;;  %v5235_v21 = vld [vmem:[%s7822_s1 + $0x1a4] ss:$8 sps:$4 sm:$0xff] (!%p291_p9)   ;;  %v5237_v22 = vld [vmem:[%s7822_s1 + $0x1a0] ss:$8 sps:$4 sm:$0xff] (!%p291_p9)   ;;  %v5238_v23 = vld [vmem:[%s7822_s1 + $0x1b4] ss:$8 sps:$4 sm:$0xff] (!%p291_p9)  }
  0x15   : > { %s326_s25 = scalar_select %p325_p10, %s6121_s13, 1  ;;  %v5240_v24 = vld [vmem:[%s7822_s1 + $0x1b0] ss:$8 sps:$4 sm:$0xff]   ;;  %v5241_v25 = vld [vmem:[%s7822_s1 + $0x1c4] ss:$8 sps:$4 sm:$0xff]  }
  0x16   : > { %v5243_v26 = vld [vmem:[%s7822_s1 + $0x1c0] ss:$8 sps:$4 sm:$0xff]   ;;  %v5244_v27 = vld [vmem:[%s7822_s1 + $0x1d4] ss:$8 sps:$4 sm:$0xff]   ;;  %v5246_v28 = vld [vmem:[%s7822_s1 + $0x1d0] ss:$8 sps:$4 sm:$0xff]  }
  0x17   : > { %2227 = vmatpush1.bf16.msra.mxu0 %v5213_v5  ;;  %s5164_s14 = smul.u32 144, %s326_s25  ;;  %v5247_v29 = vld [vmem:[%s7822_s1 + $0x1e4] ss:$8 sps:$4 sm:$0xff]   ;;  %v5249_v30 = vld [vmem:[%s7822_s1 + $0x1e0] ss:$8 sps:$4 sm:$0xff]   ;;  %s323_s29 = sand.u32 1, %s6038_s10  }
  0x18   : > { %2228 = vmatprep.subr.bf16.mxu0 %v5214_v6  ;;  %v5250_v31 = vld [vmem:[%s7822_s1 + $0x1f4] ss:$8 sps:$4 sm:$0xff]   ;;  %v5252_v32 = vld [vmem:[%s7822_s1 + $0x1f0] ss:$8 sps:$4 sm:$0xff]   ;;  %v5258_v33 = vld [vmem:[%s7822_s1 + $0x204] ss:$8 sps:$4 sm:$0xff]  }
  0x19   : > { %s6189_s26 = scalar_lea.vmem %s7821_s0, %s5164_s14  ;;  %v5256_v35 = vld [vmem:[%s7822_s1 + $0x200] ss:$8 sps:$4 sm:$0xff]   ;;  %v5261_v37 = vld [vmem:[%s7822_s1 + $0x214] ss:$8 sps:$4 sm:$0xff]   ;;  %v5259_v38 = vld [vmem:[%s7822_s1 + $0x210] ss:$8 sps:$4 sm:$0xff]  }
  0x1a   : > { %v5255_v13 = vld [vmem:[%s6189_s26 + $0xc] ss:$72 sps:$4 sm:$0xff]   ;;  %v5253_v34 = vld [vmem:[%s6189_s26 + $0x8] ss:$72 sps:$4 sm:$0xff]   ;;  %v5357_v6 = vld [vmem:[%s6189_s26 + $0x1c] ss:$72 sps:$4 sm:$0xff]  }
  0x1b   : > { %2229 = vmatpush1.bf16.msra.mxu0 %v5216_v7  ;;  %2254 = vmatprep.mubr.bf16.mxu0 %v5255_v13  ;;  %v5306_v36 = vld [vmem:[%s6189_s26 + $0x14] ss:$72 sps:$4 sm:$0xff]   ;;  %v5264_v39 = vld [vmem:[%s7822_s1 + $0x224] ss:$8 sps:$4 sm:$0xff]   ;;  %v5262_v40 = vld [vmem:[%s7822_s1 + $0x220] ss:$8 sps:$4 sm:$0xff]  }
  0x1c   : > { %2230 = vmatprep.subr.bf16.mxu0 %v5217_v8  ;;  %v5267_v41 = vld [vmem:[%s7822_s1 + $0x234] ss:$8 sps:$4 sm:$0xff]   ;;  %v5265_v42 = vld [vmem:[%s7822_s1 + $0x230] ss:$8 sps:$4 sm:$0xff]   ;;  %v5270_v43 = vld [vmem:[%s7822_s1 + $0x244] ss:$8 sps:$4 sm:$0xff]  }
  0x1d   : > { %v5268_v44 = vld [vmem:[%s7822_s1 + $0x240] ss:$8 sps:$4 sm:$0xff]   ;;  %v5273_v45 = vld [vmem:[%s7822_s1 + $0x254] ss:$8 sps:$4 sm:$0xff]   ;;  %v5271_v46 = vld [vmem:[%s7822_s1 + $0x250] ss:$8 sps:$4 sm:$0xff]  }
  0x1e   : > { %v5276_v47 = vld [vmem:[%s7822_s1 + $0x264] ss:$8 sps:$4 sm:$0xff]   ;;  %v5274_v48 = vld [vmem:[%s7822_s1 + $0x260] ss:$8 sps:$4 sm:$0xff]   ;;  %v5279_v49 = vld [vmem:[%s7822_s1 + $0x274] ss:$8 sps:$4 sm:$0xff]  }
  0x1f   : > { %2231 = vmatpush1.bf16.msra.mxu0 %v5219_v9  ;;  %v5277_v50 = vld [vmem:[%s7822_s1 + $0x270] ss:$8 sps:$4 sm:$0xff]   ;;  %v5282_v51 = vld [vmem:[%s7822_s1 + $0x284] ss:$8 sps:$4 sm:$0xff]   ;;  %v5280_v52 = vld [vmem:[%s7822_s1 + $0x280] ss:$8 sps:$4 sm:$0xff]  }
  0x20   : > { %2232 = vmatprep.subr.bf16.mxu0 %v5220_v10  ;;  %v5285_v53 = vld [vmem:[%s7822_s1 + $0x294] ss:$8 sps:$4 sm:$0xff]   ;;  %v5283_v54 = vld [vmem:[%s7822_s1 + $0x290] ss:$8 sps:$4 sm:$0xff]   ;;  %v5288_v55 = vld [vmem:[%s7822_s1 + $0x2a4] ss:$8 sps:$4 sm:$0xff]  }
  0x21   : > { %v5286_v56 = vld [vmem:[%s7822_s1 + $0x2a0] ss:$8 sps:$4 sm:$0xff]   ;;  %v5291_v57 = vld [vmem:[%s7822_s1 + $0x2b4] ss:$8 sps:$4 sm:$0xff]   ;;  %v5289_v58 = vld [vmem:[%s7822_s1 + $0x2b0] ss:$8 sps:$4 sm:$0xff]  }
  0x22   : > { %v5294_v59 = vld [vmem:[%s7822_s1 + $0x2c4] ss:$8 sps:$4 sm:$0xff]   ;;  %v5292_v60 = vld [vmem:[%s7822_s1 + $0x2c0] ss:$8 sps:$4 sm:$0xff]   ;;  %v5297_v61 = vld [vmem:[%s7822_s1 + $0x2d4] ss:$8 sps:$4 sm:$0xff]  }
  0x23   : > { %2233 = vmatpush1.bf16.msra.mxu0 %v5222_v11  ;;  %v5295_v62 = vld [vmem:[%s7822_s1 + $0x2d0] ss:$8 sps:$4 sm:$0xff]   ;;  %v5300_v63 = vld [vmem:[%s7822_s1 + $0x2e4] ss:$8 sps:$4 sm:$0xff]   ;;  %v5298_v0 = vld [vmem:[%s7822_s1 + $0x2e0] ss:$8 sps:$4 sm:$0xff]  }
  0x24   : > { %2234 = vmatprep.subr.bf16.mxu0 %v5223_v12  ;;  %v5303_v1 = vld [vmem:[%s7822_s1 + $0x2f4] ss:$8 sps:$4 sm:$0xff]   ;;  %v5301_v2 = vld [vmem:[%s7822_s1 + $0x2f0] ss:$8 sps:$4 sm:$0xff]   ;;  %v5309_v3 = vld [vmem:[%s7822_s1 + $0x304] ss:$8 sps:$4 sm:$0xff]  }
  0x25   : > { %v5304_v4 = vld [vmem:[%s6189_s26 + $0x10] ss:$72 sps:$4 sm:$0xff]   ;;  %v5307_v5 = vld [vmem:[%s7822_s1 + $0x300] ss:$8 sps:$4 sm:$0xff]   ;;  %v5312_v7 = vld [vmem:[%s7822_s1 + $0x314] ss:$8 sps:$4 sm:$0xff]  }
  0x26   : > { %v5310_v8 = vld [vmem:[%s7822_s1 + $0x310] ss:$8 sps:$4 sm:$0xff]   ;;  %v5315_v9 = vld [vmem:[%s7822_s1 + $0x324] ss:$8 sps:$4 sm:$0xff]   ;;  %v5313_v10 = vld [vmem:[%s7822_s1 + $0x320] ss:$8 sps:$4 sm:$0xff]  }
  0x27   : > { %2235 = vmatpush1.bf16.msra.mxu0 %v5225_v14  ;;  %v5318_v11 = vld [vmem:[%s7822_s1 + $0x334] ss:$8 sps:$4 sm:$0xff]   ;;  %v5316_v12 = vld [vmem:[%s7822_s1 + $0x330] ss:$8 sps:$4 sm:$0xff]   ;;  %v5321_v13 = vld [vmem:[%s7822_s1 + $0x344] ss:$8 sps:$4 sm:$0xff]  }
  0x28   : > { %2236 = vmatprep.subr.bf16.mxu0 %v5226_v15  ;;  %v5319_v14 = vld [vmem:[%s7822_s1 + $0x340] ss:$8 sps:$4 sm:$0xff]   ;;  %v5324_v15 = vld [vmem:[%s7822_s1 + $0x354] ss:$8 sps:$4 sm:$0xff]   ;;  %s5069_s14 = sshll.u32 %s6121_s13, 4  ;;  %s324_s21 = scalar_lea.vmem [#allocation2], %s323_s29 }
  0x29   : > { %s4479_s22 = sshll.u32 %s324_s21, 4  ;;  %s4467_s27 = scalar_lea.sflag [#allocation3], %s323_s29  ;;  %s7781_s22 = int_to_ptr.vmem [resolvable:$true] %s4479_s22 }
  0x2a   : > { %s5984_s13 = scalar_lea.vmem %s7781_s22, 16  ;;  %s6049_s28 = smov [#allocation2]  }
  0x2b   : > { %2237 = vmatpush1.bf16.msra.mxu0 %v5228_v16  ;;  %v5322_v16 = vld [vmem:[%s7822_s1 + $0x350] ss:$8 sps:$4 sm:$0xff]   ;;  %p5985_p11 = scmp.ne.s32.totalorder %s7781_s22, %s5984_s13  ;;  %s5988_s25 = sshll.u32 %s6049_s28, 4  ;;  %s5989_s25 = int_to_ptr.vmem [resolvable:$false] %s5988_s25 }
  0x2c   : > { %2238 = vmatprep.subr.bf16.mxu0 %v5229_v17  ;;  %v5327_v17 = vld [vmem:[%s7822_s1 + $0x364] ss:$8 sps:$4 sm:$0xff]   ;;  %s5990_s16 = scalar_lea.vmem %s5989_s25, 32  ;;  %p5991_p0 = scmp.lt.s32.totalorder %s7781_s22, %s5989_s25 }
  0x2d   : > { %p5986_p12 = pnand %p5985_p11, %p6138_p5  ;;  %p5992_p1 = scmp.lt.s32.totalorder %s5990_s16, %s5984_s13 }
  0x2f   : > { %2239 = vmatpush1.bf16.msra.mxu0 %v5231_v18  ;;  %v5325_v18 = vld [vmem:[%s7822_s1 + $0x360] ss:$8 sps:$4 sm:$0xff]   ;;  %p5987_p13 = pneg %p5986_p12  ;;  %p5993_p2 = por %p5992_p1, %p5991_p0 }
  0x30   : > { %2240 = vmatprep.subr.bf16.mxu0 %v5232_v19  ;;  %v5330_v19 = vld [vmem:[%s7822_s1 + $0x374] ss:$8 sps:$4 sm:$0xff]  }
  0x31   : > { %p5994_p3 = pnand %p5993_p2, %p5987_p13 }
  0x33   : > { %2241 = vmatpush1.bf16.msra.mxu0 %v5234_v20  ;;  %v5328_v20 = vld [vmem:[%s7822_s1 + $0x370] ss:$8 sps:$4 sm:$0xff]  }
  0x34   : > { %2242 = vmatprep.subr.bf16.mxu0 %v5235_v21  ;;  %v5333_v21 = vld [vmem:[%s7822_s1 + $0x384] ss:$8 sps:$4 sm:$0xff]  }
  0x37   : > { %2243 = vmatpush1.bf16.msra.mxu0 %v5237_v22  ;;  %v5331_v22 = vld [vmem:[%s7822_s1 + $0x380] ss:$8 sps:$4 sm:$0xff]  }
  0x38   : > { %2244 = vmatprep.subr.bf16.mxu0 %v5238_v23  ;;  %v5336_v23 = vld [vmem:[%s7822_s1 + $0x394] ss:$8 sps:$4 sm:$0xff]  }
  0x3b   : > { %2245 = vmatpush1.bf16.msra.mxu0 %v5240_v24  ;;  %v5334_v24 = vld [vmem:[%s7822_s1 + $0x390] ss:$8 sps:$4 sm:$0xff]  }
  0x3c   : > { %2246 = vmatprep.subr.bf16.mxu0 %v5241_v25  ;;  %v5339_v25 = vld [vmem:[%s7822_s1 + $0x3a4] ss:$8 sps:$4 sm:$0xff]  }
  0x3f   : > { %2247 = vmatpush1.bf16.msra.mxu0 %v5243_v26  ;;  %v5337_v26 = vld [vmem:[%s7822_s1 + $0x3a0] ss:$8 sps:$4 sm:$0xff]  }
  0x40   : > { %2248 = vmatprep.subr.bf16.mxu0 %v5244_v27  ;;  %v5342_v27 = vld [vmem:[%s7822_s1 + $0x3b4] ss:$8 sps:$4 sm:$0xff]  }
  0x43   : > { %2249 = vmatpush1.bf16.msra.mxu0 %v5246_v28  ;;  %v5340_v28 = vld [vmem:[%s7822_s1 + $0x3b0] ss:$8 sps:$4 sm:$0xff]  }
  0x44   : > { %2250 = vmatprep.subr.bf16.mxu0 %v5247_v29  ;;  %v5345_v29 = vld [vmem:[%s7822_s1 + $0x3c4] ss:$8 sps:$4 sm:$0xff]  }
  0x47   : > { %2251 = vmatpush1.bf16.msra.mxu0 %v5249_v30  ;;  %v5343_v30 = vld [vmem:[%s7822_s1 + $0x3c0] ss:$8 sps:$4 sm:$0xff]  }
  0x48   : > { %2252 = vmatprep.subr.bf16.mxu0 %v5250_v31  ;;  %v5348_v31 = vld [vmem:[%s7822_s1 + $0x3d4] ss:$8 sps:$4 sm:$0xff]  }
  0x4b   : > { %2253 = vmatpush1.bf16.msra.mxu0 %v5252_v32  ;;  %v5346_v32 = vld [vmem:[%s7822_s1 + $0x3d0] ss:$8 sps:$4 sm:$0xff]  }
  0x4c   : > { %2265 = vmatprep.subr.bf16.mxu0 %v5258_v33  ;;  %v5351_v33 = vld [vmem:[%s7822_s1 + $0x3e4] ss:$8 sps:$4 sm:$0xff]  }
  0x4e   : > { %2255 = vmatmul.mubr.bf16.vlgmr.msra.gmra.mrb[0].mxu0 %v5253_v34  ;;  %v5349_v34 = vld [vmem:[%s7822_s1 + $0x3e0] ss:$8 sps:$4 sm:$0xff]  }
  0x4f   : > { %2266 = vmatpush1.bf16.msra.mxu0 %v5256_v35  ;;  %2297 = vmatprep.mubr.bf16.mxu0 %v5306_v36  ;;  %v5354_v35 = vld [vmem:[%s7822_s1 + $0x3f4] ss:$8 sps:$4 sm:$0xff]   ;;  %v5352_v36 = vld [vmem:[%s7822_s1 + $0x3f0] ss:$8 sps:$4 sm:$0xff]  }
  0x50   : > { %2267 = vmatprep.subr.bf16.mxu0 %v5261_v37  ;;  %v5360_v37 = vld [vmem:[%s7822_s1 + $0x404] ss:$8 sps:$4 sm:$0xff]  }
  0x53   : > { %2268 = vmatpush1.bf16.msra.mxu0 %v5259_v38  ;;  %v5355_v38 = vld [vmem:[%s6189_s26 + $0x18] ss:$72 sps:$4 sm:$0xff]  }
  0x54   : > { %2269 = vmatprep.subr.bf16.mxu0 %v5264_v39  ;;  %v5358_v39 = vld [vmem:[%s7822_s1 + $0x400] ss:$8 sps:$4 sm:$0xff]  }
  0x57   : > { %2270 = vmatpush1.bf16.msra.mxu0 %v5262_v40  ;;  %v5408_v40 = vld [vmem:[%s6189_s26 + $0x24] ss:$72 sps:$4 sm:$0xff]  }
  0x58   : > { %2271 = vmatprep.subr.bf16.mxu0 %v5267_v41  ;;  %v5363_v41 = vld [vmem:[%s7822_s1 + $0x414] ss:$8 sps:$4 sm:$0xff]  }
  0x5b   : > { %2272 = vmatpush1.bf16.msra.mxu0 %v5265_v42  ;;  %v5361_v42 = vld [vmem:[%s7822_s1 + $0x410] ss:$8 sps:$4 sm:$0xff]  }
  0x5c   : > { %2273 = vmatprep.subr.bf16.mxu0 %v5270_v43  ;;  %v5366_v43 = vld [vmem:[%s7822_s1 + $0x424] ss:$8 sps:$4 sm:$0xff]  }
  0x5f   : > { %2274 = vmatpush1.bf16.msra.mxu0 %v5268_v44  ;;  %v5364_v44 = vld [vmem:[%s7822_s1 + $0x420] ss:$8 sps:$4 sm:$0xff]  }
  0x60   : > { %2275 = vmatprep.subr.bf16.mxu0 %v5273_v45  ;;  %v5369_v45 = vld [vmem:[%s7822_s1 + $0x434] ss:$8 sps:$4 sm:$0xff]  }
  0x63   : > { %2276 = vmatpush1.bf16.msra.mxu0 %v5271_v46  ;;  %v5367_v46 = vld [vmem:[%s7822_s1 + $0x430] ss:$8 sps:$4 sm:$0xff]  }
  0x64   : > { %2277 = vmatprep.subr.bf16.mxu0 %v5276_v47  ;;  %v5372_v47 = vld [vmem:[%s7822_s1 + $0x444] ss:$8 sps:$4 sm:$0xff]  }
  0x67   : > { %2278 = vmatpush1.bf16.msra.mxu0 %v5274_v48  ;;  %v5370_v48 = vld [vmem:[%s7822_s1 + $0x440] ss:$8 sps:$4 sm:$0xff]  }
  0x68   : > { %2279 = vmatprep.subr.bf16.mxu0 %v5279_v49  ;;  %v5375_v49 = vld [vmem:[%s7822_s1 + $0x454] ss:$8 sps:$4 sm:$0xff]  }
  0x6b   : > { %2280 = vmatpush1.bf16.msra.mxu0 %v5277_v50  ;;  %v5373_v50 = vld [vmem:[%s7822_s1 + $0x450] ss:$8 sps:$4 sm:$0xff]  }
  0x6c   : > { %2281 = vmatprep.subr.bf16.mxu0 %v5282_v51  ;;  %v5378_v51 = vld [vmem:[%s7822_s1 + $0x464] ss:$8 sps:$4 sm:$0xff]  }
  0x6f   : > { %2282 = vmatpush1.bf16.msra.mxu0 %v5280_v52  ;;  %v5376_v52 = vld [vmem:[%s7822_s1 + $0x460] ss:$8 sps:$4 sm:$0xff]  }
  0x70   : > { %2283 = vmatprep.subr.bf16.mxu0 %v5285_v53  ;;  %v5381_v53 = vld [vmem:[%s7822_s1 + $0x474] ss:$8 sps:$4 sm:$0xff]  }
  0x73   : > { %2284 = vmatpush1.bf16.msra.mxu0 %v5283_v54  ;;  %v5379_v54 = vld [vmem:[%s7822_s1 + $0x470] ss:$8 sps:$4 sm:$0xff]  }
  0x74   : > { %2285 = vmatprep.subr.bf16.mxu0 %v5288_v55  ;;  %v5384_v55 = vld [vmem:[%s7822_s1 + $0x484] ss:$8 sps:$4 sm:$0xff]  }
  0x77   : > { %2286 = vmatpush1.bf16.msra.mxu0 %v5286_v56  ;;  %v5382_v56 = vld [vmem:[%s7822_s1 + $0x480] ss:$8 sps:$4 sm:$0xff]  }
  0x78   : > { %2287 = vmatprep.subr.bf16.mxu0 %v5291_v57  ;;  %v5387_v57 = vld [vmem:[%s7822_s1 + $0x494] ss:$8 sps:$4 sm:$0xff]  }
  0x7b   : > { %2288 = vmatpush1.bf16.msra.mxu0 %v5289_v58  ;;  %v5385_v58 = vld [vmem:[%s7822_s1 + $0x490] ss:$8 sps:$4 sm:$0xff]  }
  0x7c   : > { %2289 = vmatprep.subr.bf16.mxu0 %v5294_v59  ;;  %v5390_v59 = vld [vmem:[%s7822_s1 + $0x4a4] ss:$8 sps:$4 sm:$0xff]  }
  0x7f   : > { %2290 = vmatpush1.bf16.msra.mxu0 %v5292_v60  ;;  %v5388_v60 = vld [vmem:[%s7822_s1 + $0x4a0] ss:$8 sps:$4 sm:$0xff]  }
  0x80   : > { %2291 = vmatprep.subr.bf16.mxu0 %v5297_v61  ;;  %v5393_v61 = vld [vmem:[%s7822_s1 + $0x4b4] ss:$8 sps:$4 sm:$0xff]  }
  0x83   : > { %2292 = vmatpush1.bf16.msra.mxu0 %v5295_v62  ;;  %v5391_v62 = vld [vmem:[%s7822_s1 + $0x4b0] ss:$8 sps:$4 sm:$0xff]  }
  0x84   : > { %2293 = vmatprep.subr.bf16.mxu0 %v5300_v63  ;;  %v5396_v63 = vld [vmem:[%s7822_s1 + $0x4c4] ss:$8 sps:$4 sm:$0xff]  }
  0x87   : > { %2294 = vmatpush1.bf16.msra.mxu0 %v5298_v0  ;;  %v5394_v0 = vld [vmem:[%s7822_s1 + $0x4c0] ss:$8 sps:$4 sm:$0xff]  }
  0x88   : > { %2295 = vmatprep.subr.bf16.mxu0 %v5303_v1  ;;  %v5399_v1 = vld [vmem:[%s7822_s1 + $0x4d4] ss:$8 sps:$4 sm:$0xff]  }
  0x8b   : > { %2296 = vmatpush1.bf16.msra.mxu0 %v5301_v2  ;;  %v5397_v2 = vld [vmem:[%s7822_s1 + $0x4d0] ss:$8 sps:$4 sm:$0xff]  }
  0x8c   : > { %2308 = vmatprep.subr.bf16.mxu0 %v5309_v3  ;;  %v5402_v3 = vld [vmem:[%s7822_s1 + $0x4e4] ss:$8 sps:$4 sm:$0xff]  }
  0x8e   : > { %2298 = vmatmul.mubr.bf16.vlgmr.msra.gmra.mrb[0].mxu0 %v5304_v4  ;;  %v5400_v4 = vld [vmem:[%s7822_s1 + $0x4e0] ss:$8 sps:$4 sm:$0xff]  }
  0x8f   : > { %2309 = vmatpush1.bf16.msra.mxu0 %v5307_v5  ;;  %2340 = vmatprep.mubr.bf16.mxu0 %v5357_v6  ;;  %v5405_v5 = vld [vmem:[%s7822_s1 + $0x4f4] ss:$8 sps:$4 sm:$0xff]   ;;  %v5403_v6 = vld [vmem:[%s7822_s1 + $0x4f0] ss:$8 sps:$4 sm:$0xff]  }
  0x90   : > { %2310 = vmatprep.subr.bf16.mxu0 %v5312_v7  ;;  %v5411_v7 = vld [vmem:[%s7822_s1 + $0x504] ss:$8 sps:$4 sm:$0xff]  }
  0x93   : > { %2311 = vmatpush1.bf16.msra.mxu0 %v5310_v8  ;;  %v5406_v8 = vld [vmem:[%s6189_s26 + $0x20] ss:$72 sps:$4 sm:$0xff]  }
  0x94   : > { %2312 = vmatprep.subr.bf16.mxu0 %v5315_v9  ;;  %v5409_v9 = vld [vmem:[%s7822_s1 + $0x500] ss:$8 sps:$4 sm:$0xff]  }
  0x97   : > { %2313 = vmatpush1.bf16.msra.mxu0 %v5313_v10  ;;  %v5459_v10 = vld [vmem:[%s6189_s26 + $0x2c] ss:$72 sps:$4 sm:$0xff]  }
  0x98   : > { %2314 = vmatprep.subr.bf16.mxu0 %v5318_v11  ;;  %v5414_v11 = vld [vmem:[%s7822_s1 + $0x514] ss:$8 sps:$4 sm:$0xff]  }
  0x9b   : > { %2315 = vmatpush1.bf16.msra.mxu0 %v5316_v12  ;;  %v5412_v12 = vld [vmem:[%s7822_s1 + $0x510] ss:$8 sps:$4 sm:$0xff]  }
  0x9c   : > { %2316 = vmatprep.subr.bf16.mxu0 %v5321_v13  ;;  %v5417_v13 = vld [vmem:[%s7822_s1 + $0x524] ss:$8 sps:$4 sm:$0xff]  }
  0x9f   : > { %2317 = vmatpush1.bf16.msra.mxu0 %v5319_v14  ;;  %v5415_v14 = vld [vmem:[%s7822_s1 + $0x520] ss:$8 sps:$4 sm:$0xff]  }
  0xa0   : > { %2318 = vmatprep.subr.bf16.mxu0 %v5324_v15  ;;  %v5420_v15 = vld [vmem:[%s7822_s1 + $0x534] ss:$8 sps:$4 sm:$0xff]  }
  0xa3   : > { %2319 = vmatpush1.bf16.msra.mxu0 %v5322_v16  ;;  %v5418_v16 = vld [vmem:[%s7822_s1 + $0x530] ss:$8 sps:$4 sm:$0xff]  }
  0xa4   : > { %2320 = vmatprep.subr.bf16.mxu0 %v5327_v17  ;;  %v5423_v17 = vld [vmem:[%s7822_s1 + $0x544] ss:$8 sps:$4 sm:$0xff]  }
  0xa7   : > { %2321 = vmatpush1.bf16.msra.mxu0 %v5325_v18  ;;  %v5421_v18 = vld [vmem:[%s7822_s1 + $0x540] ss:$8 sps:$4 sm:$0xff]  }
  0xa8   : > { %2322 = vmatprep.subr.bf16.mxu0 %v5330_v19  ;;  %v5426_v19 = vld [vmem:[%s7822_s1 + $0x554] ss:$8 sps:$4 sm:$0xff]  }
  0xab   : > { %2323 = vmatpush1.bf16.msra.mxu0 %v5328_v20  ;;  %v5424_v20 = vld [vmem:[%s7822_s1 + $0x550] ss:$8 sps:$4 sm:$0xff]  }
  0xac   : > { %2324 = vmatprep.subr.bf16.mxu0 %v5333_v21  ;;  %v5429_v21 = vld [vmem:[%s7822_s1 + $0x564] ss:$8 sps:$4 sm:$0xff]  }
  0xaf   : > { %2325 = vmatpush1.bf16.msra.mxu0 %v5331_v22  ;;  %v5427_v22 = vld [vmem:[%s7822_s1 + $0x560] ss:$8 sps:$4 sm:$0xff]  }
  0xb0   : > { %2326 = vmatprep.subr.bf16.mxu0 %v5336_v23  ;;  %v5432_v23 = vld [vmem:[%s7822_s1 + $0x574] ss:$8 sps:$4 sm:$0xff]  }
  0xb3   : > { %2327 = vmatpush1.bf16.msra.mxu0 %v5334_v24  ;;  %v5430_v24 = vld [vmem:[%s7822_s1 + $0x570] ss:$8 sps:$4 sm:$0xff]  }
  0xb4   : > { %2328 = vmatprep.subr.bf16.mxu0 %v5339_v25  ;;  %v5435_v25 = vld [vmem:[%s7822_s1 + $0x584] ss:$8 sps:$4 sm:$0xff]  }
  0xb7   : > { %2329 = vmatpush1.bf16.msra.mxu0 %v5337_v26  ;;  %v5433_v26 = vld [vmem:[%s7822_s1 + $0x580] ss:$8 sps:$4 sm:$0xff]  }
  0xb8   : > { %2330 = vmatprep.subr.bf16.mxu0 %v5342_v27  ;;  %v5438_v27 = vld [vmem:[%s7822_s1 + $0x594] ss:$8 sps:$4 sm:$0xff]  }
  0xbb   : > { %2331 = vmatpush1.bf16.msra.mxu0 %v5340_v28  ;;  %v5436_v28 = vld [vmem:[%s7822_s1 + $0x590] ss:$8 sps:$4 sm:$0xff]  }
  0xbc   : > { %2332 = vmatprep.subr.bf16.mxu0 %v5345_v29  ;;  %v5441_v29 = vld [vmem:[%s7822_s1 + $0x5a4] ss:$8 sps:$4 sm:$0xff]  }
  0xbf   : > { %2333 = vmatpush1.bf16.msra.mxu0 %v5343_v30  ;;  %v5439_v30 = vld [vmem:[%s7822_s1 + $0x5a0] ss:$8 sps:$4 sm:$0xff]  }
  0xc0   : > { %2334 = vmatprep.subr.bf16.mxu0 %v5348_v31  ;;  %v5444_v31 = vld [vmem:[%s7822_s1 + $0x5b4] ss:$8 sps:$4 sm:$0xff]  }
  0xc3   : > { %2335 = vmatpush1.bf16.msra.mxu0 %v5346_v32  ;;  %v5442_v32 = vld [vmem:[%s7822_s1 + $0x5b0] ss:$8 sps:$4 sm:$0xff]  }
  0xc4   : > { %2336 = vmatprep.subr.bf16.mxu0 %v5351_v33  ;;  %v5447_v33 = vld [vmem:[%s7822_s1 + $0x5c4] ss:$8 sps:$4 sm:$0xff]  }
  0xc7   : > { %2337 = vmatpush1.bf16.msra.mxu0 %v5349_v34  ;;  %v5445_v34 = vld [vmem:[%s7822_s1 + $0x5c0] ss:$8 sps:$4 sm:$0xff]  }
  0xc8   : > { %2338 = vmatprep.subr.bf16.mxu0 %v5354_v35  ;;  %v5450_v35 = vld [vmem:[%s7822_s1 + $0x5d4] ss:$8 sps:$4 sm:$0xff]  }
  0xcb   : > { %2339 = vmatpush1.bf16.msra.mxu0 %v5352_v36  ;;  %v5448_v36 = vld [vmem:[%s7822_s1 + $0x5d0] ss:$8 sps:$4 sm:$0xff]  }
  0xcc   : > { %2351 = vmatprep.subr.bf16.mxu0 %v5360_v37  ;;  %v5453_v37 = vld [vmem:[%s7822_s1 + $0x5e4] ss:$8 sps:$4 sm:$0xff]  }
  0xce   : > { %2341 = vmatmul.mubr.bf16.vlgmr.msra.gmra.mrb[0].mxu0 %v5355_v38  ;;  %v5451_v38 = vld [vmem:[%s7822_s1 + $0x5e0] ss:$8 sps:$4 sm:$0xff]  }
  0xcf   : > { %2352 = vmatpush1.bf16.msra.mxu0 %v5358_v39  ;;  %2383 = vmatprep.mubr.bf16.mxu0 %v5408_v40  ;;  %v5456_v39 = vld [vmem:[%s7822_s1 + $0x5f4] ss:$8 sps:$4 sm:$0xff]   ;;  %v5454_v40 = vld [vmem:[%s7822_s1 + $0x5f0] ss:$8 sps:$4 sm:$0xff]  }
  0xd0   : > { %2353 = vmatprep.subr.bf16.mxu0 %v5363_v41  ;;  %v5556_v41 = vld [vmem:[%s7822_s1 + $0x4] ss:$8 sps:$4 sm:$0xff]  }
  0xd1   : > { %2179 = vmatprep.subr.bf16.mxu1 %v5556_v41  ;;  %v5507_v41 = vld [vmem:[%s7822_s1 + $0x6f4] ss:$8 sps:$4 sm:$0xff]  }
  0xd3   : > { %2354 = vmatpush1.bf16.msra.mxu0 %v5361_v42  ;;  %v5558_v42 = vld [vmem:[%s7822_s1] ss:$8 sps:$4 sm:$0xff]  }
  0xd4   : > { %2355 = vmatprep.subr.bf16.mxu0 %v5366_v43  ;;  %v5462_v43 = vld [vmem:[%s7822_s1 + $0x604] ss:$8 sps:$4 sm:$0xff]   ;;  %2180 = vmatpush1.bf16.msra.mxu1 %v5558_v42 }
  0xd5   : > { %v5657_v42 = vld [vmem:[%s6189_s26 + $0x4] ss:$72 sps:$4 sm:$0xff]  }
  0xd6   : > { %2211 = vmatprep.mubr.bf16.mxu1 %v5657_v42  ;;  %v5592_v42 = vld [vmem:[%s7822_s1 + $0x840] ss:$8 sps:$4 sm:$0xff]  }
  0xd7   : > { %2356 = vmatpush1.bf16.msra.mxu0 %v5364_v44  ;;  %v5457_v44 = vld [vmem:[%s6189_s26 + $0x28] ss:$72 sps:$4 sm:$0xff]  }
  0xd8   : > { %2357 = vmatprep.subr.bf16.mxu0 %v5369_v45  ;;  %v5460_v45 = vld [vmem:[%s7822_s1 + $0x600] ss:$8 sps:$4 sm:$0xff]  }
  0xdb   : > { %2358 = vmatpush1.bf16.msra.mxu0 %v5367_v46  ;;  %v5510_v46 = vld [vmem:[%s6189_s26 + $0x34] ss:$72 sps:$4 sm:$0xff]  }
  0xdc   : > { %2359 = vmatprep.subr.bf16.mxu0 %v5372_v47  ;;  %v5562_v47 = vld [vmem:[%s7822_s1 + $0x14] ss:$8 sps:$4 sm:$0xff]  }
  0xdd   : > { %2181 = vmatprep.subr.bf16.mxu1 %v5562_v47  ;;  %v5511_v47 = vld [vmem:[%s7822_s1 + $0x700] ss:$8 sps:$4 sm:$0xff]  }
  0xdf   : > { %2360 = vmatpush1.bf16.msra.mxu0 %v5370_v48  ;;  %v5564_v48 = vld [vmem:[%s7822_s1 + $0x10] ss:$8 sps:$4 sm:$0xff]  }
  0xe0   : > { %2361 = vmatprep.subr.bf16.mxu0 %v5375_v49  ;;  %v5465_v49 = vld [vmem:[%s7822_s1 + $0x614] ss:$8 sps:$4 sm:$0xff]   ;;  %2182 = vmatpush1.bf16.msra.mxu1 %v5564_v48 }
  0xe1   : > { %v5567_v48 = vld [vmem:[%s6189_s26 + $0x3c] ss:$72 sps:$4 sm:$0xff]  }
  0xe3   : > { %2362 = vmatpush1.bf16.msra.mxu0 %v5373_v50  ;;  %v5463_v50 = vld [vmem:[%s7822_s1 + $0x610] ss:$8 sps:$4 sm:$0xff]  }
  0xe4   : > { %2363 = vmatprep.subr.bf16.mxu0 %v5378_v51  ;;  %v5571_v51 = vld [vmem:[%s7822_s1 + $0x24] ss:$8 sps:$4 sm:$0xff]  }
  0xe5   : > { %2183 = vmatprep.subr.bf16.mxu1 %v5571_v51  ;;  %v5666_v51 = vld [vmem:[%s7824_s3 + $0x4] ss:$16 sps:$4 sm:$0xff]  }
  0xe7   : > { %2364 = vmatpush1.bf16.msra.mxu0 %v5376_v52  ;;  %v5573_v52 = vld [vmem:[%s7822_s1 + $0x20] ss:$8 sps:$4 sm:$0xff]  }
  0xe8   : > { %2365 = vmatprep.subr.bf16.mxu0 %v5381_v53  ;;  %v5468_v53 = vld [vmem:[%s7822_s1 + $0x624] ss:$8 sps:$4 sm:$0xff]   ;;  %2184 = vmatpush1.bf16.msra.mxu1 %v5573_v52  ;;  %v5514_v52 = vld [vmem:[%s7822_s1 + $0x710] ss:$8 sps:$4 sm:$0xff]  }
  0xeb   : > { %2366 = vmatpush1.bf16.msra.mxu0 %v5379_v54  ;;  %v5466_v54 = vld [vmem:[%s7822_s1 + $0x620] ss:$8 sps:$4 sm:$0xff]  }
  0xec   : > { %2367 = vmatprep.subr.bf16.mxu0 %v5384_v55  ;;  %v5577_v55 = vld [vmem:[%s7822_s1 + $0x34] ss:$8 sps:$4 sm:$0xff]  }
  0xed   : > { %2185 = vmatprep.subr.bf16.mxu1 %v5577_v55  ;;  %v5667_v55 = vld [vmem:[%s7824_s3 + $0x20] ss:$16 sps:$4 sm:$0xff]  }
  0xef   : > { %2368 = vmatpush1.bf16.msra.mxu0 %v5382_v56  ;;  %v5579_v56 = vld [vmem:[%s7822_s1 + $0x30] ss:$8 sps:$4 sm:$0xff]  }
  0xf0   : > { %2369 = vmatprep.subr.bf16.mxu0 %v5387_v57  ;;  %v5471_v57 = vld [vmem:[%s7822_s1 + $0x634] ss:$8 sps:$4 sm:$0xff]   ;;  %2186 = vmatpush1.bf16.msra.mxu1 %v5579_v56 }
  0xf1   : > { %v5672_v56 = vld [vmem:[%s7824_s3 + $0x44] ss:$16 sps:$4 sm:$0xff]  }
  0xf3   : > { %2370 = vmatpush1.bf16.msra.mxu0 %v5385_v58  ;;  %v5469_v58 = vld [vmem:[%s7822_s1 + $0x630] ss:$8 sps:$4 sm:$0xff]  }
  0xf4   : > { %2371 = vmatprep.subr.bf16.mxu0 %v5390_v59  ;;  %v5583_v59 = vld [vmem:[%s7822_s1 + $0x44] ss:$8 sps:$4 sm:$0xff]  }
  0xf5   : > { %2187 = vmatprep.subr.bf16.mxu1 %v5583_v59  ;;  %v5670_v59 = vld [vmem:[%s7824_s3 + $0x40] ss:$16 sps:$4 sm:$0xff]  }
  0xf7   : > { %2372 = vmatpush1.bf16.msra.mxu0 %v5388_v60  ;;  %v5585_v60 = vld [vmem:[%s7822_s1 + $0x40] ss:$8 sps:$4 sm:$0xff]  }
  0xf8   : > { %2373 = vmatprep.subr.bf16.mxu0 %v5393_v61  ;;  %v5474_v61 = vld [vmem:[%s7822_s1 + $0x644] ss:$8 sps:$4 sm:$0xff]   ;;  %2188 = vmatpush1.bf16.msra.mxu1 %v5585_v60 }
  0xf9   : > { %v5675_v60 = vld [vmem:[%s7824_s3 + $0x64] ss:$16 sps:$4 sm:$0xff]  }
  0xfb   : > { %2374 = vmatpush1.bf16.msra.mxu0 %v5391_v62  ;;  %v5472_v62 = vld [vmem:[%s7822_s1 + $0x640] ss:$8 sps:$4 sm:$0xff]  }
  0xfc   : > { %2375 = vmatprep.subr.bf16.mxu0 %v5396_v63  ;;  %v5589_v63 = vld [vmem:[%s7822_s1 + $0x54] ss:$8 sps:$4 sm:$0xff]  }
  0xfd   : > { %2189 = vmatprep.subr.bf16.mxu1 %v5589_v63  ;;  %v5673_v63 = vld [vmem:[%s7824_s3 + $0x60] ss:$16 sps:$4 sm:$0xff]  }
  0xff   : > { %2376 = vmatpush1.bf16.msra.mxu0 %v5394_v0  ;;  %v5591_v0 = vld [vmem:[%s7822_s1 + $0x50] ss:$8 sps:$4 sm:$0xff]  }
 0x100   : > { %2377 = vmatprep.subr.bf16.mxu0 %v5399_v1  ;;  %v5477_v1 = vld [vmem:[%s7822_s1 + $0x654] ss:$8 sps:$4 sm:$0xff]   ;;  %2190 = vmatpush1.bf16.msra.mxu1 %v5591_v0 }
 0x101   : > { %v5678_v0 = vld [vmem:[%s7824_s3 + $0x84] ss:$16 sps:$4 sm:$0xff]  }
 0x103   : > { %2378 = vmatpush1.bf16.msra.mxu0 %v5397_v2  ;;  %v5475_v2 = vld [vmem:[%s7822_s1 + $0x650] ss:$8 sps:$4 sm:$0xff]  }
 0x104   : > { %2379 = vmatprep.subr.bf16.mxu0 %v5402_v3  ;;  %v5595_v3 = vld [vmem:[%s7822_s1 + $0x64] ss:$8 sps:$4 sm:$0xff]  }
 0x105   : > { %2191 = vmatprep.subr.bf16.mxu1 %v5595_v3  ;;  %v5676_v3 = vld [vmem:[%s7824_s3 + $0x80] ss:$16 sps:$4 sm:$0xff]  }
 0x107   : > { %2380 = vmatpush1.bf16.msra.mxu0 %v5400_v4  ;;  %v5597_v4 = vld [vmem:[%s7822_s1 + $0x60] ss:$8 sps:$4 sm:$0xff]  }
 0x108   : > { %2381 = vmatprep.subr.bf16.mxu0 %v5405_v5  ;;  %v5480_v5 = vld [vmem:[%s7822_s1 + $0x664] ss:$8 sps:$4 sm:$0xff]   ;;  %2192 = vmatpush1.bf16.msra.mxu1 %v5597_v4 }
 0x109   : > { %v5681_v4 = vld [vmem:[%s7824_s3 + $0xa4] ss:$16 sps:$4 sm:$0xff]  }
 0x10b   : > { %2382 = vmatpush1.bf16.msra.mxu0 %v5403_v6  ;;  %v5478_v6 = vld [vmem:[%s7822_s1 + $0x660] ss:$8 sps:$4 sm:$0xff]  }
 0x10c   : > { %2394 = vmatprep.subr.bf16.mxu0 %v5411_v7  ;;  %v5601_v7 = vld [vmem:[%s7822_s1 + $0x74] ss:$8 sps:$4 sm:$0xff]  }
 0x10d   : > { %2193 = vmatprep.subr.bf16.mxu1 %v5601_v7  ;;  %v5679_v7 = vld [vmem:[%s7824_s3 + $0xa0] ss:$16 sps:$4 sm:$0xff]  }
 0x10e   : > { %2384 = vmatmul.mubr.bf16.vlgmr.msra.gmra.mrb[0].mxu0 %v5406_v8  ;;  %v5603_v8 = vld [vmem:[%s7822_s1 + $0x70] ss:$8 sps:$4 sm:$0xff]  }
 0x10f   : > { %2395 = vmatpush1.bf16.msra.mxu0 %v5409_v9  ;;  %2426 = vmatprep.mubr.bf16.mxu0 %v5459_v10  ;;  %v5483_v9 = vld [vmem:[%s7822_s1 + $0x674] ss:$8 sps:$4 sm:$0xff]   ;;  %v5481_v10 = vld [vmem:[%s7822_s1 + $0x670] ss:$8 sps:$4 sm:$0xff]  }
 0x110   : > { %2396 = vmatprep.subr.bf16.mxu0 %v5414_v11  ;;  %2194 = vmatpush1.bf16.msra.mxu1 %v5603_v8  ;;  %v5607_v11 = vld [vmem:[%s7822_s1 + $0x84] ss:$8 sps:$4 sm:$0xff]  }
 0x111   : > { %2195 = vmatprep.subr.bf16.mxu1 %v5607_v11  ;;  %v5684_v8 = vld [vmem:[%s7824_s3 + $0xc4] ss:$16 sps:$4 sm:$0xff]   ;;  %v5682_v11 = vld [vmem:[%s7824_s3 + $0xc0] ss:$16 sps:$4 sm:$0xff]  }
 0x113   : > { %2397 = vmatpush1.bf16.msra.mxu0 %v5412_v12  ;;  %v5609_v12 = vld [vmem:[%s7822_s1 + $0x80] ss:$8 sps:$4 sm:$0xff]  }
 0x114   : > { %2398 = vmatprep.subr.bf16.mxu0 %v5417_v13  ;;  %v5486_v13 = vld [vmem:[%s7822_s1 + $0x684] ss:$8 sps:$4 sm:$0xff]   ;;  %2196 = vmatpush1.bf16.msra.mxu1 %v5609_v12 }
 0x115   : > { %v5687_v12 = vld [vmem:[%s7824_s3 + $0xe4] ss:$16 sps:$4 sm:$0xff]  }
 0x117   : > { %2399 = vmatpush1.bf16.msra.mxu0 %v5415_v14  ;;  %v5484_v14 = vld [vmem:[%s7822_s1 + $0x680] ss:$8 sps:$4 sm:$0xff]  }
 0x118   : > { %2400 = vmatprep.subr.bf16.mxu0 %v5420_v15  ;;  %v5613_v15 = vld [vmem:[%s7822_s1 + $0x94] ss:$8 sps:$4 sm:$0xff]  }
 0x119   : > { %2197 = vmatprep.subr.bf16.mxu1 %v5613_v15  ;;  %v5685_v15 = vld [vmem:[%s7824_s3 + $0xe0] ss:$16 sps:$4 sm:$0xff]  }
 0x11b   : > { %2401 = vmatpush1.bf16.msra.mxu0 %v5418_v16  ;;  %v5615_v16 = vld [vmem:[%s7822_s1 + $0x90] ss:$8 sps:$4 sm:$0xff]  }
 0x11c   : > { %2402 = vmatprep.subr.bf16.mxu0 %v5423_v17  ;;  %v5489_v17 = vld [vmem:[%s7822_s1 + $0x694] ss:$8 sps:$4 sm:$0xff]   ;;  %2198 = vmatpush1.bf16.msra.mxu1 %v5615_v16  ;;  %v5535_v16 = vld [vmem:[%s7822_s1 + $0x780] ss:$8 sps:$4 sm:$0xff]  }
 0x11f   : > { %2403 = vmatpush1.bf16.msra.mxu0 %v5421_v18  ;;  %v5487_v18 = vld [vmem:[%s7822_s1 + $0x690] ss:$8 sps:$4 sm:$0xff]  }
 0x120   : > { %2404 = vmatprep.subr.bf16.mxu0 %v5426_v19  ;;  %v5619_v19 = vld [vmem:[%s7822_s1 + $0xa4] ss:$8 sps:$4 sm:$0xff]  }
 0x121   : > { %2199 = vmatprep.subr.bf16.mxu1 %v5619_v19  ;;  %v5543_v19 = vld [vmem:[%s7822_s1 + $0x7a4] ss:$8 sps:$4 sm:$0xff]  }
 0x123   : > { %2405 = vmatpush1.bf16.msra.mxu0 %v5424_v20  ;;  %v5621_v20 = vld [vmem:[%s7822_s1 + $0xa0] ss:$8 sps:$4 sm:$0xff]  }
 0x124   : > { %2406 = vmatprep.subr.bf16.mxu0 %v5429_v21  ;;  %v5492_v21 = vld [vmem:[%s7822_s1 + $0x6a4] ss:$8 sps:$4 sm:$0xff]   ;;  %2200 = vmatpush1.bf16.msra.mxu1 %v5621_v20  ;;  %v5541_v20 = vld [vmem:[%s7822_s1 + $0x7a0] ss:$8 sps:$4 sm:$0xff]  }
 0x127   : > { %2407 = vmatpush1.bf16.msra.mxu0 %v5427_v22  ;;  %v5490_v22 = vld [vmem:[%s7822_s1 + $0x6a0] ss:$8 sps:$4 sm:$0xff]  }
 0x128   : > { %2408 = vmatprep.subr.bf16.mxu0 %v5432_v23  ;;  %v5625_v23 = vld [vmem:[%s7822_s1 + $0xb4] ss:$8 sps:$4 sm:$0xff]  }
 0x129   : > { %2201 = vmatprep.subr.bf16.mxu1 %v5625_v23  ;;  %v5549_v23 = vld [vmem:[%s7822_s1 + $0x7c4] ss:$8 sps:$4 sm:$0xff]  }
 0x12b   : > { %2409 = vmatpush1.bf16.msra.mxu0 %v5430_v24  ;;  %v5627_v24 = vld [vmem:[%s7822_s1 + $0xb0] ss:$8 sps:$4 sm:$0xff]  }
 0x12c   : > { %2410 = vmatprep.subr.bf16.mxu0 %v5435_v25  ;;  %v5495_v25 = vld [vmem:[%s7822_s1 + $0x6b4] ss:$8 sps:$4 sm:$0xff]   ;;  %2202 = vmatpush1.bf16.msra.mxu1 %v5627_v24  ;;  %v5547_v24 = vld [vmem:[%s7822_s1 + $0x7c0] ss:$8 sps:$4 sm:$0xff]  }
 0x12f   : > { %2411 = vmatpush1.bf16.msra.mxu0 %v5433_v26  ;;  %v5493_v26 = vld [vmem:[%s7822_s1 + $0x6b0] ss:$8 sps:$4 sm:$0xff]  }
 0x130   : > { %2412 = vmatprep.subr.bf16.mxu0 %v5438_v27  ;;  %v5631_v27 = vld [vmem:[%s7822_s1 + $0xc4] ss:$8 sps:$4 sm:$0xff]  }
 0x131   : > { %2203 = vmatprep.subr.bf16.mxu1 %v5631_v27  ;;  %v5555_v27 = vld [vmem:[%s7822_s1 + $0x7e4] ss:$8 sps:$4 sm:$0xff]  }
 0x133   : > { %2413 = vmatpush1.bf16.msra.mxu0 %v5436_v28  ;;  %v5633_v28 = vld [vmem:[%s7822_s1 + $0xc0] ss:$8 sps:$4 sm:$0xff]  }
 0x134   : > { %2414 = vmatprep.subr.bf16.mxu0 %v5441_v29  ;;  %v5498_v29 = vld [vmem:[%s7822_s1 + $0x6c4] ss:$8 sps:$4 sm:$0xff]   ;;  %2204 = vmatpush1.bf16.msra.mxu1 %v5633_v28  ;;  %v5553_v28 = vld [vmem:[%s7822_s1 + $0x7e0] ss:$8 sps:$4 sm:$0xff]  }
 0x137   : > { %2415 = vmatpush1.bf16.msra.mxu0 %v5439_v30  ;;  %v5496_v30 = vld [vmem:[%s7822_s1 + $0x6c0] ss:$8 sps:$4 sm:$0xff]  }
 0x138   : > { %2416 = vmatprep.subr.bf16.mxu0 %v5444_v31  ;;  %v5637_v31 = vld [vmem:[%s7822_s1 + $0xd4] ss:$8 sps:$4 sm:$0xff]  }
 0x139   : > { %2205 = vmatprep.subr.bf16.mxu1 %v5637_v31  ;;  %v5570_v31 = vld [vmem:[%s7822_s1 + $0x804] ss:$8 sps:$4 sm:$0xff]  }
 0x13b   : > { %2417 = vmatpush1.bf16.msra.mxu0 %v5442_v32  ;;  %v5639_v32 = vld [vmem:[%s7822_s1 + $0xd0] ss:$8 sps:$4 sm:$0xff]  }
 0x13c   : > { %2418 = vmatprep.subr.bf16.mxu0 %v5447_v33  ;;  %v5501_v33 = vld [vmem:[%s7822_s1 + $0x6d4] ss:$8 sps:$4 sm:$0xff]   ;;  %2206 = vmatpush1.bf16.msra.mxu1 %v5639_v32  ;;  %v5565_v32 = vld [vmem:[%s6189_s26 + $0x38] ss:$72 sps:$4 sm:$0xff]  }
 0x13f   : > { %2419 = vmatpush1.bf16.msra.mxu0 %v5445_v34  ;;  %v5499_v34 = vld [vmem:[%s7822_s1 + $0x6d0] ss:$8 sps:$4 sm:$0xff]  }
 0x140   : > { %2420 = vmatprep.subr.bf16.mxu0 %v5450_v35  ;;  %v5643_v35 = vld [vmem:[%s7822_s1 + $0xe4] ss:$8 sps:$4 sm:$0xff]  }
 0x141   : > { %2207 = vmatprep.subr.bf16.mxu1 %v5643_v35  ;;  %v5576_v35 = vld [vmem:[%s7822_s1 + $0x814] ss:$8 sps:$4 sm:$0xff]  }
 0x143   : > { %2421 = vmatpush1.bf16.msra.mxu0 %v5448_v36  ;;  %v5645_v36 = vld [vmem:[%s7822_s1 + $0xe0] ss:$8 sps:$4 sm:$0xff]  }
 0x144   : > { %2422 = vmatprep.subr.bf16.mxu0 %v5453_v37  ;;  %v5504_v37 = vld [vmem:[%s7822_s1 + $0x6e4] ss:$8 sps:$4 sm:$0xff]   ;;  %2208 = vmatpush1.bf16.msra.mxu1 %v5645_v36  ;;  %v5574_v36 = vld [vmem:[%s7822_s1 + $0x810] ss:$8 sps:$4 sm:$0xff]  }
 0x147   : > { %2423 = vmatpush1.bf16.msra.mxu0 %v5451_v38  ;;  %v5502_v38 = vld [vmem:[%s7822_s1 + $0x6e0] ss:$8 sps:$4 sm:$0xff]  }
 0x148   : > { %2424 = vmatprep.subr.bf16.mxu0 %v5456_v39  ;;  %v5649_v39 = vld [vmem:[%s7822_s1 + $0xf4] ss:$8 sps:$4 sm:$0xff]  }
 0x149   : > { %2209 = vmatprep.subr.bf16.mxu1 %v5649_v39  ;;  %v5588_v39 = vld [vmem:[%s7822_s1 + $0x834] ss:$8 sps:$4 sm:$0xff]  }
 0x14b   : > { %2425 = vmatpush1.bf16.msra.mxu0 %v5454_v40  ;;  %v5651_v40 = vld [vmem:[%s7822_s1 + $0xf0] ss:$8 sps:$4 sm:$0xff]  }
 0x14c   : > { %2437 = vmatprep.subr.bf16.mxu0 %v5462_v43  ;;  %2210 = vmatpush1.bf16.msra.mxu1 %v5651_v40  ;;  %v5505_v43 = vld [vmem:[%s7822_s1 + $0x6f0] ss:$8 sps:$4 sm:$0xff]  }
 0x14d   : > { %3076 = vmatprep.subr.bf16.mxu1 %v5666_v51  ;;  %v5586_v40 = vld [vmem:[%s7822_s1 + $0x830] ss:$8 sps:$4 sm:$0xff]   ;;  %v5618_v51 = vld [vmem:[%s7822_s1 + $0x884] ss:$8 sps:$4 sm:$0xff]  }
 0x14e   : > { %2427 = vmatmul.mubr.bf16.vlgmr.msra.gmra.mrb[0].mxu0 %v5457_v44  ;;  %v5655_v44 = vld [vmem:[%s6189_s26] ss:$72 sps:$4 sm:$0xff]  }
 0x14f   : > { %2438 = vmatpush1.bf16.msra.mxu0 %v5460_v45  ;;  %2469 = vmatprep.mubr.bf16.mxu0 %v5510_v46  ;;  %v5513_v45 = vld [vmem:[%s7822_s1 + $0x704] ss:$8 sps:$4 sm:$0xff]   ;;  %v5508_v46 = vld [vmem:[%s6189_s26 + $0x30] ss:$72 sps:$4 sm:$0xff]  }
 0x150   : > { %2439 = vmatprep.subr.bf16.mxu0 %v5465_v49  ;;  %2212 = vmatmul.mubr.bf16.vlgmr.msra.gmra.mrb[0].mxu1 %v5655_v44  ;;  %v5516_v49 = vld [vmem:[%s7822_s1 + $0x714] ss:$8 sps:$4 sm:$0xff]   ;;  %v5688_v44 = vld [vmem:[%s7824_s3 + $0x100] ss:$16 sps:$4 sm:$0xff]  }
 0x153   : > { %2440 = vmatpush1.bf16.msra.mxu0 %v5463_v50  ;;  %v5664_v50 = vld [vmem:[%s7824_s3] ss:$16 sps:$4 sm:$0xff]  }
 0x154   : > { %2441 = vmatprep.subr.bf16.mxu0 %v5468_v53  ;;  %v5669_v53 = vld [vmem:[%s7824_s3 + $0x24] ss:$16 sps:$4 sm:$0xff]   ;;  %3077 = vmatpush1.bf16.msra.mxu1 %v5664_v50  ;;  %v5610_v50 = vld [vmem:[%s7822_s1 + $0x870] ss:$8 sps:$4 sm:$0xff]  }
 0x155   : > { %3078 = vmatprep.subr.bf16.mxu1 %v5669_v53  ;;  %v5624_v53 = vld [vmem:[%s7822_s1 + $0x894] ss:$8 sps:$4 sm:$0xff]  }
 0x157   : > { %2442 = vmatpush1.bf16.msra.mxu0 %v5466_v54  ;;  %v5519_v54 = vld [vmem:[%s7822_s1 + $0x724] ss:$8 sps:$4 sm:$0xff]  }
 0x158   : > { %2443 = vmatprep.subr.bf16.mxu0 %v5471_v57  ;;  %v5517_v57 = vld [vmem:[%s7822_s1 + $0x720] ss:$8 sps:$4 sm:$0xff]   ;;  %3079 = vmatpush1.bf16.msra.mxu1 %v5667_v55  ;;  %v5630_v55 = vld [vmem:[%s7822_s1 + $0x8a4] ss:$8 sps:$4 sm:$0xff]  }
 0x159   : > { %3080 = vmatprep.subr.bf16.mxu1 %v5672_v56  ;;  %v5628_v56 = vld [vmem:[%s7822_s1 + $0x8a0] ss:$8 sps:$4 sm:$0xff]  }
 0x15b   : > { %2444 = vmatpush1.bf16.msra.mxu0 %v5469_v58  ;;  %v5522_v58 = vld [vmem:[%s7822_s1 + $0x734] ss:$8 sps:$4 sm:$0xff]  }
 0x15c   : > { %2445 = vmatprep.subr.bf16.mxu0 %v5474_v61  ;;  %v5520_v61 = vld [vmem:[%s7822_s1 + $0x730] ss:$8 sps:$4 sm:$0xff]   ;;  %3081 = vmatpush1.bf16.msra.mxu1 %v5670_v59  ;;  %v5642_v59 = vld [vmem:[%s7822_s1 + $0x8c4] ss:$8 sps:$4 sm:$0xff]  }
 0x15d   : > { %3082 = vmatprep.subr.bf16.mxu1 %v5675_v60  ;;  %v5640_v60 = vld [vmem:[%s7822_s1 + $0x8c0] ss:$8 sps:$4 sm:$0xff]  }
 0x15f   : > { %2446 = vmatpush1.bf16.msra.mxu0 %v5472_v62  ;;  %v5525_v62 = vld [vmem:[%s7822_s1 + $0x744] ss:$8 sps:$4 sm:$0xff]  }
 0x160   : > { %2447 = vmatprep.subr.bf16.mxu0 %v5477_v1  ;;  %v5523_v1 = vld [vmem:[%s7822_s1 + $0x740] ss:$8 sps:$4 sm:$0xff]   ;;  %3083 = vmatpush1.bf16.msra.mxu1 %v5673_v63  ;;  %v5654_v63 = vld [vmem:[%s7822_s1 + $0x8e4] ss:$8 sps:$4 sm:$0xff]  }
 0x161   : > { %3084 = vmatprep.subr.bf16.mxu1 %v5678_v0  ;;  %v5652_v0 = vld [vmem:[%s7822_s1 + $0x8e0] ss:$8 sps:$4 sm:$0xff]  }
 0x163   : > { %2448 = vmatpush1.bf16.msra.mxu0 %v5475_v2  ;;  %v5528_v2 = vld [vmem:[%s7822_s1 + $0x754] ss:$8 sps:$4 sm:$0xff]  }
 0x164   : > { %2449 = vmatprep.subr.bf16.mxu0 %v5480_v5  ;;  %v5526_v5 = vld [vmem:[%s7822_s1 + $0x750] ss:$8 sps:$4 sm:$0xff]   ;;  %3085 = vmatpush1.bf16.msra.mxu1 %v5676_v3  ;;  %v5661_v3 = vld [vmem:[%s6189_s26 + $0x40] ss:$72 sps:$4 sm:$0xff]  }
 0x165   : > { %3086 = vmatprep.subr.bf16.mxu1 %v5681_v4 }
 0x167   : > { %2450 = vmatpush1.bf16.msra.mxu0 %v5478_v6  ;;  %v5531_v6 = vld [vmem:[%s7822_s1 + $0x764] ss:$8 sps:$4 sm:$0xff]  }
 0x168   : > { %2451 = vmatprep.subr.bf16.mxu0 %v5483_v9  ;;  %v5529_v9 = vld [vmem:[%s7822_s1 + $0x760] ss:$8 sps:$4 sm:$0xff]   ;;  %3087 = vmatpush1.bf16.msra.mxu1 %v5679_v7 }
 0x169   : > { %3088 = vmatprep.subr.bf16.mxu1 %v5684_v8  ;;  %v5693_v8 = vld [vmem:[%s7824_s3 + $0x124] ss:$16 sps:$4 sm:$0xff]  }
 0x16b   : > { %2452 = vmatpush1.bf16.msra.mxu0 %v5481_v10  ;;  %v5534_v10 = vld [vmem:[%s7822_s1 + $0x774] ss:$8 sps:$4 sm:$0xff]  }
 0x16c   : > { %2453 = vmatprep.subr.bf16.mxu0 %v5486_v13  ;;  %v5532_v13 = vld [vmem:[%s7822_s1 + $0x770] ss:$8 sps:$4 sm:$0xff]   ;;  %3089 = vmatpush1.bf16.msra.mxu1 %v5682_v11 }
 0x16d   : > { %3090 = vmatprep.subr.bf16.mxu1 %v5687_v12  ;;  %v5694_v11 = vld [vmem:[%s7824_s3 + $0x140] ss:$16 sps:$4 sm:$0xff]   ;;  %v5699_v12 = vld [vmem:[%s7824_s3 + $0x164] ss:$16 sps:$4 sm:$0xff]  }
 0x16f   : > { %2454 = vmatpush1.bf16.msra.mxu0 %v5484_v14  ;;  %v5537_v14 = vld [vmem:[%s7822_s1 + $0x784] ss:$8 sps:$4 sm:$0xff]  }
 0x170   : > { %2455 = vmatprep.subr.bf16.mxu0 %v5489_v17  ;;  %v5540_v17 = vld [vmem:[%s7822_s1 + $0x794] ss:$8 sps:$4 sm:$0xff]   ;;  %3091 = vmatpush1.bf16.msra.mxu1 %v5685_v15  ;;  %v5700_v15 = vld [vmem:[%s7824_s3 + $0x180] ss:$16 sps:$4 sm:$0xff]  }
 0x173   : > { %2456 = vmatpush1.bf16.msra.mxu0 %v5487_v18  ;;  %v5538_v18 = vld [vmem:[%s7822_s1 + $0x790] ss:$8 sps:$4 sm:$0xff]  }
 0x174   : > { %2457 = vmatprep.subr.bf16.mxu0 %v5492_v21  ;;  %v5546_v21 = vld [vmem:[%s7822_s1 + $0x7b4] ss:$8 sps:$4 sm:$0xff]  }
 0x177   : > { %2458 = vmatpush1.bf16.msra.mxu0 %v5490_v22  ;;  %v5544_v22 = vld [vmem:[%s7822_s1 + $0x7b0] ss:$8 sps:$4 sm:$0xff]  }
 0x178   : > { %2459 = vmatprep.subr.bf16.mxu0 %v5495_v25  ;;  %v5552_v25 = vld [vmem:[%s7822_s1 + $0x7d4] ss:$8 sps:$4 sm:$0xff]  }
 0x17b   : > { %2460 = vmatpush1.bf16.msra.mxu0 %v5493_v26  ;;  %v5550_v26 = vld [vmem:[%s7822_s1 + $0x7d0] ss:$8 sps:$4 sm:$0xff]  }
 0x17c   : > { %2461 = vmatprep.subr.bf16.mxu0 %v5498_v29  ;;  %v5561_v29 = vld [vmem:[%s7822_s1 + $0x7f4] ss:$8 sps:$4 sm:$0xff]  }
 0x17f   : > { %2462 = vmatpush1.bf16.msra.mxu0 %v5496_v30  ;;  %v5559_v30 = vld [vmem:[%s7822_s1 + $0x7f0] ss:$8 sps:$4 sm:$0xff]  }
 0x180   : > { %2463 = vmatprep.subr.bf16.mxu0 %v5501_v33  ;;  %v5568_v33 = vld [vmem:[%s7822_s1 + $0x800] ss:$8 sps:$4 sm:$0xff]  }
 0x183   : > { %2464 = vmatpush1.bf16.msra.mxu0 %v5499_v34  ;;  %v5663_v34 = vld [vmem:[%s6189_s26 + $0x44] ss:$72 sps:$4 sm:$0xff]   ;;  %s7779_s26 = scalar_lea.hbm %s7830_s9, %s5069_s14 }
 0x184   : > { %2465 = vmatprep.subr.bf16.mxu0 %v5504_v37  ;;  %v5582_v37 = vld [vmem:[%s7822_s1 + $0x824] ss:$8 sps:$4 sm:$0xff]  }
 0x187   : > { %2466 = vmatpush1.bf16.msra.mxu0 %v5502_v38  ;;  %v5580_v38 = vld [vmem:[%s7822_s1 + $0x820] ss:$8 sps:$4 sm:$0xff]  }
 0x188   : > { %2467 = vmatprep.subr.bf16.mxu0 %v5507_v41  ;;  %v5594_v41 = vld [vmem:[%s7822_s1 + $0x844] ss:$8 sps:$4 sm:$0xff]  }
 0x18b   : > { %2468 = vmatpush1.bf16.msra.mxu0 %v5505_v43  ;;  %v5600_v43 = vld [vmem:[%s7822_s1 + $0x854] ss:$8 sps:$4 sm:$0xff]  }
 0x18c   : > { %2480 = vmatprep.subr.bf16.mxu0 %v5513_v45  ;;  %v5690_v45 = vld [vmem:[%s7824_s3 + $0x104] ss:$16 sps:$4 sm:$0xff]  }
 0x18d   : > { %3092 = vmatprep.subr.bf16.mxu1 %v5690_v45 }
 0x18e   : > { %2470 = vmatmul.mubr.bf16.vlgmr.msra.gmra.mrb[0].mxu0 %v5508_v46  ;;  %v5598_v46 = vld [vmem:[%s7822_s1 + $0x850] ss:$8 sps:$4 sm:$0xff]   ;;  %3093 = vmatpush1.bf16.msra.mxu1 %v5688_v44 }
 0x18f   : > { %2481 = vmatpush1.bf16.msra.mxu0 %v5511_v47  ;;  %2512 = vmatprep.mubr.bf16.mxu0 %v5567_v48  ;;  %v5606_v47 = vld [vmem:[%s7822_s1 + $0x864] ss:$8 sps:$4 sm:$0xff]   ;;  %v5604_v48 = vld [vmem:[%s7822_s1 + $0x860] ss:$8 sps:$4 sm:$0xff]  }
 0x190   : > { %2482 = vmatprep.subr.bf16.mxu0 %v5516_v49  ;;  %v5612_v49 = vld [vmem:[%s7822_s1 + $0x874] ss:$8 sps:$4 sm:$0xff]   ;;  %3094 = vmatprep.subr.bf16.mxu1 %v5693_v8 }
 0x193   : > { %2483 = vmatpush1.bf16.msra.mxu0 %v5514_v52  ;;  %v5616_v52 = vld [vmem:[%s7822_s1 + $0x880] ss:$8 sps:$4 sm:$0xff]  }
 0x194   : > { %2484 = vmatprep.subr.bf16.mxu0 %v5519_v54  ;;  %v5622_v54 = vld [vmem:[%s7822_s1 + $0x890] ss:$8 sps:$4 sm:$0xff]  }
 0x197   : > { %2485 = vmatpush1.bf16.msra.mxu0 %v5517_v57  ;;  %v5636_v57 = vld [vmem:[%s7822_s1 + $0x8b4] ss:$8 sps:$4 sm:$0xff]  }
 0x198   : > { %2486 = vmatprep.subr.bf16.mxu0 %v5522_v58  ;;  %v5634_v58 = vld [vmem:[%s7822_s1 + $0x8b0] ss:$8 sps:$4 sm:$0xff]  }
 0x19b   : > { %2487 = vmatpush1.bf16.msra.mxu0 %v5520_v61  ;;  %v5648_v61 = vld [vmem:[%s7822_s1 + $0x8d4] ss:$8 sps:$4 sm:$0xff]  }
 0x19c   : > { %2488 = vmatprep.subr.bf16.mxu0 %v5525_v62  ;;  %v5646_v62 = vld [vmem:[%s7822_s1 + $0x8d0] ss:$8 sps:$4 sm:$0xff]  }
 0x19f   : > { %2489 = vmatpush1.bf16.msra.mxu0 %v5523_v1  ;;  %v5660_v1 = vld [vmem:[%s7822_s1 + $0x8f4] ss:$8 sps:$4 sm:$0xff]  }
 0x1a0   : > { %2490 = vmatprep.subr.bf16.mxu0 %v5528_v2  ;;  %v5658_v2 = vld [vmem:[%s7822_s1 + $0x8f0] ss:$8 sps:$4 sm:$0xff]  }
 0x1a3   : > { %2491 = vmatpush1.bf16.msra.mxu0 %v5526_v5 }
 0x1a4   : > { %2492 = vmatprep.subr.bf16.mxu0 %v5531_v6 }
 0x1a7   : > { %2493 = vmatpush1.bf16.msra.mxu0 %v5529_v9  ;;  %v5691_v9 = vld [vmem:[%s7824_s3 + $0x120] ss:$16 sps:$4 sm:$0xff]  }
 0x1a8   : > { %2494 = vmatprep.subr.bf16.mxu0 %v5534_v10  ;;  %3095 = vmatpush1.bf16.msra.mxu1 %v5691_v9  ;;  %v5696_v10 = vld [vmem:[%s7824_s3 + $0x144] ss:$16 sps:$4 sm:$0xff]  }
 0x1a9   : > { %3096 = vmatprep.subr.bf16.mxu1 %v5696_v10 }
 0x1ab   : > { %2495 = vmatpush1.bf16.msra.mxu0 %v5532_v13  ;;  %v5697_v13 = vld [vmem:[%s7824_s3 + $0x160] ss:$16 sps:$4 sm:$0xff]  }
 0x1ac   : > { %2496 = vmatprep.subr.bf16.mxu0 %v5537_v14  ;;  %3097 = vmatpush1.bf16.msra.mxu1 %v5694_v11  ;;  %v5702_v14 = vld [vmem:[%s7824_s3 + $0x184] ss:$16 sps:$4 sm:$0xff]  }
 0x1ad   : > { %3098 = vmatprep.subr.bf16.mxu1 %v5699_v12 }
 0x1af   : > { %2497 = vmatpush1.bf16.msra.mxu0 %v5535_v16  ;;  %v5705_v16 = vld [vmem:[%s7824_s3 + $0x1a4] ss:$16 sps:$4 sm:$0xff]  }
 0x1b0   : > { %2498 = vmatprep.subr.bf16.mxu0 %v5540_v17  ;;  %3099 = vmatpush1.bf16.msra.mxu1 %v5697_v13  ;;  %v5703_v17 = vld [vmem:[%s7824_s3 + $0x1a0] ss:$16 sps:$4 sm:$0xff]  }
 0x1b1   : > { %3100 = vmatprep.subr.bf16.mxu1 %v5702_v14  ;;  %v5712_v14 = vld [vmem:[%s7824_s3 + $0x8] ss:$16 sps:$4 sm:$0xff]  }
 0x1b3   : > { %2499 = vmatpush1.bf16.msra.mxu0 %v5538_v18  ;;  %v5708_v18 = vld [vmem:[%s7824_s3 + $0x1c4] ss:$16 sps:$4 sm:$0xff]  }
 0x1b4   : > { %2500 = vmatprep.subr.bf16.mxu0 %v5543_v19  ;;  %3101 = vmatpush1.bf16.msra.mxu1 %v5700_v15  ;;  %v5706_v19 = vld [vmem:[%s7824_s3 + $0x1c0] ss:$16 sps:$4 sm:$0xff]  }
 0x1b5   : > { %3102 = vmatprep.subr.bf16.mxu1 %v5705_v16  ;;  %v5717_v16 = vld [vmem:[%s7824_s3 + $0x2c] ss:$16 sps:$4 sm:$0xff]  }
 0x1b7   : > { %2501 = vmatpush1.bf16.msra.mxu0 %v5541_v20  ;;  %v5711_v20 = vld [vmem:[%s7824_s3 + $0x1e4] ss:$16 sps:$4 sm:$0xff]  }
 0x1b8   : > { %2502 = vmatprep.subr.bf16.mxu0 %v5546_v21  ;;  %3103 = vmatpush1.bf16.msra.mxu1 %v5703_v17  ;;  %v5709_v21 = vld [vmem:[%s7824_s3 + $0x1e0] ss:$16 sps:$4 sm:$0xff]   ;;  %v5715_v17 = vld [vmem:[%s7824_s3 + $0x28] ss:$16 sps:$4 sm:$0xff]  }
 0x1b9   : > { %3104 = vmatprep.subr.bf16.mxu1 %v5708_v18  ;;  %v5720_v18 = vld [vmem:[%s7824_s3 + $0x4c] ss:$16 sps:$4 sm:$0xff]  }
 0x1bb   : > { %2503 = vmatpush1.bf16.msra.mxu0 %v5544_v22  ;;  %v5714_v22 = vld [vmem:[%s7824_s3 + $0xc] ss:$16 sps:$4 sm:$0xff]  }
 0x1bc   : > { %2504 = vmatprep.subr.bf16.mxu0 %v5549_v23  ;;  %3105 = vmatpush1.bf16.msra.mxu1 %v5706_v19  ;;  %v639_v23 = vlaneseq  ;;  %v5718_v19 = vld [vmem:[%s7824_s3 + $0x48] ss:$16 sps:$4 sm:$0xff]  }
 0x1bd   : > { %3106 = vmatprep.subr.bf16.mxu1 %v5711_v20  ;;  %v5723_v20 = vld [vmem:[%s7824_s3 + $0x6c] ss:$16 sps:$4 sm:$0xff]  }
 0x1bf   : > { %2505 = vmatpush1.bf16.msra.mxu0 %v5547_v24  ;;  %v7136_v24 = vshrl.u32 %v639_v23, 7  ;;  %v5724_v23 = vld [vmem:[%s7824_s3 + $0x88] ss:$16 sps:$4 sm:$0xff]  }
 0x1c0   : > { %2506 = vmatprep.subr.bf16.mxu0 %v5552_v25  ;;  %3107 = vmatpush1.bf16.msra.mxu1 %v5709_v21  ;;  %v5721_v21 = vld [vmem:[%s7824_s3 + $0x68] ss:$16 sps:$4 sm:$0xff]  }
 0x1c1   : > { %3117 = vmatprep.subr.bf16.mxu1 %v5714_v22  ;;  %v7139_v25 = vsub.s32 0, %v7136_v24  ;;  %v5726_v22 = vld [vmem:[%s7824_s3 + $0x8c] ss:$16 sps:$4 sm:$0xff]  }
 0x1c3   : > { %2507 = vmatpush1.bf16.msra.mxu0 %v5550_v26  ;;  %v637_v26 = vld [vmem:[%s7823_s2] sm:$0x3] }
 0x1c4   : > { %2508 = vmatprep.subr.bf16.mxu0 %v5555_v27  ;;  %v7145_v27 = vsub.s32 1, %v7136_v24 }
 0x1c7   : > { %2509 = vmatpush1.bf16.msra.mxu0 %v5553_v28  ;;  %v642_v28 = vrot.slane %v637_v26, %v7139_v25 }
 0x1c8   : > { %2510 = vmatprep.subr.bf16.mxu0 %v5561_v29  ;;  %v646_v29 = vrot.slane %v637_v26, %v7145_v27  ;;  %v5729_v26 = vld [vmem:[%s7824_s3 + $0xac] ss:$16 sps:$4 sm:$0xff]  }
 0x1cb   : > { %2511 = vmatpush1.bf16.msra.mxu0 %v5559_v30  ;;  %v6048_v30 = vmov 1966171168  }
 0x1cc   : > { %2523 = vmatprep.subr.bf16.mxu0 %v5570_v31  ;;  %v2577_v31 = vunpack.c.l.s4 %v6048_v30  ;;  %v5730_v30 = vld [vmem:[%s7824_s3 + $0xc8] ss:$16 sps:$4 sm:$0xff]  }
 0x1ce   : > { %2513 = vmatmul.mubr.bf16.vlgmr.msra.gmra.mrb[0].mxu0 %v5565_v32 }
 0x1cf   : > { %2524 = vmatpush1.bf16.msra.mxu0 %v5568_v33  ;;  %2555 = vmatprep.mubr.bf16.mxu0 %v5663_v34  ;;  %v2578_v34 = vunpack.c.0.s8 %v2577_v31  ;;  %v5735_v31 = vld [vmem:[%s7824_s3 + $0xec] ss:$16 sps:$4 sm:$0xff]  }
 0x1d0   : > { %2525 = vmatprep.subr.bf16.mxu0 %v5576_v35 }
 0x1d1   : > { %v2581_v45 = vsub.s32 %v2578_v34, %v7136_v24  ;;  %v5736_v34 = vld [vmem:[%s7824_s3 + $0x108] ss:$16 sps:$4 sm:$0xff]  }
 0x1d3   : > { %2526 = vmatpush1.bf16.msra.mxu0 %v5574_v36 }
 0x1d4   : > { %2527 = vmatprep.subr.bf16.mxu0 %v5582_v37 }
 0x1d7   : > { %2528 = vmatpush1.bf16.msra.mxu0 %v5580_v38 }
 0x1d8   : > { %2529 = vmatprep.subr.bf16.mxu0 %v5588_v39 }
 0x1db   : > { %2530 = vmatpush1.bf16.msra.mxu0 %v5586_v40 }
 0x1dc   : > { %2531 = vmatprep.subr.bf16.mxu0 %v5594_v41 }
 0x1df   : > { %2532 = vmatpush1.bf16.msra.mxu0 %v5592_v42 }
 0x1e0   : > { %2533 = vmatprep.subr.bf16.mxu0 %v5600_v43 }
 0x1e3   : > { %2534 = vmatpush1.bf16.msra.mxu0 %v5598_v46 }
 0x1e4   : > { %2535 = vmatprep.subr.bf16.mxu0 %v5606_v47 }
 0x1e7   : > { %2536 = vmatpush1.bf16.msra.mxu0 %v5604_v48 }
 0x1e8   : > { %2537 = vmatprep.subr.bf16.mxu0 %v5612_v49 }
 0x1eb   : > { %2538 = vmatpush1.bf16.msra.mxu0 %v5610_v50 }
 0x1ec   : > { %2539 = vmatprep.subr.bf16.mxu0 %v5618_v51 }
 0x1ef   : > { %2540 = vmatpush1.bf16.msra.mxu0 %v5616_v52 }
 0x1f0   : > { %2541 = vmatprep.subr.bf16.mxu0 %v5624_v53 }
 0x1f3   : > { %2542 = vmatpush1.bf16.msra.mxu0 %v5622_v54 }
 0x1f4   : > { %2543 = vmatprep.subr.bf16.mxu0 %v5630_v55 }
 0x1f7   : > { %2544 = vmatpush1.bf16.msra.mxu0 %v5628_v56 }
 0x1f8   : > { %2545 = vmatprep.subr.bf16.mxu0 %v5636_v57 }
 0x1fb   : > { %2546 = vmatpush1.bf16.msra.mxu0 %v5634_v58 }
 0x1fc   : > { %2547 = vmatprep.subr.bf16.mxu0 %v5642_v59 }
 0x1ff   : > { %2548 = vmatpush1.bf16.msra.mxu0 %v5640_v60 }
 0x200   : > { %2549 = vmatprep.subr.bf16.mxu0 %v5648_v61 }
 0x203   : > { %2550 = vmatpush1.bf16.msra.mxu0 %v5646_v62 }
 0x204   : > { %2551 = vmatprep.subr.bf16.mxu0 %v5654_v63 }
 0x207   : > { %2552 = vmatpush1.bf16.msra.mxu0 %v5652_v0 }
 0x208   : > { %2553 = vmatprep.subr.bf16.mxu0 %v5660_v1 }
 0x20b   : > { %2554 = vmatpush1.bf16.msra.mxu0 %v5658_v2 }
 0x20e   : > { %2556 = vmatmul.mubr.bf16.vlgmr.msra.gmra.mrb[0].mxu0 %v5661_v3 }
 0x223   : > { %v2213_v4 = vpop.f32.mrb[0].mxu1 }
 0x224   : > { %v2215_v5 = vpop.f32.mrb[1].mxu1  ;;  %v2214_v32 = vadd.f32 %v2213_v4, %v642_v28 }
 0x225   : > { %v2217_v6 = vpop.f32.mrb[2].mxu1  ;;  %v2216_v33 = vadd.f32 %v2215_v5, %v646_v29 }
 0x226   : > { %v2219_v7 = vpop.f32.mrb[3].mxu1  ;;  %v2218_v36 = vadd.f32 %v2217_v6, %v642_v28  ;;  %v5727_v28 = vld [vmem:[%s7824_s3 + $0xa8] ss:$16 sps:$4 sm:$0xff]  }
 0x227   : > { %v2220_v39 = vadd.f32 %v2219_v7, %v646_v29  ;;  %v5732_v29 = vld [vmem:[%s7824_s3 + $0xcc] ss:$16 sps:$4 sm:$0xff]  }
 0x2e1   : > { %v2557_v35 = vpop.f32.mrb[0].mxu0 }
 0x2e2   : > { %v5117_v37 = vadd.f32 %v2557_v35, %v2214_v32  ;;  %v2559_v38 = vpop.f32.mrb[1].mxu0  ;;  %v5733_v32 = vld [vmem:[%s7824_s3 + $0xe8] ss:$16 sps:$4 sm:$0xff]   ;;  %v5741_v35 = vld [vmem:[%s7824_s3 + $0x12c] ss:$16 sps:$4 sm:$0xff]  }
 0x2e3   : > { %v5119_v40 = vadd.f32 %v2559_v38, %v2216_v33  ;;  %v2561_v41 = vpop.f32.mrb[2].mxu0  ;;  %v5738_v33 = vld [vmem:[%s7824_s3 + $0x10c] ss:$16 sps:$4 sm:$0xff]   ;;  %v5742_v38 = vld [vmem:[%s7824_s3 + $0x148] ss:$16 sps:$4 sm:$0xff]  }
 0x2e4   : > { %v2566_v42 = vmax.f32 %v5117_v37, 0.0  ;;  %v5121_v43 = vadd.f32 %v2561_v41, %v2218_v36  ;;  %v2563_v44 = vpop.f32.mrb[3].mxu0  ;;  %v5739_v36 = vld [vmem:[%s7824_s3 + $0x128] ss:$16 sps:$4 sm:$0xff]   ;;  %v5744_v37 = vld [vmem:[%s7824_s3 + $0x14c] ss:$16 sps:$4 sm:$0xff]  }
 0x2e5   : > { %v2567_v46 = vmax.f32 %v5119_v40, 0.0  ;;  %v5123_v47 = vadd.f32 %v2563_v44, %v2220_v39  ;;  %v5747_v39 = vld [vmem:[%s7824_s3 + $0x16c] ss:$16 sps:$4 sm:$0xff]   ;;  %v5745_v40 = vld [vmem:[%s7824_s3 + $0x168] ss:$16 sps:$4 sm:$0xff]  }
 0x2e6   : > { %v2568_v48 = vmax.f32 %v5121_v43, 0.0  ;;  %v5750_v41 = vld [vmem:[%s7824_s3 + $0x18c] ss:$16 sps:$4 sm:$0xff]   ;;  %v5751_v44 = vld [vmem:[%s7824_s3 + $0x1a8] ss:$16 sps:$4 sm:$0xff]  }
 0x2e7   : > { %v2574_v49 = vcombine.low %v2566_v42, %v2567_v46  ;;  %v2575_v50 = vcombine.high %v2566_v42, %v2567_v46  ;;  %v2569_v51 = vmax.f32 %v5123_v47, 0.0  ;;  %v5748_v42 = vld [vmem:[%s7824_s3 + $0x188] ss:$16 sps:$4 sm:$0xff]   ;;  %v5753_v43 = vld [vmem:[%s7824_s3 + $0x1ac] ss:$16 sps:$4 sm:$0xff]  }
 0x2e8   : > { %v5754_v46 = vld [vmem:[%s7824_s3 + $0x1c8] ss:$16 sps:$4 sm:$0xff]   ;;  %v5759_v47 = vld [vmem:[%s7824_s3 + $0x1ec] ss:$16 sps:$4 sm:$0xff]  }
 0x2e9   : > { %v2582_v52 = vrot.slane %v2574_v49, %v2581_v45  ;;  %v2589_v53 = vrot.slane %v2575_v50, %v2581_v45  ;;  %v2624_v54 = vcombine.low %v2568_v48, %v2569_v51  ;;  %v5757_v48 = vld [vmem:[%s7824_s3 + $0x1e8] ss:$16 sps:$4 sm:$0xff]   ;;  %v5762_v49 = vld [vmem:[%s7826_s5 + $0x4] ss:$16 sps:$4 sm:$0xff]   ;;  %v5760_v50 = vld [vmem:[%s7826_s5] ss:$16 sps:$4 sm:$0xff]  }
 0x2ea   : > { %v5765_v51 = vld [vmem:[%s7826_s5 + $0x24] ss:$16 sps:$4 sm:$0xff]  }
 0x2eb   : > { %v2590_v55 = vcombine.high %v2582_v52, %v2582_v52  ;;  %v2591_v56 = vcombine.high %v2589_v53, %v2589_v53  ;;  %v2598_v57 = vrot.slane %v2582_v52, %v2581_v45  ;;  %v2631_v58 = vrot.slane %v2624_v54, %v2581_v45  ;;  %v5763_v52 = vld [vmem:[%s7826_s5 + $0x20] ss:$16 sps:$4 sm:$0xff]  }
 0x2ec   : > { %v2605_v59 = vrot.slane %v2589_v53, %v2581_v45  ;;  %v5768_v53 = vld [vmem:[%s7826_s5 + $0x44] ss:$16 sps:$4 sm:$0xff]   ;;  %v5766_v54 = vld [vmem:[%s7826_s5 + $0x40] ss:$16 sps:$4 sm:$0xff]  }
 0x2ed   : > { %v2612_v60 = vrot.slane %v2590_v55, %v2581_v45  ;;  %v2619_v61 = vrot.slane %v2591_v56, %v2581_v45  ;;  %v2620_v62 = vcombine.high %v2598_v57, %v2598_v57  ;;  %v2638_v63 = vrot.slane %v2631_v58, %v2581_v45  ;;  %v5756_v45 = vld [vmem:[%s7824_s3 + $0x1cc] ss:$16 sps:$4 sm:$0xff]   ;;  %v5771_v55 = vld [vmem:[%s7826_s5 + $0x64] ss:$16 sps:$4 sm:$0xff]   ;;  %v5769_v56 = vld [vmem:[%s7826_s5 + $0x60] ss:$16 sps:$4 sm:$0xff]  }
 0x2ee   : > { %v2621_v4 = vcombine.high %v2605_v59, %v2605_v59  ;;  %v5772_v58 = vld [vmem:[%s7826_s5 + $0x80] ss:$16 sps:$4 sm:$0xff]  }
 0x2ef   : > { %v2622_v0 = vcombine.high %v2612_v60, %v2612_v60  ;;  %v2623_v1 = vcombine.high %v2619_v61, %v2619_v61  ;;  %v2649_v2 = vmax.f32 %v2612_v60, %v2605_v59  ;;  %v2650_v3 = vmax.f32 %v2620_v62, %v2619_v61  ;;  %v5777_v59 = vld [vmem:[%s7826_s5 + $0xa4] ss:$16 sps:$4 sm:$0xff]   ;;  %v5775_v60 = vld [vmem:[%s7826_s5 + $0xa0] ss:$16 sps:$4 sm:$0xff]  }
 0x2f0   : > { %v5780_v61 = vld [vmem:[%s7826_s5 + $0xc4] ss:$16 sps:$4 sm:$0xff]   ;;  %v5778_v62 = vld [vmem:[%s7826_s5 + $0xc0] ss:$16 sps:$4 sm:$0xff]  }
 0x2f1   : > { %v2648_v5 = vmax.f32 %v2598_v57, %v2622_v0  ;;  %v2652_v6 = vmax.f32 %v2649_v2, %v2623_v1  ;;  %v2653_v7 = vmax.f32 %v2650_v3, %v2638_v63  ;;  %v5774_v57 = vld [vmem:[%s7826_s5 + $0x84] ss:$16 sps:$4 sm:$0xff]   ;;  %v5781_v0 = vld [vmem:[%s7826_s5 + $0xe0] ss:$16 sps:$4 sm:$0xff]  }
 0x2f2   : > { %v5783_v63 = vld [vmem:[%s7826_s5 + $0xe4] ss:$16 sps:$4 sm:$0xff]   ;;  %v5784_v2 = vld [vmem:[%s7826_s5 + $0x100] ss:$16 sps:$4 sm:$0xff]  }
 0x2f3   : > { %v2651_v8 = vmax.f32 %v2648_v5, %v2621_v4  ;;  %v5786_v1 = vld [vmem:[%s7826_s5 + $0x104] ss:$16 sps:$4 sm:$0xff]   ;;  %v5787_v4 = vld [vmem:[%s7826_s5 + $0x120] ss:$16 sps:$4 sm:$0xff]  }
 0x2f4   : > { %v5789_v3 = vld [vmem:[%s7826_s5 + $0x124] ss:$16 sps:$4 sm:$0xff]  }
 0x2f5   : > { %v2654_v9 = vmax.f32 %v2651_v8, %v2652_v6  ;;  %v5792_v5 = vld [vmem:[%s7826_s5 + $0x144] ss:$16 sps:$4 sm:$0xff]   ;;  %v5790_v6 = vld [vmem:[%s7826_s5 + $0x140] ss:$16 sps:$4 sm:$0xff]  }
 0x2f6   : > { %v5793_v8 = vld [vmem:[%s7826_s5 + $0x160] ss:$16 sps:$4 sm:$0xff]  }
 0x2f7   : > { %v2655_v10 = vmax.f32 %v2654_v9, %v2653_v7  ;;  %v5795_v7 = vld [vmem:[%s7826_s5 + $0x164] ss:$16 sps:$4 sm:$0xff]  }
 0x2f8   : > { %v5798_v9 = vld [vmem:[%s7826_s5 + $0x184] ss:$16 sps:$4 sm:$0xff]  }
 0x2f9   : > { %v2665_v11 = vrot.slane %v2655_v10, %v7145_v27  ;;  %v2661_v12 = vrot.slane %v2655_v10, %v7139_v25  ;;  %v5796_v10 = vld [vmem:[%s7826_s5 + $0x180] ss:$16 sps:$4 sm:$0xff]  }
 0x2fb   : > { %v2669_v13 = vpack.c.bf16 %v2665_v11, %v2665_v11  ;;  %v7155_v15 = vpack.c.bf16 %v2661_v12, %v2661_v12  ;;  %v5801_v11 = vld [vmem:[%s7826_s5 + $0x1a4] ss:$16 sps:$4 sm:$0xff]   ;;  %v5799_v12 = vld [vmem:[%s7826_s5 + $0x1a0] ss:$16 sps:$4 sm:$0xff]  }
 0x2fd   : > { %3108 = vmatprep.mubr.bf16.mxu1 %v2669_v13 }
 0x2fe   : > { %3109 = vmatmul.mubr.bf16.vlgmr.msra.gmra.mrb[4].mxu1 %v7155_v15 }
 0x2ff   : > { %3118 = vmatpush1.bf16.msra.mxu1 %v5712_v14  ;;  %3149 = vmatprep.mubr.bf16.mxu1 %v2669_v13  ;;  %v5804_v13 = vld [vmem:[%s7826_s5 + $0x1c4] ss:$16 sps:$4 sm:$0xff]   ;;  %v5802_v14 = vld [vmem:[%s7826_s5 + $0x1c0] ss:$16 sps:$4 sm:$0xff]  }
 0x300   : > { %3119 = vmatprep.subr.bf16.mxu1 %v5717_v16  ;;  %v5805_v16 = vld [vmem:[%s7826_s5 + $0x1e0] ss:$16 sps:$4 sm:$0xff]  }
 0x303   : > { %3120 = vmatpush1.bf16.msra.mxu1 %v5715_v17  ;;  %v5810_v17 = vld [vmem:[%s7826_s5 + $0x204] ss:$16 sps:$4 sm:$0xff]  }
 0x304   : > { %3121 = vmatprep.subr.bf16.mxu1 %v5720_v18  ;;  %v7351_v18 = vld [vmem:[%s7825_s4] sm:$0xf] }
 0x307   : > { %3122 = vmatpush1.bf16.msra.mxu1 %v5718_v19  ;;  %v3059_v19 = vrot.slane %v7351_v18, %v7139_v25 }
 0x308   : > { %3123 = vmatprep.subr.bf16.mxu1 %v5723_v20  ;;  %v3063_v20 = vrot.slane %v7351_v18, %v7145_v27 }
 0x30b   : > { %3124 = vmatpush1.bf16.msra.mxu1 %v5721_v21 }
 0x30c   : > { %3125 = vmatprep.subr.bf16.mxu1 %v5726_v22 }
 0x30f   : > { %3126 = vmatpush1.bf16.msra.mxu1 %v5724_v23 }
 0x310   : > { %3127 = vmatprep.subr.bf16.mxu1 %v5729_v26 }
 0x313   : > { %3128 = vmatpush1.bf16.msra.mxu1 %v5727_v28 }
 0x314   : > { %3129 = vmatprep.subr.bf16.mxu1 %v5732_v29 }
 0x317   : > { %3130 = vmatpush1.bf16.msra.mxu1 %v5730_v30 }
 0x318   : > { %3131 = vmatprep.subr.bf16.mxu1 %v5735_v31 }
 0x31b   : > { %3132 = vmatpush1.bf16.msra.mxu1 %v5733_v32 }
 0x31c   : > { %3133 = vmatprep.subr.bf16.mxu1 %v5738_v33  ;;  %v5808_v33 = vld [vmem:[%s7826_s5 + $0x200] ss:$16 sps:$4 sm:$0xff]  }
 0x31f   : > { %3134 = vmatpush1.bf16.msra.mxu1 %v5736_v34 }
 0x320   : > { %3135 = vmatprep.subr.bf16.mxu1 %v5741_v35  ;;  %v5813_v35 = vld [vmem:[%s7826_s5 + $0x224] ss:$16 sps:$4 sm:$0xff]  }
 0x323   : > { %3136 = vmatpush1.bf16.msra.mxu1 %v5739_v36  ;;  %v5811_v36 = vld [vmem:[%s7826_s5 + $0x220] ss:$16 sps:$4 sm:$0xff]  }
 0x324   : > { %3137 = vmatprep.subr.bf16.mxu1 %v5744_v37  ;;  %v5816_v37 = vld [vmem:[%s7826_s5 + $0x244] ss:$16 sps:$4 sm:$0xff]  }
 0x327   : > { %3138 = vmatpush1.bf16.msra.mxu1 %v5742_v38  ;;  %v5814_v38 = vld [vmem:[%s7826_s5 + $0x240] ss:$16 sps:$4 sm:$0xff]  }
 0x328   : > { %3139 = vmatprep.subr.bf16.mxu1 %v5747_v39  ;;  %v5819_v39 = vld [vmem:[%s7826_s5 + $0x264] ss:$16 sps:$4 sm:$0xff]  }
 0x32b   : > { %3140 = vmatpush1.bf16.msra.mxu1 %v5745_v40  ;;  %v5817_v40 = vld [vmem:[%s7826_s5 + $0x260] ss:$16 sps:$4 sm:$0xff]  }
 0x32c   : > { %3141 = vmatprep.subr.bf16.mxu1 %v5750_v41  ;;  %v5822_v41 = vld [vmem:[%s7826_s5 + $0x284] ss:$16 sps:$4 sm:$0xff]  }
 0x32f   : > { %3142 = vmatpush1.bf16.msra.mxu1 %v5748_v42  ;;  %v5820_v42 = vld [vmem:[%s7826_s5 + $0x280] ss:$16 sps:$4 sm:$0xff]  }
 0x330   : > { %3143 = vmatprep.subr.bf16.mxu1 %v5753_v43  ;;  %v5825_v43 = vld [vmem:[%s7826_s5 + $0x2a4] ss:$16 sps:$4 sm:$0xff]  }
 0x333   : > { %3144 = vmatpush1.bf16.msra.mxu1 %v5751_v44  ;;  %v5823_v44 = vld [vmem:[%s7826_s5 + $0x2a0] ss:$16 sps:$4 sm:$0xff]  }
 0x334   : > { %3145 = vmatprep.subr.bf16.mxu1 %v5756_v45  ;;  %v5828_v45 = vld [vmem:[%s7826_s5 + $0x2c4] ss:$16 sps:$4 sm:$0xff]  }
 0x337   : > { %3146 = vmatpush1.bf16.msra.mxu1 %v5754_v46  ;;  %v5826_v46 = vld [vmem:[%s7826_s5 + $0x2c0] ss:$16 sps:$4 sm:$0xff]  }
 0x338   : > { %3147 = vmatprep.subr.bf16.mxu1 %v5759_v47  ;;  %v5831_v47 = vld [vmem:[%s7826_s5 + $0x2e4] ss:$16 sps:$4 sm:$0xff]  }
 0x33b   : > { %3148 = vmatpush1.bf16.msra.mxu1 %v5757_v48  ;;  %v5829_v48 = vld [vmem:[%s7826_s5 + $0x2e0] ss:$16 sps:$4 sm:$0xff]  }
 0x33c   : > { %3956 = vmatprep.subr.bf16.mxu1 %v5762_v49  ;;  %v5834_v49 = vld [vmem:[%s7826_s5 + $0x304] ss:$16 sps:$4 sm:$0xff]  }
 0x33e   : > { %3150 = vmatmul.mubr.bf16.vlgmr.msra.gmra.mrb[8].mxu1 %v7155_v15  ;;  %v5807_v15 = vld [vmem:[%s7826_s5 + $0x1e4] ss:$16 sps:$4 sm:$0xff]  }
 0x33f   : > { %3957 = vmatpush1.bf16.msra.mxu1 %v5760_v50  ;;  %v5832_v50 = vld [vmem:[%s7826_s5 + $0x300] ss:$16 sps:$4 sm:$0xff]  }
 0x340   : > { %3958 = vmatprep.subr.bf16.mxu1 %v5765_v51  ;;  %v5837_v51 = vld [vmem:[%s7826_s5 + $0x324] ss:$16 sps:$4 sm:$0xff]  }
 0x343   : > { %3959 = vmatpush1.bf16.msra.mxu1 %v5763_v52  ;;  %v5835_v52 = vld [vmem:[%s7826_s5 + $0x320] ss:$16 sps:$4 sm:$0xff]  }
 0x344   : > { %3960 = vmatprep.subr.bf16.mxu1 %v5768_v53  ;;  %v5840_v53 = vld [vmem:[%s7826_s5 + $0x344] ss:$16 sps:$4 sm:$0xff]  }
 0x347   : > { %3961 = vmatpush1.bf16.msra.mxu1 %v5766_v54  ;;  %v5838_v54 = vld [vmem:[%s7826_s5 + $0x340] ss:$16 sps:$4 sm:$0xff]  }
 0x348   : > { %3962 = vmatprep.subr.bf16.mxu1 %v5771_v55  ;;  %v5843_v55 = vld [vmem:[%s7826_s5 + $0x364] ss:$16 sps:$4 sm:$0xff]  }
 0x34b   : > { %3963 = vmatpush1.bf16.msra.mxu1 %v5769_v56  ;;  %v5841_v56 = vld [vmem:[%s7826_s5 + $0x360] ss:$16 sps:$4 sm:$0xff]  }
 0x34c   : > { %3964 = vmatprep.subr.bf16.mxu1 %v5774_v57  ;;  %v5846_v57 = vld [vmem:[%s7826_s5 + $0x384] ss:$16 sps:$4 sm:$0xff]  }
 0x34f   : > { %3965 = vmatpush1.bf16.msra.mxu1 %v5772_v58  ;;  %v5844_v58 = vld [vmem:[%s7826_s5 + $0x380] ss:$16 sps:$4 sm:$0xff]  }
 0x350   : > { %3966 = vmatprep.subr.bf16.mxu1 %v5777_v59  ;;  %v5849_v59 = vld [vmem:[%s7826_s5 + $0x3a4] ss:$16 sps:$4 sm:$0xff]  }
 0x353   : > { %3967 = vmatpush1.bf16.msra.mxu1 %v5775_v60  ;;  %v3066_v60 = vsub.s32 2, %v7136_v24 }
 0x354   : > { %3968 = vmatprep.subr.bf16.mxu1 %v5780_v61  ;;  %v5847_v61 = vld [vmem:[%s7826_s5 + $0x3a0] ss:$16 sps:$4 sm:$0xff]  }
 0x357   : > { %3969 = vmatpush1.bf16.msra.mxu1 %v5778_v62  ;;  %v3070_v62 = vsub.s32 3, %v7136_v24 }
 0x358   : > { %3970 = vmatprep.subr.bf16.mxu1 %v5783_v63  ;;  %v5852_v63 = vld [vmem:[%s7826_s5 + $0x3c4] ss:$16 sps:$4 sm:$0xff]  }
 0x35b   : > { %3971 = vmatpush1.bf16.msra.mxu1 %v5781_v0  ;;  %v3067_v0 = vrot.slane %v7351_v18, %v3066_v60 }
 0x35c   : > { %3972 = vmatprep.subr.bf16.mxu1 %v5786_v1  ;;  %v3071_v1 = vrot.slane %v7351_v18, %v3070_v62  ;;  %v5859_v18 = vld [vmem:[%s7826_s5 + $0x28] ss:$16 sps:$4 sm:$0xff]  }
 0x35f   : > { %3973 = vmatpush1.bf16.msra.mxu1 %v5784_v2  ;;  %v5850_v2 = vld [vmem:[%s7826_s5 + $0x3c0] ss:$16 sps:$4 sm:$0xff]  }
 0x360   : > { %3974 = vmatprep.subr.bf16.mxu1 %v5789_v3  ;;  %v5855_v3 = vld [vmem:[%s7826_s5 + $0x3e4] ss:$16 sps:$4 sm:$0xff]  }
 0x363   : > { %3975 = vmatpush1.bf16.msra.mxu1 %v5787_v4 }
 0x364   : > { %3976 = vmatprep.subr.bf16.mxu1 %v5792_v5 }
 0x367   : > { %3977 = vmatpush1.bf16.msra.mxu1 %v5790_v6 }
 0x368   : > { %3978 = vmatprep.subr.bf16.mxu1 %v5795_v7 }
 0x36b   : > { %3979 = vmatpush1.bf16.msra.mxu1 %v5793_v8 }
 0x36c   : > { %3980 = vmatprep.subr.bf16.mxu1 %v5798_v9  ;;  %v5853_v9 = vld [vmem:[%s7826_s5 + $0x3e0] ss:$16 sps:$4 sm:$0xff]  }
 0x36f   : > { %3981 = vmatpush1.bf16.msra.mxu1 %v5796_v10 }
 0x370   : > { %3982 = vmatprep.subr.bf16.mxu1 %v5801_v11 }
 0x373   : > { %3983 = vmatpush1.bf16.msra.mxu1 %v5799_v12  ;;  %v5858_v12 = vld [vmem:[%s7826_s5 + $0xc] ss:$16 sps:$4 sm:$0xff]  }
 0x374   : > { %3984 = vmatprep.subr.bf16.mxu1 %v5804_v13 }
 0x377   : > { %3985 = vmatpush1.bf16.msra.mxu1 %v5802_v14 }
 0x378   : > { %3986 = vmatprep.subr.bf16.mxu1 %v5807_v15  ;;  %v5856_v15 = vld [vmem:[%s7826_s5 + $0x8] ss:$16 sps:$4 sm:$0xff]  }
 0x37b   : > { %3987 = vmatpush1.bf16.msra.mxu1 %v5805_v16 }
 0x37c   : > { %3997 = vmatprep.subr.bf16.mxu1 %v5810_v17  ;;  %v5861_v17 = vld [vmem:[%s7826_s5 + $0x2c] ss:$16 sps:$4 sm:$0xff]  }
 0x3d1   : > { %v3110_v21 = vpop.f32.mrb[4].mxu1 }
 0x3d2   : > { %v3111_v22 = vadd.f32 %v3110_v21, %v3059_v19  ;;  %v3112_v23 = vpop.f32.mrb[5].mxu1  ;;  %v5864_v19 = vld [vmem:[%s7826_s5 + $0x4c] ss:$16 sps:$4 sm:$0xff]  }
 0x3d3   : > { %v3113_v26 = vadd.f32 %v3112_v23, %v3063_v20  ;;  %v3114_v28 = vpop.f32.mrb[6].mxu1  ;;  %v5862_v20 = vld [vmem:[%s7826_s5 + $0x48] ss:$16 sps:$4 sm:$0xff]   ;;  %v5867_v21 = vld [vmem:[%s7826_s5 + $0x6c] ss:$16 sps:$4 sm:$0xff]  }
 0x3d4   : > { %v3158_v29 = vmax.f32 %v3111_v22, 0.0  ;;  %v3115_v30 = vpop.f32.mrb[7].mxu1  ;;  %v5865_v22 = vld [vmem:[%s7826_s5 + $0x68] ss:$16 sps:$4 sm:$0xff]   ;;  %v5870_v23 = vld [vmem:[%s7826_s5 + $0x8c] ss:$16 sps:$4 sm:$0xff]  }
 0x3d5   : > { %v3159_v31 = vmax.f32 %v3113_v26, 0.0  ;;  %v5868_v26 = vld [vmem:[%s7826_s5 + $0x88] ss:$16 sps:$4 sm:$0xff]   ;;  %v5873_v28 = vld [vmem:[%s7826_s5 + $0xac] ss:$16 sps:$4 sm:$0xff]  }
 0x3d6   : > { %v7362_v34 = vpack.c.bf16 %v3158_v29, %v3158_v29  ;;  %v5871_v29 = vld [vmem:[%s7826_s5 + $0xa8] ss:$16 sps:$4 sm:$0xff]   ;;  %v5876_v30 = vld [vmem:[%s7826_s5 + $0xcc] ss:$16 sps:$4 sm:$0xff]  }
 0x3d7   : > { %v7357_v32 = vpack.c.bf16 %v3159_v31, %v3159_v31  ;;  %v5874_v31 = vld [vmem:[%s7826_s5 + $0xc8] ss:$16 sps:$4 sm:$0xff]  }
 0x3d9   : > { %3988 = vmatprep.mubr.bf16.mxu1 %v7357_v32 }
 0x3da   : > { %3989 = vmatmul.mubr.bf16.vlgmr.msra.gmra.mrb[12].mxu1 %v7362_v34 }
 0x3db   : > { %3998 = vmatpush1.bf16.msra.mxu1 %v5808_v33  ;;  %v5877_v33 = vld [vmem:[%s7826_s5 + $0xe8] ss:$16 sps:$4 sm:$0xff]  }
 0x3dc   : > { %3999 = vmatprep.subr.bf16.mxu1 %v5813_v35  ;;  %v5882_v35 = vld [vmem:[%s7826_s5 + $0x10c] ss:$16 sps:$4 sm:$0xff]  }
 0x3df   : > { %4000 = vmatpush1.bf16.msra.mxu1 %v5811_v36  ;;  %v5880_v36 = vld [vmem:[%s7826_s5 + $0x108] ss:$16 sps:$4 sm:$0xff]  }
 0x3e0   : > { %4001 = vmatprep.subr.bf16.mxu1 %v5816_v37  ;;  %v5885_v37 = vld [vmem:[%s7826_s5 + $0x12c] ss:$16 sps:$4 sm:$0xff]  }
 0x3e3   : > { %4002 = vmatpush1.bf16.msra.mxu1 %v5814_v38  ;;  %v5883_v38 = vld [vmem:[%s7826_s5 + $0x128] ss:$16 sps:$4 sm:$0xff]  }
 0x3e4   : > { %4003 = vmatprep.subr.bf16.mxu1 %v5819_v39  ;;  %v5888_v39 = vld [vmem:[%s7826_s5 + $0x14c] ss:$16 sps:$4 sm:$0xff]  }
 0x3e7   : > { %4004 = vmatpush1.bf16.msra.mxu1 %v5817_v40  ;;  %v5886_v40 = vld [vmem:[%s7826_s5 + $0x148] ss:$16 sps:$4 sm:$0xff]  }
 0x3e8   : > { %4005 = vmatprep.subr.bf16.mxu1 %v5822_v41  ;;  %v5891_v41 = vld [vmem:[%s7826_s5 + $0x16c] ss:$16 sps:$4 sm:$0xff]  }
 0x3eb   : > { %4006 = vmatpush1.bf16.msra.mxu1 %v5820_v42  ;;  %v5889_v42 = vld [vmem:[%s7826_s5 + $0x168] ss:$16 sps:$4 sm:$0xff]  }
 0x3ec   : > { %4007 = vmatprep.subr.bf16.mxu1 %v5825_v43  ;;  %v5894_v43 = vld [vmem:[%s7826_s5 + $0x18c] ss:$16 sps:$4 sm:$0xff]  }
 0x3ef   : > { %4008 = vmatpush1.bf16.msra.mxu1 %v5823_v44  ;;  %v5892_v44 = vld [vmem:[%s7826_s5 + $0x188] ss:$16 sps:$4 sm:$0xff]  }
 0x3f0   : > { %4009 = vmatprep.subr.bf16.mxu1 %v5828_v45  ;;  %v5897_v45 = vld [vmem:[%s7826_s5 + $0x1ac] ss:$16 sps:$4 sm:$0xff]  }
 0x3f3   : > { %4010 = vmatpush1.bf16.msra.mxu1 %v5826_v46  ;;  %v5895_v46 = vld [vmem:[%s7826_s5 + $0x1a8] ss:$16 sps:$4 sm:$0xff]  }
 0x3f4   : > { %4011 = vmatprep.subr.bf16.mxu1 %v5831_v47  ;;  %v5900_v47 = vld [vmem:[%s7826_s5 + $0x1cc] ss:$16 sps:$4 sm:$0xff]  }
 0x3f7   : > { %4012 = vmatpush1.bf16.msra.mxu1 %v5829_v48  ;;  %v5898_v48 = vld [vmem:[%s7826_s5 + $0x1c8] ss:$16 sps:$4 sm:$0xff]  }
 0x3f8   : > { %4013 = vmatprep.subr.bf16.mxu1 %v5834_v49  ;;  %v5903_v49 = vld [vmem:[%s7826_s5 + $0x1ec] ss:$16 sps:$4 sm:$0xff]  }
 0x3fb   : > { %4014 = vmatpush1.bf16.msra.mxu1 %v5832_v50  ;;  %v5901_v50 = vld [vmem:[%s7826_s5 + $0x1e8] ss:$16 sps:$4 sm:$0xff]  }
 0x3fc   : > { %4015 = vmatprep.subr.bf16.mxu1 %v5837_v51  ;;  %v5906_v51 = vld [vmem:[%s7826_s5 + $0x20c] ss:$16 sps:$4 sm:$0xff]  }
 0x3ff   : > { %4016 = vmatpush1.bf16.msra.mxu1 %v5835_v52  ;;  %v5904_v52 = vld [vmem:[%s7826_s5 + $0x208] ss:$16 sps:$4 sm:$0xff]  }
 0x400   : > { %4017 = vmatprep.subr.bf16.mxu1 %v5840_v53  ;;  %v5909_v53 = vld [vmem:[%s7826_s5 + $0x22c] ss:$16 sps:$4 sm:$0xff]  }
 0x403   : > { %4018 = vmatpush1.bf16.msra.mxu1 %v5838_v54  ;;  %v5907_v54 = vld [vmem:[%s7826_s5 + $0x228] ss:$16 sps:$4 sm:$0xff]  }
 0x404   : > { %4019 = vmatprep.subr.bf16.mxu1 %v5843_v55  ;;  %v5912_v55 = vld [vmem:[%s7826_s5 + $0x24c] ss:$16 sps:$4 sm:$0xff]  }
 0x407   : > { %4020 = vmatpush1.bf16.msra.mxu1 %v5841_v56  ;;  %v5910_v56 = vld [vmem:[%s7826_s5 + $0x248] ss:$16 sps:$4 sm:$0xff]  }
 0x408   : > { %4021 = vmatprep.subr.bf16.mxu1 %v5846_v57  ;;  %v5913_v57 = vld [vmem:[%s7826_s5 + $0x268] ss:$16 sps:$4 sm:$0xff]  }
 0x40b   : > { %4022 = vmatpush1.bf16.msra.mxu1 %v5844_v58  ;;  %v5918_v58 = vld [vmem:[%s7826_s5 + $0x28c] ss:$16 sps:$4 sm:$0xff]  }
 0x40c   : > { %4023 = vmatprep.subr.bf16.mxu1 %v5849_v59  ;;  %v5916_v59 = vld [vmem:[%s7826_s5 + $0x288] ss:$16 sps:$4 sm:$0xff]  }
 0x40f   : > { %4024 = vmatpush1.bf16.msra.mxu1 %v5847_v61  ;;  %v5921_v61 = vld [vmem:[%s7826_s5 + $0x2ac] ss:$16 sps:$4 sm:$0xff]  }
 0x410   : > { %4025 = vmatprep.subr.bf16.mxu1 %v5852_v63  ;;  %v5919_v63 = vld [vmem:[%s7826_s5 + $0x2a8] ss:$16 sps:$4 sm:$0xff]  }
 0x411   : > { %v3151_v4 = vpop.f32.mrb[8].mxu1 }
 0x412   : > { %v3152_v5 = vadd.f32 %v3151_v4, %v3067_v0  ;;  %v3153_v6 = vpop.f32.mrb[9].mxu1  ;;  %v5924_v0 = vld [vmem:[%s7826_s5 + $0x2cc] ss:$16 sps:$4 sm:$0xff]  }
 0x413   : > { %v3154_v7 = vadd.f32 %v3153_v6, %v3071_v1  ;;  %v3155_v8 = vpop.f32.mrb[10].mxu1  ;;  %4026 = vmatpush1.bf16.msra.mxu1 %v5850_v2  ;;  %v5922_v1 = vld [vmem:[%s7826_s5 + $0x2c8] ss:$16 sps:$4 sm:$0xff]   ;;  %v5927_v2 = vld [vmem:[%s7826_s5 + $0x2ec] ss:$16 sps:$4 sm:$0xff]  }
 0x414   : > { %v3160_v10 = vmax.f32 %v3152_v5, 0.0  ;;  %v3156_v11 = vpop.f32.mrb[11].mxu1  ;;  %4027 = vmatprep.subr.bf16.mxu1 %v5855_v3  ;;  %v5925_v3 = vld [vmem:[%s7826_s5 + $0x2e8] ss:$16 sps:$4 sm:$0xff]   ;;  %v5930_v4 = vld [vmem:[%s7826_s5 + $0x30c] ss:$16 sps:$4 sm:$0xff]  }
 0x415   : > { %v3161_v13 = vmax.f32 %v3154_v7, 0.0  ;;  %v5928_v5 = vld [vmem:[%s7826_s5 + $0x308] ss:$16 sps:$4 sm:$0xff]   ;;  %v5933_v6 = vld [vmem:[%s7826_s5 + $0x32c] ss:$16 sps:$4 sm:$0xff]  }
 0x416   : > { %v7472_v16 = vpack.c.bf16 %v3160_v10, %v3160_v10  ;;  %v5931_v7 = vld [vmem:[%s7826_s5 + $0x328] ss:$16 sps:$4 sm:$0xff]   ;;  %v5936_v8 = vld [vmem:[%s7826_s5 + $0x34c] ss:$16 sps:$4 sm:$0xff]  }
 0x417   : > { %v7467_v14 = vpack.c.bf16 %v3161_v13, %v3161_v13  ;;  %4028 = vmatpush1.bf16.msra.mxu1 %v5853_v9  ;;  %v5934_v9 = vld [vmem:[%s7826_s5 + $0x348] ss:$16 sps:$4 sm:$0xff]   ;;  %v5939_v10 = vld [vmem:[%s7826_s5 + $0x36c] ss:$16 sps:$4 sm:$0xff]  }
 0x418   : > { %4038 = vmatprep.subr.bf16.mxu1 %v5858_v12  ;;  %v5937_v11 = vld [vmem:[%s7826_s5 + $0x368] ss:$16 sps:$4 sm:$0xff]   ;;  %v5942_v12 = vld [vmem:[%s7826_s5 + $0x38c] ss:$16 sps:$4 sm:$0xff]  }
 0x419   : > { %4029 = vmatprep.mubr.bf16.mxu1 %v7467_v14  ;;  %v5940_v13 = vld [vmem:[%s7826_s5 + $0x388] ss:$16 sps:$4 sm:$0xff]  }
 0x41a   : > { %4030 = vmatmul.mubr.bf16.vlgmr.msra.gmra.mrb[12].mxu1 %v7472_v16 }
 0x41b   : > { %4039 = vmatpush1.bf16.msra.mxu1 %v5856_v15  ;;  %4070 = vmatprep.mubr.bf16.mxu1 %v7357_v32  ;;  %v5879_v32 = vld [vmem:[%s7826_s5 + $0xec] ss:$16 sps:$4 sm:$0xff]   ;;  %v5943_v15 = vld [vmem:[%s7826_s5 + $0x3a8] ss:$16 sps:$4 sm:$0xff]  }
 0x41c   : > { %4040 = vmatprep.subr.bf16.mxu1 %v5861_v17  ;;  %v5948_v17 = vld [vmem:[%s7826_s5 + $0x3cc] ss:$16 sps:$4 sm:$0xff]  }
 0x41f   : > { %4041 = vmatpush1.bf16.msra.mxu1 %v5859_v18  ;;  %v5946_v18 = vld [vmem:[%s7826_s5 + $0x3c8] ss:$16 sps:$4 sm:$0xff]  }
 0x420   : > { %4042 = vmatprep.subr.bf16.mxu1 %v5864_v19  ;;  %v5951_v19 = vld [vmem:[%s7826_s5 + $0x3ec] ss:$16 sps:$4 sm:$0xff]  }
 0x423   : > { %4043 = vmatpush1.bf16.msra.mxu1 %v5862_v20  ;;  %v5949_v20 = vld [vmem:[%s7826_s5 + $0x3e8] ss:$16 sps:$4 sm:$0xff]  }
 0x424   : > { %4044 = vmatprep.subr.bf16.mxu1 %v5867_v21  ;;  %v5952_v21 = vld [vmem:[%s7828_s7 + $0x40] sm:$0xff]  }
 0x427   : > { %4045 = vmatpush1.bf16.msra.mxu1 %v5865_v22  ;;  %v5953_v22 = vld [vmem:[%s7828_s7] sm:$0xff]  }
 0x428   : > { %4046 = vmatprep.subr.bf16.mxu1 %v5870_v23  ;;  %v5954_v23 = vld [vmem:[%s7828_s7 + $0x48] sm:$0xff]  }
 0x42b   : > { %4047 = vmatpush1.bf16.msra.mxu1 %v5868_v26  ;;  %v5955_v26 = vld [vmem:[%s7828_s7 + $0x8] sm:$0xff]  }
 0x42c   : > { %4048 = vmatprep.subr.bf16.mxu1 %v5873_v28  ;;  %v5956_v28 = vld [vmem:[%s7828_s7 + $0x50] sm:$0xff]  }
 0x42f   : > { %4049 = vmatpush1.bf16.msra.mxu1 %v5871_v29  ;;  %v5957_v29 = vld [vmem:[%s7828_s7 + $0x10] sm:$0xff]  }
 0x430   : > { %4050 = vmatprep.subr.bf16.mxu1 %v5876_v30  ;;  %v5959_v30 = vld [vmem:[%s7828_s7 + $0x18] sm:$0xff]  }
 0x433   : > { %4051 = vmatpush1.bf16.msra.mxu1 %v5874_v31  ;;  %v5960_v31 = vld [vmem:[%s7828_s7 + $0x60] sm:$0xff]  }
 0x434   : > { %4052 = vmatprep.subr.bf16.mxu1 %v5879_v32  ;;  %v5961_v32 = vld [vmem:[%s7828_s7 + $0x20] sm:$0xff]  }
 0x437   : > { %4053 = vmatpush1.bf16.msra.mxu1 %v5877_v33  ;;  %v5962_v33 = vld [vmem:[%s7828_s7 + $0x68] sm:$0xff]  }
 0x438   : > { %4054 = vmatprep.subr.bf16.mxu1 %v5882_v35  ;;  %v5963_v35 = vld [vmem:[%s7828_s7 + $0x28] sm:$0xff]  }
 0x43b   : > { %4055 = vmatpush1.bf16.msra.mxu1 %v5880_v36  ;;  %v5964_v36 = vld [vmem:[%s7828_s7 + $0x70] sm:$0xff]  }
 0x43c   : > { %4056 = vmatprep.subr.bf16.mxu1 %v5885_v37  ;;  %v5965_v37 = vld [vmem:[%s7828_s7 + $0x30] sm:$0xff]  }
 0x43f   : > { %4057 = vmatpush1.bf16.msra.mxu1 %v5883_v38  ;;  %v5966_v38 = vld [vmem:[%s7828_s7 + $0x78] sm:$0xff]  }
 0x440   : > { %4058 = vmatprep.subr.bf16.mxu1 %v5888_v39  ;;  %v5967_v39 = vld [vmem:[%s7828_s7 + $0x38] sm:$0xff]  }
 0x443   : > { %4059 = vmatpush1.bf16.msra.mxu1 %v5886_v40  ;;  %v5968_v40 = vld [vmem:[%s7828_s7 + $0xc0] sm:$0xff]  }
 0x444   : > { %4060 = vmatprep.subr.bf16.mxu1 %v5891_v41  ;;  %v3294_v41 = vld [vmem:[%s7827_s6] sm:$0xf] }
 0x447   : > { %4061 = vmatpush1.bf16.msra.mxu1 %v5889_v42  ;;  %v3939_v42 = vrot.slane %v3294_v41, %v7139_v25  ;;  %v5970_v25 = vld [vmem:[%s7828_s7 + $0xc8] sm:$0xff]  }
 0x448   : > { %4062 = vmatprep.subr.bf16.mxu1 %v5894_v43  ;;  %v3943_v43 = vrot.slane %v3294_v41, %v7145_v27  ;;  %v5971_v27 = vld [vmem:[%s7828_s7 + $0x88] sm:$0xff]  }
 0x44b   : > { %4063 = vmatpush1.bf16.msra.mxu1 %v5892_v44 }
 0x44c   : > { %4064 = vmatprep.subr.bf16.mxu1 %v5897_v45 }
 0x44f   : > { %4065 = vmatpush1.bf16.msra.mxu1 %v5895_v46 }
 0x450   : > { %4066 = vmatprep.subr.bf16.mxu1 %v5900_v47 }
 0x453   : > { %4067 = vmatpush1.bf16.msra.mxu1 %v5898_v48 }
 0x454   : > { %4068 = vmatprep.subr.bf16.mxu1 %v5903_v49 }
 0x457   : > { %4069 = vmatpush1.bf16.msra.mxu1 %v5901_v50 }
 0x458   : > { %4079 = vmatprep.subr.bf16.mxu1 %v5906_v51 }
 0x45a   : > { %4071 = vmatmul.mubr.bf16.vlgmr.msra.gmra.mrb[16].mxu1 %v7362_v34  ;;  %v5915_v34 = vld [vmem:[%s7826_s5 + $0x26c] ss:$16 sps:$4 sm:$0xff]  }
 0x45b   : > { %4080 = vmatpush1.bf16.msra.mxu1 %v5904_v52  ;;  %4111 = vmatprep.mubr.bf16.mxu1 %v7467_v14  ;;  %v5945_v14 = vld [vmem:[%s7826_s5 + $0x3ac] ss:$16 sps:$4 sm:$0xff]  }
 0x45c   : > { %4081 = vmatprep.subr.bf16.mxu1 %v5909_v53  ;;  %v5969_v53 = vld [vmem:[%s7828_s7 + $0x80] sm:$0xff]  }
 0x45f   : > { %4082 = vmatpush1.bf16.msra.mxu1 %v5907_v54 }
 0x460   : > { %4083 = vmatprep.subr.bf16.mxu1 %v5912_v55  ;;  %v5972_v55 = vld [vmem:[%s7828_s7 + $0xd0] sm:$0xff]  }
 0x463   : > { %4084 = vmatpush1.bf16.msra.mxu1 %v5910_v56  ;;  %v5973_v56 = vld [vmem:[%s7828_s7 + $0x90] sm:$0xff]  }
 0x464   : > { %4085 = vmatprep.subr.bf16.mxu1 %v5915_v34  ;;  %v5974_v34 = vld [vmem:[%s7828_s7 + $0xd8] sm:$0xff]  }
 0x467   : > { %4086 = vmatpush1.bf16.msra.mxu1 %v5913_v57  ;;  %v5975_v57 = vld [vmem:[%s7828_s7 + $0x98] sm:$0xff]  }
 0x468   : > { %4087 = vmatprep.subr.bf16.mxu1 %v5918_v58  ;;  %v5976_v58 = vld [vmem:[%s7828_s7 + $0xe0] sm:$0xff]  }
 0x46b   : > { %4088 = vmatpush1.bf16.msra.mxu1 %v5916_v59  ;;  %v5977_v59 = vld [vmem:[%s7828_s7 + $0xa0] sm:$0xff]  }
 0x46c   : > { %4089 = vmatprep.subr.bf16.mxu1 %v5921_v61  ;;  %v5978_v61 = vld [vmem:[%s7828_s7 + $0xe8] sm:$0xff]  }
 0x46f   : > { %4090 = vmatpush1.bf16.msra.mxu1 %v5919_v63  ;;  %v5979_v63 = vld [vmem:[%s7828_s7 + $0xa8] sm:$0xff]  }
 0x470   : > { %4091 = vmatprep.subr.bf16.mxu1 %v5924_v0  ;;  %v5980_v0 = vld [vmem:[%s7828_s7 + $0xf0] sm:$0xff]  }
 0x473   : > { %4092 = vmatpush1.bf16.msra.mxu1 %v5922_v1  ;;  %v5981_v1 = vld [vmem:[%s7828_s7 + $0xb0] sm:$0xff]  }
 0x474   : > { %4093 = vmatprep.subr.bf16.mxu1 %v5927_v2  ;;  %v5982_v2 = vld [vmem:[%s7828_s7 + $0xf8] sm:$0xff]  }
 0x477   : > { %4094 = vmatpush1.bf16.msra.mxu1 %v5925_v3  ;;  %v5983_v3 = vld [vmem:[%s7828_s7 + $0xb8] sm:$0xff]  }
 0x478   : > { %4095 = vmatprep.subr.bf16.mxu1 %v5930_v4  ;;  %v3947_v4 = vrot.slane %v3294_v41, %v3066_v60 }
 0x47b   : > { %4096 = vmatpush1.bf16.msra.mxu1 %v5928_v5  ;;  %v3951_v5 = vrot.slane %v3294_v41, %v3070_v62  ;;  %v4192_v62 = vld [vmem:[%s7829_s8] sm:$0x1] }
 0x47c   : > { %4097 = vmatprep.subr.bf16.mxu1 %v5933_v6 }
 0x47f   : > { %4098 = vmatpush1.bf16.msra.mxu1 %v5931_v7 }
 0x480   : > { %4099 = vmatprep.subr.bf16.mxu1 %v5936_v8 }
 0x483   : > { %4100 = vmatpush1.bf16.msra.mxu1 %v5934_v9 }
 0x484   : > { %4101 = vmatprep.subr.bf16.mxu1 %v5939_v10 }
 0x487   : > { %4102 = vmatpush1.bf16.msra.mxu1 %v5937_v11 }
 0x488   : > { %4103 = vmatprep.subr.bf16.mxu1 %v5942_v12 }
 0x48b   : > { %4104 = vmatpush1.bf16.msra.mxu1 %v5940_v13 }
 0x48c   : > { %4105 = vmatprep.subr.bf16.mxu1 %v5945_v14 }
 0x48f   : > { %4106 = vmatpush1.bf16.msra.mxu1 %v5943_v15 }
 0x490   : > { %4107 = vmatprep.subr.bf16.mxu1 %v5948_v17 }
 0x493   : > { %4108 = vmatpush1.bf16.msra.mxu1 %v5946_v18 }
 0x494   : > { %4109 = vmatprep.subr.bf16.mxu1 %v5951_v19 }
 0x497   : > { %4110 = vmatpush1.bf16.msra.mxu1 %v5949_v20 }
 0x498   : > { %5072 = vmatprep.subr.bf16.mxu1 %v5952_v21 }
 0x49a   : > { %4112 = vmatmul.mubr.bf16.vlgmr.msra.gmra.mrb[16].mxu1 %v7472_v16  ;;  %v5958_v16 = vld [vmem:[%s7828_s7 + $0x58] sm:$0xff]  }
 0x49b   : > { %5073 = vmatpush3.bf16.msra.mxu1 %v5953_v22 }
 0x49c   : > { %5074 = vmatprep.subr.bf16.mxu1 %v5954_v23 }
 0x49f   : > { %5075 = vmatpush3.bf16.msra.mxu1 %v5955_v26 }
 0x4a0   : > { %5076 = vmatprep.subr.bf16.mxu1 %v5956_v28 }
 0x4a3   : > { %5077 = vmatpush3.bf16.msra.mxu1 %v5957_v29 }
 0x4a4   : > { %5078 = vmatprep.subr.bf16.mxu1 %v5958_v16 }
 0x4a7   : > { %5079 = vmatpush3.bf16.msra.mxu1 %v5959_v30 }
 0x4a8   : > { %5080 = vmatprep.subr.bf16.mxu1 %v5960_v31 }
 0x4ab   : > { %5081 = vmatpush3.bf16.msra.mxu1 %v5961_v32 }
 0x4ac   : > { %5082 = vmatprep.subr.bf16.mxu1 %v5962_v33 }
 0x4af   : > { %5083 = vmatpush3.bf16.msra.mxu1 %v5963_v35 }
 0x4b0   : > { %5084 = vmatprep.subr.bf16.mxu1 %v5964_v36 }
 0x4b3   : > { %5085 = vmatpush3.bf16.msra.mxu1 %v5965_v37 }
 0x4b4   : > { %5086 = vmatprep.subr.bf16.mxu1 %v5966_v38 }
 0x4b7   : > { %5087 = vmatpush3.bf16.msra.mxu1 %v5967_v39 }
 0x4b8   : > { %5094 = vmatprep.subr.bf16.mxu1 %v5968_v40 }
 0x4ed   : > { %v4031_v44 = vpop.f32.mrb[12].mxu1 }
 0x4ee   : > { %v5124_v45 = vadd.f32 %v4031_v44, %v3939_v42  ;;  %v4033_v46 = vpop.f32.mrb[13].mxu1 }
 0x4ef   : > { %v5125_v47 = vadd.f32 %v4033_v46, %v3943_v43  ;;  %v4035_v48 = vpop.f32.mrb[14].mxu1 }
 0x4f0   : > { %v4120_v49 = vmax.f32 %v5124_v45, 0.0  ;;  %v4036_v50 = vpop.f32.mrb[15].mxu1 }
 0x4f1   : > { %v4121_v51 = vmax.f32 %v5125_v47, 0.0 }
 0x4f2   : > { %v4124_v54 = vpack.c.bf16 %v4120_v49, %v4120_v49 }
 0x4f3   : > { %v4125_v52 = vpack.c.bf16 %v4121_v51, %v4121_v51 }
 0x4f5   : > { %4417 = vmatprep.mubr.bf16.mxu1 %v4125_v52 }
 0x4f6   : > { %4418 = vmatmul.mubr.bf16.vlgmr.msra.gmra.mrb[20].mxu1 %v4124_v54 }
 0x4f7   : > { %5095 = vmatpush3.bf16.msra.mxu1 %v5969_v53 }
 0x4f8   : > { %5096 = vmatprep.subr.bf16.mxu1 %v5970_v25 }
 0x4fb   : > { %5097 = vmatpush3.bf16.msra.mxu1 %v5971_v27 }
 0x4fc   : > { %5098 = vmatprep.subr.bf16.mxu1 %v5972_v55 }
 0x4ff   : > { %5099 = vmatpush3.bf16.msra.mxu1 %v5973_v56 }
 0x500   : > { %5100 = vmatprep.subr.bf16.mxu1 %v5974_v34 }
 0x503   : > { %5101 = vmatpush3.bf16.msra.mxu1 %v5975_v57 }
 0x504   : > { %5102 = vmatprep.subr.bf16.mxu1 %v5976_v58 }
 0x507   : > { %5103 = vmatpush3.bf16.msra.mxu1 %v5977_v59 }
 0x508   : > { %5104 = vmatprep.subr.bf16.mxu1 %v5978_v61 }
 0x50b   : > { %5105 = vmatpush3.bf16.msra.mxu1 %v5979_v63 }
 0x50c   : > { %5106 = vmatprep.subr.bf16.mxu1 %v5980_v0 }
 0x50f   : > { %5107 = vmatpush3.bf16.msra.mxu1 %v5981_v1 }
 0x510   : > { %5108 = vmatprep.subr.bf16.mxu1 %v5982_v2 }
 0x513   : > { %5109 = vmatpush3.bf16.msra.mxu1 %v5983_v3 }
 0x56d   : > { %v4113_v6 = vpop.f32.mrb[16].mxu1 }
 0x56e   : > { %v5126_v7 = vadd.f32 %v4113_v6, %v3947_v4  ;;  %v4115_v8 = vpop.f32.mrb[17].mxu1 }
 0x56f   : > { %v5127_v9 = vadd.f32 %v4115_v8, %v3951_v5  ;;  %v4117_v10 = vpop.f32.mrb[18].mxu1 }
 0x570   : > { %v4122_v11 = vmax.f32 %v5126_v7, 0.0  ;;  %v4118_v12 = vpop.f32.mrb[19].mxu1 }
 0x571   : > { %v4123_v13 = vmax.f32 %v5127_v9, 0.0 }
 0x572   : > { %v4126_v15 = vpack.c.bf16 %v4122_v11, %v4122_v11 }
 0x573   : > { %v4127_v14 = vpack.c.bf16 %v4123_v13, %v4123_v13 }
 0x575   : > { %4457 = vmatprep.mubr.bf16.mxu1 %v4127_v14 }
 0x576   : > { %4458 = vmatmul.mubr.bf16.vlgmr.msra.gmra.mrb[24].mxu1 %v4126_v15 }
 0x5c9   : > { %v5088_v17 = vpop.f32.mrb[20].mxu1 }
 0x5ca   : > { %v5089_v18 = vpop.f32.mrb[21].mxu1 }
 0x5cb   : > { %v5090_v60 = vadd.f32 %v5089_v18, %v5088_v17  ;;  %v5091_v19 = vpop.f32.mrb[22].mxu1 }
 0x5cc   : > { %v5092_v24 = vpop.f32.mrb[23].mxu1 }
 0x5cd   : > { %v4420_v22 = vadd.f32 %v5090_v60, %v4192_v62 }
 0x649   : > { %v5110_v20 = vpop.f32.mrb[24].mxu1 }
 0x64a   : > { %v5111_v21 = vpop.f32.mrb[25].mxu1 }
 0x64b   : > { %v5112_v23 = vadd.f32 %v5111_v21, %v5110_v20  ;;  %v5113_v26 = vpop.f32.mrb[26].mxu1 }
 0x64c   : > { %v5114_v28 = vpop.f32.mrb[27].mxu1 }
 0x64d   : > { %v4460_v29 = vadd.f32 %v5112_v23, %v4420_v22 }
 0x64f   : > { %4465 = vst [vmem:[%s324_s21] sm:$0x1] %v4460_v29 }
 0x650   : > { %5997 = shalt.err (!%p5994_p3)
}
 0x651   : > { %s5998_s29 = scalar_lea.hbm %s7779_s26, 16  ;;  %s6002_s21 = scalar_lea.hbm %s7830_s9, 32 }
 0x652   : > { %p5999_p4 = scmp.ne.s32.totalorder %s7779_s26, %s5998_s29  ;;  %p6003_p9 = scmp.lt.u32.totalorder %s7779_s26, %s7830_s9 }
 0x653   : > { %p6004_p10 = scmp.lt.u32.totalorder %s6002_s21, %s5998_s29  ;;  %p6006_p12 = scmp.lt.u32.totalorder %s5998_s29, %s7779_s26 }
 0x654   : > { %p6000_p7 = pnand %p5999_p4, %p6138_p5 }
 0x655   : > { %p6005_p11 = por %p6004_p10, %p6003_p9 }
 0x656   : > { %p6001_p8 = pneg %p6000_p7 }
 0x657   : > { %p6007_p13 = por %p6006_p12, %p6005_p11 }
 0x659   : > { %p6008_p0 = pnand %p6007_p13, %p6001_p8 }
 0x65b   : > { %6011 = shalt.err (!%p6008_p0)
}
 0x65c   : > { %5165 = dma.vmem_to_hbm [thread:$0]  (%p6138_p5), %s7781_s22, 16, %s7779_s26, %s4467_s27  }
 0x65d PF: > { %p5171_p1 = scmp.ge.s32.totalorder %s6046_s12, 2  ;;  %s4491_s13 = sand.u32 1, %s6034_s30  }
 0x65e   : > { %s4492_s28 = scalar_lea.sflag [#allocation3], %s4491_s13 }
 0x65f   : > { %p5168_p2 = pnand %p5171_p1, %p6142_p6 }
 0x661   : > { %6029 = dma.done.wait (!%p5168_p2), %s4492_s28, 16  }
 0x662   : > { %6031 = vsyncadd (!%p5168_p2), %s4492_s28, 4294967280  ;;  %p19_p3 = scmp.ge.s32.totalorder %s6125_s15, 4   ;;  %s7833_s30 = smov %s6038_s10 }
 0x663   : > { %s7834_s10 = smov %s6042_s11  ;;  %s7835_s11 = smov %s6136_s18 }
 0x664   : > { %s7836_s12 = smov %s6125_s15  ;;  %21 = sbr.rel (!%p19_p3) target bundleno = 3 (0x3), region = 91 }
 0x66b   :  { %4496 = vsyncpa [#allocation3], 1 }
 0x66c   :  { %4498 = vsyncpa [#allocation3 + $0x1], 1 }

</bundles_post_ra>
